<compile_context>
chip_gen: v7x
topology: tpu7x:2x2x1
jax: 0.10.0
libtpu: 0.0.40
codegen_flags: <defaults>
</compile_context>

<pallas_src>
import functools

import jax
import jax.numpy as jnp
from jax import lax
from jax.experimental import pallas as pl
from jax.experimental.pallas import tpu as pltpu


def _pad_hw(a, bt, H, W):
    """(bt, H, W, Cc) -> (bt, H+2, W+2, Cc) with a zero halo, built as a value
    (megacore-safe: no persistent scratch, no full-buffer zero store)."""
    Cc = a.shape[-1]
    zc = jnp.zeros((bt, H, 1, Cc), a.dtype)
    a = jnp.concatenate([zc, a, zc], axis=2)
    zr = jnp.zeros((bt, 1, W + 2, Cc), a.dtype)
    return jnp.concatenate([zr, a, zr], axis=1)


def _im2col(ap, bt, H, W):
    """(bt, H+2, W+2, Cc) -> (bt*H*W, 9*Cc).  K ordered (dy, dx, cin) to match
    the HWIO weight reshape (3, 3, Cin, Cout) -> (9*Cin, Cout)."""
    Cc = ap.shape[-1]
    M = bt * H * W
    taps = [ap[:, dy:dy + H, dx:dx + W, :].reshape(M, Cc)
            for dy in range(3) for dx in range(3)]
    return jnp.concatenate(taps, axis=-1)


def _bfpu_kernel(x_ref, y_ref, wxf_ref, wyf_ref, waf_ref, bxf_ref, byf_ref,
                 out_ref, *, H, W, C, bt, mm_dtype):
    f32 = jnp.float32
    M = bt * H * W

    x = x_ref[...].astype(f32)                       # (bt, H, W, C)
    y = y_ref[...].astype(f32)

    px = _im2col(_pad_hw(x, bt, H, W), bt, H, W)     # (M, 9C)
    py = _im2col(_pad_hw(y, bt, H, W), bt, H, W)     # (M, 9C)

    # Fused convs: cx = [query_conv(x) | gamma1_x_part(x)] + [bq | bg1], etc.
    cx = jnp.dot(px.astype(mm_dtype), wxf_ref[...].astype(mm_dtype),
                 preferred_element_type=f32) + bxf_ref[...]          # (M, C+2)
    cy = jnp.dot(py.astype(mm_dtype), wyf_ref[...].astype(mm_dtype),
                 preferred_element_type=f32) + byf_ref[...]          # (M, C+2)

    x_flat = x.reshape(M, C)
    y_flat = y.reshape(M, C)

    attention = jax.nn.sigmoid(cx[:, :C] * cy[:, :C])                # (M, C)
    att_x = x_flat * attention
    att_y = y_flat * attention

    # Attention-branch gamma convs: one block-diagonal matmul for both branches.
    att = jnp.concatenate([att_x, att_y], axis=-1)                   # (M, 2C)
    pa = _im2col(_pad_hw(att.reshape(bt, H, W, 2 * C), bt, H, W), bt, H, W)
    ca = jnp.dot(pa.astype(mm_dtype), waf_ref[...].astype(mm_dtype),
                 preferred_element_type=f32)                         # (M, 4)

    x_gamma = cx[:, C:C + 2] + ca[:, 0:2]                            # (M, 2)
    y_gamma = cy[:, C:C + 2] + ca[:, 2:4]                            # (M, 2)

    out = (x_flat * x_gamma[:, 0:1] + att_x * x_gamma[:, 1:2]
           + y_flat * y_gamma[:, 0:1] + att_y * y_gamma[:, 1:2])
    out_ref[...] = out.reshape(bt, H, W, C).astype(out_ref.dtype)


def _pick_bt(B, cap=8):
    """Largest divisor of B (<= cap) that still leaves >= 2 grid steps, so both
    TensorCores stay busy on megacore parts while amortizing per-step cost."""
    bt = 1
    for cand in range(1, min(B, cap) + 1):
        if B % cand == 0 and B // cand >= 2:
            bt = cand
    return bt


def _fuse_params(params, C):
    wq, wk = params["wq"], params["wk"]               # (3,3,C,C)  HWIO
    wg1, wg2 = params["wg1"], params["wg2"]           # (3,3,2C,2) HWIO
    w1x, w1a = wg1[:, :, :C, :], wg1[:, :, C:, :]
    w2y, w2a = wg2[:, :, :C, :], wg2[:, :, C:, :]
    wxf = jnp.concatenate([wq, w1x], axis=-1).reshape(9 * C, C + 2)
    wyf = jnp.concatenate([wk, w2y], axis=-1).reshape(9 * C, C + 2)
    z = jnp.zeros((3, 3, C, 2), wg1.dtype)
    waf = jnp.concatenate(
        [jnp.concatenate([w1a, z], axis=-1),          # att_x channels -> cols 0:2
         jnp.concatenate([z, w2a], axis=-1)],         # att_y channels -> cols 2:4
        axis=2).reshape(18 * C, 4)
    bxf = jnp.concatenate([params["bq"], params["bg1"]]).reshape(1, C + 2)
    byf = jnp.concatenate([params["bk"], params["bg2"]]).reshape(1, C + 2)
    return wxf, wyf, waf, bxf, byf


def bfpu_block_nhwc(x, y, params, *, bt=None, use_bf16_matmul=False):
    """x, y: (B, H, W, C) NHWC.  Returns (B, H, W, C)."""
    B, H, W, C = x.shape
    if bt is None:
        bt = _pick_bt(B)
    assert B % bt == 0
    wxf, wyf, waf, bxf, byf = _fuse_params(params, C)
    mm_dtype = jnp.bfloat16 if use_bf16_matmul else jnp.float32

    kernel = functools.partial(_bfpu_kernel, H=H, W=W, C=C, bt=bt,
                               mm_dtype=mm_dtype)

    def const_spec(shape):
        n = len(shape)
        return pl.BlockSpec(shape, lambda b, n=n: (0,) * n)

    return pl.pallas_call(
        kernel,
        out_shape=jax.ShapeDtypeStruct((B, H, W, C), x.dtype),
        grid_spec=pltpu.PrefetchScalarGridSpec(
            num_scalar_prefetch=0,
            grid=(B // bt,),
            in_specs=[
                pl.BlockSpec((bt, H, W, C), lambda b: (b, 0, 0, 0)),   # x
                pl.BlockSpec((bt, H, W, C), lambda b: (b, 0, 0, 0)),   # y
                const_spec(wxf.shape), const_spec(wyf.shape),
                const_spec(waf.shape),
                const_spec(bxf.shape), const_spec(byf.shape),
            ],
            out_specs=pl.BlockSpec((bt, H, W, C), lambda b: (b, 0, 0, 0)),
        ),
        compiler_params=pltpu.CompilerParams(
            dimension_semantics=("parallel",)),
    )(x, y, wxf, wyf, waf, bxf, byf)


def bfpu_block(x, y, params, *, bt=None, use_bf16_matmul=False):
    """x, y: (B, C, H, W) NCHW (PyTorch convention).  Returns (B, C, H, W)."""
    # TODO(synk): keep the surrounding model NHWC end-to-end to drop these
    # wrapper transposes (plain XLA ops over the full tensors).
    x_nhwc = jnp.transpose(x, (0, 2, 3, 1))
    y_nhwc = jnp.transpose(y, (0, 2, 3, 1))
    out = bfpu_block_nhwc(x_nhwc, y_nhwc, params, bt=bt,
                          use_bf16_matmul=use_bf16_matmul)
    return jnp.transpose(out, (0, 3, 1, 2))


# ---------------- pure-JAX reference (mirrors the PyTorch forward) ----------------
def _conv_ref(x_nchw, w_hwio, b):
    w_oihw = jnp.transpose(w_hwio, (3, 2, 0, 1))
    out = lax.conv_general_dilated(x_nchw, w_oihw, (1, 1), 'SAME',
                                   dimension_numbers=('NCHW', 'OIHW', 'NCHW'))
    return out + b[None, :, None, None]


def bfpu_ref(x, y, p):
    x_q = _conv_ref(x, p["wq"], p["bq"])
    y_k = _conv_ref(y, p["wk"], p["bk"])
    attention = jax.nn.sigmoid(x_q * y_k)
    ax = x * attention
    ay = y * attention
    xg = _conv_ref(jnp.concatenate([x, ax], axis=1), p["wg1"], p["bg1"])
    x_out = x * xg[:, 0:1] + ax * xg[:, 1:2]
    yg = _conv_ref(jnp.concatenate([y, ay], axis=1), p["wg2"], p["bg2"])
    y_out = y * yg[:, 0:1] + ay * yg[:, 1:2]
    return x_out + y_out


if __name__ == "__main__":
    B, C, H, W = 2, 32, 16, 16   # in_dim = 32 (module default), small spatial size
    key = jax.random.PRNGKey(0)
    ks = jax.random.split(key, 10)

    params = {
        # conv weights in HWIO: (kh, kw, Cin, Cout)
        "wq": 0.1 * jax.random.normal(ks[0], (3, 3, C, C), jnp.float32),
        "bq": 0.1 * jax.random.normal(ks[1], (C,), jnp.float32),
        "wk": 0.1 * jax.random.normal(ks[2], (3, 3, C, C), jnp.float32),
        "bk": 0.1 * jax.random.normal(ks[3], (C,), jnp.float32),
        "wg1": 0.1 * jax.random.normal(ks[4], (3, 3, 2 * C, 2), jnp.float32),
        "bg1": 0.1 * jax.random.normal(ks[5], (2,), jnp.float32),
        "wg2": 0.1 * jax.random.normal(ks[6], (3, 3, 2 * C, 2), jnp.float32),
        "bg2": 0.1 * jax.random.normal(ks[7], (2,), jnp.float32),
    }
    x = jax.random.normal(ks[8], (B, C, H, W), jnp.float32)
    y = jax.random.normal(ks[9], (B, C, H, W), jnp.float32)

    out = jax.block_until_ready(bfpu_block(x, y, params))
    ref = jax.block_until_ready(bfpu_ref(x, y, params))

    assert out.shape == (B, C, H, W)
    assert jnp.allclose(out, ref, atol=1e-4, rtol=1e-4), \
        f"max abs err {jnp.max(jnp.abs(out - ref))}"
    print("KERNEL_OK")
</pallas_src>

<mosaic_0001>
module attributes {stable_mosaic.version = 11 : i64} {
  func.func @_bfpu_kernel(%arg0: i32, %arg1: memref<1x16x16x32xf32, #tpu.memory_space<vmem>>, %arg2: memref<1x16x16x32xf32, #tpu.memory_space<vmem>>, %arg3: memref<288x34xf32, #tpu.memory_space<vmem>>, %arg4: memref<288x34xf32, #tpu.memory_space<vmem>>, %arg5: memref<576x4xf32, #tpu.memory_space<vmem>>, %arg6: memref<1x34xf32, #tpu.memory_space<vmem>>, %arg7: memref<1x34xf32, #tpu.memory_space<vmem>>, %arg8: memref<1x16x16x32xf32, #tpu.memory_space<vmem>>) attributes {dimension_semantics = [#tpu.dimension_semantics<parallel>], iteration_bounds = array<i64: 2>, scalar_prefetch = 0 : i64, scratch_operands = 0 : i64, tpu.core_type = #tpu.core_type<tc>, window_params = [{transform_indices = @transform_0, window_bounds = array<i64: 1, 16, 16, 32>}, {transform_indices = @transform_1, window_bounds = array<i64: 1, 16, 16, 32>}, {pipeline_mode = #tpu.pipeline_mode<synchronous>, transform_indices = @transform_2, window_bounds = array<i64: 288, 34>}, {pipeline_mode = #tpu.pipeline_mode<synchronous>, transform_indices = @transform_3, window_bounds = array<i64: 288, 34>}, {pipeline_mode = #tpu.pipeline_mode<synchronous>, transform_indices = @transform_4, window_bounds = array<i64: 576, 4>}, {pipeline_mode = #tpu.pipeline_mode<synchronous>, transform_indices = @transform_5, window_bounds = array<i64: 1, 34>}, {pipeline_mode = #tpu.pipeline_mode<synchronous>, transform_indices = @transform_6, window_bounds = array<i64: 1, 34>}, {transform_indices = @transform_7, window_bounds = array<i64: 1, 16, 16, 32>}]} {
    %c0 = arith.constant 0 : index
    %c0_0 = arith.constant 0 : index
    %c0_1 = arith.constant 0 : index
    %c0_2 = arith.constant 0 : index
    %0 = vector.load %arg1[%c0, %c0_0, %c0_1, %c0_2] : memref<1x16x16x32xf32, #tpu.memory_space<vmem>>, vector<1x16x16x32xf32>
    %c0_3 = arith.constant 0 : index
    %c0_4 = arith.constant 0 : index
    %c0_5 = arith.constant 0 : index
    %c0_6 = arith.constant 0 : index
    %1 = vector.load %arg2[%c0_3, %c0_4, %c0_5, %c0_6] : memref<1x16x16x32xf32, #tpu.memory_space<vmem>>, vector<1x16x16x32xf32>
    %cst = arith.constant 0.000000e+00 : f32
    %2 = vector.broadcast %cst : f32 to vector<1x16x1x32xf32>
    %3 = tpu.concatenate %2, %0, %2 in 2 : vector<1x16x1x32xf32>, vector<1x16x16x32xf32>, vector<1x16x1x32xf32> -> vector<1x16x18x32xf32>
    %cst_7 = arith.constant 0.000000e+00 : f32
    %4 = vector.broadcast %cst_7 : f32 to vector<1x1x18x32xf32>
    %5 = tpu.concatenate %4, %3, %4 in 1 : vector<1x1x18x32xf32>, vector<1x16x18x32xf32>, vector<1x1x18x32xf32> -> vector<1x18x18x32xf32>
    %6 = vector.extract_strided_slice %5 {offsets = [0, 0, 0, 0], sizes = [1, 16, 16, 32], strides = [1, 1, 1, 1]} : vector<1x18x18x32xf32> to vector<1x16x16x32xf32>
    %7 = vector.shape_cast %6 : vector<1x16x16x32xf32> to vector<256x32xf32>
    %8 = vector.extract_strided_slice %5 {offsets = [0, 0, 1, 0], sizes = [1, 16, 16, 32], strides = [1, 1, 1, 1]} : vector<1x18x18x32xf32> to vector<1x16x16x32xf32>
    %9 = vector.shape_cast %8 : vector<1x16x16x32xf32> to vector<256x32xf32>
    %10 = vector.extract_strided_slice %5 {offsets = [0, 0, 2, 0], sizes = [1, 16, 16, 32], strides = [1, 1, 1, 1]} : vector<1x18x18x32xf32> to vector<1x16x16x32xf32>
    %11 = vector.shape_cast %10 : vector<1x16x16x32xf32> to vector<256x32xf32>
    %12 = vector.extract_strided_slice %5 {offsets = [0, 1, 0, 0], sizes = [1, 16, 16, 32], strides = [1, 1, 1, 1]} : vector<1x18x18x32xf32> to vector<1x16x16x32xf32>
    %13 = vector.shape_cast %12 : vector<1x16x16x32xf32> to vector<256x32xf32>
    %14 = vector.extract_strided_slice %5 {offsets = [0, 1, 1, 0], sizes = [1, 16, 16, 32], strides = [1, 1, 1, 1]} : vector<1x18x18x32xf32> to vector<1x16x16x32xf32>
    %15 = vector.shape_cast %14 : vector<1x16x16x32xf32> to vector<256x32xf32>
    %16 = vector.extract_strided_slice %5 {offsets = [0, 1, 2, 0], sizes = [1, 16, 16, 32], strides = [1, 1, 1, 1]} : vector<1x18x18x32xf32> to vector<1x16x16x32xf32>
    %17 = vector.shape_cast %16 : vector<1x16x16x32xf32> to vector<256x32xf32>
    %18 = vector.extract_strided_slice %5 {offsets = [0, 2, 0, 0], sizes = [1, 16, 16, 32], strides = [1, 1, 1, 1]} : vector<1x18x18x32xf32> to vector<1x16x16x32xf32>
    %19 = vector.shape_cast %18 : vector<1x16x16x32xf32> to vector<256x32xf32>
    %20 = vector.extract_strided_slice %5 {offsets = [0, 2, 1, 0], sizes = [1, 16, 16, 32], strides = [1, 1, 1, 1]} : vector<1x18x18x32xf32> to vector<1x16x16x32xf32>
    %21 = vector.shape_cast %20 : vector<1x16x16x32xf32> to vector<256x32xf32>
    %22 = vector.extract_strided_slice %5 {offsets = [0, 2, 2, 0], sizes = [1, 16, 16, 32], strides = [1, 1, 1, 1]} : vector<1x18x18x32xf32> to vector<1x16x16x32xf32>
    %23 = vector.shape_cast %22 : vector<1x16x16x32xf32> to vector<256x32xf32>
    %24 = tpu.concatenate %7, %9, %11, %13, %15, %17, %19, %21, %23 in 1 : vector<256x32xf32>, vector<256x32xf32>, vector<256x32xf32>, vector<256x32xf32>, vector<256x32xf32>, vector<256x32xf32>, vector<256x32xf32>, vector<256x32xf32>, vector<256x32xf32> -> vector<256x288xf32>
    %cst_8 = arith.constant 0.000000e+00 : f32
    %25 = vector.broadcast %cst_8 : f32 to vector<1x16x1x32xf32>
    %26 = tpu.concatenate %25, %1, %25 in 2 : vector<1x16x1x32xf32>, vector<1x16x16x32xf32>, vector<1x16x1x32xf32> -> vector<1x16x18x32xf32>
    %cst_9 = arith.constant 0.000000e+00 : f32
    %27 = vector.broadcast %cst_9 : f32 to vector<1x1x18x32xf32>
    %28 = tpu.concatenate %27, %26, %27 in 1 : vector<1x1x18x32xf32>, vector<1x16x18x32xf32>, vector<1x1x18x32xf32> -> vector<1x18x18x32xf32>
    %29 = vector.extract_strided_slice %28 {offsets = [0, 0, 0, 0], sizes = [1, 16, 16, 32], strides = [1, 1, 1, 1]} : vector<1x18x18x32xf32> to vector<1x16x16x32xf32>
    %30 = vector.shape_cast %29 : vector<1x16x16x32xf32> to vector<256x32xf32>
    %31 = vector.extract_strided_slice %28 {offsets = [0, 0, 1, 0], sizes = [1, 16, 16, 32], strides = [1, 1, 1, 1]} : vector<1x18x18x32xf32> to vector<1x16x16x32xf32>
    %32 = vector.shape_cast %31 : vector<1x16x16x32xf32> to vector<256x32xf32>
    %33 = vector.extract_strided_slice %28 {offsets = [0, 0, 2, 0], sizes = [1, 16, 16, 32], strides = [1, 1, 1, 1]} : vector<1x18x18x32xf32> to vector<1x16x16x32xf32>
    %34 = vector.shape_cast %33 : vector<1x16x16x32xf32> to vector<256x32xf32>
    %35 = vector.extract_strided_slice %28 {offsets = [0, 1, 0, 0], sizes = [1, 16, 16, 32], strides = [1, 1, 1, 1]} : vector<1x18x18x32xf32> to vector<1x16x16x32xf32>
    %36 = vector.shape_cast %35 : vector<1x16x16x32xf32> to vector<256x32xf32>
    %37 = vector.extract_strided_slice %28 {offsets = [0, 1, 1, 0], sizes = [1, 16, 16, 32], strides = [1, 1, 1, 1]} : vector<1x18x18x32xf32> to vector<1x16x16x32xf32>
    %38 = vector.shape_cast %37 : vector<1x16x16x32xf32> to vector<256x32xf32>
    %39 = vector.extract_strided_slice %28 {offsets = [0, 1, 2, 0], sizes = [1, 16, 16, 32], strides = [1, 1, 1, 1]} : vector<1x18x18x32xf32> to vector<1x16x16x32xf32>
    %40 = vector.shape_cast %39 : vector<1x16x16x32xf32> to vector<256x32xf32>
    %41 = vector.extract_strided_slice %28 {offsets = [0, 2, 0, 0], sizes = [1, 16, 16, 32], strides = [1, 1, 1, 1]} : vector<1x18x18x32xf32> to vector<1x16x16x32xf32>
    %42 = vector.shape_cast %41 : vector<1x16x16x32xf32> to vector<256x32xf32>
    %43 = vector.extract_strided_slice %28 {offsets = [0, 2, 1, 0], sizes = [1, 16, 16, 32], strides = [1, 1, 1, 1]} : vector<1x18x18x32xf32> to vector<1x16x16x32xf32>
    %44 = vector.shape_cast %43 : vector<1x16x16x32xf32> to vector<256x32xf32>
    %45 = vector.extract_strided_slice %28 {offsets = [0, 2, 2, 0], sizes = [1, 16, 16, 32], strides = [1, 1, 1, 1]} : vector<1x18x18x32xf32> to vector<1x16x16x32xf32>
    %46 = vector.shape_cast %45 : vector<1x16x16x32xf32> to vector<256x32xf32>
    %47 = tpu.concatenate %30, %32, %34, %36, %38, %40, %42, %44, %46 in 1 : vector<256x32xf32>, vector<256x32xf32>, vector<256x32xf32>, vector<256x32xf32>, vector<256x32xf32>, vector<256x32xf32>, vector<256x32xf32>, vector<256x32xf32>, vector<256x32xf32> -> vector<256x288xf32>
    %c0_10 = arith.constant 0 : index
    %c0_11 = arith.constant 0 : index
    %48 = vector.load %arg3[%c0_10, %c0_11] : memref<288x34xf32, #tpu.memory_space<vmem>>, vector<288x34xf32>
    %cst_12 = arith.constant dense<0.000000e+00> : vector<256x34xf32>
    %49 = tpu.matmul %24, %48, %cst_12 {dimension_numbers = #tpu.dot_dimension_numbers<[1], [0], [0], [1], [0, 0, 1, 1], [], []>} : vector<256x288xf32>, vector<288x34xf32>, vector<256x34xf32> -> vector<256x34xf32>
    %c0_13 = arith.constant 0 : index
    %c0_14 = arith.constant 0 : index
    %50 = vector.load %arg6[%c0_13, %c0_14] : memref<1x34xf32, #tpu.memory_space<vmem>>, vector<1x34xf32>
    %51 = vector.broadcast %50 : vector<1x34xf32> to vector<256x34xf32>
    %52 = arith.addf %49, %51 : vector<256x34xf32>
    %c0_15 = arith.constant 0 : index
    %c0_16 = arith.constant 0 : index
    %53 = vector.load %arg4[%c0_15, %c0_16] : memref<288x34xf32, #tpu.memory_space<vmem>>, vector<288x34xf32>
    %cst_17 = arith.constant dense<0.000000e+00> : vector<256x34xf32>
    %54 = tpu.matmul %47, %53, %cst_17 {dimension_numbers = #tpu.dot_dimension_numbers<[1], [0], [0], [1], [0, 0, 1, 1], [], []>} : vector<256x288xf32>, vector<288x34xf32>, vector<256x34xf32> -> vector<256x34xf32>
    %c0_18 = arith.constant 0 : index
    %c0_19 = arith.constant 0 : index
    %55 = vector.load %arg7[%c0_18, %c0_19] : memref<1x34xf32, #tpu.memory_space<vmem>>, vector<1x34xf32>
    %56 = vector.broadcast %55 : vector<1x34xf32> to vector<256x34xf32>
    %57 = arith.addf %54, %56 : vector<256x34xf32>
    %58 = vector.shape_cast %0 : vector<1x16x16x32xf32> to vector<256x32xf32>
    %59 = vector.shape_cast %1 : vector<1x16x16x32xf32> to vector<256x32xf32>
    %60 = vector.extract_strided_slice %52 {offsets = [0, 0], sizes = [256, 32], strides = [1, 1]} : vector<256x34xf32> to vector<256x32xf32>
    %61 = vector.extract_strided_slice %57 {offsets = [0, 0], sizes = [256, 32], strides = [1, 1]} : vector<256x34xf32> to vector<256x32xf32>
    %62 = arith.mulf %60, %61 : vector<256x32xf32>
    %63 = arith.negf %62 : vector<256x32xf32>
    %64 = math.exp %63 : vector<256x32xf32>
    %cst_20 = arith.constant 1.000000e+00 : f32
    %65 = vector.broadcast %cst_20 : f32 to vector<256x32xf32>
    %66 = arith.addf %65, %64 : vector<256x32xf32>
    %67 = arith.divf %65, %66 : vector<256x32xf32>
    %68 = arith.mulf %58, %67 : vector<256x32xf32>
    %69 = arith.mulf %59, %67 : vector<256x32xf32>
    %70 = tpu.concatenate %68, %69 in 1 : vector<256x32xf32>, vector<256x32xf32> -> vector<256x64xf32>
    %71 = vector.shape_cast %70 : vector<256x64xf32> to vector<1x16x16x64xf32>
    %cst_21 = arith.constant 0.000000e+00 : f32
    %72 = vector.broadcast %cst_21 : f32 to vector<1x16x1x64xf32>
    %73 = tpu.concatenate %72, %71, %72 in 2 : vector<1x16x1x64xf32>, vector<1x16x16x64xf32>, vector<1x16x1x64xf32> -> vector<1x16x18x64xf32>
    %cst_22 = arith.constant 0.000000e+00 : f32
    %74 = vector.broadcast %cst_22 : f32 to vector<1x1x18x64xf32>
    %75 = tpu.concatenate %74, %73, %74 in 1 : vector<1x1x18x64xf32>, vector<1x16x18x64xf32>, vector<1x1x18x64xf32> -> vector<1x18x18x64xf32>
    %76 = vector.extract_strided_slice %75 {offsets = [0, 0, 0, 0], sizes = [1, 16, 16, 64], strides = [1, 1, 1, 1]} : vector<1x18x18x64xf32> to vector<1x16x16x64xf32>
    %77 = vector.shape_cast %76 : vector<1x16x16x64xf32> to vector<256x64xf32>
    %78 = vector.extract_strided_slice %75 {offsets = [0, 0, 1, 0], sizes = [1, 16, 16, 64], strides = [1, 1, 1, 1]} : vector<1x18x18x64xf32> to vector<1x16x16x64xf32>
    %79 = vector.shape_cast %78 : vector<1x16x16x64xf32> to vector<256x64xf32>
    %80 = vector.extract_strided_slice %75 {offsets = [0, 0, 2, 0], sizes = [1, 16, 16, 64], strides = [1, 1, 1, 1]} : vector<1x18x18x64xf32> to vector<1x16x16x64xf32>
    %81 = vector.shape_cast %80 : vector<1x16x16x64xf32> to vector<256x64xf32>
    %82 = vector.extract_strided_slice %75 {offsets = [0, 1, 0, 0], sizes = [1, 16, 16, 64], strides = [1, 1, 1, 1]} : vector<1x18x18x64xf32> to vector<1x16x16x64xf32>
    %83 = vector.shape_cast %82 : vector<1x16x16x64xf32> to vector<256x64xf32>
    %84 = vector.extract_strided_slice %75 {offsets = [0, 1, 1, 0], sizes = [1, 16, 16, 64], strides = [1, 1, 1, 1]} : vector<1x18x18x64xf32> to vector<1x16x16x64xf32>
    %85 = vector.shape_cast %84 : vector<1x16x16x64xf32> to vector<256x64xf32>
    %86 = vector.extract_strided_slice %75 {offsets = [0, 1, 2, 0], sizes = [1, 16, 16, 64], strides = [1, 1, 1, 1]} : vector<1x18x18x64xf32> to vector<1x16x16x64xf32>
    %87 = vector.shape_cast %86 : vector<1x16x16x64xf32> to vector<256x64xf32>
    %88 = vector.extract_strided_slice %75 {offsets = [0, 2, 0, 0], sizes = [1, 16, 16, 64], strides = [1, 1, 1, 1]} : vector<1x18x18x64xf32> to vector<1x16x16x64xf32>
    %89 = vector.shape_cast %88 : vector<1x16x16x64xf32> to vector<256x64xf32>
    %90 = vector.extract_strided_slice %75 {offsets = [0, 2, 1, 0], sizes = [1, 16, 16, 64], strides = [1, 1, 1, 1]} : vector<1x18x18x64xf32> to vector<1x16x16x64xf32>
    %91 = vector.shape_cast %90 : vector<1x16x16x64xf32> to vector<256x64xf32>
    %92 = vector.extract_strided_slice %75 {offsets = [0, 2, 2, 0], sizes = [1, 16, 16, 64], strides = [1, 1, 1, 1]} : vector<1x18x18x64xf32> to vector<1x16x16x64xf32>
    %93 = vector.shape_cast %92 : vector<1x16x16x64xf32> to vector<256x64xf32>
    %94 = tpu.concatenate %77, %79, %81, %83, %85, %87, %89, %91, %93 in 1 : vector<256x64xf32>, vector<256x64xf32>, vector<256x64xf32>, vector<256x64xf32>, vector<256x64xf32>, vector<256x64xf32>, vector<256x64xf32>, vector<256x64xf32>, vector<256x64xf32> -> vector<256x576xf32>
    %c0_23 = arith.constant 0 : index
    %c0_24 = arith.constant 0 : index
    %95 = vector.load %arg5[%c0_23, %c0_24] : memref<576x4xf32, #tpu.memory_space<vmem>>, vector<576x4xf32>
    %cst_25 = arith.constant dense<0.000000e+00> : vector<256x4xf32>
    %96 = tpu.matmul %94, %95, %cst_25 {dimension_numbers = #tpu.dot_dimension_numbers<[1], [0], [0], [1], [0, 0, 1, 1], [], []>} : vector<256x576xf32>, vector<576x4xf32>, vector<256x4xf32> -> vector<256x4xf32>
    %97 = vector.extract_strided_slice %52 {offsets = [0, 32], sizes = [256, 2], strides = [1, 1]} : vector<256x34xf32> to vector<256x2xf32>
    %98 = vector.extract_strided_slice %96 {offsets = [0, 0], sizes = [256, 2], strides = [1, 1]} : vector<256x4xf32> to vector<256x2xf32>
    %99 = arith.addf %97, %98 : vector<256x2xf32>
    %100 = vector.extract_strided_slice %57 {offsets = [0, 32], sizes = [256, 2], strides = [1, 1]} : vector<256x34xf32> to vector<256x2xf32>
    %101 = vector.extract_strided_slice %96 {offsets = [0, 2], sizes = [256, 2], strides = [1, 1]} : vector<256x4xf32> to vector<256x2xf32>
    %102 = arith.addf %100, %101 : vector<256x2xf32>
    %103 = vector.extract_strided_slice %99 {offsets = [0, 0], sizes = [256, 1], strides = [1, 1]} : vector<256x2xf32> to vector<256x1xf32>
    %104 = vector.broadcast %103 : vector<256x1xf32> to vector<256x32xf32>
    %105 = arith.mulf %58, %104 : vector<256x32xf32>
    %106 = vector.extract_strided_slice %99 {offsets = [0, 1], sizes = [256, 1], strides = [1, 1]} : vector<256x2xf32> to vector<256x1xf32>
    %107 = vector.broadcast %106 : vector<256x1xf32> to vector<256x32xf32>
    %108 = arith.mulf %68, %107 : vector<256x32xf32>
    %109 = arith.addf %105, %108 : vector<256x32xf32>
    %110 = vector.extract_strided_slice %102 {offsets = [0, 0], sizes = [256, 1], strides = [1, 1]} : vector<256x2xf32> to vector<256x1xf32>
    %111 = vector.broadcast %110 : vector<256x1xf32> to vector<256x32xf32>
    %112 = arith.mulf %59, %111 : vector<256x32xf32>
    %113 = arith.addf %109, %112 : vector<256x32xf32>
    %114 = vector.extract_strided_slice %102 {offsets = [0, 1], sizes = [256, 1], strides = [1, 1]} : vector<256x2xf32> to vector<256x1xf32>
    %115 = vector.broadcast %114 : vector<256x1xf32> to vector<256x32xf32>
    %116 = arith.mulf %69, %115 : vector<256x32xf32>
    %117 = arith.addf %113, %116 : vector<256x32xf32>
    %118 = vector.shape_cast %117 : vector<256x32xf32> to vector<1x16x16x32xf32>
    %c0_26 = arith.constant 0 : index
    %c0_27 = arith.constant 0 : index
    %c0_28 = arith.constant 0 : index
    %c0_29 = arith.constant 0 : index
    %119 = vector.load %arg8[%c0_26, %c0_27, %c0_28, %c0_29] : memref<1x16x16x32xf32, #tpu.memory_space<vmem>>, vector<1x16x16x32xf32>
    tpu.vector_store %arg8[%c0_26, %c0_27, %c0_28, %c0_29], %118 {strides = array<i32>} : memref<1x16x16x32xf32, #tpu.memory_space<vmem>>, vector<1x16x16x32xf32>,
    return
  }
  func.func @transform_0(%arg0: i32) -> (i32, i32, i32, i32) {
    %c0_i32 = arith.constant 0 : i32
    %c0_i32_0 = arith.constant 0 : i32
    %c0_i32_1 = arith.constant 0 : i32
    %c0_i32_2 = arith.constant 0 : i32
    return %arg0, %c0_i32, %c0_i32_0, %c0_i32_1 : i32, i32, i32, i32
  }
  func.func @transform_1(%arg0: i32) -> (i32, i32, i32, i32) {
    %c0_i32 = arith.constant 0 : i32
    %c0_i32_0 = arith.constant 0 : i32
    %c0_i32_1 = arith.constant 0 : i32
    %c0_i32_2 = arith.constant 0 : i32
    return %arg0, %c0_i32, %c0_i32_0, %c0_i32_1 : i32, i32, i32, i32
  }
  func.func @transform_2(%arg0: i32) -> (i32, i32) {
    %c0_i32 = arith.constant 0 : i32
    %c0_i32_0 = arith.constant 0 : i32
    %c0_i32_1 = arith.constant 0 : i32
    return %c0_i32, %c0_i32_0 : i32, i32
  }
  func.func @transform_3(%arg0: i32) -> (i32, i32) {
    %c0_i32 = arith.constant 0 : i32
    %c0_i32_0 = arith.constant 0 : i32
    %c0_i32_1 = arith.constant 0 : i32
    return %c0_i32, %c0_i32_0 : i32, i32
  }
  func.func @transform_4(%arg0: i32) -> (i32, i32) {
    %c0_i32 = arith.constant 0 : i32
    %c0_i32_0 = arith.constant 0 : i32
    %c0_i32_1 = arith.constant 0 : i32
    return %c0_i32, %c0_i32_0 : i32, i32
  }
  func.func @transform_5(%arg0: i32) -> (i32, i32) {
    %c0_i32 = arith.constant 0 : i32
    %c0_i32_0 = arith.constant 0 : i32
    %c0_i32_1 = arith.constant 0 : i32
    return %c0_i32, %c0_i32_0 : i32, i32
  }
  func.func @transform_6(%arg0: i32) -> (i32, i32) {
    %c0_i32 = arith.constant 0 : i32
    %c0_i32_0 = arith.constant 0 : i32
    %c0_i32_1 = arith.constant 0 : i32
    return %c0_i32, %c0_i32_0 : i32, i32
  }
  func.func @transform_7(%arg0: i32) -> (i32, i32, i32, i32) {
    %c0_i32 = arith.constant 0 : i32
    %c0_i32_0 = arith.constant 0 : i32
    %c0_i32_1 = arith.constant 0 : i32
    %c0_i32_2 = arith.constant 0 : i32
    return %arg0, %c0_i32, %c0_i32_0, %c0_i32_1 : i32, i32, i32, i32
  }
}

</mosaic_0001>

<bundles_post_ra>
// kernel: tpu_custom_call.1
= control target key start
LH: loop header
LB: loop body
LE: loop exit
PB: predicated region body
PF: predicated region fallthrough
CT: control target
= control target key end

     0   :  { %12 = vsyncpa [#allocation3], 0  ;;  %s15537_s0 = inlined_call_operand.vmem [shape: f32[2,16,16,32], index: 0, kind: input, shape index: {}]   ;;  %s15538_s1 = inlined_call_operand.vmem [shape: f32[2,16,16,32], index: 1, kind: input, shape index: {}]   ;;  %s15539_s2 = inlined_call_operand.vmem [shape: f32[288,34], index: 2, kind: input, shape index: {}]   ;;  %s15540_s3 = inlined_call_operand.vmem [shape: f32[288,34], index: 3, kind: input, shape index: {}]   ;;  %s15541_s4 = inlined_call_operand.vmem [shape: f32[576,4], index: 4, kind: input, shape index: {}]   ;;  %s15542_s5 = inlined_call_operand.vmem [shape: f32[1,34], index: 5, kind: input, shape index: {}]   ;;  %s15543_s6 = inlined_call_operand.vmem [shape: f32[1,34], index: 6, kind: input, shape index: {}]   ;;  %s15544_s7 = inlined_call_operand.hbm [shape: f32[2,16,16,32], index: 7, kind: output, shape index: {}]  }
   0x1   :  { %14 = vsyncpa [#allocation3 + $0x1], 0  ;;  %s9325_s24 = smov 0   ;;  %s9327_s25 = smov 0  }
   0x2   :  { %s9329_s26 = smov 0   ;;  %s9331_s27 = smov 0  }
   0x3 LB: > { %s9346_s28 = sadd.s32 4294967295, %s9272_s27   ;;  %s7008_s29 = sadd.s32 4294967294, %s9272_s27   ;;  %s9272_s27 = sphi %s9331_s27, %s17425_s27   ;;  %s9268_s26 = sphi %s9329_s26, %s17424_s26   ;;  %s9264_s25 = sphi %s9327_s25, %s17423_s25   ;;  %s9260_s24 = sphi %s9325_s24, %s17422_s24  }
   0x4   : > { %s9350_s30 = sadd.s32 1, %s9272_s27   ;;  %s184_s8 = sadd.s32 1, %s9268_s26 }
   0x5   : > { %s181_s9 = ssub.s32 %s9272_s27, %s9350_s30  ;;  %p194_p0 = scmp.ne.s32.totalorder %s9268_s26, %s9264_s25 }
   0x6   : > { %p182_p1 = scmp.eq.s32.totalorder %s181_s9, 0  ;;  %p195_p2 = scmp.eq.s32.totalorder %s9346_s28, 1 }
   0x7   : > { %p200_p3 = scmp.ne.s32.totalorder %s9264_s25, %s9260_s24  ;;  %p201_p4 = scmp.eq.s32.totalorder %s7008_s29, 1 }
   0x8   : > { %s9361_s10 = scalar_select %p182_p1, %s9268_s26, %s184_s8  }
   0x9   : > { %p9363_p5 = por %p195_p2, %p194_p0  ;;  %p9367_p6 = por %p201_p4, %p200_p3 }
   0xa   : > { %p7011_p7 = scmp.ge.s32.totalorder %s9272_s27, 1  ;;  %p250_p8 = scmp.lt.s32.totalorder %s9272_s27, 3 }
   0xc   : > { %p251_p9 = pnand %p7011_p7, %p250_p8 }
   0xe   : > { %254 = sbr.rel (%p251_p9) target bundleno = 1975 (0x7b7), region = 48 }
  0x15   : > { %p287_p10 = scmp.lt.s32.totalorder %s9346_s28, 1  ;;  %vm393_vm0 = vcmask 1040384   ;;  %vm552_vm1 = vcmask 1046528   ;;  %v15545_v12 = vmov 0.0   ;;  %s9275_s18 = smov 32   ;;  %vm630_vm2 = vcmask 1045504  }
  0x16   : > { %v9392_v13 = vrot.slane %v15545_v12, 1  ;;  %v9419_v27 = vrot.slane %v15545_v12, 2  ;;  %s9276_s19 = smov 64   ;;  %vm1316_vm3 = vcmask 261120   ;;  %s9277_s23 = smov 96   ;;  %vm1348_vm4 = vcmask 523264  }
  0x17   : > { %s9375_s13 = scalar_select %p287_p10, %s9346_s28, 1  ;;  %vm1380_vm5 = vcmask 785408   ;;  %vm14478_vm6 = vmneg %vm1348_vm4 }
  0x18   : > { %16192 = vst [vmem:[#allocation5_spill] sm:$0xff] %v9392_v13  ;;  %16198 = vst [vmem:[#allocation11_spill] sm:$0xff] %v9419_v27  ;;  %s9281_s15 = smov 30   ;;  %s7162_s21 = sshll.u32 %s9346_s28, 12 }
  0x19   : > { %s7160_s14 = sshll.u32 %s9375_s13, 8  ;;  %s15488_s8 = scalar_lea.hbm %s15544_s7, %s7162_s21 }
  0x1a   : > { %s9383_s17 = scalar_lea.vmem %s15537_s0, %s7160_s14  ;;  %s9955_s22 = scalar_lea.vmem %s15538_s1, %s7160_s14 }
  0x1b   : > { %v299_v0 = vld [vmem:[%s9383_s17 + $0x10] sm:$0xff]  ;;  %v300_v1 = vld [vmem:[%s9383_s17 + $0x18] sm:$0xff]  ;;  %v301_v2 = vld [vmem:[%s9383_s17 + $0x20] sm:$0xff]  ;;  %s9282_s9 = smov [#allocation2]  }
  0x1c   : > { %v302_v3 = vld [vmem:[%s9383_s17 + $0x28] sm:$0xff]  ;;  %v397_v4 = vrot.slane %v299_v0, 7  ;;  %v398_v5 = vrot.slane %v300_v1, 7  ;;  %v400_v6 = vrot.slane %v301_v2, 7  ;;  %v297_v7 = vld [vmem:[%s9383_s17] sm:$0xff]  ;;  %v303_v14 = vld [vmem:[%s9383_s17 + $0x30] sm:$0xff] }
  0x1d   : > { %v298_v8 = vld [vmem:[%s9383_s17 + $0x8] sm:$0xff]  ;;  %v401_v9 = vrot.slane %v302_v3, 7  ;;  %v394_v10 = vrot.slane %v297_v7, 7  ;;  %v304_v18 = vld [vmem:[%s9383_s17 + $0x38] sm:$0xff]  ;;  %v403_v19 = vrot.slane %v303_v14, 7  ;;  %v305_v36 = vld [vmem:[%s9383_s17 + $0x40] sm:$0xff] }
  0x1e   : > { %v395_v11 = vrot.slane %v298_v8, 7  ;;  %v9396_v15 = vsel %vm393_vm0, %v397_v4, %v398_v5  ;;  %v9399_v16 = vsel %vm393_vm0, 0.0, %v400_v6  ;;  %v9402_v17 = vsel %vm393_vm0, %v398_v5, 0.0  ;;  %v306_v41 = vld [vmem:[%s9383_s17 + $0x48] sm:$0xff]  ;;  %v307_v42 = vld [vmem:[%s9383_s17 + $0x50] sm:$0xff]  ;;  %v9451_v43 = vld [vmem:[%s9383_s17 + $0x58] sm:$0xff] }
  0x1f   : > { %16193 = vst [vmem:[#allocation6_spill] sm:$0xff] %v9396_v15  ;;  %16194 = vst [vmem:[#allocation7_spill] sm:$0xff] %v9399_v16  ;;  %v9406_v20 = vsel %vm393_vm0, %v400_v6, %v401_v9  ;;  %v561_v21 = vrot.slane %v9396_v15, 1  ;;  %v563_v22 = vrot.slane %v9402_v17, 1  ;;  %v565_v23 = vrot.slane %v9399_v16, 1  ;;  %v309_v60 = vld [vmem:[%s9383_s17 + $0x60] sm:$0xff] }
  0x20   : > { %16195 = vst [vmem:[#allocation8_spill] sm:$0xff] %v9406_v20  ;;  %v566_v24 = vrot.slane %v9406_v20, 1  ;;  %v9413_v25 = vsel %vm393_vm0, %v394_v10, %v395_v11  ;;  %v9416_v26 = vsel %vm393_vm0, 0.0, %v394_v10  ;;  %v404_v31 = vrot.slane %v304_v18, 7  ;;  %v310_v1 = vld [vmem:[%s9383_s17 + $0x68] sm:$0xff]  ;;  %v311_v2 = vld [vmem:[%s9383_s17 + $0x70] sm:$0xff] }
  0x21   : > { %16196 = vst [vmem:[#allocation9_spill] sm:$0xff] %v9413_v25  ;;  %16197 = vst [vmem:[#allocation10_spill] sm:$0xff] %v9416_v26  ;;  %v9422_v28 = vsel %vm552_vm1, %v561_v21, %v563_v22  ;;  %v555_v29 = vrot.slane %v9416_v26, 1  ;;  %v556_v30 = vrot.slane %v9413_v25, 1  ;;  %v9430_v33 = vsel %vm393_vm0, 0.0, %v403_v19  ;;  %v312_v7 = vld [vmem:[%s9383_s17 + $0x78] sm:$0xff] }
  0x22   : > { %16199 = vst [vmem:[#allocation12_spill] sm:$0xff] %v9422_v28  ;;  %v9427_v32 = vsel %vm552_vm1, %v565_v23, %v566_v24  ;;  %16201 = vst [vmem:[#allocation14_spill] sm:$0xff] %v9430_v33  ;;  %v9433_v34 = vsel %vm393_vm0, %v401_v9, 0.0  ;;  %v9436_v35 = vsel %vm393_vm0, 0.0, %v397_v4  ;;  %v9445_v39 = vsel %vm393_vm0, %v403_v19, %v404_v31  ;;  %s9214_s13 = sshll.u32 %s9282_s9, 4  ;;  %s9215_s13 = int_to_ptr.vmem [resolvable:$false] %s9214_s13 }
  0x23   : > { %16200 = vst [vmem:[#allocation13_spill] sm:$0xff] %v9427_v32  ;;  %16202 = vst [vmem:[#allocation15_spill] sm:$0xff] %v9436_v35  ;;  %v7813_v37 = vpack.i.bf16 %v9427_v32, %v9422_v28  ;;  %v9442_v38 = vsel %vm552_vm1, %v555_v29, %v556_v30  ;;  %v568_v40 = vrot.slane %v9433_v34, 1  ;;  %v570_v45 = vrot.slane %v9430_v33, 1  ;;  %s9216_s14 = scalar_lea.vmem %s9215_s13, 8192 }
  0x24   : > { %16203 = vst [vmem:[#allocation16_spill] sm:$0xff] %v9442_v38  ;;  %16204 = vst [vmem:[#allocation17_spill] sm:$0xff] %v9445_v39  ;;  %v7803_v44 = vpack.i.bf16 %v9442_v38, %v9392_v13  ;;  %v571_v46 = vrot.slane %v9445_v39, 1  ;;  %v9458_v47 = vsel %vm393_vm0, %v395_v11, 0.0  ;;  %v560_v50 = vrot.slane %v9436_v35, 1  ;;  %v321_v13 = vld [vmem:[%s9383_s17 + $0xc0] sm:$0xff] }
  0x25   : > { %7814 = vrot.lane.b32.xlu1 %v7813_v37, %s9275_s18  ;;  %v9462_v48 = vsel %vm552_vm1, %v566_v24, %v568_v40  ;;  %v558_v49 = vrot.slane %v9458_v47, 1  ;;  %v406_v51 = vrot.slane %v305_v36, 7  ;;  %v407_v53 = vrot.slane %v306_v41, 7  ;;  %v313_v40 = vld [vmem:[%s9383_s17 + $0x80] sm:$0xff]  ;;  %v314_v41 = vld [vmem:[%s9383_s17 + $0x88] sm:$0xff] }
  0x26   : > { %16205 = vst [vmem:[#allocation18_spill] sm:$0xff] %v9462_v48  ;;  %7804 = vrot.lane.b32.xlu0 %v7803_v44, %s9275_s18  ;;  %v9468_v52 = vsel %vm552_vm1, %v570_v45, %v571_v46  ;;  %v409_v54 = vrot.slane %v307_v42, 7  ;;  %v410_v55 = vrot.slane %v9451_v43, 7  ;;  %v9477_v58 = vsel %vm552_vm1, %v560_v50, %v561_v21 }
  0x27   : > { %16206 = vst [vmem:[#allocation19_spill] sm:$0xff] %v9468_v52  ;;  %v7818_v56 = vpack.i.bf16 %v9468_v52, %v9462_v48  ;;  %v9474_v57 = vsel %vm552_vm1, %v556_v30, %v558_v49  ;;  %16208 = vst [vmem:[#allocation21_spill] sm:$0xff] %v9477_v58  ;;  %v9480_v59 = vsel %vm393_vm0, 0.0, %v406_v51  ;;  %v9486_v62 = vsel %vm393_vm0, %v406_v51, %v407_v53  ;;  %v9547_v49 = vld [vmem:[%s9383_s17 + $0x98] sm:$0xff] }
  0x28   : > { %16207 = vst [vmem:[#allocation20_spill] sm:$0xff] %v9474_v57  ;;  %16209 = vst [vmem:[#allocation22_spill] sm:$0xff] %v9480_v59  ;;  %v7808_v61 = vpack.i.bf16 %v9477_v58, %v9474_v57  ;;  %v9489_v63 = vsel %vm393_vm0, %v409_v54, %v410_v55  ;;  %v9492_v0 = vsel %vm393_vm0, 0.0, %v409_v54  ;;  %v9498_v3 = vsel %vm393_vm0, %v407_v53, 0.0 }
  0x29   : > { %16210 = vst [vmem:[#allocation23_spill] sm:$0xff] %v9486_v62  ;;  %16211 = vst [vmem:[#allocation24_spill] sm:$0xff] %v9489_v63  ;;  %7819 = vrot.lane.b32.xlu1 %v7818_v56, %s9275_s18  ;;  %v576_v4 = vrot.slane %v9486_v62, 1  ;;  %v580_v5 = vrot.slane %v9492_v0, 1  ;;  %v581_v6 = vrot.slane %v9489_v63, 1  ;;  %v578_v8 = vrot.slane %v9498_v3, 1 }
  0x2a   : > { %16212 = vst [vmem:[#allocation25_spill] sm:$0xff] %v9492_v0  ;;  %7809 = vrot.lane.b32.xlu0 %v7808_v61, %s9275_s18  ;;  %v9507_v9 = vsel %vm393_vm0, %v404_v31, 0.0  ;;  %v575_v10 = vrot.slane %v9480_v59, 1  ;;  %v412_v11 = vrot.slane %v309_v60, 7  ;;  %v413_v19 = vrot.slane %v310_v1, 7 }
  0x2b   : > { %v9511_v14 = vsel %vm552_vm1, %v580_v5, %v581_v6  ;;  %v573_v18 = vrot.slane %v9507_v9, 1  ;;  %v415_v21 = vrot.slane %v311_v2, 7  ;;  %v9515_v22 = vsel %vm552_vm1, %v576_v4, %v578_v8 }
  0x2c   : > { %16213 = vst [vmem:[#allocation26_spill] sm:$0xff] %v9511_v14  ;;  %16214 = vst [vmem:[#allocation27_spill] sm:$0xff] %v9515_v22  ;;  %v9518_v23 = vsel %vm552_vm1, %v575_v10, %v576_v4  ;;  %v416_v24 = vrot.slane %v312_v7, 7  ;;  %v9521_v29 = vsel %vm393_vm0, 0.0, %v412_v11  ;;  %v7828_v30 = vpack.i.bf16 %v9511_v14, %v9515_v22  ;;  %v325_v14 = vld [vmem:[%s9383_s17 + $0xe0] sm:$0xff] }
  0x2d   : > { %16215 = vst [vmem:[#allocation28_spill] sm:$0xff] %v9518_v23  ;;  %16216 = vst [vmem:[#allocation29_spill] sm:$0xff] %v9521_v29  ;;  %v9526_v31 = vsel %vm552_vm1, %v571_v46, %v573_v18  ;;  %v9529_v36 = vsel %vm393_vm0, %v412_v11, %v413_v19  ;;  %v9532_v37 = vsel %vm393_vm0, 0.0, %v415_v21  ;;  %v9542_v44 = vsel %vm393_vm0, %v413_v19, 0.0  ;;  %v315_v46 = vld [vmem:[%s9383_s17 + $0x90] sm:$0xff]  ;;  %v317_v18 = vld [vmem:[%s9383_s17 + $0xa0] sm:$0xff] }
  0x2e   : > { %16217 = vst [vmem:[#allocation30_spill] sm:$0xff] %v9526_v31  ;;  %16218 = vst [vmem:[#allocation31_spill] sm:$0xff] %v9529_v36  ;;  %v7823_v42 = vpack.i.bf16 %v9518_v23, %v9526_v31  ;;  %v9539_v43 = vsel %vm393_vm0, %v415_v21, %v416_v24  ;;  %v586_v45 = vrot.slane %v9529_v36, 1  ;;  %7829 = vrot.lane.b32.xlu1 %v7828_v30, %s9275_s18  ;;  %v588_v50 = vrot.slane %v9542_v44, 1  ;;  %v318_v19 = vld [vmem:[%s9383_s17 + $0xa8] sm:$0xff] }
  0x2f   : > { %16219 = vst [vmem:[#allocation32_spill] sm:$0xff] %v9532_v37  ;;  %16220 = vst [vmem:[#allocation33_spill] sm:$0xff] %v9539_v43  ;;  %v590_v51 = vrot.slane %v9532_v37, 1  ;;  %v591_v53 = vrot.slane %v9539_v43, 1  ;;  %v9554_v54 = vsel %vm393_vm0, %v410_v55, 0.0  ;;  %v585_v60 = vrot.slane %v9521_v29, 1 }
  0x30   : > { %7824 = vrot.lane.b32.xlu0 %v7823_v42, %s9275_s18  ;;  %v583_v56 = vrot.slane %v9554_v54, 1  ;;  %v418_v61 = vrot.slane %v313_v40, 7  ;;  %v419_v1 = vrot.slane %v314_v41, 7  ;;  %v9560_v2 = vsel %vm552_vm1, %v586_v45, %v588_v50  ;;  %v320_v50 = vld [vmem:[%s9383_s17 + $0xb8] sm:$0xff] }
  0x31   : > { %16221 = vst [vmem:[#allocation34_spill] sm:$0xff] %v9560_v2  ;;  %v9563_v4 = vsel %vm552_vm1, %v590_v51, %v591_v53  ;;  %v421_v5 = vrot.slane %v315_v46, 7  ;;  %v422_v7 = vrot.slane %v9547_v49, 7  ;;  %v9572_v10 = vsel %vm552_vm1, %v585_v60, %v586_v45  ;;  %v319_v49 = vld [vmem:[%s9383_s17 + $0xb0] sm:$0xff] }
  0x32   : > { %16222 = vst [vmem:[#allocation35_spill] sm:$0xff] %v9563_v4  ;;  %v7838_v55 = vpack.i.bf16 %v9563_v4, %v9560_v2  ;;  %v9569_v8 = vsel %vm552_vm1, %v581_v6, %v583_v56  ;;  %16224 = vst [vmem:[#allocation37_spill] sm:$0xff] %v9572_v10  ;;  %v9575_v11 = vsel %vm393_vm0, %v418_v61, %v419_v1  ;;  %v9588_v6 = vsel %vm393_vm0, %v419_v1, 0.0 }
  0x33   : > { %16223 = vst [vmem:[#allocation36_spill] sm:$0xff] %v9569_v8  ;;  %16225 = vst [vmem:[#allocation38_spill] sm:$0xff] %v9575_v11  ;;  %v7833_v21 = vpack.i.bf16 %v9572_v10, %v9569_v8  ;;  %v9582_v30 = vsel %vm393_vm0, %v421_v5, %v422_v7  ;;  %v9585_v40 = vsel %vm393_vm0, 0.0, %v421_v5  ;;  %v596_v41 = vrot.slane %v9575_v11, 1 }
  0x34   : > { %16226 = vst [vmem:[#allocation39_spill] sm:$0xff] %v9582_v30  ;;  %16227 = vst [vmem:[#allocation40_spill] sm:$0xff] %v9585_v40  ;;  %7839 = vrot.lane.b32.xlu1 %v7838_v55, %s9275_s18  ;;  %v598_v42 = vrot.slane %v9588_v6, 1  ;;  %v600_v45 = vrot.slane %v9585_v40, 1  ;;  %v601_v46 = vrot.slane %v9582_v30, 1  ;;  %v9599_v51 = vsel %vm393_vm0, 0.0, %v418_v61 }
  0x35   : > { %7834 = vrot.lane.b32.xlu0 %v7833_v21, %s9275_s18  ;;  %16228 = vst [vmem:[#allocation41_spill] sm:$0xff] %v9599_v51  ;;  %v9602_v56 = vsel %vm393_vm0, %v416_v24, 0.0  ;;  %v424_v60 = vrot.slane %v317_v18, 7  ;;  %v425_v1 = vrot.slane %v318_v19, 7  ;;  %v595_v21 = vrot.slane %v9599_v51, 1 }
  0x36   : > { %v9605_v5 = vsel %vm552_vm1, %v596_v41, %v598_v42  ;;  %v9608_v55 = vsel %vm552_vm1, %v600_v45, %v601_v46  ;;  %v593_v12 = vrot.slane %v9602_v56, 1  ;;  %v427_v18 = vrot.slane %v319_v49, 7 }
  0x37   : > { %16229 = vst [vmem:[#allocation42_spill] sm:$0xff] %v9605_v5  ;;  %16230 = vst [vmem:[#allocation43_spill] sm:$0xff] %v9608_v55  ;;  %v7848_v61 = vpack.i.bf16 %v9608_v55, %v9605_v5  ;;  %v9615_v24 = vsel %vm393_vm0, %v424_v60, %v425_v1  ;;  %v428_v19 = vrot.slane %v320_v50, 7  ;;  %v9621_v45 = vsel %vm552_vm1, %v595_v21, %v596_v41  ;;  %v322_v41 = vld [vmem:[%s9383_s17 + $0xc8] sm:$0xff]  ;;  %v323_v50 = vld [vmem:[%s9383_s17 + $0xd0] sm:$0xff] }
  0x38   : > { %16231 = vst [vmem:[#allocation44_spill] sm:$0xff] %v9615_v24  ;;  %v9618_v42 = vsel %vm552_vm1, %v591_v53, %v593_v12  ;;  %16233 = vst [vmem:[#allocation46_spill] sm:$0xff] %v9621_v45  ;;  %v9624_v57 = vsel %vm393_vm0, %v425_v1, 0.0  ;;  %v606_v38 = vrot.slane %v9615_v24, 1  ;;  %v9635_v12 = vsel %vm393_vm0, 0.0, %v427_v18  ;;  %v324_v1 = vld [vmem:[%s9383_s17 + $0xd8] sm:$0xff] }
  0x39   : > { %16232 = vst [vmem:[#allocation45_spill] sm:$0xff] %v9618_v42  ;;  %7849 = vrot.lane.b32.xlu1 %v7848_v61, %s9275_s18  ;;  %v7843_v5 = vpack.i.bf16 %v9621_v45, %v9618_v42  ;;  %v9632_v49 = vsel %vm393_vm0, %v427_v18, %v428_v19  ;;  %16235 = vst [vmem:[#allocation48_spill] sm:$0xff] %v9635_v12  ;;  %v608_v53 = vrot.slane %v9624_v57, 1  ;;  %v610_v21 = vrot.slane %v9635_v12, 1 }
  0x3a   : > { %16234 = vst [vmem:[#allocation47_spill] sm:$0xff] %v9632_v49  ;;  %v611_v55 = vrot.slane %v9632_v49, 1  ;;  %v9644_v61 = vsel %vm393_vm0, 0.0, %v424_v60  ;;  %v9647_v45 = vsel %vm393_vm0, %v422_v7, 0.0  ;;  %v430_v42 = vrot.slane %v321_v13, 7 }
  0x3b   : > { %16236 = vst [vmem:[#allocation49_spill] sm:$0xff] %v9644_v61  ;;  %7844 = vrot.lane.b32.xlu0 %v7843_v5, %s9275_s18  ;;  %v9651_v18 = vsel %vm552_vm1, %v606_v38, %v608_v53  ;;  %v603_v2 = vrot.slane %v9647_v45, 1  ;;  %v605_v10 = vrot.slane %v9644_v61, 1  ;;  %v431_v22 = vrot.slane %v322_v41, 7 }
  0x3c   : > { %16237 = vst [vmem:[#allocation50_spill] sm:$0xff] %v9651_v18  ;;  %v9656_v4 = vsel %vm552_vm1, %v610_v21, %v611_v55  ;;  %v433_v60 = vrot.slane %v323_v50, 7  ;;  %v434_v23 = vrot.slane %v324_v1, 7  ;;  %v9667_v8 = vsel %vm393_vm0, 0.0, %v430_v42 }
  0x3d   : > { %16238 = vst [vmem:[#allocation51_spill] sm:$0xff] %v9656_v4  ;;  %v7858_v7 = vpack.i.bf16 %v9656_v4, %v9651_v18  ;;  %v9661_v5 = vsel %vm552_vm1, %v601_v46, %v603_v2  ;;  %v9664_v53 = vsel %vm552_vm1, %v605_v10, %v606_v38  ;;  %16241 = vst [vmem:[#allocation54_spill] sm:$0xff] %v9667_v8  ;;  %v326_v2 = vld [vmem:[%s9383_s17 + $0xe8] sm:$0xff]  ;;  %v9684_v38 = vsel %vm393_vm0, %v431_v22, 0.0 }
  0x3e   : > { %16239 = vst [vmem:[#allocation52_spill] sm:$0xff] %v9661_v5  ;;  %16240 = vst [vmem:[#allocation53_spill] sm:$0xff] %v9664_v53  ;;  %v7853_v13 = vpack.i.bf16 %v9664_v53, %v9661_v5  ;;  %v9673_v41 = vsel %vm393_vm0, %v430_v42, %v431_v22  ;;  %v9676_v50 = vsel %vm393_vm0, %v433_v60, %v434_v23  ;;  %v9679_v1 = vsel %vm393_vm0, 0.0, %v433_v60 }
  0x3f   : > { %16242 = vst [vmem:[#allocation55_spill] sm:$0xff] %v9673_v41  ;;  %16243 = vst [vmem:[#allocation56_spill] sm:$0xff] %v9676_v50  ;;  %7859 = vrot.lane.b32.xlu1 %v7858_v7, %s9275_s18  ;;  %v616_v10 = vrot.slane %v9673_v41, 1  ;;  %v620_v46 = vrot.slane %v9679_v1, 1  ;;  %v621_v21 = vrot.slane %v9676_v50, 1  ;;  %v618_v42 = vrot.slane %v9684_v38, 1 }
  0x40   : > { %16244 = vst [vmem:[#allocation57_spill] sm:$0xff] %v9679_v1  ;;  %7854 = vrot.lane.b32.xlu0 %v7853_v13, %s9275_s18  ;;  %v9692_v18 = vsel %vm393_vm0, %v428_v19, 0.0  ;;  %v615_v60 = vrot.slane %v9667_v8, 1  ;;  %v436_v53 = vrot.slane %v325_v14, 7  ;;  %v437_v4 = vrot.slane %v326_v2, 7 }
  0x41   : > { %v9696_v7 = vsel %vm552_vm1, %v620_v46, %v621_v21  ;;  %v613_v22 = vrot.slane %v9692_v18, 1  ;;  %v633_v5 = vrot.slane %v9416_v26, 2  ;;  %v9701_v48 = vsel %vm552_vm1, %v616_v10, %v618_v42 }
  0x42   : > { %16245 = vst [vmem:[#allocation58_spill] sm:$0xff] %v9696_v7  ;;  %16246 = vst [vmem:[#allocation59_spill] sm:$0xff] %v9701_v48  ;;  %v9704_v13 = vsel %vm552_vm1, %v615_v60, %v616_v10  ;;  %v634_v19 = vrot.slane %v9413_v25, 2  ;;  %v9708_v32 = vsel %vm393_vm0, 0.0, %v436_v53  ;;  %v7868_v14 = vpack.i.bf16 %v9696_v7, %v9701_v48 }
  0x43   : > { %16247 = vst [vmem:[#allocation60_spill] sm:$0xff] %v9704_v13  ;;  %16248 = vst [vmem:[#allocation61_spill] sm:$0xff] %v9708_v32  ;;  %v9713_v46 = vsel %vm552_vm1, %v611_v55, %v613_v22  ;;  %v9716_v2 = vsel %vm393_vm0, %v436_v53, %v437_v4  ;;  %v9719_v42 = vsel %vm393_vm0, %v437_v4, 0.0  ;;  %v9728_v55 = vsel %vm393_vm0, %v434_v23, 0.0 }
  0x44   : > { %16249 = vst [vmem:[#allocation62_spill] sm:$0xff] %v9713_v46  ;;  %16250 = vst [vmem:[#allocation63_spill] sm:$0xff] %v9716_v2  ;;  %v7863_v10 = vpack.i.bf16 %v9704_v13, %v9713_v46  ;;  %v626_v60 = vrot.slane %v9716_v2, 1  ;;  %v628_v31 = vrot.slane %v9719_v42, 1  ;;  %v635_v52 = vsel %vm630_vm2, %v633_v5, %v634_v19  ;;  %7869 = vrot.lane.b32.xlu1 %v7868_v14, %s9275_s18 }
  0x45   : > { %v625_v53 = vrot.slane %v9708_v32, 1  ;;  %v636_v22 = vrot.slane %v9458_v47, 2  ;;  %v638_v4 = vrot.slane %v9436_v35, 2  ;;  %v641_v48 = vrot.slane %v9402_v17, 2 }
  0x46   : > { %7864 = vrot.lane.b32.xlu0 %v7863_v10, %s9275_s18  ;;  %v9736_v13 = vsel %vm552_vm1, %v626_v60, %v628_v31  ;;  %v623_v5 = vrot.slane %v9728_v55, 1  ;;  %v639_v14 = vrot.slane %v9396_v15, 2  ;;  %v644_v46 = vrot.slane %v9406_v20, 2 }
  0x47   : > { %16251 = vst [vmem:[#allocation64_spill] sm:$0xff] %v9736_v13  ;;  %v7878_v23 = vpack.i.bf16 %v635_v52, %v9736_v13  ;;  %v9742_v7 = vsel %vm552_vm1, %v625_v53, %v626_v60  ;;  %v637_v47 = vsel %vm630_vm2, %v634_v19, %v636_v22  ;;  %v646_v31 = vrot.slane %v9433_v34, 2 }
  0x48   : > { %16252 = vst [vmem:[#allocation65_spill] sm:$0xff] %v9742_v7  ;;  %v9747_v17 = vsel %vm552_vm1, %v621_v21, %v623_v5  ;;  %v9750_v10 = vsel %vm630_vm2, %v638_v4, %v639_v14  ;;  %v648_v28 = vrot.slane %v9430_v33, 2  ;;  %v649_v19 = vrot.slane %v9445_v39, 2 }
  0x49   : > { %16253 = vst [vmem:[#allocation66_spill] sm:$0xff] %v9747_v17  ;;  %7879 = vrot.lane.b32.xlu1 %v7878_v23, %s9275_s18  ;;  %v7873_v60 = vpack.i.bf16 %v9742_v7, %v9747_v17  ;;  %v9758_v53 = vpack.i.bf16 %v9750_v10, %v637_v47  ;;  %v9762_v21 = vsel %vm630_vm2, %v644_v46, %v646_v31  ;;  %v643_v22 = vrot.slane %v9399_v16, 2 }
  0x4a   : > { %16254 = vst [vmem:[#allocation67_spill] sm:$0xff] %v9762_v21  ;;  %v654_v4 = vrot.slane %v9486_v62, 2  ;;  %v656_v34 = vrot.slane %v9498_v3, 2  ;;  %v7883_v5 = vpack.i.bf16 %v635_v52, %v9419_v27  ;;  %v9770_v23 = vsel %vm630_vm2, %v648_v28, %v649_v19  ;;  %7283 = vmatprep.mubr.msk.f32.mxu1 %vm1316_vm3, %v9750_v10 }
  0x4b   : > { %7874 = vrot.lane.b32.xlu0 %v7873_v60, %s9275_s18  ;;  %16255 = vst [vmem:[#allocation68_spill] sm:$0xff] %v9770_v23  ;;  %v658_v47 = vrot.slane %v9492_v0, 2  ;;  %v659_v13 = vrot.slane %v9489_v63, 2  ;;  %v9775_v31 = vsel %vm630_vm2, %v639_v14, %v641_v48  ;;  %v9778_v7 = vsel %vm630_vm2, %v643_v22, %v644_v46 }
  0x4c   : > { %v651_v17 = vrot.slane %v9507_v9, 2  ;;  %v653_v3 = vrot.slane %v9480_v59, 2  ;;  %v9786_v28 = vpack.i.bf16 %v9770_v23, %v9762_v21  ;;  %v664_v52 = vrot.slane %v9529_v36, 2 }
  0x4d   : > { %7889 = vrot.lane.b32.xlu1 %v9758_v53, %s9276_s19  ;;  %v9790_v48 = vsel %vm630_vm2, %v654_v4, %v656_v34  ;;  %v9793_v46 = vsel %vm630_vm2, %v658_v47, %v659_v13  ;;  %v666_v9 = vrot.slane %v9542_v44, 2  ;;  %v668_v14 = vrot.slane %v9532_v37, 2 }
  0x4e   : > { %16256 = vst [vmem:[#allocation69_spill] sm:$0xff] %v9790_v48  ;;  %16257 = vst [vmem:[#allocation70_spill] sm:$0xff] %v9793_v46  ;;  %v9800_v60 = vpack.i.bf16 %v9778_v7, %v9775_v31  ;;  %v669_v22 = vrot.slane %v9539_v43, 2  ;;  %v661_v27 = vrot.slane %v9554_v54, 2  ;;  %v9805_v34 = vsel %vm630_vm2, %v649_v19, %v651_v17 }
  0x4f   : > { %7884 = vrot.lane.b32.xlu0 %v7883_v5, %s9276_s19  ;;  %16258 = vst [vmem:[#allocation71_spill] sm:$0xff] %v9805_v34  ;;  %v9808_v47 = vsel %vm630_vm2, %v653_v3, %v654_v4  ;;  %v663_v44 = vrot.slane %v9521_v29, 2  ;;  %v9815_v5 = vpack.i.bf16 %v9793_v46, %v9790_v48  ;;  %v9818_v23 = vsel %vm630_vm2, %v664_v52, %v666_v9 }
  0x50   : > { %16259 = vst [vmem:[#allocation72_spill] sm:$0xff] %v9808_v47  ;;  %16260 = vst [vmem:[#allocation73_spill] sm:$0xff] %v9818_v23  ;;  %v9821_v54 = vsel %vm630_vm2, %v668_v14, %v669_v22  ;;  %v674_v17 = vrot.slane %v9575_v11, 2  ;;  %v676_v19 = vrot.slane %v9588_v6, 2  ;;  %v678_v4 = vrot.slane %v9585_v40, 2 }
  0x51   : > { %7899 = vrot.lane.b32.xlu1 %v9786_v28, %s9276_s19  ;;  %16261 = vst [vmem:[#allocation74_spill] sm:$0xff] %v9821_v54  ;;  %v679_v3 = vrot.slane %v9582_v30, 2  ;;  %v9831_v46 = vpack.i.bf16 %v9808_v47, %v9805_v34  ;;  %v9834_v9 = vsel %vm630_vm2, %v659_v13, %v661_v27  ;;  %v9838_v14 = vpack.i.bf16 %v9821_v54, %v9818_v23 }
  0x52   : > { %16262 = vst [vmem:[#allocation75_spill] sm:$0xff] %v9834_v9  ;;  %v9841_v6 = vsel %vm630_vm2, %v663_v44, %v664_v52  ;;  %v671_v48 = vrot.slane %v9602_v56, 2  ;;  %v673_v21 = vrot.slane %v9599_v51, 2  ;;  %v684_v47 = vrot.slane %v9615_v24, 2 }
  0x53   : > { %7894 = vrot.lane.b32.xlu0 %v9800_v60, %s9276_s19  ;;  %16263 = vst [vmem:[#allocation76_spill] sm:$0xff] %v9841_v6  ;;  %v686_v34 = vrot.slane %v9624_v57, 2  ;;  %v688_v27 = vrot.slane %v9635_v12, 2  ;;  %v689_v13 = vrot.slane %v9632_v49, 2  ;;  %v9852_v54 = vsel %vm630_vm2, %v674_v17, %v676_v19 }
  0x54   : > { %16264 = vst [vmem:[#allocation77_spill] sm:$0xff] %v9852_v54  ;;  %v9855_v52 = vsel %vm630_vm2, %v678_v4, %v679_v3  ;;  %v9861_v56 = vpack.i.bf16 %v9841_v6, %v9834_v9  ;;  %v9864_v44 = vsel %vm630_vm2, %v669_v22, %v671_v48  ;;  %v9867_v57 = vsel %vm630_vm2, %v673_v21, %v674_v17 }
  0x55   : > { %7909 = vrot.lane.b32.xlu1 %v9815_v5, %s9276_s19  ;;  %16265 = vst [vmem:[#allocation78_spill] sm:$0xff] %v9855_v52  ;;  %16266 = vst [vmem:[#allocation79_spill] sm:$0xff] %v9867_v57  ;;  %v681_v23 = vrot.slane %v9647_v45, 2  ;;  %v683_v19 = vrot.slane %v9644_v61, 2  ;;  %v9875_v4 = vpack.i.bf16 %v9855_v52, %v9852_v54  ;;  %v9878_v6 = vsel %vm630_vm2, %v684_v47, %v686_v34 }
  0x56   : > { %16267 = vst [vmem:[#allocation80_spill] sm:$0xff] %v9878_v6  ;;  %v9881_v48 = vsel %vm630_vm2, %v688_v27, %v689_v13  ;;  %v694_v21 = vrot.slane %v9673_v41, 2  ;;  %v696_v22 = vrot.slane %v9684_v38, 2  ;;  %v698_v45 = vrot.slane %v9679_v1, 2 }
  0x57   : > { %7904 = vrot.lane.b32.xlu0 %v9831_v46, %s9276_s19  ;;  %16268 = vst [vmem:[#allocation81_spill] sm:$0xff] %v9881_v48  ;;  %v699_v17 = vrot.slane %v9676_v50, 2  ;;  %v9891_v52 = vpack.i.bf16 %v9867_v57, %v9864_v44  ;;  %v9894_v34 = vsel %vm630_vm2, %v679_v3, %v681_v23  ;;  %v9897_v27 = vsel %vm630_vm2, %v683_v19, %v684_v47 }
  0x58   : > { %v691_v54 = vrot.slane %v9692_v18, 2  ;;  %v693_v38 = vrot.slane %v9667_v8, 2  ;;  %v9905_v9 = vpack.i.bf16 %v9881_v48, %v9878_v6  ;;  %v9908_v57 = vsel %vm630_vm2, %v694_v21, %v696_v22 }
  0x59   : > { %7919 = vrot.lane.b32.xlu1 %v9838_v14, %s9276_s19  ;;  %16269 = vst [vmem:[#allocation82_spill] sm:$0xff] %v9908_v57  ;;  %v9911_v23 = vsel %vm630_vm2, %v698_v45, %v699_v17  ;;  %v704_v47 = vrot.slane %v9716_v2, 2  ;;  %v706_v18 = vrot.slane %v9719_v42, 2  ;;  %v9919_v3 = vpack.i.bf16 %v9897_v27, %v9894_v34 }
  0x5a   : > { %16270 = vst [vmem:[#allocation83_spill] sm:$0xff] %v9911_v23  ;;  %v9922_v19 = vsel %vm630_vm2, %v689_v13, %v691_v54  ;;  %v9925_v22 = vsel %vm630_vm2, %v693_v38, %v694_v21  ;;  %v701_v45 = vrot.slane %v9728_v55, 2  ;;  %v703_v48 = vrot.slane %v9708_v32, 2  ;;  %v9971_v38 = vld [vmem:[%s9383_s17 + $0xf8] sm:$0xff] }
  0x5b   : > { %7914 = vrot.lane.b32.xlu0 %v9861_v56, %s9276_s19  ;;  %16271 = vst [vmem:[#allocation84_spill] sm:$0xff] %v9922_v19  ;;  %16272 = vst [vmem:[#allocation85_spill] sm:$0xff] %v9925_v22  ;;  %v9933_v42 = vpack.i.bf16 %v9911_v23, %v9908_v57  ;;  %v9936_v6 = vsel %vm630_vm2, %v704_v47, %v706_v18  ;;  %v9942_v55 = vpack.i.bf16 %v9925_v22, %v9922_v19  ;;  %v330_v18 = vld [vmem:[%s9955_s22 + $0x8] sm:$0xff] }
  0x5c   : > { %v9945_v54 = vsel %vm630_vm2, %v699_v17, %v701_v45  ;;  %v9948_v13 = vsel %vm630_vm2, %v703_v48, %v704_v47  ;;  %v7958_v21 = vpack.i.bf16 %v9436_v35, %v9936_v6  ;;  %v327_v17 = vld [vmem:[%s9383_s17 + $0xf0] sm:$0xff]  ;;  %v9974_v47 = vld [vmem:[%s9955_s22] sm:$0xff]  ;;  %v7968_v45 = vpack.i.bf16 %v9396_v15, %v9436_v35 }
  0x5d   : > { %7929 = vrot.lane.b32.xlu1 %v9875_v4, %s9276_s19  ;;  %16273 = vst [vmem:[#allocation86_spill] sm:$0xff] %v9945_v54  ;;  %16274 = vst [vmem:[#allocation87_spill] sm:$0xff] %v9948_v13  ;;  %v9967_v48 = vpack.i.bf16 %v9948_v13, %v9945_v54  ;;  %v7963_v10 = vpack.i.bf16 %v9413_v25, %v9416_v26  ;;  %v439_v23 = vrot.slane %v327_v17, 7  ;;  %v15628_v13 = vrot.slane %v9971_v38, 7 }
  0x5e   : > { %v15630_v54 = vrot.slane %v9974_v47, 7  ;;  %v1542_v57 = vrot.slane %v330_v18, 7  ;;  %v7973_v35 = vpack.i.bf16 %v9406_v20, %v9399_v16  ;;  %v7988_v26 = vpack.i.bf16 %v9489_v63, %v9492_v0 }
  0x5f   : > { %7924 = vrot.lane.b32.xlu0 %v9891_v52, %s9276_s19  ;;  %v9995_v17 = vsel %vm393_vm0, %v439_v23, %v15628_v13  ;;  %v9998_v25 = vsel %vm393_vm0, 0.0, %v439_v23 }
  0x60   : > { %v10003_v18 = vsel %vm393_vm0, %v15630_v54, %v1542_v57  ;;  %v10011_v13 = vsel %vm393_vm0, %v1542_v57, 0.0  ;;  %v7998_v57 = vpack.i.bf16 %v9539_v43, %v9532_v37 }
  0x61   : > { %7939 = vrot.lane.b32.xlu1 %v9905_v9, %s9276_s19  ;;  %16275 = vst [vmem:[#allocation88_spill] sm:$0xff] %v10003_v18  ;;  %v15635_v23 = vrot.slane %v10003_v18, 1  ;;  %v1701_v54 = vrot.slane %v10011_v13, 1 }
  0x63   : > { %7934 = vrot.lane.b32.xlu0 %v9919_v3, %s9276_s19  ;;  %v10026_v19 = vsel %vm552_vm1, %v15635_v23, %v1701_v54  ;;  %v8003_v54 = vpack.i.bf16 %v9575_v11, %v9599_v51 }
  0x64   : > { %16277 = vst [vmem:[#allocation90_spill] sm:$0xff] %v10026_v19 }
  0x65   : > { %7949 = vrot.lane.b32.xlu1 %v9933_v42, %s9276_s19 }
  0x67   : > { %7944 = vrot.lane.b32.xlu0 %v9942_v55, %s9276_s19 }
  0x69   : > { %7959 = vrot.lane.b32.xlu1 %v7958_v21, %s9276_s19  ;;  %v7978_v21 = vpack.i.bf16 %v9445_v39, %v9430_v33 }
  0x6b   : > { %7954 = vrot.lane.b32.xlu0 %v9967_v48, %s9276_s19 }
  0x6d   : > { %7969 = vrot.lane.b32.xlu1 %v7968_v45, %s9277_s23  ;;  %v710_v45 = vrot.slane %v9998_v25, 1 }
  0x6f   : > { %7964 = vrot.lane.b32.xlu0 %v7963_v10, %s9277_s23  ;;  %v15632_v10 = vrot.slane %v9995_v17, 1 }
  0x71   : > { %7979 = vrot.lane.b32.xlu1 %v7978_v21, %s9277_s23  ;;  %v10017_v22 = vsel %vm552_vm1, %v710_v45, %v15632_v10  ;;  %v7983_v21 = vpack.i.bf16 %v9486_v62, %v9480_v59  ;;  %v7993_v45 = vpack.i.bf16 %v9529_v36, %v9521_v29 }
  0x72   : > { %16276 = vst [vmem:[#allocation89_spill] sm:$0xff] %v10017_v22 }
  0x73   : > { %7974 = vrot.lane.b32.xlu0 %v7973_v35, %s9277_s23  ;;  %v8008_v35 = vpack.i.bf16 %v9582_v30, %v9585_v40 }
  0x75   : > { %7989 = vrot.lane.b32.xlu1 %v7988_v26, %s9277_s23  ;;  %v8018_v26 = vpack.i.bf16 %v9632_v49, %v9635_v12 }
  0x77   : > { %7984 = vrot.lane.b32.xlu0 %v7983_v21, %s9277_s23  ;;  %v8013_v21 = vpack.i.bf16 %v9615_v24, %v9644_v61 }
  0x79   : > { %7999 = vrot.lane.b32.xlu1 %v7998_v57, %s9277_s23  ;;  %v8028_v57 = vpack.i.bf16 %v9676_v50, %v9679_v1 }
  0x7b   : > { %7994 = vrot.lane.b32.xlu0 %v7993_v45, %s9277_s23  ;;  %v8023_v45 = vpack.i.bf16 %v9673_v41, %v9667_v8 }
  0x7d   : > { %8009 = vrot.lane.b32.xlu1 %v8008_v35, %s9277_s23  ;;  %v8038_v35 = vpack.i.bf16 %v9995_v17, %v9998_v25 }
  0x7f   : > { %8004 = vrot.lane.b32.xlu0 %v8003_v54, %s9277_s23  ;;  %v8033_v54 = vpack.i.bf16 %v9716_v2, %v9708_v32 }
  0x81   : > { %8019 = vrot.lane.b32.xlu1 %v8018_v26, %s9277_s23  ;;  %v2632_v26 = vld [vmem:[%s15539_s2] sm:$0xff] }
  0x83   : > { %8014 = vrot.lane.b32.xlu0 %v8013_v21, %s9277_s23  ;;  %v2633_v21 = vld [vmem:[%s15539_s2 + $0x8] sm:$0xff] }
  0x85   : > { %8029 = vrot.lane.b32.xlu1 %v8028_v57, %s9277_s23  ;;  %v7452_v57 = vpack.c.bf16 %v2633_v21, %v2632_v26  ;;  %v2636_v26 = vld [vmem:[%s15539_s2 + $0x20] sm:$0xff] }
  0x87   : > { %8024 = vrot.lane.b32.xlu0 %v8023_v45, %s9277_s23  ;;  %v15633_v45 = vmov 0.0|0.0  }
  0x88   : > { %7451 = vmatprep.subr.bf16.mxu0 %v15633_v45 }
  0x89   : > { %8039 = vrot.lane.b32.xlu1 %v8038_v35, %s9277_s23  ;;  %7453 = vmatpush1.bf16.msra.mxu0 %v7452_v57  ;;  %v2634_v35 = vld [vmem:[%s15539_s2 + $0x10] sm:$0xff]  ;;  %v16282_v57 = vrot.slane %v9974_v47, 7 }
  0x8a   : > { %7454 = vmatprep.subr.bf16.mxu0 %v15633_v45 }
  0x8b   : > { %8034 = vrot.lane.b32.xlu0 %v8033_v54, %s9277_s23 }
  0x8d   : > { %8049 = vrot.lane.b32.xlu1 %v9800_v60, %s9275_s18  ;;  %v2635_v60 = vld [vmem:[%s15539_s2 + $0x18] sm:$0xff] }
  0x8f   : > { %8044 = vrot.lane.b32.xlu0 %v9758_v53, %s9275_s18  ;;  %v7455_v53 = vpack.c.bf16 %v2635_v60, %v2634_v35  ;;  %v10111_v35 = vsel %vm393_vm0, 0.0, %v16282_v57  ;;  %v747_v57 = vrot.slane %v9998_v25, 2 }
  0x90   : > { %16283 = vst [vmem:[#allocation94_spill] sm:$0xff] %v10111_v35 }
  0x91   : > { %8059 = vrot.lane.b32.xlu1 %v9831_v46, %s9275_s18  ;;  %7456 = vmatpush1.bf16.msra.mxu0 %v7455_v53 }
  0x92   : > { %7457 = vmatprep.subr.bf16.mxu0 %v15633_v45 }
  0x93   : > { %8054 = vrot.lane.b32.xlu0 %v9786_v28, %s9275_s18  ;;  %v2637_v28 = vld [vmem:[%s15539_s2 + $0x28] sm:$0xff] }
  0x94   : > { %v7458_v60 = vpack.c.bf16 %v2637_v28, %v2636_v26  ;;  %v1698_v26 = vrot.slane %v10111_v35, 1  ;;  %v2640_v28 = vld [vmem:[%s15539_s2 + $0x40] sm:$0xff] }
  0x95   : > { %8069 = vrot.lane.b32.xlu1 %v9861_v56, %s9275_s18  ;;  %v16281_v56 = vrot.slane %v9971_v38, 7  ;;  %v748_v38 = vrot.slane %v9995_v17, 2 }
  0x96   : > { %7459 = vmatpush1.bf16.msra.mxu0 %v7458_v60 }
  0x97   : > { %8064 = vrot.lane.b32.xlu0 %v9815_v5, %s9275_s18  ;;  %v10086_v46 = vpop.permute.xlu1 %7814  ;;  %v10106_v21 = vsel %vm393_vm0, %v16281_v56, 0.0  ;;  %7460 = vmatprep.subr.bf16.mxu0 %v15633_v45  ;;  %v2641_v56 = vld [vmem:[%s15539_s2 + $0x48] sm:$0xff] }
  0x98   : > { %16278 = vst [vmem:[#allocation91_spill] sm:$0xff] %v10086_v46  ;;  %v10088_v54 = vpop.permute.xlu0 %7804  ;;  %v750_v47 = vrot.slane %v10106_v21, 2  ;;  %v7464_v10 = vpack.c.bf16 %v2641_v56, %v2640_v28  ;;  %v8128_v28 = vpack.i.bf16 %v9430_v33, %v9406_v20  ;;  %v8123_v56 = vpack.i.bf16 %v9399_v16, %v9396_v15  ;;  %v16354_v33 = vld [vmem:[#allocation76_spill] sm:$0xff]  ;;  %v16357_v20 = vld [vmem:[#allocation65_spill] sm:$0xff]  ;;  %v346_v16 = vld [vmem:[%s9955_s22 + $0x88] sm:$0xff] }
  0x99   : > { %16279 = vst [vmem:[#allocation92_spill] sm:$0xff] %v10088_v54  ;;  %8079 = vrot.lane.b32.xlu1 %v9891_v52, %s9275_s18  ;;  %v2638_v52 = vld [vmem:[%s15539_s2 + $0x30] sm:$0xff] }
  0x9a   : > { %v10143_v23 = vsel %vm630_vm2, %v748_v38, %v750_v47  ;;  %v347_v15 = vld [vmem:[%s9955_s22 + $0x90] sm:$0xff] }
  0x9b   : > { %8074 = vrot.lane.b32.xlu0 %v9838_v14, %s9275_s18  ;;  %v10101_v5 = vpop.permute.xlu1 %7819  ;;  %v2639_v14 = vld [vmem:[%s15539_s2 + $0x38] sm:$0xff] }
  0x9c   : > { %16280 = vst [vmem:[#allocation93_spill] sm:$0xff] %v10101_v5  ;;  %v10113_v53 = vpop.permute.xlu0 %7809  ;;  %v16287_v5 = vrot.slane %v10003_v18, 1 }
  0x9d   : > { %16284 = vst [vmem:[#allocation95_spill] sm:$0xff] %v10113_v53  ;;  %8089 = vrot.lane.b32.xlu1 %v9919_v3, %s9275_s18  ;;  %v7461_v3 = vpack.c.bf16 %v2639_v14, %v2638_v52  ;;  %v2643_v52 = vld [vmem:[%s15539_s2 + $0x58] sm:$0xff]  ;;  %v10160_v14 = vsel %vm630_vm2, %v747_v57, %v748_v38  ;;  %v2646_v57 = vld [vmem:[%s15539_s2 + $0x70] sm:$0xff] }
  0x9e   : > { %v10148_v46 = vsel %vm552_vm1, %v1698_v26, %v16287_v5  ;;  %v8113_v26 = vpack.i.bf16 %v10160_v14, %v9936_v6 }
  0x9f   : > { %8084 = vrot.lane.b32.xlu0 %v9875_v4, %s9275_s18  ;;  %7462 = vmatpush1.bf16.msra.mxu0 %v7461_v3  ;;  %16288 = vst [vmem:[#allocation98_spill] sm:$0xff] %v10148_v46  ;;  %v16289_v4 = vmov 0.0|0.0   ;;  %v8118_v5 = vpack.i.bf16 %v10148_v46, %v10143_v23 }
  0xa0   : > { %v10138_v60 = vpop.permute.xlu1 %7829  ;;  %7463 = vmatprep.subr.bf16.mxu0 %v16289_v4 }
  0xa1   : > { %8099 = vrot.lane.b32.xlu1 %v9942_v55, %s9275_s18  ;;  %16285 = vst [vmem:[#allocation96_spill] sm:$0xff] %v10138_v60  ;;  %v2642_v55 = vld [vmem:[%s15539_s2 + $0x50] sm:$0xff]  ;;  %v16348_v60 = vld [vmem:[#allocation50_spill] sm:$0xff] }
  0xa2   : > { %v10140_v45 = vpop.permute.xlu0 %7824 }
  0xa3   : > { %16286 = vst [vmem:[#allocation97_spill] sm:$0xff] %v10140_v45  ;;  %8094 = vrot.lane.b32.xlu0 %v9905_v9, %s9275_s18  ;;  %7465 = vmatpush1.bf16.msra.mxu0 %v7464_v10  ;;  %v7467_v9 = vpack.c.bf16 %v2643_v52, %v2642_v55  ;;  %v2645_v10 = vld [vmem:[%s15539_s2 + $0x68] sm:$0xff]  ;;  %v2647_v55 = vld [vmem:[%s15539_s2 + $0x78] sm:$0xff] }
  0xa4   : > { %7466 = vmatprep.subr.bf16.mxu0 %v16289_v4  ;;  %v16355_v45 = vld [vmem:[#allocation60_spill] sm:$0xff] }
  0xa5   : > { %8109 = vrot.lane.b32.xlu1 %v9967_v48, %s9275_s18  ;;  %v2644_v48 = vld [vmem:[%s15539_s2 + $0x60] sm:$0xff] }
  0xa6   : > { %v10166_v47 = vpop.permute.xlu1 %7839 }
  0xa7   : > { %16290 = vst [vmem:[#allocation99_spill] sm:$0xff] %v10166_v47  ;;  %8104 = vrot.lane.b32.xlu0 %v9933_v42, %s9275_s18  ;;  %v10173_v38 = vpop.permute.xlu0 %7834  ;;  %7468 = vmatpush1.bf16.msra.mxu0 %v7467_v9  ;;  %v7470_v42 = vpack.c.bf16 %v2645_v10, %v2644_v48  ;;  %v2648_v9 = vld [vmem:[%s15539_s2 + $0x80] sm:$0xff]  ;;  %v8133_v48 = vpack.i.bf16 %v9480_v59, %v9445_v39  ;;  %v16350_v39 = vld [vmem:[#allocation75_spill] sm:$0xff] }
  0xa8   : > { %16291 = vst [vmem:[#allocation100_spill] sm:$0xff] %v10173_v38  ;;  %7469 = vmatprep.subr.bf16.mxu0 %v16289_v4  ;;  %v7473_v10 = vpack.c.bf16 %v2647_v55, %v2646_v57  ;;  %v2650_v57 = vld [vmem:[%s15539_s2 + $0x90] sm:$0xff]  ;;  %v2651_v55 = vld [vmem:[%s15539_s2 + $0x98] sm:$0xff]  ;;  %v16338_v38 = vld [vmem:[#allocation46_spill] sm:$0xff] }
  0xa9   : > { %8119 = vrot.lane.b32.xlu1 %v8118_v5, %s9275_s18  ;;  %v8138_v5 = vpack.i.bf16 %v9492_v0, %v9486_v62 }
  0xab   : > { %8114 = vrot.lane.b32.xlu0 %v8113_v26, %s9275_s18  ;;  %v10188_v3 = vpop.permute.xlu1 %7849  ;;  %7471 = vmatpush1.bf16.msra.mxu0 %v7470_v42  ;;  %v2649_v26 = vld [vmem:[%s15539_s2 + $0x88] sm:$0xff]  ;;  %v8148_v42 = vpack.i.bf16 %v9532_v37, %v9529_v36  ;;  %v16318_v37 = vld [vmem:[#allocation28_spill] sm:$0xff] }
  0xac   : > { %16292 = vst [vmem:[#allocation101_spill] sm:$0xff] %v10188_v3  ;;  %7472 = vmatprep.subr.bf16.mxu0 %v16289_v4  ;;  %v7476_v46 = vpack.c.bf16 %v2649_v26, %v2648_v9  ;;  %v7479_v9 = vpack.c.bf16 %v2651_v55, %v2650_v57  ;;  %v2652_v26 = vld [vmem:[%s15539_s2 + $0xa0] sm:$0xff]  ;;  %v2655_v55 = vld [vmem:[%s15539_s2 + $0xb8] sm:$0xff] }
  0xad   : > { %8129 = vrot.lane.b32.xlu1 %v8128_v28, %s9276_s19  ;;  %v10197_v52 = vpop.permute.xlu0 %7844 }
  0xae   : > { %16293 = vst [vmem:[#allocation102_spill] sm:$0xff] %v10197_v52  ;;  %v16319_v52 = vld [vmem:[#allocation27_spill] sm:$0xff] }
  0xaf   : > { %8124 = vrot.lane.b32.xlu0 %v8123_v56, %s9276_s19  ;;  %7474 = vmatpush1.bf16.msra.mxu0 %v7473_v10  ;;  %v8143_v56 = vpack.i.bf16 %v9521_v29, %v9489_v63 }
  0xb0   : > { %7475 = vmatprep.subr.bf16.mxu0 %v16289_v4 }
  0xb1   : > { %8139 = vrot.lane.b32.xlu1 %v8138_v5, %s9276_s19  ;;  %v10212_v28 = vpop.permute.xlu1 %7859  ;;  %v8158_v5 = vpack.i.bf16 %v9585_v40, %v9575_v11  ;;  %v16315_v40 = vld [vmem:[#allocation36_spill] sm:$0xff]  ;;  %v334_v11 = vld [vmem:[%s9955_s22 + $0x28] sm:$0xff] }
  0xb2   : > { %16294 = vst [vmem:[#allocation103_spill] sm:$0xff] %v10212_v28  ;;  %v10216_v3 = vpop.permute.xlu0 %7854  ;;  %v1548_v63 = vrot.slane %v334_v11, 7 }
  0xb3   : > { %16295 = vst [vmem:[#allocation104_spill] sm:$0xff] %v10216_v3  ;;  %8134 = vrot.lane.b32.xlu0 %v8133_v48, %s9276_s19  ;;  %7477 = vmatpush1.bf16.msra.mxu0 %v7476_v46  ;;  %v2653_v48 = vld [vmem:[%s15539_s2 + $0xa8] sm:$0xff]  ;;  %v8168_v46 = vpack.i.bf16 %v9635_v12, %v9615_v24  ;;  %v2667_v24 = vld [vmem:[%s15539_s2 + $0x118] sm:$0xff]  ;;  %v333_v3 = vld [vmem:[%s9955_s22 + $0x20] sm:$0xff] }
  0xb4   : > { %7478 = vmatprep.subr.bf16.mxu0 %v16289_v4  ;;  %v7482_v57 = vpack.c.bf16 %v2653_v48, %v2652_v26  ;;  %v2665_v26 = vld [vmem:[%s15539_s2 + $0x108] sm:$0xff] }
  0xb5   : > { %8149 = vrot.lane.b32.xlu1 %v8148_v42, %s9276_s19  ;;  %v8153_v42 = vpack.i.bf16 %v9599_v51, %v9539_v43  ;;  %v335_v51 = vld [vmem:[%s9955_s22 + $0x30] sm:$0xff] }
  0xb6   : > { %v10239_v10 = vpop.permute.xlu1 %7869  ;;  %v16316_v43 = vld [vmem:[#allocation67_spill] sm:$0xff] }
  0xb7   : > { %8144 = vrot.lane.b32.xlu0 %v8143_v56, %s9276_s19  ;;  %16296 = vst [vmem:[#allocation105_spill] sm:$0xff] %v10239_v10  ;;  %7480 = vmatpush1.bf16.msra.mxu0 %v7479_v9  ;;  %v2654_v56 = vld [vmem:[%s15539_s2 + $0xb0] sm:$0xff]  ;;  %v2664_v9 = vld [vmem:[%s15539_s2 + $0x100] sm:$0xff] }
  0xb8   : > { %v10243_v28 = vpop.permute.xlu0 %7864  ;;  %7481 = vmatprep.subr.bf16.mxu0 %v16289_v4  ;;  %v7485_v12 = vpack.c.bf16 %v2655_v55, %v2654_v56  ;;  %v8173_v56 = vpack.i.bf16 %v9667_v8, %v9632_v49  ;;  %v7499_v55 = vpack.c.bf16 %v2665_v26, %v2664_v9  ;;  %v2659_v9 = vld [vmem:[%s15539_s2 + $0xd8] sm:$0xff]  ;;  %v16314_v49 = vld [vmem:[#allocation26_spill] sm:$0xff] }
  0xb9   : > { %16297 = vst [vmem:[#allocation106_spill] sm:$0xff] %v10243_v28  ;;  %8159 = vrot.lane.b32.xlu1 %v8158_v5, %s9276_s19  ;;  %v8163_v5 = vpack.i.bf16 %v9644_v61, %v9582_v30  ;;  %v2666_v28 = vld [vmem:[%s15539_s2 + $0x110] sm:$0xff]  ;;  %v8188_v61 = vpack.i.bf16 %v9998_v25, %v9716_v2  ;;  %v8183_v25 = vpack.i.bf16 %v9708_v32, %v9676_v50  ;;  %v332_v50 = vld [vmem:[%s9955_s22 + $0x18] sm:$0xff] }
  0xba   : > { %7500 = vmatprep.subr.bf16.mxu1 %v7499_v55  ;;  %v1545_v29 = vrot.slane %v332_v50, 7 }
  0xbb   : > { %8154 = vrot.lane.b32.xlu0 %v8153_v42, %s9276_s19  ;;  %v10256_v10 = vpop.permute.xlu1 %7879  ;;  %v8178_v42 = vpack.i.bf16 %v9679_v1, %v9673_v41  ;;  %7483 = vmatpush1.bf16.msra.mxu0 %v7482_v57  ;;  %v7503_v1 = vpack.c.bf16 %v2667_v24, %v2666_v28  ;;  %v16304_v28 = vld [vmem:[#allocation12_spill] sm:$0xff] }
  0xbc   : > { %16298 = vst [vmem:[#allocation107_spill] sm:$0xff] %v10256_v10  ;;  %7484 = vmatprep.subr.bf16.mxu0 %v16289_v4  ;;  %7502 = vmatpush3.bf16.msra.mxu1 %v7499_v55  ;;  %v8198_v26 = vpack.i.bf16 %v16304_v28, %v9477_v58  ;;  %v10425_v59 = vsel %vm393_vm0, %v1545_v29, 0.0  ;;  %v16388_v58 = vld [vmem:[#allocation77_spill] sm:$0xff] }
  0xbd   : > { %v10266_v48 = vpop.permute.xlu0 %7874  ;;  %8169 = vrot.lane.b32.xlu1 %v8168_v46, %s9276_s19  ;;  %v2657_v46 = vld [vmem:[%s15539_s2 + $0xc8] sm:$0xff]  ;;  %7504 = vmatprep.subr.bf16.mxu1 %v7503_v1 }
  0xbe   : > { %16299 = vst [vmem:[#allocation108_spill] sm:$0xff] %v10266_v48  ;;  %v2656_v48 = vld [vmem:[%s15539_s2 + $0xc0] sm:$0xff] }
  0xbf   : > { %8164 = vrot.lane.b32.xlu0 %v8163_v5, %s9276_s19  ;;  %v10285_v57 = vpop.permute.xlu1 %7889  ;;  %7486 = vmatpush1.bf16.msra.mxu0 %v7485_v12  ;;  %v7488_v30 = vpack.c.bf16 %v2657_v46, %v2656_v48  ;;  %v2658_v5 = vld [vmem:[%s15539_s2 + $0xd0] sm:$0xff]  ;;  %v2661_v46 = vld [vmem:[%s15539_s2 + $0xe8] sm:$0xff] }
  0xc0   : > { %16300 = vst [vmem:[#allocation109_spill] sm:$0xff] %v10285_v57  ;;  %7487 = vmatprep.subr.bf16.mxu0 %v16289_v4  ;;  %v7491_v48 = vpack.c.bf16 %v2659_v9, %v2658_v5  ;;  %7506 = vmatpush3.bf16.msra.mxu1 %v7503_v1  ;;  %v16308_v5 = vld [vmem:[#allocation19_spill] sm:$0xff]  ;;  %v16309_v9 = vld [vmem:[#allocation30_spill] sm:$0xff] }
  0xc1   : > { %v10289_v41 = vpop.permute.xlu0 %7884  ;;  %8179 = vrot.lane.b32.xlu1 %v8178_v42, %s9276_s19  ;;  %v2660_v42 = vld [vmem:[%s15539_s2 + $0xe0] sm:$0xff]  ;;  %7507 = vmatprep.subr.bf16.mxu1 %v16289_v4  ;;  %v8208_v2 = vpack.i.bf16 %v16309_v9, %v16308_v5  ;;  %v2662_v1 = vld [vmem:[%s15539_s2 + $0xf0] sm:$0xff]  ;;  %v10494_v9 = vld [vmem:[%s9955_s22 + $0x78] sm:$0xff] }
  0xc2   : > { %16301 = vst [vmem:[#allocation110_spill] sm:$0xff] %v10289_v41  ;;  %v7494_v32 = vpack.c.bf16 %v2661_v46, %v2660_v42  ;;  %v16312_v42 = vld [vmem:[#allocation18_spill] sm:$0xff] }
  0xc3   : > { %8174 = vrot.lane.b32.xlu0 %v8173_v56, %s9276_s19  ;;  %v10302_v24 = vpop.permute.xlu1 %7899  ;;  %7489 = vmatpush1.bf16.msra.mxu0 %v7488_v30 }
  0xc4   : > { %16302 = vst [vmem:[#allocation111_spill] sm:$0xff] %v10302_v24  ;;  %7490 = vmatprep.subr.bf16.mxu0 %v16289_v4  ;;  %7284 = vmatmul.mubr.msk.f32.vlgmr.msra.gmra.mrb[0].mxu1 %vm1316_vm3, %v9775_v31  ;;  %v8218_v31 = vpack.i.bf16 %v16315_v40, %v16314_v49  ;;  %v16340_v40 = vld [vmem:[#allocation51_spill] sm:$0xff] }
  0xc5   : > { %v10306_v12 = vpop.permute.xlu0 %7894  ;;  %8189 = vrot.lane.b32.xlu1 %v8188_v61, %s9276_s19  ;;  %v16306_v61 = vmov 0.0   ;;  %7286 = vmatprep.mubr.msk.f32.mxu1 %vm1316_vm3, %v9778_v7 }
  0xc6   : > { %16303 = vst [vmem:[#allocation112_spill] sm:$0xff] %v10306_v12  ;;  %v8193_v55 = vpack.i.bf16 %v16306_v61, %v9995_v17  ;;  %v331_v61 = vld [vmem:[%s9955_s22 + $0x10] sm:$0xff] }
  0xc7   : > { %8184 = vrot.lane.b32.xlu0 %v8183_v25, %s9276_s19  ;;  %v10319_v56 = vpop.permute.xlu1 %7909  ;;  %7492 = vmatpush1.bf16.msra.mxu0 %v7491_v48  ;;  %v2663_v25 = vld [vmem:[%s15539_s2 + $0xf8] sm:$0xff]  ;;  %v16311_v48 = vld [vmem:[#allocation13_spill] sm:$0xff]  ;;  %v1544_v36 = vrot.slane %v331_v61, 7  ;;  %v16324_v61 = vld [vmem:[#allocation71_spill] sm:$0xff] }
  0xc8   : > { %16305 = vst [vmem:[#allocation113_spill] sm:$0xff] %v10319_v56  ;;  %7493 = vmatprep.subr.bf16.mxu0 %v16289_v4  ;;  %v8203_v46 = vpack.i.bf16 %v16312_v42, %v16311_v48  ;;  %7287 = vmatmul.mubr.msk.f32.gmra.mrb[2].mxu1 %vm1316_vm3, %v16316_v43  ;;  %v16323_v43 = vld [vmem:[#allocation45_spill] sm:$0xff]  ;;  %v16343_v56 = vrot.slane %v9995_v17, 1  ;;  %v10533_v42 = vld [vmem:[%s9955_s22 + $0x98] sm:$0xff]  ;;  %v16379_v48 = vld [vmem:[#allocation79_spill] sm:$0xff] }
  0xc9   : > { %v10324_v30 = vpop.permute.xlu0 %7904  ;;  %8199 = vrot.lane.b32.xlu1 %v8198_v26, %s9277_s23  ;;  %v10385_v11 = vsel %vm393_vm0, 0.0, %v1544_v36  ;;  %v16391_v41 = vrot.slane %v10533_v42, 7 }
  0xca   : > { %16307 = vst [vmem:[#allocation114_spill] sm:$0xff] %v10324_v30 }
  0xcb   : > { %8194 = vrot.lane.b32.xlu0 %v8193_v55, %s9276_s19  ;;  %v10339_v26 = vpop.permute.xlu1 %7919  ;;  %7495 = vmatpush1.bf16.msra.mxu0 %v7494_v32  ;;  %v7497_v55 = vpack.c.bf16 %v2663_v25, %v2662_v1  ;;  %v16320_v32 = vld [vmem:[#allocation68_spill] sm:$0xff]  ;;  %v16322_v25 = vld [vmem:[#allocation35_spill] sm:$0xff] }
  0xcc   : > { %16310 = vst [vmem:[#allocation115_spill] sm:$0xff] %v10339_v26  ;;  %7496 = vmatprep.subr.bf16.mxu0 %v16289_v4  ;;  %v10364_v26 = vld [vmem:[%s9955_s22 + $0x38] sm:$0xff]  ;;  %7289 = vmatprep.mubr.msk.f32.mxu1 %vm1316_vm3, %v16320_v32  ;;  %v8228_v47 = vpack.i.bf16 %v16323_v43, %v16322_v25  ;;  %v16326_v32 = vld [vmem:[#allocation37_spill] sm:$0xff]  ;;  %v10382_v43 = vsel %vm393_vm0, %v1544_v36, %v1545_v29  ;;  %v1703_v36 = vrot.slane %v10385_v11, 1 }
  0xcd   : > { %v10347_v8 = vpop.permute.xlu0 %7914  ;;  %8209 = vrot.lane.b32.xlu1 %v8208_v2, %s9277_s23  ;;  %v8213_v2 = vpack.i.bf16 %v16319_v52, %v16318_v37  ;;  %7290 = vmatmul.mubr.msk.f32.gmra.mrb[4].mxu1 %vm1316_vm3, %v16324_v61  ;;  %v16331_v61 = vld [vmem:[#allocation52_spill] sm:$0xff]  ;;  %v16353_v52 = vld [vmem:[#allocation66_spill] sm:$0xff]  ;;  %v16372_v5 = vrot.slane %v10364_v26, 7 }
  0xce   : > { %16313 = vst [vmem:[#allocation116_spill] sm:$0xff] %v10347_v8 }
  0xcf   : > { %8204 = vrot.lane.b32.xlu0 %v8203_v46, %s9277_s23  ;;  %v10359_v7 = vpop.permute.xlu1 %7929  ;;  %v1547_v46 = vrot.slane %v333_v3, 7  ;;  %7498 = vmatpush1.bf16.msra.mxu0 %v7497_v55  ;;  %v713_v3 = vrot.slane %v10106_v21, 1 }
  0xd0   : > { %16317 = vst [vmem:[#allocation67_spill] sm:$0xff] %v10359_v7  ;;  %v1550_v7 = vrot.slane %v335_v51, 7  ;;  %v16328_v51 = vld [vmem:[#allocation72_spill] sm:$0xff] }
  0xd1   : > { %v10368_v1 = vpop.permute.xlu0 %7924  ;;  %8219 = vrot.lane.b32.xlu1 %v8218_v31, %s9277_s23  ;;  %7292 = vmatprep.mubr.msk.f32.mxu1 %vm1316_vm3, %v16328_v51  ;;  %v16334_v51 = vrot.slane %v10364_v26, 7  ;;  %v1566_v26 = vrot.slane %v346_v16, 7 }
  0xd2   : > { %16321 = vst [vmem:[#allocation68_spill] sm:$0xff] %v10368_v1  ;;  %v16327_v1 = vld [vmem:[#allocation34_spill] sm:$0xff]  ;;  %v10399_v25 = vsel %vm393_vm0, 0.0, %v1550_v7 }
  0xd3   : > { %8214 = vrot.lane.b32.xlu0 %v8213_v2, %s9277_s23  ;;  %v10377_v50 = vpop.permute.xlu1 %7939  ;;  %v8223_v31 = vpack.i.bf16 %v16327_v1, %v16326_v32  ;;  %v16330_v2 = vld [vmem:[#allocation43_spill] sm:$0xff]  ;;  %16333 = vst [vmem:[#allocation118_spill] sm:$0xff] %v10399_v25  ;;  %v1704_v1 = vrot.slane %v10382_v43, 1  ;;  %v10406_v21 = vsel %vm393_vm0, %v1550_v7, %v16334_v51  ;;  %v16339_v32 = vld [vmem:[#allocation42_spill] sm:$0xff] }
  0xd4   : > { %16325 = vst [vmem:[#allocation71_spill] sm:$0xff] %v10377_v50  ;;  %v8238_v0 = vpack.i.bf16 %v16331_v61, %v16330_v2  ;;  %v10396_v50 = vsel %vm393_vm0, %v1547_v46, %v1548_v63  ;;  %16335 = vst [vmem:[#allocation119_spill] sm:$0xff] %v10406_v21  ;;  %v338_v61 = vld [vmem:[%s9955_s22 + $0x48] sm:$0xff]  ;;  %v16336_v2 = vld [vmem:[#allocation69_spill] sm:$0xff]  ;;  %v8233_v62 = vpack.i.bf16 %v16339_v32, %v16338_v38  ;;  %v10437_v32 = vsel %vm393_vm0, 0.0, %v1547_v46 }
  0xd5   : > { %v10390_v55 = vpop.permute.xlu0 %7934  ;;  %8229 = vrot.lane.b32.xlu1 %v8228_v47, %s9277_s23  ;;  %16332 = vst [vmem:[#allocation117_spill] sm:$0xff] %v10396_v50  ;;  %v10409_v47 = vsel %vm393_vm0, %v1548_v63, 0.0  ;;  %7293 = vmatmul.mubr.msk.f32.gmra.mrb[6].mxu1 %vm1316_vm3, %v16336_v2  ;;  %v16341_v7 = vld [vmem:[#allocation62_spill] sm:$0xff]  ;;  %v10432_v2 = vsel %vm552_vm1, %v16343_v56, %v713_v3  ;;  %16345 = vst [vmem:[#allocation120_spill] sm:$0xff] %v10437_v32  ;;  %v339_v38 = vld [vmem:[%s9955_s22 + $0x50] sm:$0xff]  ;;  %v10452_v49 = vsel %vm552_vm1, %v1703_v36, %v1704_v1 }
  0xd6   : > { %16329 = vst [vmem:[#allocation72_spill] sm:$0xff] %v10390_v55  ;;  %v10412_v55 = vld [vmem:[%s9955_s22 + $0x40] sm:$0xff]  ;;  %v8248_v51 = vpack.i.bf16 %v16341_v7, %v16340_v40  ;;  %v16342_v63 = vld [vmem:[#allocation70_spill] sm:$0xff]  ;;  %v10441_v7 = vld [vmem:[%s9955_s22 + $0x58] sm:$0xff]  ;;  %v1711_v17 = vrot.slane %v10409_v47, 1  ;;  %v1556_v30 = vrot.slane %v339_v38, 7 }
  0xd7   : > { %8224 = vrot.lane.b32.xlu0 %v8223_v31, %s9277_s23  ;;  %v10418_v8 = vpop.permute.xlu1 %7949  ;;  %7295 = vmatprep.mubr.msk.f32.mxu1 %vm1316_vm3, %v16342_v63  ;;  %16344 = vst [vmem:[#allocation70_spill] sm:$0xff] %v10432_v2  ;;  %v1709_v31 = vrot.slane %v10396_v50, 1  ;;  %v1553_v3 = vrot.slane %v10412_v55, 7  ;;  %v1554_v63 = vrot.slane %v338_v61, 7  ;;  %v16347_v40 = vld [vmem:[#allocation53_spill] sm:$0xff]  ;;  %16349 = vst [vmem:[#allocation122_spill] sm:$0xff] %v10452_v49 }
  0xd8   : > { %16337 = vst [vmem:[#allocation69_spill] sm:$0xff] %v10418_v8  ;;  %v1713_v8 = vrot.slane %v10399_v25, 1  ;;  %v8243_v46 = vpack.i.bf16 %v16348_v60, %v16347_v40  ;;  %v16352_v56 = vld [vmem:[#allocation58_spill] sm:$0xff]  ;;  %v1708_v61 = vrot.slane %v10437_v32, 1  ;;  %v1557_v36 = vrot.slane %v10441_v7, 7  ;;  %v341_v60 = vld [vmem:[%s9955_s22 + $0x60] sm:$0xff] }
  0xd9   : > { %v10443_v29 = vpop.permute.xlu0 %7944  ;;  %8239 = vrot.lane.b32.xlu1 %v8238_v0, %s9277_s23  ;;  %7296 = vmatmul.mubr.msk.f32.gmra.mrb[8].mxu1 %vm1316_vm3, %v16350_v39  ;;  %v8258_v55 = vpack.i.bf16 %v16353_v52, %v16352_v56  ;;  %v342_v40 = vld [vmem:[%s9955_s22 + $0x68] sm:$0xff]  ;;  %v16356_v39 = vld [vmem:[#allocation59_spill] sm:$0xff]  ;;  %v16358_v52 = vld [vmem:[#allocation64_spill] sm:$0xff]  ;;  %v10491_v56 = vsel %vm393_vm0, %v1553_v3, %v1554_v63 }
  0xda   : > { %16346 = vst [vmem:[#allocation121_spill] sm:$0xff] %v10443_v29  ;;  %v1706_v29 = vrot.slane %v10425_v59, 1  ;;  %7298 = vmatprep.mubr.msk.f32.mxu1 %vm1316_vm3, %v16354_v33  ;;  %v8253_v37 = vpack.i.bf16 %v16356_v39, %v16355_v45  ;;  %v16359_v38 = vld [vmem:[#allocation5_spill] sm:$0xff]  ;;  %v343_v7 = vld [vmem:[%s9955_s22 + $0x70] sm:$0xff]  ;;  %v10483_v39 = vsel %vm552_vm1, %v1709_v31, %v1711_v17  ;;  %16364 = vst [vmem:[#allocation125_spill] sm:$0xff] %v10491_v56  ;;  %v1559_v33 = vrot.slane %v341_v60, 7 }
  0xdb   : > { %8234 = vrot.lane.b32.xlu0 %v8233_v62, %s9277_s23  ;;  %v10458_v0 = vpop.permute.xlu1 %7959  ;;  %v8268_v62 = vpack.i.bf16 %v10432_v2, %v10017_v22  ;;  %16361 = vst [vmem:[#allocation123_spill] sm:$0xff] %v10483_v39  ;;  %v16362_v2 = vrot.slane %v10406_v21, 1  ;;  %v1560_v17 = vrot.slane %v342_v40, 7  ;;  %v10503_v45 = vld [vmem:[%s9955_s22 + $0x80] sm:$0xff]  ;;  %v10518_v60 = vsel %vm393_vm0, 0.0, %v1556_v30 }
  0xdc   : > { %16351 = vst [vmem:[#allocation75_spill] sm:$0xff] %v10458_v0  ;;  %16370 = vst [vmem:[#allocation129_spill] sm:$0xff] %v10518_v60  ;;  %v1562_v40 = vrot.slane %v343_v7, 7  ;;  %v10570_v28 = vsel %vm393_vm0, 0.0, %v1559_v33 }
  0xdd   : > { %v10477_v24 = vpop.permute.xlu0 %7954  ;;  %8249 = vrot.lane.b32.xlu1 %v8248_v51, %s9277_s23  ;;  %v10488_v22 = vsel %vm552_vm1, %v1713_v8, %v16362_v2  ;;  %v10500_v51 = vsel %vm393_vm0, %v1554_v63, 0.0  ;;  %v16366_v8 = vld [vmem:[#allocation73_spill] sm:$0xff]  ;;  %v16371_v63 = vld [vmem:[#allocation74_spill] sm:$0xff]  ;;  %v10548_v12 = vsel %vm393_vm0, %v1559_v33, %v1560_v17  ;;  %16381 = vst [vmem:[#allocation135_spill] sm:$0xff] %v10570_v28  ;;  %v1728_v0 = vrot.slane %v10570_v28, 1 }
  0xde   : > { %16360 = vst [vmem:[#allocation76_spill] sm:$0xff] %v10477_v24  ;;  %16363 = vst [vmem:[#allocation124_spill] sm:$0xff] %v10488_v22  ;;  %v10497_v24 = vsel %vm552_vm1, %v1704_v1, %v1706_v29  ;;  %7299 = vmatmul.mubr.msk.f32.gmra.mrb[10].mxu1 %vm1316_vm3, %v16366_v8  ;;  %v10512_v1 = vsel %vm552_vm1, %v1708_v61, %v1709_v31  ;;  %v10515_v29 = vsel %vm393_vm0, %v1556_v30, %v1557_v36  ;;  %v10590_v33 = vld [vmem:[%s9955_s22 + $0xa0] sm:$0xff] }
  0xdf   : > { %16365 = vst [vmem:[#allocation126_spill] sm:$0xff] %v10497_v24  ;;  %8244 = vrot.lane.b32.xlu0 %v8243_v46, %s9277_s23  ;;  %v10509_v2 = vpop.permute.xlu1 %7969  ;;  %16368 = vst [vmem:[#allocation127_spill] sm:$0xff] %v10512_v1  ;;  %7301 = vmatprep.mubr.msk.f32.mxu1 %vm1316_vm3, %v16371_v63  ;;  %v10528_v31 = vsel %vm393_vm0, %v16372_v5, 0.0  ;;  %v1563_v61 = vrot.slane %v10494_v9, 7  ;;  %v1721_v7 = vrot.slane %v10500_v51, 1  ;;  %v10540_v63 = vsel %vm393_vm0, 0.0, %v1553_v3 }
  0xe0   : > { %16367 = vst [vmem:[#allocation73_spill] sm:$0xff] %v10509_v2  ;;  %16369 = vst [vmem:[#allocation128_spill] sm:$0xff] %v10515_v29  ;;  %v1565_v8 = vrot.slane %v10503_v45, 7  ;;  %v1723_v9 = vrot.slane %v10518_v60, 1  ;;  %v1724_v46 = vrot.slane %v10515_v29, 1  ;;  %v10556_v16 = vsel %vm393_vm0, 0.0, %v1562_v40 }
  0xe1   : > { %v10535_v30 = vpop.permute.xlu0 %7964  ;;  %8259 = vrot.lane.b32.xlu1 %v8258_v55, %s9277_s23  ;;  %16374 = vst [vmem:[#allocation130_spill] sm:$0xff] %v10540_v63  ;;  %16375 = vst [vmem:[#allocation131_spill] sm:$0xff] %v10548_v12  ;;  %v10559_v45 = vsel %vm393_vm0, %v1560_v17, 0.0  ;;  %v1568_v55 = vrot.slane %v347_v15, 7  ;;  %v16383_v15 = vrot.slane %v10491_v56, 1  ;;  %v10581_v5 = vsel %vm393_vm0, %v1557_v36, 0.0 }
  0xe2   : > { %16373 = vst [vmem:[#allocation74_spill] sm:$0xff] %v10535_v30  ;;  %7302 = vmatmul.mubr.msk.f32.gmra.mrb[12].mxu1 %vm1316_vm3, %v9864_v44  ;;  %16377 = vst [vmem:[#allocation133_spill] sm:$0xff] %v10556_v16  ;;  %v1716_v44 = vrot.slane %v10528_v31, 1  ;;  %v10584_v57 = vsel %vm393_vm0, %v1565_v8, %v1566_v26  ;;  %v1731_v53 = vrot.slane %v10559_v45, 1  ;;  %v351_v36 = vld [vmem:[%s9955_s22 + $0xb0] sm:$0xff]  ;;  %v10601_v2 = vld [vmem:[%s9955_s22 + $0xb8] sm:$0xff] }
  0xe3   : > { %8254 = vrot.lane.b32.xlu0 %v8253_v37, %s9277_s23  ;;  %v10553_v3 = vpop.permute.xlu1 %7979  ;;  %16378 = vst [vmem:[#allocation134_spill] sm:$0xff] %v10559_v45  ;;  %7304 = vmatprep.mubr.msk.f32.mxu1 %vm1316_vm3, %v16379_v48  ;;  %v1718_v37 = vrot.slane %v10540_v63, 1  ;;  %v10578_v48 = vsel %vm552_vm1, %v16383_v15, %v1721_v7  ;;  %16385 = vst [vmem:[#allocation138_spill] sm:$0xff] %v10584_v57  ;;  %v1733_v7 = vrot.slane %v10556_v16, 1  ;;  %v350_v15 = vld [vmem:[%s9955_s22 + $0xa8] sm:$0xff]  ;;  %v10619_v54 = vsel %vm393_vm0, 0.0, %v1568_v55 }
  0xe4   : > { %16376 = vst [vmem:[#allocation132_spill] sm:$0xff] %v10553_v3  ;;  %v10567_v3 = vsel %vm393_vm0, %v1562_v40, %v1563_v61  ;;  %16384 = vst [vmem:[#allocation137_spill] sm:$0xff] %v10578_v48  ;;  %v10587_v40 = vsel %vm393_vm0, %v1566_v26, 0.0  ;;  %v16389_v26 = vpack.i.bf16 %v16358_v52, %v16357_v20  ;;  %v10616_v10 = vsel %vm393_vm0, %v1568_v55, %v16391_v41 }
  0xe5   : > { %16380 = vst [vmem:[#allocation79_spill] sm:$0xff] %v10567_v3  ;;  %v10572_v17 = vpop.permute.xlu0 %7974  ;;  %8269 = vrot.lane.b32.xlu1 %v8268_v62, %s9277_s23  ;;  %16386 = vst [vmem:[#allocation139_spill] sm:$0xff] %v10587_v40  ;;  %v1729_v62 = vrot.slane %v10548_v12, 1  ;;  %v1726_v52 = vrot.slane %v10581_v5, 1  ;;  %v1741_v20 = vrot.slane %v10587_v40, 1  ;;  %v10627_v30 = vsel %vm393_vm0, %v1563_v61, 0.0 }
  0xe6   : > { %16382 = vst [vmem:[#allocation136_spill] sm:$0xff] %v10572_v17  ;;  %v10593_v17 = vsel %vm552_vm1, %v1723_v9, %v1724_v46  ;;  %7305 = vmatmul.mubr.msk.f32.gmra.mrb[14].mxu1 %vm1316_vm3, %v16388_v58  ;;  %16392 = vst [vmem:[#allocation141_spill] sm:$0xff] %v10616_v10  ;;  %v16394_v58 = vld [vmem:[#allocation78_spill] sm:$0xff]  ;;  %v16396_v41 = vpack.i.bf16 %v10452_v49, %v10026_v19  ;;  %v1571_v55 = vrot.slane %v10590_v33, 7  ;;  %v1574_v4 = vrot.slane %v351_v36, 7 }
  0xe7   : > { %16387 = vst [vmem:[#allocation140_spill] sm:$0xff] %v10593_v17  ;;  %8264 = vrot.lane.b32.xlu0 %v16389_v26, %s9277_s23  ;;  %v10609_v9 = vpop.permute.xlu1 %7989  ;;  %16393 = vst [vmem:[#allocation142_spill] sm:$0xff] %v10619_v54  ;;  %7307 = vmatprep.mubr.msk.f32.mxu1 %vm1316_vm3, %v16394_v58  ;;  %v1739_v26 = vrot.slane %v10584_v57, 1  ;;  %v1572_v58 = vrot.slane %v350_v15, 7  ;;  %v8298_v40 = vpack.i.bf16 %v10593_v17, %v10578_v48  ;;  %v16397_v61 = vrot.slane %v10406_v21, 1  ;;  %v16440_v49 = vld [vmem:[#allocation82_spill] sm:$0xff] }
  0xe8   : > { %16390 = vst [vmem:[#allocation77_spill] sm:$0xff] %v10609_v9  ;;  %v1743_v45 = vrot.slane %v10619_v54, 1  ;;  %v16399_v33 = vpack.i.bf16 %v10111_v35, %v16359_v38  ;;  %v16401_v36 = vrot.slane %v10491_v56, 1  ;;  %v353_v38 = vld [vmem:[%s9955_s22 + $0xc0] sm:$0xff]  ;;  %v10675_v19 = vsel %vm552_vm1, %v1724_v46, %v1726_v52 }
  0xe9   : > { %v10629_v9 = vpop.permute.xlu0 %7984  ;;  %8279 = vrot.lane.b32.xlu1 %v16396_v41, %s9275_s18  ;;  %v16404_v41 = vrot.slane %v10567_v3, 1  ;;  %16407 = vst [vmem:[#allocation149_spill] sm:$0xff] %v10675_v19  ;;  %v10695_v52 = vsel %vm393_vm0, %v1571_v55, %v1572_v58  ;;  %v10703_v46 = vsel %vm393_vm0, 0.0, %v1574_v4  ;;  %v16416_v48 = vrot.slane %v10616_v10, 1 }
  0xea   : > { %16395 = vst [vmem:[#allocation78_spill] sm:$0xff] %v10629_v9  ;;  %v10642_v9 = vsel %vm552_vm1, %v16397_v61, %v1716_v44  ;;  %7308 = vmatmul.mubr.msk.f32.gmra.mrb[16].mxu1 %vm1316_vm3, %v9894_v34  ;;  %v10657_v44 = vsel %vm552_vm1, %v1718_v37, %v16401_v36  ;;  %v10660_v61 = vsel %vm552_vm1, %v1729_v62, %v1731_v53  ;;  %v10668_v34 = vsel %vm393_vm0, 0.0, %v1565_v8  ;;  %v10686_v36 = vld [vmem:[%s9955_s22 + $0xd8] sm:$0xff] }
  0xeb   : > { %16398 = vst [vmem:[#allocation143_spill] sm:$0xff] %v10642_v9  ;;  %8274 = vrot.lane.b32.xlu0 %v16399_v33, %s9277_s23  ;;  %v10652_v15 = vpop.permute.xlu1 %7999  ;;  %16402 = vst [vmem:[#allocation145_spill] sm:$0xff] %v10657_v44  ;;  %v10665_v57 = vsel %vm552_vm1, %v1733_v7, %v16404_v41  ;;  %v354_v33 = vld [vmem:[%s9955_s22 + $0xc8] sm:$0xff]  ;;  %7310 = vmatprep.mubr.msk.f32.mxu1 %vm1316_vm3, %v9897_v27  ;;  %v10678_v37 = vsel %vm552_vm1, %v1728_v0, %v1729_v62  ;;  %v1736_v7 = vrot.slane %v10627_v30, 1  ;;  %v355_v41 = vld [vmem:[%s9955_s22 + $0xd0] sm:$0xff] }
  0xec   : > { %16400 = vst [vmem:[#allocation144_spill] sm:$0xff] %v10652_v15  ;;  %16403 = vst [vmem:[#allocation146_spill] sm:$0xff] %v10660_v61  ;;  %v10681_v53 = vsel %vm552_vm1, %v1739_v26, %v1741_v20  ;;  %v16411_v27 = vpack.i.bf16 %v10488_v22, %v10483_v39  ;;  %v16413_v0 = vrot.slane %v10601_v2, 7  ;;  %v10706_v62 = vsel %vm393_vm0, %v1572_v58, 0.0  ;;  %v16418_v15 = vld [vmem:[#allocation80_spill] sm:$0xff] }
  0xed   : > { %16405 = vst [vmem:[#allocation147_spill] sm:$0xff] %v10665_v57  ;;  %16406 = vst [vmem:[#allocation148_spill] sm:$0xff] %v10668_v34  ;;  %v10688_v8 = vpop.permute.xlu0 %7994  ;;  %v10711_v17 = vsel %vm552_vm1, %v1743_v45, %v16416_v48  ;;  %v1577_v39 = vrot.slane %v353_v38, 7  ;;  %v1578_v22 = vrot.slane %v354_v33, 7  ;;  %v8293_v45 = vpack.i.bf16 %v10657_v44, %v10642_v9  ;;  %v16421_v33 = vld [vmem:[#allocation81_spill] sm:$0xff] }
  0xee   : > { %16408 = vst [vmem:[#allocation150_spill] sm:$0xff] %v10678_v37  ;;  %16409 = vst [vmem:[#allocation151_spill] sm:$0xff] %v10681_v53  ;;  %8289 = vrot.lane.b32.xlu1 %v16411_v27, %s9275_s18  ;;  %v10700_v20 = vsel %vm393_vm0, %v1574_v4, %v16413_v0  ;;  %v1738_v27 = vrot.slane %v10668_v34, 1  ;;  %7311 = vmatmul.mubr.msk.f32.gmra.mrb[18].mxu1 %vm1316_vm3, %v16418_v15  ;;  %v16419_v4 = vpack.i.bf16 %v10512_v1, %v10497_v24  ;;  %v357_v1 = vld [vmem:[%s9955_s22 + $0xe0] sm:$0xff] }
  0xef   : > { %16410 = vst [vmem:[#allocation152_spill] sm:$0xff] %v10688_v8  ;;  %16412 = vst [vmem:[#allocation153_spill] sm:$0xff] %v10695_v52  ;;  %v10720_v58 = vpop.permute.xlu1 %8009  ;;  %v8308_v48 = vpack.i.bf16 %v10665_v57, %v10660_v61  ;;  %v1580_v0 = vrot.slane %v355_v41, 7  ;;  %v1581_v38 = vrot.slane %v10686_v36, 7  ;;  %7313 = vmatprep.mubr.msk.f32.mxu1 %vm1316_vm3, %v16421_v33  ;;  %v1749_v15 = vrot.slane %v10695_v52, 1 }
  0xf0   : > { %16414 = vst [vmem:[#allocation154_spill] sm:$0xff] %v10700_v20  ;;  %16415 = vst [vmem:[#allocation155_spill] sm:$0xff] %v10703_v46  ;;  %8284 = vrot.lane.b32.xlu0 %v16419_v4, %s9275_s18  ;;  %v1751_v8 = vrot.slane %v10706_v62, 1  ;;  %v1753_v4 = vrot.slane %v10703_v46, 1  ;;  %v1754_v24 = vrot.slane %v10700_v20, 1  ;;  %v8303_v41 = vpack.i.bf16 %v10678_v37, %v10675_v19 }
  0xf1   : > { %16417 = vst [vmem:[#allocation156_spill] sm:$0xff] %v10711_v17  ;;  %16420 = vst [vmem:[#allocation80_spill] sm:$0xff] %v10720_v58  ;;  %v358_v58 = vld [vmem:[%s9955_s22 + $0xe8] sm:$0xff]  ;;  %v10735_v9 = vpop.permute.xlu0 %8004  ;;  %v8318_v36 = vpack.i.bf16 %v10711_v17, %v10681_v53  ;;  %v10743_v33 = vsel %vm393_vm0, 0.0, %v1571_v55  ;;  %v16424_v61 = vrot.slane %v10533_v42, 7  ;;  %v16425_v44 = vrot.slane %v10567_v3, 1 }
  0xf2   : > { %16422 = vst [vmem:[#allocation81_spill] sm:$0xff] %v10735_v9  ;;  %8299 = vrot.lane.b32.xlu1 %v8298_v40, %s9275_s18  ;;  %16423 = vst [vmem:[#allocation157_spill] sm:$0xff] %v10743_v33  ;;  %v10756_v40 = vsel %vm552_vm1, %v1738_v27, %v1739_v26  ;;  %v10759_v19 = vsel %vm393_vm0, %v1577_v39, %v1578_v22  ;;  %v10762_v53 = vsel %vm393_vm0, %v1578_v22, 0.0  ;;  %v16430_v55 = vld [vmem:[#allocation84_spill] sm:$0xff]  ;;  %v1583_v26 = vrot.slane %v357_v1, 7  ;;  %v16434_v27 = vld [vmem:[#allocation85_spill] sm:$0xff] }
  0xf3   : > { %v10748_v57 = vsel %vm393_vm0, %v16424_v61, 0.0  ;;  %v10753_v9 = vsel %vm552_vm1, %v16425_v44, %v1736_v7  ;;  %16427 = vst [vmem:[#allocation159_spill] sm:$0xff] %v10756_v40  ;;  %16428 = vst [vmem:[#allocation160_spill] sm:$0xff] %v10759_v19  ;;  %7314 = vmatmul.mubr.msk.f32.gmra.mrb[20].mxu1 %vm1316_vm3, %v16430_v55  ;;  %v10767_v42 = vpop.permute.xlu1 %8019  ;;  %v10770_v61 = vsel %vm393_vm0, %v1580_v0, %v1581_v38  ;;  %v10773_v44 = vsel %vm393_vm0, 0.0, %v1580_v0 }
  0xf4   : > { %16426 = vst [vmem:[#allocation158_spill] sm:$0xff] %v10753_v9  ;;  %16429 = vst [vmem:[#allocation161_spill] sm:$0xff] %v10762_v53  ;;  %8294 = vrot.lane.b32.xlu0 %v8293_v45, %s9275_s18  ;;  %v1584_v7 = vrot.slane %v358_v58, 7  ;;  %7316 = vmatprep.mubr.msk.f32.mxu1 %vm1316_vm3, %v16434_v27  ;;  %v10778_v22 = vsel %vm552_vm1, %v1749_v15, %v1751_v8  ;;  %v10781_v55 = vsel %vm552_vm1, %v1753_v4, %v1754_v24 }
  0xf5   : > { %16431 = vst [vmem:[#allocation84_spill] sm:$0xff] %v10767_v42  ;;  %16432 = vst [vmem:[#allocation162_spill] sm:$0xff] %v10770_v61  ;;  %v1746_v45 = vrot.slane %v10748_v57, 1  ;;  %v1748_v17 = vrot.slane %v10743_v33, 1  ;;  %v10785_v37 = vpop.permute.xlu0 %8014  ;;  %v1759_v1 = vrot.slane %v10759_v19, 1  ;;  %v1761_v58 = vrot.slane %v10762_v53, 1 }
  0xf6   : > { %16433 = vst [vmem:[#allocation163_spill] sm:$0xff] %v10773_v44  ;;  %16435 = vst [vmem:[#allocation85_spill] sm:$0xff] %v10778_v22  ;;  %8309 = vrot.lane.b32.xlu1 %v8308_v48, %s9275_s18  ;;  %v10791_v0 = vsel %vm393_vm0, 0.0, %v1577_v39  ;;  %v16439_v8 = vrot.slane %v10601_v2, 7  ;;  %v1763_v27 = vrot.slane %v10773_v44, 1  ;;  %v1764_v42 = vrot.slane %v10770_v61, 1 }
  0xf7   : > { %16436 = vst [vmem:[#allocation164_spill] sm:$0xff] %v10781_v55  ;;  %16437 = vst [vmem:[#allocation165_spill] sm:$0xff] %v10785_v37  ;;  %7317 = vmatmul.mubr.msk.f32.gmra.mrb[22].mxu1 %vm1316_vm3, %v16440_v49  ;;  %v10803_v48 = vpop.permute.xlu1 %8029  ;;  %v8313_v39 = vpack.i.bf16 %v10756_v40, %v10753_v9  ;;  %v8328_v2 = vpack.i.bf16 %v10781_v55, %v10778_v22  ;;  %v10813_v37 = vsel %vm393_vm0, %v1584_v7, 0.0  ;;  %v16444_v53 = vld [vmem:[#allocation83_spill] sm:$0xff]  ;;  %v16445_v49 = vrot.slane %v10616_v10, 1 }
  0xf8   : > { %16438 = vst [vmem:[#allocation166_spill] sm:$0xff] %v10791_v0  ;;  %v10796_v4 = vsel %vm393_vm0, %v16439_v8, 0.0  ;;  %8304 = vrot.lane.b32.xlu0 %v8303_v41, %s9275_s18  ;;  %16441 = vst [vmem:[#allocation82_spill] sm:$0xff] %v10803_v48  ;;  %v10810_v8 = vsel %vm393_vm0, %v1583_v26, %v1584_v7  ;;  %7319 = vmatprep.mubr.msk.f32.mxu1 %vm1316_vm3, %v16444_v53  ;;  %v10823_v48 = vsel %vm552_vm1, %v1748_v17, %v1749_v15 }
  0xf9   : > { %16442 = vst [vmem:[#allocation167_spill] sm:$0xff] %v10810_v8  ;;  %16443 = vst [vmem:[#allocation168_spill] sm:$0xff] %v10813_v37  ;;  %v10820_v41 = vsel %vm552_vm1, %v16445_v49, %v1746_v45  ;;  %v1756_v9 = vrot.slane %v10796_v4, 1  ;;  %v1758_v22 = vrot.slane %v10791_v0, 1  ;;  %v10827_v55 = vpop.permute.xlu0 %8024  ;;  %v10831_v7 = vsel %vm552_vm1, %v1759_v1, %v1761_v58 }
  0xfa   : > { %16446 = vst [vmem:[#allocation83_spill] sm:$0xff] %v10820_v41  ;;  %16447 = vst [vmem:[#allocation169_spill] sm:$0xff] %v10823_v48  ;;  %8319 = vrot.lane.b32.xlu1 %v8318_v36, %s9275_s18  ;;  %v1773_v53 = vrot.slane %v10111_v35, 2  ;;  %v10835_v40 = vsel %vm393_vm0, 0.0, %v1583_v26  ;;  %v10838_v45 = vsel %vm393_vm0, %v1581_v38, 0.0  ;;  %v10841_v17 = vsel %vm552_vm1, %v1763_v27, %v1764_v42  ;;  %v16454_v26 = vld [vmem:[#allocation87_spill] sm:$0xff] }
  0xfb   : > { %16448 = vst [vmem:[#allocation170_spill] sm:$0xff] %v10827_v55  ;;  %16449 = vst [vmem:[#allocation171_spill] sm:$0xff] %v10831_v7  ;;  %v1769_v15 = vrot.slane %v10810_v8, 1  ;;  %v1771_v49 = vrot.slane %v10813_v37, 1  ;;  %v1774_v36 = vrot.slane %v10003_v18, 2  ;;  %v16452_v55 = vld [vmem:[#allocation86_spill] sm:$0xff]  ;;  %v10849_v58 = vpop.permute.xlu1 %8039  ;;  %v8323_v38 = vpack.i.bf16 %v10823_v48, %v10820_v41 }
  0xfc   : > { %16450 = vst [vmem:[#allocation172_spill] sm:$0xff] %v10835_v40  ;;  %16451 = vst [vmem:[#allocation173_spill] sm:$0xff] %v10841_v17  ;;  %7320 = vmatmul.mubr.msk.f32.gmra.mrb[24].mxu1 %vm1316_vm3, %v16452_v55  ;;  %8314 = vrot.lane.b32.xlu0 %v8313_v39, %s9275_s18  ;;  %v10856_v27 = vsel %vm552_vm1, %v1754_v24, %v1756_v9  ;;  %v10859_v35 = vsel %vm552_vm1, %v1758_v22, %v1759_v1  ;;  %v1766_v18 = vrot.slane %v10838_v45, 1 }
  0xfd   : > { %16453 = vst [vmem:[#allocation86_spill] sm:$0xff] %v10849_v58  ;;  %7322 = vmatprep.mubr.msk.f32.mxu1 %vm1316_vm3, %v16454_v26  ;;  %16455 = vst [vmem:[#allocation87_spill] sm:$0xff] %v10856_v27  ;;  %v1768_v55 = vrot.slane %v10835_v40, 1  ;;  %v1781_v39 = vrot.slane %v10425_v59, 2  ;;  %v10864_v37 = vpop.permute.xlu0 %8034  ;;  %v8338_v58 = vpack.i.bf16 %v10841_v17, %v10831_v7  ;;  %v10870_v26 = vsel %vm552_vm1, %v1769_v15, %v1771_v49 }
  0xfe   : > { %16456 = vst [vmem:[#allocation174_spill] sm:$0xff] %v10859_v35  ;;  %16457 = vst [vmem:[#allocation175_spill] sm:$0xff] %v10864_v37  ;;  %8329 = vrot.lane.b32.xlu1 %v8328_v2, %s9275_s18  ;;  %v1775_v24 = vsel %vm630_vm2, %v1773_v53, %v1774_v36  ;;  %v1778_v9 = vrot.slane %v10385_v11, 2  ;;  %v1779_v22 = vrot.slane %v10382_v43, 2  ;;  %v8333_v1 = vpack.i.bf16 %v10859_v35, %v10856_v27 }
  0xff   : > { %16458 = vst [vmem:[#allocation176_spill] sm:$0xff] %v10870_v26  ;;  %v10878_v59 = vpop.permute.xlu1 %8049  ;;  %v1776_v2 = vrot.slane %v10011_v13, 2  ;;  %v10886_v53 = vsel %vm552_vm1, %v1764_v42, %v1766_v18  ;;  %v10889_v49 = vsel %vm552_vm1, %v1768_v55, %v1769_v15  ;;  %v1789_v17 = vrot.slane %v10406_v21, 2 }
 0x100   : > { %7323 = vmatmul.mubr.msk.f32.gmra.mrb[26].mxu1 %vm1316_vm3, %v9936_v6  ;;  %8324 = vrot.lane.b32.xlu0 %v8323_v38, %s9275_s18  ;;  %16459 = vst [vmem:[#allocation177_spill] sm:$0xff] %v10886_v53  ;;  %16460 = vst [vmem:[#allocation178_spill] sm:$0xff] %v10889_v49  ;;  %v8348_v6 = vpack.i.bf16 %v1775_v24, %v10870_v26  ;;  %v1788_v38 = vrot.slane %v10399_v25, 2  ;;  %v10901_v13 = vsel %vm630_vm2, %v1779_v22, %v1781_v39 }
 0x101   : > { %7325 = vmatprep.mubr.msk.f32.mxu1 %vm1316_vm3, %v10160_v14  ;;  %v10891_v7 = vpop.permute.xlu0 %8044  ;;  %v10898_v14 = vsel %vm630_vm2, %v1778_v9, %v1779_v22  ;;  %v1791_v18 = vrot.slane %v10528_v31, 2  ;;  %v8343_v15 = vpack.i.bf16 %v10889_v49, %v10886_v53  ;;  %v1786_v55 = vrot.slane %v10409_v47, 2 }
 0x102   : > { %8339 = vrot.lane.b32.xlu1 %v8338_v58, %s9275_s18  ;;  %v16462_v58 = vld [vmem:[#allocation11_spill] sm:$0xff]  ;;  %v10915_v39 = vsel %vm630_vm2, %v1774_v36, %v1776_v2  ;;  %v1783_v31 = vrot.slane %v10437_v32, 2  ;;  %v1784_v9 = vrot.slane %v10396_v50, 2  ;;  %v8358_v22 = vpack.i.bf16 %v10901_v13, %v10898_v14 }
 0x103   : > { %v10907_v42 = vpop.permute.xlu1 %8059  ;;  %v10928_v26 = vsel %vm630_vm2, %v1789_v17, %v1791_v18  ;;  %v1798_v47 = vrot.slane %v10518_v60, 2  ;;  %v1799_v36 = vrot.slane %v10515_v29, 2  ;;  %v1801_v2 = vrot.slane %v10581_v5, 2 }
 0x104   : > { %7326 = vmatmul.mubr.msk.f32.gmra.mrb[28].mxu1 %vm1316_vm3, %v10143_v23  ;;  %8334 = vrot.lane.b32.xlu0 %v8333_v1, %s9275_s18  ;;  %16461 = vst [vmem:[#allocation179_spill] sm:$0xff] %v10907_v42  ;;  %v10925_v1 = vsel %vm630_vm2, %v1788_v38, %v1789_v17  ;;  %v8353_v53 = vpack.i.bf16 %v10915_v39, %v1775_v24  ;;  %v1793_v38 = vrot.slane %v10540_v63, 2  ;;  %v1794_v17 = vrot.slane %v10491_v56, 2 }
 0x105   : > { %7328 = vmatprep.mubr.msk.f32.mxu1 %vm1316_vm3, %v16462_v58  ;;  %v10919_v23 = vpop.permute.xlu0 %8054  ;;  %v10942_v18 = vsel %vm630_vm2, %v1783_v31, %v1784_v9  ;;  %v10945_v49 = vsel %vm630_vm2, %v1784_v9, %v1786_v55  ;;  %v1796_v5 = vrot.slane %v10500_v51, 2  ;;  %v1808_v24 = vrot.slane %v10556_v16, 2 }
 0x106   : > { %8349 = vrot.lane.b32.xlu1 %v8348_v6, %s9275_s18  ;;  %v10956_v35 = vsel %vm630_vm2, %v1798_v47, %v1799_v36  ;;  %v10959_v31 = vsel %vm630_vm2, %v1799_v36, %v1801_v2  ;;  %v1811_v55 = vrot.slane %v10627_v30, 2  ;;  %v8363_v9 = vpack.i.bf16 %v10945_v49, %v10942_v18  ;;  %v16470_v2 = vld [vmem:[#allocation134_spill] sm:$0xff] }
 0x107   : > { %v10936_v6 = vpop.permute.xlu1 %8069  ;;  %16465 = vst [vmem:[#allocation182_spill] sm:$0xff] %v10956_v35  ;;  %16466 = vst [vmem:[#allocation183_spill] sm:$0xff] %v10959_v31  ;;  %v10971_v37 = vsel %vm630_vm2, %v1794_v17, %v1796_v5  ;;  %v1803_v47 = vrot.slane %v10570_v28, 2  ;;  %v1804_v36 = vrot.slane %v10548_v12, 2  ;;  %v1806_v41 = vrot.slane %v16470_v2, 2 }
 0x108   : > { %7329 = vmatmul.mubr.msk.f32.gmra.mrb[30].mxu1 %vm1316_vm3, %v16462_v58  ;;  %8344 = vrot.lane.b32.xlu0 %v8343_v15, %s9275_s18  ;;  %16463 = vst [vmem:[#allocation180_spill] sm:$0xff] %v10936_v6  ;;  %v8368_v15 = vpack.i.bf16 %v10928_v26, %v10925_v1  ;;  %v1809_v58 = vrot.slane %v10567_v3, 2  ;;  %16469 = vst [vmem:[#allocation186_spill] sm:$0xff] %v10971_v37  ;;  %v1819_v5 = vrot.slane %v10616_v10, 2 }
 0x109   : > { %v10948_v27 = vpop.permute.xlu0 %8064 }
 0x10a   : > { %16464 = vst [vmem:[#allocation181_spill] sm:$0xff] %v10948_v27  ;;  %8359 = vrot.lane.b32.xlu1 %v8358_v22, %s9276_s19  ;;  %v10968_v22 = vsel %vm630_vm2, %v1793_v38, %v1794_v17  ;;  %v10982_v48 = vsel %vm630_vm2, %v1808_v24, %v1809_v58  ;;  %v10985_v38 = vsel %vm630_vm2, %v1809_v58, %v1811_v55  ;;  %v1818_v17 = vrot.slane %v10619_v54, 2  ;;  %v16475_v24 = vld [vmem:[#allocation138_spill] sm:$0xff]  ;;  %v16478_v27 = vld [vmem:[#allocation139_spill] sm:$0xff] }
 0x10b   : > { %v10963_v51 = vpop.permute.xlu1 %8079  ;;  %16468 = vst [vmem:[#allocation185_spill] sm:$0xff] %v10968_v22  ;;  %16472 = vst [vmem:[#allocation187_spill] sm:$0xff] %v10982_v48  ;;  %v1814_v6 = vrot.slane %v16475_v24, 2  ;;  %v10998_v58 = vsel %vm630_vm2, %v1803_v47, %v1804_v36  ;;  %v11001_v55 = vsel %vm630_vm2, %v1804_v36, %v1806_v41  ;;  %v1816_v42 = vrot.slane %v16478_v27, 2 }
 0x10c   : > { %8354 = vrot.lane.b32.xlu0 %v8353_v53, %s9276_s19  ;;  %16467 = vst [vmem:[#allocation184_spill] sm:$0xff] %v10963_v51  ;;  %v8378_v53 = vpack.i.bf16 %v10959_v31, %v10956_v35  ;;  %16473 = vst [vmem:[#allocation188_spill] sm:$0xff] %v10985_v38  ;;  %v1821_v51 = vrot.slane %v10748_v57, 2  ;;  %v1829_v31 = vrot.slane %v10700_v20, 2  ;;  %v1831_v41 = vrot.slane %v10796_v4, 2 }
 0x10d   : > { %v10976_v30 = vpop.permute.xlu0 %8074  ;;  %16476 = vst [vmem:[#allocation190_spill] sm:$0xff] %v10998_v58  ;;  %16477 = vst [vmem:[#allocation191_spill] sm:$0xff] %v11001_v55  ;;  %v8383_v36 = vpack.i.bf16 %v11001_v55, %v10998_v58 }
 0x10e   : > { %16471 = vst [vmem:[#allocation134_spill] sm:$0xff] %v10976_v30  ;;  %8369 = vrot.lane.b32.xlu1 %v8368_v15, %s9276_s19  ;;  %v8373_v15 = vpack.i.bf16 %v10971_v37, %v10968_v22  ;;  %v1813_v30 = vrot.slane %v10668_v34, 2  ;;  %v11012_v22 = vsel %vm630_vm2, %v1818_v17, %v1819_v5  ;;  %v11015_v47 = vsel %vm630_vm2, %v1819_v5, %v1821_v51 }
 0x10f   : > { %v10991_v2 = vpop.permute.xlu1 %8089  ;;  %16480 = vst [vmem:[#allocation192_spill] sm:$0xff] %v11012_v22  ;;  %16481 = vst [vmem:[#allocation193_spill] sm:$0xff] %v11015_v47  ;;  %v1823_v17 = vrot.slane %v10743_v33, 2  ;;  %v1824_v51 = vrot.slane %v10695_v52, 2  ;;  %v1826_v5 = vrot.slane %v10706_v62, 2 }
 0x110   : > { %8364 = vrot.lane.b32.xlu0 %v8363_v9, %s9276_s19  ;;  %16474 = vst [vmem:[#allocation189_spill] sm:$0xff] %v10991_v2  ;;  %v8388_v9 = vpack.i.bf16 %v10985_v38, %v10982_v48  ;;  %v1828_v2 = vrot.slane %v10703_v46, 2  ;;  %v1841_v38 = vrot.slane %v10838_v45, 2 }
 0x111   : > { %v11004_v57 = vpop.permute.xlu0 %8084 }
 0x112   : > { %16479 = vst [vmem:[#allocation139_spill] sm:$0xff] %v11004_v57  ;;  %8379 = vrot.lane.b32.xlu1 %v8378_v53, %s9276_s19  ;;  %v11024_v53 = vsel %vm630_vm2, %v1813_v30, %v1814_v6  ;;  %v11027_v57 = vsel %vm630_vm2, %v1814_v6, %v1816_v42  ;;  %v11041_v30 = vsel %vm630_vm2, %v1829_v31, %v1831_v41  ;;  %v1838_v42 = vrot.slane %v10773_v44, 2 }
 0x113   : > { %v11019_v27 = vpop.permute.xlu1 %8099  ;;  %16483 = vst [vmem:[#allocation195_spill] sm:$0xff] %v11024_v53  ;;  %16484 = vst [vmem:[#allocation196_spill] sm:$0xff] %v11027_v57  ;;  %v1839_v6 = vrot.slane %v10770_v61, 2  ;;  %v11057_v41 = vsel %vm630_vm2, %v1824_v51, %v1826_v5 }
 0x114   : > { %8374 = vrot.lane.b32.xlu0 %v8373_v15, %s9276_s19  ;;  %16482 = vst [vmem:[#allocation194_spill] sm:$0xff] %v11019_v27  ;;  %v8398_v15 = vpack.i.bf16 %v11015_v47, %v11012_v22  ;;  %v11038_v27 = vsel %vm630_vm2, %v1828_v2, %v1829_v31  ;;  %16487 = vst [vmem:[#allocation199_spill] sm:$0xff] %v11041_v30  ;;  %v1834_v2 = vrot.slane %v10759_v19, 2  ;;  %v16489_v47 = vld [vmem:[#allocation161_spill] sm:$0xff] }
 0x115   : > { %v11032_v4 = vpop.permute.xlu0 %8094  ;;  %16486 = vst [vmem:[#allocation198_spill] sm:$0xff] %v11038_v27  ;;  %v11054_v31 = vsel %vm630_vm2, %v1823_v17, %v1824_v51  ;;  %v1836_v22 = vrot.slane %v16489_v47, 2  ;;  %v3219_v17 = vld [vmem:[%s15540_s3 + $0x100] sm:$0xff]  ;;  %v3220_v47 = vld [vmem:[%s15540_s3 + $0x108] sm:$0xff] }
 0x116   : > { %16485 = vst [vmem:[#allocation197_spill] sm:$0xff] %v11032_v4  ;;  %8389 = vrot.lane.b32.xlu1 %v8388_v9, %s9276_s19  ;;  %v8393_v9 = vpack.i.bf16 %v11027_v57, %v11024_v53  ;;  %v1833_v4 = vrot.slane %v10791_v0, 2  ;;  %v11069_v53 = vsel %vm630_vm2, %v1839_v6, %v1841_v38  ;;  %v8403_v5 = vpack.i.bf16 %v11057_v41, %v11054_v31 }
 0x117   : > { %v11047_v62 = vpop.permute.xlu1 %8109  ;;  %16492 = vst [vmem:[#allocation202_spill] sm:$0xff] %v11069_v53  ;;  %v11085_v38 = vpack.c.bf16 %v3220_v47, %v3219_v17 }
 0x118   : > { %8384 = vrot.lane.b32.xlu0 %v8383_v36, %s9276_s19  ;;  %16488 = vst [vmem:[#allocation200_spill] sm:$0xff] %v11047_v62  ;;  %v8408_v36 = vpack.i.bf16 %v11041_v30, %v11038_v27  ;;  %v11066_v62 = vsel %vm630_vm2, %v1838_v42, %v1839_v6  ;;  %v11088_v42 = vsel %vm630_vm2, %v1834_v2, %v1836_v22  ;;  %v1843_v6 = vrot.slane %v10835_v40, 2  ;;  %v16496_v30 = vld [vmem:[#allocation168_spill] sm:$0xff] }
 0x119   : > { %v11060_v45 = vpop.permute.xlu0 %8104  ;;  %16491 = vst [vmem:[#allocation201_spill] sm:$0xff] %v11066_v62  ;;  %16495 = vst [vmem:[#allocation205_spill] sm:$0xff] %v11088_v42  ;;  %v1846_v27 = vrot.slane %v16496_v30, 2  ;;  %7556 = vmatprep.subr.bf16.mxu0 %v11085_v38  ;;  %v3187_v30 = vld [vmem:[%s15540_s3] sm:$0xff] }
 0x11a   : > { %16490 = vst [vmem:[#allocation161_spill] sm:$0xff] %v11060_v45  ;;  %8399 = vrot.lane.b32.xlu1 %v8398_v15, %s9276_s19  ;;  %v11083_v15 = vsel %vm630_vm2, %v1833_v4, %v1834_v2  ;;  %v1844_v45 = vrot.slane %v10810_v8, 2  ;;  %v3188_v2 = vld [vmem:[%s15540_s3 + $0x8] sm:$0xff] }
 0x11b   : > { %v11078_v51 = vpop.permute.xlu1 %8119  ;;  %16494 = vst [vmem:[#allocation204_spill] sm:$0xff] %v11083_v15  ;;  %v8413_v22 = vpack.i.bf16 %v11088_v42, %v11083_v15  ;;  %v7508_v47 = vpack.c.bf16 %v3188_v2, %v3187_v30 }
 0x11c   : > { %8394 = vrot.lane.b32.xlu0 %v8393_v9, %s9276_s19  ;;  %16493 = vst [vmem:[#allocation203_spill] sm:$0xff] %v11078_v51  ;;  %v8418_v51 = vpack.i.bf16 %v11069_v53, %v11066_v62  ;;  %v11114_v17 = vsel %vm630_vm2, %v1844_v45, %v1846_v27  ;;  %v16499_v62 = vmov 0.0|0.0   ;;  %v3189_v27 = vld [vmem:[%s15540_s3 + $0x10] sm:$0xff] }
 0x11d   : > { %v11093_v9 = vpop.permute.xlu0 %8114  ;;  %7509 = vmatpush1.bf16.msra.mxu1 %v7508_v47  ;;  %v8433_v47 = vpack.i.bf16 %v10437_v32, %v10382_v43  ;;  %v3193_v32 = vld [vmem:[%s15540_s3 + $0x30] sm:$0xff] }
 0x11e   : > { %16497 = vst [vmem:[#allocation168_spill] sm:$0xff] %v11093_v9  ;;  %8409 = vrot.lane.b32.xlu1 %v8408_v36, %s9276_s19  ;;  %v11111_v36 = vsel %vm630_vm2, %v1843_v6, %v1844_v45  ;;  %v16498_v9 = vld [vmem:[#allocation88_spill] sm:$0xff]  ;;  %7510 = vmatprep.subr.bf16.mxu1 %v16499_v62 }
 0x11f   : > { %v11100_v4 = vpop.permute.xlu1 %8129  ;;  %v8428_v53 = vpack.i.bf16 %v10385_v11, %v16498_v9  ;;  %v8423_v6 = vpack.i.bf16 %v11114_v17, %v11111_v36  ;;  %v3190_v45 = vld [vmem:[%s15540_s3 + $0x18] sm:$0xff]  ;;  %v3191_v9 = vld [vmem:[%s15540_s3 + $0x20] sm:$0xff] }
 0x120   : > { %8404 = vrot.lane.b32.xlu0 %v8403_v5, %s9276_s19  ;;  %v7511_v30 = vpack.c.bf16 %v3190_v45, %v3189_v27 }
 0x121   : > { %v11116_v5 = vpop.permute.xlu0 %8124 }
 0x122   : > { %8419 = vrot.lane.b32.xlu1 %v8418_v51, %s9276_s19  ;;  %7512 = vmatpush1.bf16.msra.mxu1 %v7511_v30  ;;  %v8443_v30 = vpack.i.bf16 %v10540_v63, %v10406_v21 }
 0x123   : > { %v11122_v15 = vpop.permute.xlu1 %8139  ;;  %7513 = vmatprep.subr.bf16.mxu1 %v16499_v62 }
 0x124   : > { %8414 = vrot.lane.b32.xlu0 %v8413_v22, %s9276_s19  ;;  %v8438_v22 = vpack.i.bf16 %v10399_v25, %v10396_v50 }
 0x125   : > { %v11133_v51 = vpop.permute.xlu0 %8134 }
 0x126   : > { %8429 = vrot.lane.b32.xlu1 %v8428_v53, %s9277_s23  ;;  %v3192_v53 = vld [vmem:[%s15540_s3 + $0x28] sm:$0xff] }
 0x127   : > { %v11139_v2 = vpop.permute.xlu1 %8149  ;;  %v7514_v27 = vpack.c.bf16 %v3192_v53, %v3191_v9  ;;  %v8458_v9 = vpack.i.bf16 %v10556_v16, %v10548_v12  ;;  %v16512_v16 = vld [vmem:[#allocation74_spill] sm:$0xff] }
 0x128   : > { %8424 = vrot.lane.b32.xlu0 %v8423_v6, %s9276_s19  ;;  %v8448_v6 = vpack.i.bf16 %v10518_v60, %v10491_v56  ;;  %v7966_v63 = vunpack.i.l.bf16 %v16512_v16 }
 0x129   : > { %v11150_v50 = vpop.permute.xlu0 %8144  ;;  %7515 = vmatpush1.bf16.msra.mxu1 %v7514_v27  ;;  %v8453_v27 = vpack.i.bf16 %v10570_v28, %v10515_v29  ;;  %v11214_v28 = vld [vmem:[%s9955_s22 + $0xf8] sm:$0xff] }
 0x12a   : > { %8439 = vrot.lane.b32.xlu1 %v8438_v22, %s9277_s23  ;;  %v3194_v22 = vld [vmem:[%s15540_s3 + $0x38] sm:$0xff]  ;;  %7516 = vmatprep.subr.bf16.mxu1 %v16499_v62 }
 0x12b   : > { %v11156_v45 = vpop.permute.xlu1 %8159 }
 0x12c   : > { %8434 = vrot.lane.b32.xlu0 %v8433_v47, %s9277_s23  ;;  %16500 = vst [vmem:[#allocation206_spill] sm:$0xff] %v11156_v45  ;;  %v7517_v47 = vpack.c.bf16 %v3194_v22, %v3193_v32  ;;  %v3195_v45 = vld [vmem:[%s15540_s3 + $0x40] sm:$0xff]  ;;  %v8468_v32 = vpack.i.bf16 %v10619_v54, %v16475_v24  ;;  %v16505_v24 = vld [vmem:[#allocation92_spill] sm:$0xff]  ;;  %v8473_v54 = vpack.i.bf16 %v10743_v33, %v10616_v10 }
 0x12d   : > { %v11167_v56 = vpop.permute.xlu0 %8154 }
 0x12e   : > { %16501 = vst [vmem:[#allocation207_spill] sm:$0xff] %v11167_v56  ;;  %8449 = vrot.lane.b32.xlu1 %v8448_v6, %s9277_s23  ;;  %7518 = vmatpush1.bf16.msra.mxu1 %v7517_v47  ;;  %v3196_v6 = vld [vmem:[%s15540_s3 + $0x48] sm:$0xff]  ;;  %v8463_v47 = vpack.i.bf16 %v10668_v34, %v10567_v3  ;;  %v8046_v3 = vunpack.i.l.bf16 %v10891_v7 }
 0x12f   : > { %v11173_v53 = vpop.permute.xlu1 %8169  ;;  %7519 = vmatprep.subr.bf16.mxu1 %v16499_v62 }
 0x130   : > { %8444 = vrot.lane.b32.xlu0 %v8443_v30, %s9277_s23  ;;  %16502 = vst [vmem:[#allocation208_spill] sm:$0xff] %v11173_v53  ;;  %v7520_v30 = vpack.c.bf16 %v3196_v6, %v3195_v45  ;;  %v359_v53 = vld [vmem:[%s9955_s22 + $0xf0] sm:$0xff]  ;;  %v7806_v45 = vunpack.i.l.bf16 %v16505_v24  ;;  %v8478_v6 = vpack.i.bf16 %v10703_v46, %v10695_v52 }
 0x131   : > { %v11184_v12 = vpop.permute.xlu0 %8164  ;;  %v16510_v52 = vld [vmem:[#allocation75_spill] sm:$0xff] }
 0x132   : > { %16503 = vst [vmem:[#allocation209_spill] sm:$0xff] %v11184_v12  ;;  %8459 = vrot.lane.b32.xlu1 %v8458_v9, %s9277_s23  ;;  %7521 = vmatpush1.bf16.msra.mxu1 %v7520_v30  ;;  %v3197_v12 = vld [vmem:[%s15540_s3 + $0x50] sm:$0xff]  ;;  %v3198_v9 = vld [vmem:[%s15540_s3 + $0x58] sm:$0xff]  ;;  %v7962_v33 = vunpack.i.h.bf16 %v16510_v52  ;;  %v8126_v52 = vunpack.i.l.bf16 %v11116_v5 }
 0x133   : > { %v11190_v22 = vpop.permute.xlu1 %8179  ;;  %7522 = vmatprep.subr.bf16.mxu1 %v16499_v62  ;;  %v7523_v30 = vpack.c.bf16 %v3198_v9, %v3197_v12  ;;  %v1317_v12 = vsel %vm1316_vm3, 0.0, %v7806_v45  ;;  %v16509_v9 = vld [vmem:[#allocation110_spill] sm:$0xff] }
 0x134   : > { %8454 = vrot.lane.b32.xlu0 %v8453_v27, %s9277_s23  ;;  %16504 = vst [vmem:[#allocation210_spill] sm:$0xff] %v11190_v22  ;;  %v1586_v22 = vrot.slane %v359_v53, 7  ;;  %v16508_v53 = vld [vmem:[#allocation107_spill] sm:$0xff] }
 0x135   : > { %v11203_v27 = vpop.permute.xlu0 %8174 }
 0x136   : > { %16506 = vst [vmem:[#allocation92_spill] sm:$0xff] %v11203_v27  ;;  %8469 = vrot.lane.b32.xlu1 %v8468_v32, %s9277_s23  ;;  %7524 = vmatpush1.bf16.msra.mxu1 %v7523_v30  ;;  %v3199_v27 = vld [vmem:[%s15540_s3 + $0x60] sm:$0xff]  ;;  %v3200_v32 = vld [vmem:[%s15540_s3 + $0x68] sm:$0xff]  ;;  %v8488_v30 = vpack.i.bf16 %v10773_v44, %v10759_v19  ;;  %v11234_v45 = vsel %vm393_vm0, 0.0, %v1586_v22  ;;  %v16513_v44 = vld [vmem:[#allocation16_spill] sm:$0xff] }
 0x137   : > { %v11209_v34 = vpop.permute.xlu1 %8189  ;;  %7525 = vmatprep.subr.bf16.mxu1 %v16499_v62  ;;  %v7526_v10 = vpack.c.bf16 %v3200_v32, %v3199_v27  ;;  %v3201_v27 = vld [vmem:[%s15540_s3 + $0x70] sm:$0xff]  ;;  %v3202_v32 = vld [vmem:[%s15540_s3 + $0x78] sm:$0xff] }
 0x138   : > { %8464 = vrot.lane.b32.xlu0 %v8463_v47, %s9277_s23  ;;  %16507 = vst [vmem:[#allocation211_spill] sm:$0xff] %v11209_v34  ;;  %v7882_v47 = vunpack.i.h.bf16 %v16508_v53  ;;  %v7886_v34 = vunpack.i.l.bf16 %v16509_v9  ;;  %v7529_v29 = vpack.c.bf16 %v3202_v32, %v3201_v27 }
 0x139   : > { %v11227_v46 = vpop.permute.xlu0 %8184 }
 0x13a   : > { %16511 = vst [vmem:[#allocation110_spill] sm:$0xff] %v11227_v46  ;;  %8479 = vrot.lane.b32.xlu1 %v8478_v6, %s9277_s23  ;;  %v8483_v6 = vpack.i.bf16 %v10791_v0, %v10700_v20  ;;  %7527 = vmatpush1.bf16.msra.mxu1 %v7526_v10  ;;  %v1413_v56 = vsel %vm1316_vm3, %v16513_v44, %v7882_v47  ;;  %v8047_v44 = vunpack.i.h.bf16 %v10891_v7 }
 0x13b   : > { %v8200_v46 = vpop.permute.xlu1 %8199  ;;  %7528 = vmatprep.subr.bf16.mxu1 %v16499_v62  ;;  %v1445_v10 = vsel %vm1348_vm4, %v1413_v56, %v7962_v33  ;;  %v11258_v20 = vsel %vm1348_vm4, %v1317_v12, %v7886_v34  ;;  %v7967_v56 = vunpack.i.h.bf16 %v16512_v16  ;;  %v8127_v34 = vunpack.i.h.bf16 %v11116_v5  ;;  %v3204_v16 = vld [vmem:[%s15540_s3 + $0x88] sm:$0xff] }
 0x13c   : > { %8474 = vrot.lane.b32.xlu0 %v8473_v54, %s9277_s23  ;;  %v8202_v53 = vunpack.i.h.bf16 %v8200_v46  ;;  %v8201_v19 = vunpack.i.l.bf16 %v8200_v46  ;;  %v8493_v54 = vpack.i.bf16 %v10835_v40, %v10770_v61  ;;  %16515 = vst [vmem:[#allocation16_spill] sm:$0xff] %v11258_v20  ;;  %v8498_v46 = vpack.i.bf16 %v11234_v45, %v10810_v8  ;;  %v16516_v40 = vld [vmem:[#allocation20_spill] sm:$0xff] }
 0x13d   : > { %v11253_v0 = vpop.permute.xlu0 %8194  ;;  %v1414_v61 = vsel %vm1316_vm3, %v16516_v40, %v8046_v3  ;;  %v3203_v3 = vld [vmem:[%s15540_s3 + $0x80] sm:$0xff]  ;;  %v7887_v5 = vunpack.i.h.bf16 %v16509_v9 }
 0x13e   : > { %16514 = vst [vmem:[#allocation74_spill] sm:$0xff] %v11253_v0  ;;  %8489 = vrot.lane.b32.xlu1 %v8488_v30, %s9277_s23  ;;  %v1477_v47 = vsel %vm1380_vm5, %v1445_v10, %v8201_v19  ;;  %v16517_v0 = vrot.slane %v11214_v28, 7  ;;  %v1381_v19 = vsel %vm1380_vm5, %v11258_v20, %v7966_v63  ;;  %v1446_v7 = vsel %vm1348_vm4, %v1414_v61, %v8126_v52  ;;  %v16520_v9 = vld [vmem:[#allocation73_spill] sm:$0xff] }
 0x13f   : > { %v11274_v33 = vpop.permute.xlu1 %8209  ;;  %2801 = vmatprep.mubr.f32.mxu0 %v1477_v47  ;;  %v1478_v40 = vsel %vm1380_vm5, %v1446_v7, %v8202_v53  ;;  %7530 = vmatpush1.bf16.msra.mxu1 %v7529_v29  ;;  %v8508_v63 = vpack.i.bf16 %v10898_v14, %v10915_v39  ;;  %v7532_v52 = vpack.c.bf16 %v3204_v16, %v3203_v3  ;;  %v8051_v61 = vunpack.i.l.bf16 %v10878_v59  ;;  %v16519_v53 = vld [vmem:[#allocation21_spill] sm:$0xff]  ;;  %v3206_v39 = vld [vmem:[%s15540_s3 + $0x98] sm:$0xff]  ;;  %v16521_v3 = vld [vmem:[#allocation95_spill] sm:$0xff] }
 0x140   : > { %v11269_v30 = vsel %vm393_vm0, %v1586_v22, %v16517_v0  ;;  %8484 = vrot.lane.b32.xlu0 %v8483_v6, %s9277_s23  ;;  %2802 = vmatmul.mubr.f32.vlgmr.msra.gmra.mrb[0].mxu0 %v1381_v19  ;;  %v7807_v0 = vunpack.i.h.bf16 %v16505_v24  ;;  %v16518_v6 = vld [vmem:[#allocation122_spill] sm:$0xff]  ;;  %v1415_v29 = vsel %vm1316_vm3, %v16519_v53, %v8047_v44  ;;  %v3205_v24 = vld [vmem:[%s15540_s3 + $0x90] sm:$0xff]  ;;  %v7971_v32 = vunpack.i.l.bf16 %v16520_v9 }
 0x141   : > { %v8205_v22 = vpop.permute.xlu0 %8204  ;;  %2806 = vmatprep.mubr.f32.mxu0 %v1478_v40  ;;  %v8503_v27 = vpack.i.bf16 %v16518_v6, %v11269_v30  ;;  %7558 = vmatpush3.bf16.msra.mxu0 %v11085_v38  ;;  %v8131_v10 = vunpack.i.l.bf16 %v11100_v4  ;;  %v1382_v38 = vsel %vm1380_vm5, %v11258_v20, %v7967_v56  ;;  %v1447_v44 = vsel %vm1348_vm4, %v1415_v29, %v8127_v34  ;;  %v16522_v40 = vld [vmem:[#allocation109_spill] sm:$0xff]  ;;  %v16524_v29 = vld [vmem:[#allocation12_spill] sm:$0xff] }
 0x142   : > { %8499 = vrot.lane.b32.xlu1 %v8498_v46, %s9277_s23  ;;  %v8206_v12 = vunpack.i.l.bf16 %v8205_v22  ;;  %7531 = vmatprep.subr.bf16.mxu1 %v16499_v62  ;;  %v8207_v47 = vunpack.i.h.bf16 %v8205_v22  ;;  %v7535_v7 = vpack.c.bf16 %v3206_v39, %v3205_v24  ;;  %v7811_v16 = vunpack.i.l.bf16 %v16521_v3 }
 0x143   : > { %v11307_v46 = vpop.permute.xlu1 %8219  ;;  %7533 = vmatpush1.bf16.msra.mxu1 %v7532_v52  ;;  %v7891_v53 = vunpack.i.l.bf16 %v16522_v40  ;;  %v8518_v34 = vpack.i.bf16 %v10925_v1, %v10945_v49  ;;  %v8052_v22 = vunpack.i.h.bf16 %v10878_v59  ;;  %v1416_v24 = vsel %vm1316_vm3, %v16524_v29, %v8051_v61  ;;  %v16527_v29 = vld [vmem:[#allocation13_spill] sm:$0xff] }
 0x144   : > { %8494 = vrot.lane.b32.xlu0 %v8493_v54, %s9277_s23  ;;  %2807 = vmatmul.mubr.f32.gmra.mrb[2].mxu0 %v1382_v38  ;;  %v1479_v19 = vsel %vm1380_vm5, %v1447_v44, %v8206_v12  ;;  %v16523_v54 = vld [vmem:[#allocation10_spill] sm:$0xff]  ;;  %v8513_v12 = vpack.i.bf16 %v10942_v18, %v10901_v13  ;;  %v7972_v59 = vunpack.i.h.bf16 %v16520_v9  ;;  %v1448_v38 = vsel %vm1348_vm4, %v1416_v24, %v8131_v10  ;;  %v16528_v24 = vld [vmem:[#allocation136_spill] sm:$0xff] }
 0x145   : > { %v11315_v6 = vpop.permute.xlu0 %8214  ;;  %2811 = vmatprep.mubr.f32.mxu0 %v1479_v19  ;;  %v1318_v56 = vsel %vm1316_vm3, %v16523_v54, %v7807_v0  ;;  %7534 = vmatprep.subr.bf16.mxu1 %v16499_v62  ;;  %v3208_v0 = vld [vmem:[%s15540_s3 + $0xa8] sm:$0xff]  ;;  %v8211_v44 = vunpack.i.l.bf16 %v11274_v33  ;;  %v1480_v19 = vsel %vm1380_vm5, %v1448_v38, %v8207_v47  ;;  %v7892_v9 = vunpack.i.h.bf16 %v16522_v40  ;;  %v16529_v38 = vld [vmem:[#allocation91_spill] sm:$0xff] }
 0x146   : > { %8509 = vrot.lane.b32.xlu1 %v8508_v63, %s9275_s18  ;;  %v1350_v52 = vsel %vm1348_vm4, %v1318_v56, %v7887_v5  ;;  %v3207_v63 = vld [vmem:[%s15540_s3 + $0xa0] sm:$0xff]  ;;  %v8132_v5 = vunpack.i.h.bf16 %v11100_v4  ;;  %v7812_v56 = vunpack.i.h.bf16 %v16521_v3  ;;  %v8528_v10 = vpack.i.bf16 %v10956_v35, %v10971_v37  ;;  %v16530_v35 = vld [vmem:[#allocation112_spill] sm:$0xff] }
 0x147   : > { %v11338_v39 = vpop.permute.xlu1 %8229  ;;  %v1383_v61 = vsel %vm1380_vm5, %v1350_v52, %v7971_v32  ;;  %7536 = vmatpush1.bf16.msra.mxu1 %v7535_v7  ;;  %v7538_v54 = vpack.c.bf16 %v3208_v0, %v3207_v63  ;;  %v8056_v52 = vunpack.i.l.bf16 %v10919_v23  ;;  %v16526_v7 = vld [vmem:[#allocation185_spill] sm:$0xff]  ;;  %v1417_v40 = vsel %vm1316_vm3, %v16527_v29, %v8052_v22 }
 0x148   : > { %8504 = vrot.lane.b32.xlu0 %v8503_v27, %s9277_s23  ;;  %2812 = vmatmul.mubr.f32.gmra.mrb[4].mxu0 %v1383_v61  ;;  %v16525_v27 = vld [vmem:[#allocation9_spill] sm:$0xff]  ;;  %v8523_v3 = vpack.i.bf16 %v16526_v7, %v10928_v26  ;;  %v7976_v63 = vunpack.i.l.bf16 %v16528_v24  ;;  %v1449_v61 = vsel %vm1348_vm4, %v1417_v40, %v8132_v5  ;;  %v7816_v20 = vunpack.i.l.bf16 %v16529_v38 }
 0x149   : > { %v11346_v4 = vpop.permute.xlu0 %8224  ;;  %2816 = vmatprep.mubr.f32.mxu0 %v1480_v19  ;;  %v1319_v32 = vsel %vm1316_vm3, %v16525_v27, %v7811_v16  ;;  %7537 = vmatprep.subr.bf16.mxu1 %v16499_v62  ;;  %v3210_v16 = vld [vmem:[%s15540_s3 + $0xb8] sm:$0xff]  ;;  %v7817_v19 = vunpack.i.h.bf16 %v16529_v38  ;;  %v8212_v27 = vunpack.i.h.bf16 %v11274_v33  ;;  %v7896_v37 = vunpack.i.l.bf16 %v16530_v35  ;;  %v16534_v38 = vld [vmem:[#allocation93_spill] sm:$0xff] }
 0x14a   : > { %8519 = vrot.lane.b32.xlu1 %v8518_v34, %s9275_s18  ;;  %v1351_v47 = vsel %vm1348_vm4, %v1319_v32, %v7891_v53  ;;  %v3209_v34 = vld [vmem:[%s15540_s3 + $0xb0] sm:$0xff]  ;;  %v8136_v53 = vunpack.i.l.bf16 %v11133_v51  ;;  %v1481_v32 = vsel %vm1380_vm5, %v1449_v61, %v8211_v44  ;;  %v8538_v33 = vpack.i.bf16 %v10982_v48, %v11001_v55 }
 0x14b   : > { %v11369_v0 = vpop.permute.xlu1 %8239  ;;  %v1384_v22 = vsel %vm1380_vm5, %v1351_v47, %v7972_v59  ;;  %7539 = vmatpush1.bf16.msra.mxu1 %v7538_v54  ;;  %v7541_v29 = vpack.c.bf16 %v3210_v16, %v3209_v34  ;;  %v16531_v59 = vld [vmem:[#allocation15_spill] sm:$0xff]  ;;  %v8057_v47 = vunpack.i.h.bf16 %v10919_v23  ;;  %v16533_v34 = vld [vmem:[#allocation18_spill] sm:$0xff]  ;;  %v7977_v23 = vunpack.i.h.bf16 %v16528_v24 }
 0x14c   : > { %8514 = vrot.lane.b32.xlu0 %v8513_v12, %s9275_s18  ;;  %2817 = vmatmul.mubr.f32.gmra.mrb[6].mxu0 %v1384_v22  ;;  %v1320_v5 = vsel %vm1316_vm3, %v16531_v59, %v7812_v56  ;;  %v16532_v54 = vld [vmem:[#allocation183_spill] sm:$0xff]  ;;  %v1418_v16 = vsel %vm1316_vm3, %v16533_v34, %v8056_v52  ;;  %v3212_v56 = vld [vmem:[%s15540_s3 + $0xc8] sm:$0xff]  ;;  %v8216_v59 = vunpack.i.l.bf16 %v11315_v6  ;;  %v7821_v24 = vunpack.i.l.bf16 %v16534_v38 }
 0x14d   : > { %v11378_v12 = vpop.permute.xlu0 %8234  ;;  %2821 = vmatprep.mubr.f32.mxu0 %v1481_v32  ;;  %v1352_v44 = vsel %vm1348_vm4, %v1320_v5, %v7892_v9  ;;  %v8533_v40 = vpack.i.bf16 %v10998_v58, %v16532_v54  ;;  %7540 = vmatprep.subr.bf16.mxu1 %v16499_v62  ;;  %v8137_v9 = vunpack.i.h.bf16 %v11133_v51  ;;  %v1450_v61 = vsel %vm1348_vm4, %v1418_v16, %v8136_v53  ;;  %v16543_v55 = vld [vmem:[#allocation111_spill] sm:$0xff] }
 0x14e   : > { %8529 = vrot.lane.b32.xlu1 %v8528_v10, %s9275_s18  ;;  %v3211_v10 = vld [vmem:[%s15540_s3 + $0xc0] sm:$0xff]  ;;  %v1385_v52 = vsel %vm1380_vm5, %v1352_v44, %v7976_v63  ;;  %v1482_v5 = vsel %vm1380_vm5, %v1450_v61, %v8212_v27  ;;  %v7897_v51 = vunpack.i.h.bf16 %v16530_v35  ;;  %v16535_v63 = vld [vmem:[#allocation6_spill] sm:$0xff]  ;;  %v16536_v44 = vld [vmem:[#allocation192_spill] sm:$0xff]  ;;  %v7901_v58 = vunpack.i.l.bf16 %v16543_v55 }
 0x14f   : > { %v11401_v22 = vpop.permute.xlu1 %8249  ;;  %7542 = vmatpush1.bf16.msra.mxu1 %v7541_v29  ;;  %v7544_v34 = vpack.c.bf16 %v3212_v56, %v3211_v10  ;;  %v1321_v53 = vsel %vm1316_vm3, %v16535_v63, %v7816_v20  ;;  %v8548_v16 = vpack.i.bf16 %v16536_v44, %v11027_v57  ;;  %v16538_v29 = vld [vmem:[#allocation188_spill] sm:$0xff]  ;;  %v16539_v10 = vld [vmem:[#allocation195_spill] sm:$0xff]  ;;  %v8217_v44 = vunpack.i.h.bf16 %v11315_v6 }
 0x150   : > { %8524 = vrot.lane.b32.xlu0 %v8523_v3, %s9275_s18  ;;  %2822 = vmatmul.mubr.f32.gmra.mrb[8].mxu0 %v1385_v52  ;;  %v16537_v52 = vld [vmem:[#allocation179_spill] sm:$0xff]  ;;  %v1353_v27 = vsel %vm1348_vm4, %v1321_v53, %v7896_v37  ;;  %v8543_v56 = vpack.i.bf16 %v16539_v10, %v16538_v29  ;;  %v3214_v20 = vld [vmem:[%s15540_s3 + $0xd8] sm:$0xff]  ;;  %v8141_v37 = vunpack.i.l.bf16 %v11122_v15 }
 0x151   : > { %v11410_v3 = vpop.permute.xlu0 %8244  ;;  %2826 = vmatprep.mubr.f32.mxu0 %v1482_v5  ;;  %v8061_v32 = vunpack.i.l.bf16 %v16537_v52  ;;  %v16540_v61 = vld [vmem:[#allocation19_spill] sm:$0xff]  ;;  %7543 = vmatprep.subr.bf16.mxu1 %v16499_v62  ;;  %v16541_v5 = vld [vmem:[#allocation132_spill] sm:$0xff] }
 0x152   : > { %8539 = vrot.lane.b32.xlu1 %v8538_v33, %s9275_s18  ;;  %v1419_v35 = vsel %vm1316_vm3, %v16540_v61, %v8057_v47  ;;  %v3213_v33 = vld [vmem:[%s15540_s3 + $0xd0] sm:$0xff]  ;;  %v7981_v63 = vunpack.i.l.bf16 %v16541_v5  ;;  %v1386_v47 = vsel %vm1380_vm5, %v1353_v27, %v7977_v23  ;;  %v16544_v23 = vld [vmem:[#allocation198_spill] sm:$0xff] }
 0x153   : > { %v11433_v53 = vpop.permute.xlu1 %8259  ;;  %v1451_v61 = vsel %vm1348_vm4, %v1419_v35, %v8137_v9  ;;  %v16542_v10 = vld [vmem:[#allocation7_spill] sm:$0xff]  ;;  %7545 = vmatpush1.bf16.msra.mxu1 %v7544_v34  ;;  %v7547_v48 = vpack.c.bf16 %v3214_v20, %v3213_v33  ;;  %v8558_v6 = vpack.i.bf16 %v16544_v23, %v11057_v41  ;;  %v1887_v9 = vrot.slane %v11234_v45, 2  ;;  %v16545_v34 = vld [vmem:[#allocation30_spill] sm:$0xff] }
 0x154   : > { %8534 = vrot.lane.b32.xlu0 %v8533_v40, %s9275_s18  ;;  %2827 = vmatmul.mubr.f32.gmra.mrb[10].mxu0 %v1386_v47  ;;  %v1483_v57 = vsel %vm1380_vm5, %v1451_v61, %v8216_v59  ;;  %v1322_v29 = vsel %vm1316_vm3, %v16542_v10, %v7817_v19  ;;  %v7982_v59 = vunpack.i.h.bf16 %v16541_v5  ;;  %v8062_v19 = vunpack.i.h.bf16 %v16537_v52  ;;  %v16547_v47 = vld [vmem:[#allocation8_spill] sm:$0xff]  ;;  %v16558_v23 = vld [vmem:[#allocation14_spill] sm:$0xff] }
 0x155   : > { %v11442_v54 = vpop.permute.xlu0 %8254  ;;  %2831 = vmatprep.mubr.f32.mxu0 %v1483_v57  ;;  %v1354_v40 = vsel %vm1348_vm4, %v1322_v29, %v7897_v51  ;;  %v1420_v27 = vsel %vm1316_vm3, %v16545_v34, %v8061_v32  ;;  %7546 = vmatprep.subr.bf16.mxu1 %v16499_v62  ;;  %v3215_v57 = vld [vmem:[%s15540_s3 + $0xe0] sm:$0xff]  ;;  %v3216_v51 = vld [vmem:[%s15540_s3 + $0xe8] sm:$0xff]  ;;  %v8221_v20 = vunpack.i.l.bf16 %v11307_v46  ;;  %v1323_v61 = vsel %vm1316_vm3, %v16547_v47, %v7821_v24  ;;  %v16552_v24 = vld [vmem:[#allocation28_spill] sm:$0xff] }
 0x156   : > { %8549 = vrot.lane.b32.xlu1 %v8548_v16, %s9275_s18  ;;  %v8142_v16 = vunpack.i.h.bf16 %v11122_v15  ;;  %v1387_v32 = vsel %vm1380_vm5, %v1354_v40, %v7981_v63  ;;  %v16546_v29 = vld [vmem:[#allocation193_spill] sm:$0xff]  ;;  %v1452_v33 = vsel %vm1348_vm4, %v1420_v27, %v8141_v37  ;;  %v7550_v15 = vpack.c.bf16 %v3216_v51, %v3215_v57  ;;  %v16549_v27 = vld [vmem:[#allocation199_spill] sm:$0xff]  ;;  %v3222_v51 = vld [vmem:[%s15540_s3 + $0x118] sm:$0xff] }
 0x157   : > { %v11463_v52 = vpop.permute.xlu1 %8269  ;;  %v8553_v35 = vpack.i.bf16 %v11054_v31, %v16546_v29  ;;  %v1484_v5 = vsel %vm1380_vm5, %v1452_v33, %v8217_v44  ;;  %7548 = vmatpush1.bf16.msra.mxu1 %v7547_v48  ;;  %v1355_v63 = vsel %vm1348_vm4, %v1323_v61, %v7901_v58  ;;  %v16548_v37 = vld [vmem:[#allocation201_spill] sm:$0xff]  ;;  %v16553_v57 = vrot.slane %v11269_v30, 2  ;;  %v3221_v58 = vld [vmem:[%s15540_s3 + $0x110] sm:$0xff] }
 0x158   : > { %8544 = vrot.lane.b32.xlu0 %v8543_v56, %s9275_s18  ;;  %2832 = vmatmul.mubr.f32.gmra.mrb[12].mxu0 %v1387_v32  ;;  %v7902_v56 = vunpack.i.h.bf16 %v16543_v55  ;;  %v8568_v40 = vpack.i.bf16 %v16548_v37, %v11088_v42  ;;  %v16550_v32 = vld [vmem:[#allocation204_spill] sm:$0xff]  ;;  %v16551_v33 = vld [vmem:[#allocation181_spill] sm:$0xff]  ;;  %v1388_v48 = vsel %vm1380_vm5, %v1355_v63, %v7982_v59  ;;  %v1421_v55 = vsel %vm1316_vm3, %v16552_v24, %v8062_v19  ;;  %v3217_v59 = vld [vmem:[%s15540_s3 + $0xf0] sm:$0xff] }
 0x159   : > { %v11474_v34 = vpop.permute.xlu0 %8264  ;;  %2836 = vmatprep.mubr.f32.mxu0 %v1484_v5  ;;  %v8563_v44 = vpack.i.bf16 %v16550_v32, %v16549_v27  ;;  %v8066_v10 = vunpack.i.l.bf16 %v16551_v33  ;;  %7549 = vmatprep.subr.bf16.mxu1 %v16499_v62  ;;  %v16554_v19 = vld [vmem:[#allocation78_spill] sm:$0xff]  ;;  %v8146_v47 = vunpack.i.l.bf16 %v11150_v50  ;;  %v1453_v61 = vsel %vm1348_vm4, %v1421_v55, %v8142_v16  ;;  %v3218_v24 = vld [vmem:[%s15540_s3 + $0xf8] sm:$0xff] }
 0x15a   : > { %8559 = vrot.lane.b32.xlu1 %v8558_v6, %s9275_s18  ;;  %v11489_v6 = vsel %vm630_vm2, %v1887_v9, %v16553_v57  ;;  %v7986_v5 = vunpack.i.l.bf16 %v16554_v19  ;;  %v7559_v63 = vpack.c.bf16 %v3222_v51, %v3221_v58  ;;  %v16556_v57 = vld [vmem:[#allocation97_spill] sm:$0xff]  ;;  %v8222_v42 = vunpack.i.h.bf16 %v11307_v46  ;;  %v16562_v51 = vld [vmem:[#allocation27_spill] sm:$0xff] }
 0x15b   : > { %v11504_v9 = vpop.permute.xlu1 %8279  ;;  %v7826_v37 = vunpack.i.l.bf16 %v16556_v57  ;;  %v1485_v32 = vsel %vm1380_vm5, %v1453_v61, %v8221_v20  ;;  %v16557_v27 = vunpack.i.h.bf16 %v16534_v38  ;;  %7551 = vmatpush1.bf16.msra.mxu1 %v7550_v15  ;;  %v8578_v58 = vpack.i.bf16 %v11489_v6, %v11114_v17  ;;  %v16561_v15 = vld [vmem:[#allocation202_spill] sm:$0xff] }
 0x15c   : > { %8554 = vrot.lane.b32.xlu0 %v8553_v35, %s9275_s18  ;;  %16555 = vst [vmem:[#allocation20_spill] sm:$0xff] %v11504_v9  ;;  %2837 = vmatmul.mubr.f32.gmra.mrb[14].mxu0 %v1388_v48  ;;  %v16559_v9 = vld [vmem:[#allocation114_spill] sm:$0xff]  ;;  %v16560_v46 = vrot.slane %v11214_v28, 7  ;;  %v7553_v38 = vpack.c.bf16 %v3218_v24, %v3217_v59  ;;  %v8067_v48 = vunpack.i.h.bf16 %v16551_v33  ;;  %v8147_v28 = vunpack.i.h.bf16 %v11150_v50 }
 0x15d   : > { %v1324_v35 = vsel %vm1316_vm3, %v16558_v23, %v16557_v27  ;;  %v7906_v16 = vunpack.i.l.bf16 %v16559_v9  ;;  %v11518_v55 = vpop.permute.xlu0 %8274  ;;  %2841 = vmatprep.mubr.f32.mxu0 %v1485_v32  ;;  %v8573_v27 = vpack.i.bf16 %v11111_v36, %v16561_v15  ;;  %7560 = vmatprep.subr.bf16.mxu0 %v7559_v63  ;;  %v7987_v32 = vunpack.i.h.bf16 %v16554_v19 }
 0x15e   : > { %8569 = vrot.lane.b32.xlu1 %v8568_v40, %s9275_s18  ;;  %v11526_v20 = vsel %vm393_vm0, %v16560_v46, 0.0  ;;  %v1356_v23 = vsel %vm1348_vm4, %v1324_v35, %v7902_v56  ;;  %v1422_v40 = vsel %vm1316_vm3, %v16562_v51, %v8066_v10  ;;  %7552 = vmatprep.subr.bf16.mxu1 %v16499_v62  ;;  %v8226_v61 = vunpack.i.l.bf16 %v11346_v4  ;;  %v16564_v35 = vld [vmem:[#allocation180_spill] sm:$0xff] }
 0x15f   : > { %v1389_v33 = vsel %vm1380_vm5, %v1356_v23, %v7986_v5  ;;  %v1454_v56 = vsel %vm1348_vm4, %v1422_v40, %v8146_v47  ;;  %7562 = vmatpush3.bf16.msra.mxu0 %v7559_v63  ;;  %v1890_v24 = vrot.slane %v11526_v20, 2  ;;  %7554 = vmatpush1.bf16.msra.mxu1 %v7553_v38  ;;  %v7827_v19 = vunpack.i.h.bf16 %v16556_v57  ;;  %v16565_v38 = vld [vmem:[#allocation26_spill] sm:$0xff] }
 0x160   : > { %8564 = vrot.lane.b32.xlu0 %v8563_v44, %s9275_s18  ;;  %v11538_v59 = vpop.permute.xlu1 %8289  ;;  %2842 = vmatmul.mubr.f32.gmra.mrb[16].mxu0 %v1389_v33  ;;  %v1486_v10 = vsel %vm1380_vm5, %v1454_v56, %v8222_v42  ;;  %v16563_v44 = vld [vmem:[#allocation17_spill] sm:$0xff]  ;;  %v8583_v47 = vpack.i.bf16 %v10382_v43, %v10385_v11  ;;  %v7907_v63 = vunpack.i.h.bf16 %v16559_v9  ;;  %v8071_v42 = vunpack.i.l.bf16 %v16564_v35 }
 0x161   : > { %2846 = vmatprep.mubr.f32.mxu0 %v1486_v10  ;;  %v1325_v5 = vsel %vm1316_vm3, %v16563_v44, %v7826_v37  ;;  %v1423_v57 = vsel %vm1316_vm3, %v16565_v38, %v8067_v48  ;;  %7563 = vmatprep.subr.bf16.mxu1 %v16499_v62  ;;  %v8151_v37 = vunpack.i.l.bf16 %v11139_v2  ;;  %v8227_v48 = vunpack.i.h.bf16 %v11346_v4 }
 0x162   : > { %v11546_v50 = vpop.permute.xlu0 %8284  ;;  %8579 = vrot.lane.b32.xlu1 %v8578_v58, %s9275_s18  ;;  %v1357_v46 = vsel %vm1348_vm4, %v1325_v5, %v7906_v16  ;;  %7611 = vmatprep.subr.bf16.mxu0 %v16499_v62  ;;  %v16566_v58 = vld [vmem:[#allocation77_spill] sm:$0xff]  ;;  %v1455_v40 = vsel %vm1348_vm4, %v1423_v57, %v8147_v28  ;;  %v16568_v16 = vld [vmem:[#allocation96_spill] sm:$0xff]  ;;  %v16569_v56 = vrot.slane %v11269_v30, 2  ;;  %v8593_v4 = vpack.i.bf16 %v10406_v21, %v10399_v25 }
 0x163   : > { %v7991_v23 = vunpack.i.l.bf16 %v16566_v58  ;;  %v1390_v9 = vsel %vm1380_vm5, %v1357_v46, %v7987_v32  ;;  %v7831_v33 = vunpack.i.l.bf16 %v16568_v16  ;;  %v1487_v44 = vsel %vm1380_vm5, %v1455_v40, %v8226_v61  ;;  %v16570_v5 = vld [vmem:[#allocation113_spill] sm:$0xff]  ;;  %v16572_v32 = vld [vmem:[#allocation22_spill] sm:$0xff]  ;;  %v16573_v61 = vld [vmem:[#allocation36_spill] sm:$0xff] }
 0x164   : > { %8574 = vrot.lane.b32.xlu0 %v8573_v27, %s9275_s18  ;;  %v11563_v51 = vpop.permute.xlu1 %8299  ;;  %2847 = vmatmul.mubr.f32.gmra.mrb[18].mxu0 %v1390_v9  ;;  %v11572_v10 = vsel %vm630_vm2, %v16569_v56, %v1890_v24  ;;  %v7911_v27 = vunpack.i.l.bf16 %v16570_v5  ;;  %v1326_v28 = vsel %vm1316_vm3, %v16572_v32, %v7827_v19  ;;  %v7992_v46 = vunpack.i.h.bf16 %v16566_v58  ;;  %v16575_v56 = vld [vmem:[#allocation120_spill] sm:$0xff] }
 0x165   : > { %16567 = vst [vmem:[#allocation21_spill] sm:$0xff] %v11563_v51  ;;  %2851 = vmatprep.mubr.f32.mxu0 %v1487_v44  ;;  %v8072_v24 = vunpack.i.h.bf16 %v16564_v35  ;;  %v1358_v57 = vsel %vm1348_vm4, %v1326_v28, %v7907_v63  ;;  %v1424_v9 = vsel %vm1316_vm3, %v16573_v61, %v8071_v42  ;;  %v8152_v40 = vunpack.i.h.bf16 %v11139_v2  ;;  %v16576_v44 = vld [vmem:[#allocation117_spill] sm:$0xff]  ;;  %v16577_v42 = vld [vmem:[#allocation23_spill] sm:$0xff]  ;;  %v16661_v25 = vld [vmem:[#allocation72_spill] sm:$0xff] }
 0x166   : > { %v11576_v38 = vpop.permute.xlu0 %8294  ;;  %8584 = vrot.lane.b32.xlu1 %v8583_v47, %s9276_s19  ;;  %v1391_v19 = vsel %vm1380_vm5, %v1358_v57, %v7991_v23  ;;  %v8588_v32 = vpack.i.bf16 %v16576_v44, %v16575_v56  ;;  %v1456_v58 = vsel %vm1348_vm4, %v1424_v9, %v8151_v37  ;;  %v8231_v35 = vunpack.i.l.bf16 %v11338_v39  ;;  %v16579_v57 = vld [vmem:[#allocation128_spill] sm:$0xff] }
 0x167   : > { %16571 = vst [vmem:[#allocation73_spill] sm:$0xff] %v11576_v38  ;;  %v1488_v63 = vsel %vm1380_vm5, %v1456_v58, %v8227_v48  ;;  %v1327_v2 = vsel %vm1316_vm3, %v16577_v42, %v7831_v33  ;;  %v7832_v28 = vunpack.i.h.bf16 %v16568_v16  ;;  %v8603_v37 = vpack.i.bf16 %v16579_v57, %v10518_v60  ;;  %v16581_v58 = vld [vmem:[#allocation37_spill] sm:$0xff]  ;;  %v16582_v16 = vld [vmem:[#allocation152_spill] sm:$0xff]  ;;  %v16678_v38 = vld [vmem:[#allocation71_spill] sm:$0xff] }
 0x168   : > { %2230 = vrot.lane.b32.xlu0 %v11572_v10, %s9275_s18  ;;  %v11591_v47 = vpop.permute.xlu1 %8309  ;;  %2852 = vmatmul.mubr.f32.gmra.mrb[20].mxu0 %v1391_v19  ;;  %v1359_v23 = vsel %vm1348_vm4, %v1327_v2, %v7911_v27  ;;  %v7912_v9 = vunpack.i.h.bf16 %v16570_v5  ;;  %v16580_v19 = vld [vmem:[#allocation134_spill] sm:$0xff]  ;;  %v1425_v33 = vsel %vm1316_vm3, %v16581_v58, %v8072_v24  ;;  %v7996_v42 = vunpack.i.l.bf16 %v16582_v16  ;;  %v16588_v58 = vld [vmem:[#allocation116_spill] sm:$0xff] }
 0x169   : > { %16574 = vst [vmem:[#allocation95_spill] sm:$0xff] %v11591_v47  ;;  %2856 = vmatprep.mubr.f32.mxu0 %v1488_v63  ;;  %v8076_v62 = vunpack.i.l.bf16 %v16580_v19  ;;  %v1392_v48 = vsel %vm1380_vm5, %v1359_v23, %v7992_v46  ;;  %v16583_v47 = vld [vmem:[#allocation207_spill] sm:$0xff]  ;;  %v16585_v27 = vld [vmem:[#allocation130_spill] sm:$0xff]  ;;  %v16586_v63 = vld [vmem:[#allocation125_spill] sm:$0xff]  ;;  %v1457_v5 = vsel %vm1348_vm4, %v1425_v33, %v8152_v40  ;;  %v8232_v57 = vunpack.i.h.bf16 %v11338_v39 }
 0x16a   : > { %v11602_v61 = vpop.permute.xlu0 %8304  ;;  %8594 = vrot.lane.b32.xlu1 %v8593_v4, %s9276_s19  ;;  %v8598_v2 = vpack.i.bf16 %v16586_v63, %v16585_v27  ;;  %v1489_v46 = vsel %vm1380_vm5, %v1457_v5, %v8231_v35  ;;  %v16587_v23 = vld [vmem:[#allocation100_spill] sm:$0xff]  ;;  %v7916_v60 = vunpack.i.l.bf16 %v16588_v58  ;;  %v16591_v63 = vld [vmem:[#allocation133_spill] sm:$0xff]  ;;  %v16592_v27 = vld [vmem:[#allocation79_spill] sm:$0xff]  ;;  %v7997_v39 = vunpack.i.h.bf16 %v16582_v16 }
 0x16b   : > { %16578 = vst [vmem:[#allocation109_spill] sm:$0xff] %v11602_v61  ;;  %v8156_v61 = vunpack.i.l.bf16 %v16583_v47  ;;  %v7836_v24 = vunpack.i.l.bf16 %v16587_v23  ;;  %v8613_v40 = vpack.i.bf16 %v16592_v27, %v16591_v63  ;;  %v16593_v33 = vld [vmem:[#allocation34_spill] sm:$0xff] }
 0x16c   : > { %8589 = vrot.lane.b32.xlu0 %v8588_v32, %s9276_s19  ;;  %v11616_v4 = vpop.permute.xlu1 %8319  ;;  %2857 = vmatmul.mubr.f32.gmra.mrb[22].mxu0 %v1392_v48  ;;  %v16590_v32 = vld [vmem:[#allocation25_spill] sm:$0xff]  ;;  %v8077_v48 = vunpack.i.h.bf16 %v16580_v19  ;;  %v1426_v5 = vsel %vm1316_vm3, %v16593_v33, %v8076_v62  ;;  %v8236_v19 = vunpack.i.l.bf16 %v11378_v12  ;;  %v7837_v62 = vunpack.i.h.bf16 %v16587_v23  ;;  %v16603_v23 = vld [vmem:[#allocation35_spill] sm:$0xff] }
 0x16d   : > { %16584 = vst [vmem:[#allocation10_spill] sm:$0xff] %v11616_v4  ;;  %2861 = vmatprep.mubr.f32.mxu0 %v1489_v46  ;;  %v1328_v4 = vsel %vm1316_vm3, %v16590_v32, %v7832_v28  ;;  %v16595_v46 = vld [vmem:[#allocation135_spill] sm:$0xff]  ;;  %v1458_v16 = vsel %vm1348_vm4, %v1426_v5, %v8156_v61  ;;  %v16600_v33 = vld [vmem:[#allocation141_spill] sm:$0xff]  ;;  %v16601_v5 = vld [vmem:[#allocation144_spill] sm:$0xff] }
 0x16e   : > { %v11625_v51 = vpop.permute.xlu0 %8314  ;;  %8604 = vrot.lane.b32.xlu1 %v8603_v37, %s9276_s19  ;;  %v1360_v35 = vsel %vm1348_vm4, %v1328_v4, %v7912_v9  ;;  %v16596_v32 = vld [vmem:[#allocation131_spill] sm:$0xff]  ;;  %v1490_v9 = vsel %vm1380_vm5, %v1458_v16, %v8232_v57  ;;  %v16604_v16 = vld [vmem:[#allocation206_spill] sm:$0xff] }
 0x16f   : > { %16589 = vst [vmem:[#allocation12_spill] sm:$0xff] %v11625_v51  ;;  %v8157_v51 = vunpack.i.h.bf16 %v16583_v47  ;;  %v1393_v28 = vsel %vm1380_vm5, %v1360_v35, %v7996_v42  ;;  %v8608_v27 = vpack.i.bf16 %v16596_v32, %v16595_v46  ;;  %v7917_v47 = vunpack.i.h.bf16 %v16588_v58  ;;  %v16598_v42 = vld [vmem:[#allocation24_spill] sm:$0xff]  ;;  %v16599_v35 = vld [vmem:[#allocation142_spill] sm:$0xff]  ;;  %v16608_v32 = vld [vmem:[#allocation99_spill] sm:$0xff] }
 0x170   : > { %8599 = vrot.lane.b32.xlu0 %v8598_v2, %s9276_s19  ;;  %v11639_v37 = vpop.permute.xlu1 %8329  ;;  %2862 = vmatmul.mubr.f32.gmra.mrb[24].mxu0 %v1393_v28  ;;  %v1329_v2 = vsel %vm1316_vm3, %v16598_v42, %v7836_v24  ;;  %v8623_v61 = vpack.i.bf16 %v16600_v33, %v16599_v35  ;;  %v16602_v28 = vld [vmem:[#allocation184_spill] sm:$0xff]  ;;  %v1427_v58 = vsel %vm1316_vm3, %v16603_v23, %v8077_v48  ;;  %v16607_v42 = vld [vmem:[#allocation138_spill] sm:$0xff]  ;;  %v7841_v46 = vunpack.i.l.bf16 %v16608_v32 }
 0x171   : > { %16594 = vst [vmem:[#allocation9_spill] sm:$0xff] %v11639_v37  ;;  %2866 = vmatprep.mubr.f32.mxu0 %v1490_v9  ;;  %v8001_v37 = vunpack.i.l.bf16 %v16601_v5  ;;  %v8081_v63 = vunpack.i.l.bf16 %v16602_v28  ;;  %v1361_v57 = vsel %vm1348_vm4, %v1329_v2, %v7916_v60  ;;  %v16606_v9 = vld [vmem:[#allocation148_spill] sm:$0xff]  ;;  %v1459_v35 = vsel %vm1348_vm4, %v1427_v58, %v8157_v51  ;;  %v16609_v2 = vld [vmem:[#allocation115_spill] sm:$0xff] }
 0x172   : > { %v11649_v4 = vpop.permute.xlu0 %8324  ;;  %8614 = vrot.lane.b32.xlu1 %v8613_v40, %s9276_s19  ;;  %v1394_v24 = vsel %vm1380_vm5, %v1361_v57, %v7997_v39  ;;  %v8618_v33 = vpack.i.bf16 %v16607_v42, %v16606_v9  ;;  %v8237_v60 = vunpack.i.h.bf16 %v11378_v12  ;;  %v1491_v48 = vsel %vm1380_vm5, %v1459_v35, %v8236_v19  ;;  %v16612_v57 = vld [vmem:[#allocation155_spill] sm:$0xff]  ;;  %v16614_v19 = vld [vmem:[#allocation45_spill] sm:$0xff]  ;;  %v16654_v9 = vld [vmem:[#allocation92_spill] sm:$0xff] }
 0x173   : > { %16597 = vst [vmem:[#allocation185_spill] sm:$0xff] %v11649_v4  ;;  %v8161_v4 = vunpack.i.l.bf16 %v16604_v16  ;;  %v7921_v23 = vunpack.i.l.bf16 %v16609_v2  ;;  %v8002_v58 = vunpack.i.h.bf16 %v16601_v5  ;;  %v8082_v12 = vunpack.i.h.bf16 %v16602_v28 }
 0x174   : > { %8609 = vrot.lane.b32.xlu0 %v8608_v27, %s9276_s19  ;;  %v11663_v40 = vpop.permute.xlu1 %8339  ;;  %2867 = vmatmul.mubr.f32.gmra.mrb[26].mxu0 %v1394_v24  ;;  %v16611_v27 = vld [vmem:[#allocation29_spill] sm:$0xff]  ;;  %v1428_v35 = vsel %vm1316_vm3, %v16614_v19, %v8081_v63  ;;  %v8241_v28 = vunpack.i.l.bf16 %v11369_v0  ;;  %v16621_v19 = vld [vmem:[#allocation162_spill] sm:$0xff] }
 0x175   : > { %16605 = vst [vmem:[#allocation13_spill] sm:$0xff] %v11663_v40  ;;  %2871 = vmatprep.mubr.f32.mxu0 %v1491_v48  ;;  %v1330_v39 = vsel %vm1316_vm3, %v16611_v27, %v7837_v62  ;;  %v16613_v40 = vld [vmem:[#allocation154_spill] sm:$0xff]  ;;  %v16616_v48 = vld [vmem:[#allocation157_spill] sm:$0xff]  ;;  %v1460_v5 = vsel %vm1348_vm4, %v1428_v35, %v8161_v4  ;;  %v7922_v35 = vunpack.i.h.bf16 %v16609_v2 }
 0x176   : > { %v11673_v21 = vpop.permute.xlu0 %8334  ;;  %8624 = vrot.lane.b32.xlu1 %v8623_v61, %s9276_s19  ;;  %v8633_v51 = vpack.i.bf16 %v16613_v40, %v16612_v57  ;;  %v1362_v24 = vsel %vm1348_vm4, %v1330_v39, %v7917_v47  ;;  %v16617_v27 = vld [vmem:[#allocation153_spill] sm:$0xff]  ;;  %v1492_v47 = vsel %vm1380_vm5, %v1460_v5, %v8237_v60  ;;  %v16618_v39 = vld [vmem:[#allocation31_spill] sm:$0xff]  ;;  %v16623_v5 = vld [vmem:[#allocation46_spill] sm:$0xff] }
 0x177   : > { %16610 = vst [vmem:[#allocation136_spill] sm:$0xff] %v11673_v21  ;;  %v8162_v21 = vunpack.i.h.bf16 %v16604_v16  ;;  %v1395_v62 = vsel %vm1380_vm5, %v1362_v24, %v8001_v37  ;;  %v8628_v40 = vpack.i.bf16 %v16617_v27, %v16616_v48  ;;  %v1331_v63 = vsel %vm1316_vm3, %v16618_v39, %v7841_v46  ;;  %v16620_v24 = vld [vmem:[#allocation163_spill] sm:$0xff] }
 0x178   : > { %8619 = vrot.lane.b32.xlu0 %v8618_v33, %s9276_s19  ;;  %v11687_v61 = vpop.permute.xlu1 %8349  ;;  %2872 = vmatmul.mubr.f32.gmra.mrb[28].mxu0 %v1395_v62  ;;  %v7842_v16 = vunpack.i.h.bf16 %v16608_v32  ;;  %v1363_v37 = vsel %vm1348_vm4, %v1331_v63, %v7921_v23  ;;  %v8643_v4 = vpack.i.bf16 %v16621_v19, %v16620_v24  ;;  %v16622_v62 = vld [vmem:[#allocation139_spill] sm:$0xff]  ;;  %v1429_v46 = vsel %vm1316_vm3, %v16623_v5, %v8082_v12  ;;  %v16624_v32 = vld [vmem:[#allocation81_spill] sm:$0xff]  ;;  %v16626_v23 = vld [vmem:[#allocation166_spill] sm:$0xff] }
 0x179   : > { %16615 = vst [vmem:[#allocation91_spill] sm:$0xff] %v11687_v61  ;;  %2876 = vmatprep.mubr.f32.mxu0 %v1492_v47  ;;  %v8086_v57 = vunpack.i.l.bf16 %v16622_v62  ;;  %v1396_v60 = vsel %vm1380_vm5, %v1363_v37, %v8002_v58  ;;  %v8006_v39 = vunpack.i.l.bf16 %v16624_v32  ;;  %v16627_v47 = vld [vmem:[#allocation160_spill] sm:$0xff]  ;;  %v1461_v2 = vsel %vm1348_vm4, %v1429_v46, %v8162_v21  ;;  %v16628_v37 = vld [vmem:[#allocation102_spill] sm:$0xff] }
 0x17a   : > { %v11698_v33 = vpop.permute.xlu0 %8344  ;;  %8634 = vrot.lane.b32.xlu1 %v8633_v51, %s9276_s19  ;;  %v8638_v63 = vpack.i.bf16 %v16627_v47, %v16626_v23  ;;  %v8242_v19 = vunpack.i.h.bf16 %v11369_v0  ;;  %v1493_v58 = vsel %vm1380_vm5, %v1461_v2, %v8241_v28  ;;  %v7846_v12 = vunpack.i.l.bf16 %v16628_v37  ;;  %v16629_v5 = vld [vmem:[#allocation68_spill] sm:$0xff]  ;;  %v16631_v46 = vld [vmem:[#allocation42_spill] sm:$0xff]  ;;  %v16644_v23 = vld [vmem:[#allocation67_spill] sm:$0xff] }
 0x17b   : > { %16619 = vst [vmem:[#allocation112_spill] sm:$0xff] %v11698_v33  ;;  %v16625_v33 = vld [vmem:[#allocation209_spill] sm:$0xff]  ;;  %v7926_v24 = vunpack.i.l.bf16 %v16629_v5  ;;  %v8653_v21 = vpack.i.bf16 %v11269_v30, %v11234_v45  ;;  %v8007_v0 = vunpack.i.h.bf16 %v16624_v32  ;;  %v1430_v2 = vsel %vm1316_vm3, %v16631_v46, %v8086_v57 }
 0x17c   : > { %v8166_v27 = vunpack.i.l.bf16 %v16625_v33  ;;  %8629 = vrot.lane.b32.xlu0 %v8628_v40, %s9276_s19  ;;  %v11712_v51 = vpop.permute.xlu1 %8359  ;;  %2877 = vmatmul.mubr.f32.gmra.mrb[30].mxu0 %v1396_v60  ;;  %v16630_v40 = vld [vmem:[#allocation32_spill] sm:$0xff]  ;;  %v8087_v60 = vunpack.i.h.bf16 %v16622_v62  ;;  %v8167_v47 = vunpack.i.h.bf16 %v16625_v33  ;;  %v8246_v62 = vunpack.i.l.bf16 %v11410_v3  ;;  %v16634_v33 = vld [vmem:[#allocation33_spill] sm:$0xff] }
 0x17d   : > { %2881 = vmatprep.mubr.f32.mxu0 %v1493_v58  ;;  %v1332_v42 = vsel %vm1316_vm3, %v16630_v40, %v7842_v16  ;;  %v16633_v58 = vld [vmem:[#allocation172_spill] sm:$0xff]  ;;  %v7847_v57 = vunpack.i.h.bf16 %v16628_v37 }
 0x17e   : > { %v11721_v48 = vpop.permute.xlu0 %8354  ;;  %8644 = vrot.lane.b32.xlu1 %v8643_v4, %s9276_s19  ;;  %v1364_v28 = vsel %vm1348_vm4, %v1332_v42, %v7922_v35  ;;  %v8648_v40 = vpack.i.bf16 %v10810_v8, %v16633_v58  ;;  %v1462_v32 = vsel %vm1348_vm4, %v1430_v2, %v8166_v27  ;;  %v16636_v2 = vld [vmem:[#allocation43_spill] sm:$0xff]  ;;  %v16638_v37 = vld [vmem:[#allocation208_spill] sm:$0xff] }
 0x17f   : > { %v1397_v16 = vsel %vm1380_vm5, %v1364_v28, %v8006_v39  ;;  %v1494_v42 = vsel %vm1380_vm5, %v1462_v32, %v8242_v19  ;;  %v1333_v39 = vsel %vm1316_vm3, %v16634_v33, %v7846_v12  ;;  %v16635_v28 = vld [vmem:[#allocation189_spill] sm:$0xff]  ;;  %v16637_v19 = vld [vmem:[#allocation80_spill] sm:$0xff]  ;;  %v8171_v8 = vunpack.i.l.bf16 %v16638_v37 }
 0x180   : > { %8639 = vrot.lane.b32.xlu0 %v8638_v63, %s9276_s19  ;;  %v11735_v4 = vpop.permute.xlu1 %8369  ;;  %2882 = vmatmul.mubr.f32.gmra.mrb[32].mxu0 %v1397_v16  ;;  %v7927_v63 = vunpack.i.h.bf16 %v16629_v5  ;;  %v8091_v46 = vunpack.i.l.bf16 %v16635_v28  ;;  %v1365_v27 = vsel %vm1348_vm4, %v1333_v39, %v7926_v24  ;;  %v1431_v16 = vsel %vm1316_vm3, %v16636_v2, %v8087_v60  ;;  %v16640_v33 = vld [vmem:[#allocation101_spill] sm:$0xff]  ;;  %v16642_v2 = vld [vmem:[#allocation127_spill] sm:$0xff] }
 0x181   : > { %16632 = vst [vmem:[#allocation15_spill] sm:$0xff] %v11735_v4  ;;  %2886 = vmatprep.mubr.f32.mxu0 %v1494_v42  ;;  %v8011_v32 = vunpack.i.l.bf16 %v16637_v19  ;;  %v1398_v42 = vsel %vm1380_vm5, %v1365_v27, %v8007_v0  ;;  %v1463_v12 = vsel %vm1348_vm4, %v1431_v16, %v8167_v47  ;;  %v8247_v5 = vunpack.i.h.bf16 %v11410_v3  ;;  %v16645_v27 = vld [vmem:[#allocation52_spill] sm:$0xff] }
 0x182   : > { %v11744_v35 = vpop.permute.xlu0 %8364  ;;  %8654 = vrot.lane.b32.xlu1 %v8653_v21, %s9276_s19  ;;  %v1495_v24 = vsel %vm1380_vm5, %v1463_v12, %v8246_v62  ;;  %v7851_v39 = vunpack.i.l.bf16 %v16640_v33  ;;  %v7931_v0 = vunpack.i.l.bf16 %v16644_v23  ;;  %v8092_v47 = vunpack.i.h.bf16 %v16635_v28  ;;  %v16646_v12 = vld [vmem:[#allocation126_spill] sm:$0xff] }
 0x183   : > { %v1432_v62 = vsel %vm1316_vm3, %v16645_v27, %v8091_v46  ;;  %v8012_v16 = vunpack.i.h.bf16 %v16637_v19  ;;  %v8251_v28 = vunpack.i.l.bf16 %v11401_v22  ;;  %v16649_v19 = vld [vmem:[#allocation124_spill] sm:$0xff] }
 0x184   : > { %8649 = vrot.lane.b32.xlu0 %v8648_v40, %s9276_s19  ;;  %v11757_v21 = vpop.permute.xlu1 %8379  ;;  %2887 = vmatmul.mubr.f32.gmra.mrb[34].mxu0 %v1398_v42  ;;  %v16643_v40 = vld [vmem:[#allocation41_spill] sm:$0xff]  ;;  %v8172_v42 = vunpack.i.h.bf16 %v16638_v37  ;;  %v16650_v37 = vld [vmem:[#allocation38_spill] sm:$0xff] }
 0x185   : > { %16639 = vst [vmem:[#allocation18_spill] sm:$0xff] %v11757_v21  ;;  %2891 = vmatprep.mubr.f32.mxu0 %v1495_v24  ;;  %v1334_v58 = vsel %vm1316_vm3, %v16643_v40, %v7847_v57  ;;  %v1464_v40 = vsel %vm1348_vm4, %v1432_v62, %v8171_v8  ;;  %v1335_v27 = vsel %vm1316_vm3, %v16650_v37, %v7851_v39  ;;  %v8252_v37 = vunpack.i.h.bf16 %v11401_v22  ;;  %v16659_v21 = vld [vmem:[#allocation145_spill] sm:$0xff] }
 0x186   : > { %v11764_v60 = vpop.permute.xlu0 %8374  ;;  %2358 = vrot.lane.b32.xlu1 %v16642_v2, %s9277_s23  ;;  %v1366_v3 = vsel %vm1348_vm4, %v1334_v58, %v7927_v63  ;;  %v1496_v58 = vsel %vm1380_vm5, %v1464_v40, %v8247_v5  ;;  %v7852_v63 = vunpack.i.h.bf16 %v16640_v33  ;;  %v1367_v62 = vsel %vm1348_vm4, %v1335_v27, %v7931_v0  ;;  %v16653_v40 = vld [vmem:[#allocation165_spill] sm:$0xff]  ;;  %v16657_v27 = vld [vmem:[#allocation104_spill] sm:$0xff] }
 0x187   : > { %16641 = vst [vmem:[#allocation93_spill] sm:$0xff] %v11764_v60  ;;  %v1399_v57 = vsel %vm1380_vm5, %v1366_v3, %v8011_v32  ;;  %v7932_v32 = vunpack.i.h.bf16 %v16644_v23  ;;  %v16651_v3 = vld [vmem:[#allocation197_spill] sm:$0xff]  ;;  %v8016_v33 = vunpack.i.l.bf16 %v16653_v40  ;;  %v1400_v39 = vsel %vm1380_vm5, %v1367_v62, %v8012_v16  ;;  %v16660_v60 = vld [vmem:[#allocation40_spill] sm:$0xff]  ;;  %v16662_v62 = vld [vmem:[#allocation50_spill] sm:$0xff] }
 0x188   : > { %2356 = vrot.lane.b32.xlu0 %v16646_v12, %s9277_s23  ;;  %v11779_v24 = vpop.permute.xlu1 %8389  ;;  %2892 = vmatmul.mubr.f32.gmra.mrb[36].mxu0 %v1399_v57  ;;  %v8096_v8 = vunpack.i.l.bf16 %v16651_v3  ;;  %v16652_v57 = vld [vmem:[#allocation53_spill] sm:$0xff]  ;;  %v7936_v16 = vunpack.i.l.bf16 %v16661_v25 }
 0x189   : > { %16647 = vst [vmem:[#allocation6_spill] sm:$0xff] %v11779_v24  ;;  %2896 = vmatprep.mubr.f32.mxu0 %v1496_v58  ;;  %v1433_v5 = vsel %vm1316_vm3, %v16652_v57, %v8092_v47  ;;  %v8176_v24 = vunpack.i.l.bf16 %v16654_v9  ;;  %v7856_v47 = vunpack.i.l.bf16 %v16657_v27 }
 0x18a   : > { %v11786_v46 = vpop.permute.xlu0 %8384  ;;  %2362 = vrot.lane.b32.xlu1 %v16649_v19, %s9277_s23  ;;  %v1465_v23 = vsel %vm1348_vm4, %v1433_v5, %v8172_v42  ;;  %v8097_v42 = vunpack.i.h.bf16 %v16651_v3  ;;  %v8017_v5 = vunpack.i.h.bf16 %v16653_v40  ;;  %v8256_v3 = vunpack.i.l.bf16 %v11442_v54  ;;  %v16667_v40 = vld [vmem:[#allocation39_spill] sm:$0xff] }
 0x18b   : > { %16648 = vst [vmem:[#allocation179_spill] sm:$0xff] %v11786_v46  ;;  %v16655_v46 = vld [vmem:[#allocation123_spill] sm:$0xff]  ;;  %v1497_v0 = vsel %vm1380_vm5, %v1465_v23, %v8251_v28  ;;  %v1434_v28 = vsel %vm1316_vm3, %v16662_v62, %v8096_v8  ;;  %v7857_v8 = vunpack.i.h.bf16 %v16657_v27  ;;  %v1337_v62 = vsel %vm1316_vm3, %v16667_v40, %v7856_v47 }
 0x18c   : > { %2360 = vrot.lane.b32.xlu0 %v16655_v46, %s9277_s23  ;;  %v11801_v58 = vpop.permute.xlu1 %8399  ;;  %2897 = vmatmul.mubr.f32.gmra.mrb[38].mxu0 %v1400_v39  ;;  %v8177_v39 = vunpack.i.h.bf16 %v16654_v9  ;;  %v16663_v23 = vld [vmem:[#allocation143_spill] sm:$0xff]  ;;  %v16666_v9 = vld [vmem:[#allocation140_spill] sm:$0xff]  ;;  %v8257_v40 = vunpack.i.h.bf16 %v11442_v54 }
 0x18d   : > { %16656 = vst [vmem:[#allocation19_spill] sm:$0xff] %v11801_v58  ;;  %2901 = vmatprep.mubr.f32.mxu0 %v1497_v0  ;;  %v1336_v58 = vsel %vm1316_vm3, %v16660_v60, %v7852_v63  ;;  %v1466_v63 = vsel %vm1348_vm4, %v1434_v28, %v8176_v24  ;;  %v1369_v28 = vsel %vm1348_vm4, %v1337_v62, %v7936_v16  ;;  %v16674_v62 = vld [vmem:[#allocation103_spill] sm:$0xff] }
 0x18e   : > { %v11808_v57 = vpop.permute.xlu0 %8394  ;;  %2366 = vrot.lane.b32.xlu1 %v16659_v21, %s9277_s23  ;;  %v1368_v22 = vsel %vm1348_vm4, %v1336_v58, %v7932_v32  ;;  %v1498_v32 = vsel %vm1380_vm5, %v1466_v63, %v8252_v37  ;;  %v16670_v63 = vld [vmem:[#allocation84_spill] sm:$0xff]  ;;  %v1402_v47 = vsel %vm1380_vm5, %v1369_v28, %v8017_v5  ;;  %v7941_v5 = vunpack.i.l.bf16 %v16678_v38  ;;  %v16679_v28 = vld [vmem:[#allocation62_spill] sm:$0xff] }
 0x18f   : > { %16658 = vst [vmem:[#allocation132_spill] sm:$0xff] %v11808_v57  ;;  %v1401_v60 = vsel %vm1380_vm5, %v1368_v22, %v8016_v33  ;;  %v7937_v33 = vunpack.i.h.bf16 %v16661_v25  ;;  %v16668_v22 = vld [vmem:[#allocation194_spill] sm:$0xff]  ;;  %v8021_v27 = vunpack.i.l.bf16 %v16670_v63  ;;  %v16672_v57 = vld [vmem:[#allocation137_spill] sm:$0xff] }
 0x190   : > { %2364 = vrot.lane.b32.xlu0 %v16663_v23, %s9277_s23  ;;  %v11823_v0 = vpop.permute.xlu1 %8409  ;;  %2902 = vmatmul.mubr.f32.gmra.mrb[40].mxu0 %v1401_v60  ;;  %v8101_v24 = vunpack.i.l.bf16 %v16668_v22  ;;  %v16669_v60 = vld [vmem:[#allocation51_spill] sm:$0xff] }
 0x191   : > { %16664 = vst [vmem:[#allocation7_spill] sm:$0xff] %v11823_v0  ;;  %2906 = vmatprep.mubr.f32.mxu0 %v1498_v32  ;;  %v1435_v37 = vsel %vm1316_vm3, %v16669_v60, %v8097_v42  ;;  %v16671_v0 = vld [vmem:[#allocation210_spill] sm:$0xff]  ;;  %v7861_v42 = vunpack.i.l.bf16 %v16674_v62 }
 0x192   : > { %v11830_v58 = vpop.permute.xlu0 %8404  ;;  %2370 = vrot.lane.b32.xlu1 %v16666_v9, %s9277_s23  ;;  %v1467_v25 = vsel %vm1348_vm4, %v1435_v37, %v8177_v39  ;;  %v16676_v9 = vld [vmem:[#allocation150_spill] sm:$0xff]  ;;  %v8102_v39 = vunpack.i.h.bf16 %v16668_v22  ;;  %v8022_v37 = vunpack.i.h.bf16 %v16670_v63  ;;  %v8261_v22 = vunpack.i.l.bf16 %v11433_v53  ;;  %v16683_v63 = vld [vmem:[#allocation44_spill] sm:$0xff] }
 0x193   : > { %16665 = vst [vmem:[#allocation111_spill] sm:$0xff] %v11830_v58  ;;  %v8181_v58 = vunpack.i.l.bf16 %v16671_v0  ;;  %v1499_v16 = vsel %vm1380_vm5, %v1467_v25, %v8256_v3  ;;  %v1436_v3 = vsel %vm1316_vm3, %v16679_v28, %v8101_v24  ;;  %v16680_v25 = vld [vmem:[#allocation149_spill] sm:$0xff]  ;;  %v7862_v24 = vunpack.i.h.bf16 %v16674_v62 }
 0x194   : > { %2368 = vrot.lane.b32.xlu0 %v16672_v57, %s9277_s23  ;;  %v11845_v32 = vpop.permute.xlu1 %8419  ;;  %2907 = vmatmul.mubr.f32.gmra.mrb[42].mxu0 %v1402_v47  ;;  %v16677_v57 = vld [vmem:[#allocation49_spill] sm:$0xff]  ;;  %v8182_v47 = vunpack.i.h.bf16 %v16671_v0  ;;  %v16682_v0 = vld [vmem:[#allocation147_spill] sm:$0xff]  ;;  %v1339_v28 = vsel %vm1316_vm3, %v16683_v63, %v7861_v42  ;;  %v8262_v63 = vunpack.i.h.bf16 %v11433_v53 }
 0x195   : > { %16673 = vst [vmem:[#allocation30_spill] sm:$0xff] %v11845_v32  ;;  %2911 = vmatprep.mubr.f32.mxu0 %v1499_v16  ;;  %v1338_v32 = vsel %vm1316_vm3, %v16677_v57, %v7857_v8  ;;  %v1468_v8 = vsel %vm1348_vm4, %v1436_v3, %v8181_v58  ;;  %v1371_v3 = vsel %vm1348_vm4, %v1339_v28, %v7941_v5  ;;  %v16689_v28 = vld [vmem:[#allocation106_spill] sm:$0xff] }
 0x196   : > { %v11852_v60 = vpop.permute.xlu0 %8414  ;;  %2374 = vrot.lane.b32.xlu1 %v16676_v9, %s9277_s23  ;;  %v1370_v54 = vsel %vm1348_vm4, %v1338_v32, %v7937_v33  ;;  %v1500_v33 = vsel %vm1380_vm5, %v1468_v8, %v8257_v40  ;;  %v16686_v8 = vld [vmem:[#allocation170_spill] sm:$0xff]  ;;  %v1404_v42 = vsel %vm1380_vm5, %v1371_v3, %v8022_v37  ;;  %v16693_v37 = vld [vmem:[#allocation121_spill] sm:$0xff] }
 0x197   : > { %16675 = vst [vmem:[#allocation193_spill] sm:$0xff] %v11852_v60  ;;  %v1403_v57 = vsel %vm1380_vm5, %v1370_v54, %v8021_v27  ;;  %v7942_v27 = vunpack.i.h.bf16 %v16678_v38  ;;  %v16684_v54 = vld [vmem:[#allocation161_spill] sm:$0xff]  ;;  %v8026_v62 = vunpack.i.l.bf16 %v16686_v8  ;;  %v16687_v60 = vld [vmem:[#allocation110_spill] sm:$0xff]  ;;  %v11902_v21 = vpop.f32.mrb[0].mxu1 }
 0x198   : > { %2372 = vrot.lane.b32.xlu0 %v16680_v25, %s9277_s23  ;;  %v11867_v16 = vpop.permute.xlu1 %8429  ;;  %2912 = vmatmul.mubr.f32.gmra.mrb[44].mxu0 %v1403_v57  ;;  %v8106_v58 = vunpack.i.l.bf16 %v16684_v54  ;;  %v16685_v57 = vld [vmem:[#allocation60_spill] sm:$0xff]  ;;  %v16688_v9 = vld [vmem:[#allocation146_spill] sm:$0xff]  ;;  %16692 = vst [vmem:[#allocation181_spill] sm:$0xff] %v11902_v21  ;;  %v8107_v53 = vunpack.i.h.bf16 %v16684_v54 }
 0x199   : > { %2916 = vmatprep.mubr.f32.mxu0 %v1500_v33  ;;  %v1437_v40 = vsel %vm1316_vm3, %v16685_v57, %v8102_v39  ;;  %v7866_v39 = vunpack.i.l.bf16 %v16689_v28 }
 0x19a   : > { %v11874_v32 = vpop.permute.xlu0 %8424  ;;  %2378 = vrot.lane.b32.xlu1 %v16682_v0, %s9277_s23  ;;  %v1469_v38 = vsel %vm1348_vm4, %v1437_v40, %v8182_v47  ;;  %v16690_v0 = vld [vmem:[#allocation159_spill] sm:$0xff]  ;;  %v7946_v47 = vunpack.i.l.bf16 %v16693_v37 }
 0x19b   : > { %16681 = vst [vmem:[#allocation8_spill] sm:$0xff] %v11874_v32  ;;  %v8186_v32 = vunpack.i.l.bf16 %v16687_v60  ;;  %v1501_v5 = vsel %vm1380_vm5, %v1469_v38, %v8261_v22  ;;  %v16694_v22 = vld [vmem:[#allocation59_spill] sm:$0xff]  ;;  %v8027_v38 = vunpack.i.h.bf16 %v16686_v8 }
 0x19c   : > { %2376 = vrot.lane.b32.xlu0 %v16688_v9, %s9277_s23  ;;  %v11889_v33 = vpop.permute.xlu1 %8439  ;;  %2917 = vmatmul.mubr.f32.gmra.mrb[46].mxu0 %v1404_v42  ;;  %v16691_v9 = vld [vmem:[#allocation48_spill] sm:$0xff]  ;;  %v1438_v40 = vsel %vm1316_vm3, %v16694_v22, %v8106_v58  ;;  %v11909_v42 = vpop.f32.mrb[1].mxu1  ;;  %v7867_v58 = vunpack.i.h.bf16 %v16689_v28  ;;  %v16699_v8 = vld [vmem:[#allocation47_spill] sm:$0xff] }
 0x19d   : > { %2921 = vmatprep.mubr.f32.mxu0 %v1501_v5  ;;  %v1340_v25 = vsel %vm1316_vm3, %v16691_v9, %v7862_v24  ;;  %16695 = vst [vmem:[#allocation28_spill] sm:$0xff] %v11909_v42  ;;  %v8187_v5 = vunpack.i.h.bf16 %v16687_v60  ;;  %v1470_v54 = vsel %vm1348_vm4, %v1438_v40, %v8186_v32  ;;  %v16698_v60 = vld [vmem:[#allocation156_spill] sm:$0xff]  ;;  %v11928_v21 = vpop.f32.mrb[2].mxu1  ;;  %v7947_v32 = vunpack.i.h.bf16 %v16693_v37  ;;  %v16706_v42 = vld [vmem:[#allocation151_spill] sm:$0xff] }
 0x19e   : > { %v11896_v57 = vpop.permute.xlu0 %8434  ;;  %2382 = vrot.lane.b32.xlu1 %v16690_v0, %s9277_s23  ;;  %v1372_v3 = vsel %vm1348_vm4, %v1340_v25, %v7942_v27  ;;  %v16696_v0 = vld [vmem:[#allocation158_spill] sm:$0xff]  ;;  %v8266_v25 = vunpack.i.l.bf16 %v11474_v34  ;;  %v1502_v27 = vsel %vm1380_vm5, %v1470_v54, %v8262_v63  ;;  %16700 = vst [vmem:[#allocation97_spill] sm:$0xff] %v11928_v21 }
 0x19f   : > { %v1405_v24 = vsel %vm1380_vm5, %v1372_v3, %v8026_v62  ;;  %v16701_v62 = vld [vmem:[#allocation200_spill] sm:$0xff]  ;;  %v16702_v63 = vld [vmem:[#allocation58_spill] sm:$0xff] }
 0x1a0   : > { %2380 = vrot.lane.b32.xlu0 %v16696_v0, %s9277_s23  ;;  %v11915_v9 = vpop.permute.xlu1 %8449  ;;  %2922 = vmatmul.mubr.f32.gmra.mrb[48].mxu0 %v1405_v24  ;;  %v1341_v0 = vsel %vm1316_vm3, %v16699_v8, %v7866_v39  ;;  %v8111_v3 = vunpack.i.l.bf16 %v16701_v62  ;;  %v1439_v28 = vsel %vm1316_vm3, %v16702_v63, %v8107_v53  ;;  %v11935_v24 = vpop.f32.mrb[3].mxu1  ;;  %v16704_v54 = vld [vmem:[#allocation82_spill] sm:$0xff]  ;;  %v16708_v53 = vld [vmem:[#allocation105_spill] sm:$0xff] }
 0x1a1   : > { %16697 = vst [vmem:[#allocation78_spill] sm:$0xff] %v11915_v9  ;;  %2926 = vmatprep.mubr.f32.mxu0 %v1502_v27  ;;  %v1373_v40 = vsel %vm1348_vm4, %v1341_v0, %v7946_v47  ;;  %16703 = vst [vmem:[#allocation14_spill] sm:$0xff] %v11935_v24  ;;  %v8031_v9 = vunpack.i.l.bf16 %v16704_v54  ;;  %v1471_v8 = vsel %vm1348_vm4, %v1439_v28, %v8187_v5  ;;  %v8267_v0 = vunpack.i.h.bf16 %v11474_v34  ;;  %v16710_v24 = vld [vmem:[#allocation169_spill] sm:$0xff]  ;;  %v11954_v4 = vpop.f32.mrb[4].mxu1 }
 0x1a2   : > { %v11922_v22 = vpop.permute.xlu0 %8444  ;;  %2386 = vrot.lane.b32.xlu1 %v16698_v60, %s9277_s23  ;;  %v16705_v60 = vld [vmem:[#allocation211_spill] sm:$0xff]  ;;  %v1406_v37 = vsel %vm1380_vm5, %v1373_v40, %v8027_v38  ;;  %v1503_v47 = vsel %vm1380_vm5, %v1471_v8, %v8266_v25  ;;  %v7871_v63 = vunpack.i.l.bf16 %v16708_v53  ;;  %16712 = vst [vmem:[#allocation27_spill] sm:$0xff] %v11954_v4  ;;  %v16713_v38 = vld [vmem:[#allocation69_spill] sm:$0xff]  ;;  %v8112_v34 = vunpack.i.h.bf16 %v16701_v62  ;;  %v16714_v25 = vld [vmem:[#allocation66_spill] sm:$0xff] }
 0x1a3   : > { %v8191_v27 = vunpack.i.l.bf16 %v16705_v60  ;;  %v7951_v5 = vunpack.i.l.bf16 %v16713_v38  ;;  %v1440_v28 = vsel %vm1316_vm3, %v16714_v25, %v8111_v3  ;;  %v8032_v8 = vunpack.i.h.bf16 %v16704_v54  ;;  %v16720_v54 = vld [vmem:[#allocation55_spill] sm:$0xff]  ;;  %v16725_v4 = vld [vmem:[#allocation85_spill] sm:$0xff] }
 0x1a4   : > { %2384 = vrot.lane.b32.xlu0 %v16706_v42, %s9277_s23  ;;  %v11941_v39 = vpop.permute.xlu1 %8459  ;;  %2927 = vmatmul.mubr.f32.gmra.mrb[50].mxu0 %v1406_v37  ;;  %v16711_v42 = vld [vmem:[#allocation54_spill] sm:$0xff]  ;;  %v11961_v37 = vpop.f32.mrb[5].mxu1 }
 0x1a5   : > { %16707 = vst [vmem:[#allocation114_spill] sm:$0xff] %v11941_v39  ;;  %2931 = vmatprep.mubr.f32.mxu0 %v1503_v47  ;;  %v1342_v39 = vsel %vm1316_vm3, %v16711_v42, %v7867_v58  ;;  %16715 = vst [vmem:[#allocation17_spill] sm:$0xff] %v11961_v37  ;;  %v8192_v47 = vunpack.i.h.bf16 %v16705_v60  ;;  %v1472_v62 = vsel %vm1348_vm4, %v1440_v28, %v8191_v27  ;;  %v16719_v60 = vld [vmem:[#allocation164_spill] sm:$0xff] }
 0x1a6   : > { %v11948_v21 = vpop.permute.xlu0 %8454  ;;  %2390 = vrot.lane.b32.xlu1 %v16710_v24, %s9277_s23  ;;  %v1374_v40 = vsel %vm1348_vm4, %v1342_v39, %v7947_v32  ;;  %v16716_v24 = vld [vmem:[#allocation83_spill] sm:$0xff]  ;;  %v8271_v32 = vunpack.i.l.bf16 %v11463_v52  ;;  %v1504_v3 = vsel %vm1380_vm5, %v1472_v62, %v8267_v0  ;;  %v7872_v39 = vunpack.i.h.bf16 %v16708_v53 }
 0x1a7   : > { %16709 = vst [vmem:[#allocation202_spill] sm:$0xff] %v11948_v21  ;;  %v1407_v58 = vsel %vm1380_vm5, %v1374_v40, %v8031_v9  ;;  %v7952_v9 = vunpack.i.h.bf16 %v16713_v38  ;;  %v16721_v40 = vld [vmem:[#allocation168_spill] sm:$0xff]  ;;  %v16723_v62 = vld [vmem:[#allocation175_spill] sm:$0xff]  ;;  %v16729_v21 = vld [vmem:[#allocation174_spill] sm:$0xff] }
 0x1a8   : > { %2388 = vrot.lane.b32.xlu0 %v16716_v24, %s9277_s23  ;;  %v11967_v42 = vpop.permute.xlu1 %8469  ;;  %2932 = vmatmul.mubr.f32.gmra.mrb[52].mxu0 %v1407_v58  ;;  %v1343_v24 = vsel %vm1316_vm3, %v16720_v54, %v7871_v63  ;;  %v8116_v27 = vunpack.i.l.bf16 %v16721_v40  ;;  %v16722_v58 = vld [vmem:[#allocation65_spill] sm:$0xff]  ;;  %v8036_v53 = vunpack.i.l.bf16 %v16723_v62  ;;  %v16727_v54 = vld [vmem:[#allocation108_spill] sm:$0xff] }
 0x1a9   : > { %16717 = vst [vmem:[#allocation180_spill] sm:$0xff] %v11967_v42  ;;  %2936 = vmatprep.mubr.f32.mxu0 %v1504_v3  ;;  %v1375_v28 = vsel %vm1348_vm4, %v1343_v24, %v7951_v5  ;;  %v1441_v0 = vsel %vm1316_vm3, %v16722_v58, %v8112_v34  ;;  %v16724_v42 = vld [vmem:[#allocation74_spill] sm:$0xff]  ;;  %v8272_v24 = vunpack.i.h.bf16 %v11463_v52  ;;  %v16728_v34 = vld [vmem:[#allocation76_spill] sm:$0xff] }
 0x1aa   : > { %v11974_v25 = vpop.permute.xlu0 %8464  ;;  %2394 = vrot.lane.b32.xlu1 %v16719_v60, %s9277_s23  ;;  %v1408_v63 = vsel %vm1380_vm5, %v1375_v28, %v8032_v8  ;;  %v1473_v38 = vsel %vm1348_vm4, %v1441_v0, %v8192_v47  ;;  %v7876_v60 = vunpack.i.l.bf16 %v16727_v54  ;;  %v7956_v58 = vunpack.i.l.bf16 %v16728_v34  ;;  %v12003_v28 = vpop.f32.mrb[6].mxu1  ;;  %v16731_v0 = vld [vmem:[#allocation64_spill] sm:$0xff] }
 0x1ab   : > { %16718 = vst [vmem:[#allocation26_spill] sm:$0xff] %v11974_v25  ;;  %v8196_v25 = vunpack.i.l.bf16 %v16724_v42  ;;  %v1505_v5 = vsel %vm1380_vm5, %v1473_v38, %v8271_v32  ;;  %v8117_v47 = vunpack.i.h.bf16 %v16721_v40  ;;  %v1442_v32 = vsel %vm1316_vm3, %v16731_v0, %v8116_v27 }
 0x1ac   : > { %2392 = vrot.lane.b32.xlu0 %v16725_v4, %s9277_s23  ;;  %v11989_v3 = vpop.permute.xlu1 %8479  ;;  %2937 = vmatmul.mubr.f32.gmra.mrb[54].mxu0 %v1408_v63  ;;  %v12009_v63 = vpop.f32.mrb[7].mxu1  ;;  %v8037_v38 = vunpack.i.h.bf16 %v16723_v62  ;;  %v12013_v4 = vunpack.i.h.bf16 %v16724_v42  ;;  %v7877_v42 = vunpack.i.h.bf16 %v16727_v54  ;;  %v7957_v0 = vunpack.i.h.bf16 %v16728_v34  ;;  %v16741_v54 = vld [vmem:[#allocation86_spill] sm:$0xff]  ;;  %v16742_v34 = vld [vmem:[#allocation171_spill] sm:$0xff] }
 0x1ad   : > { %16726 = vst [vmem:[#allocation77_spill] sm:$0xff] %v11989_v3  ;;  %2941 = vmatprep.mubr.f32.mxu0 %v1505_v5  ;;  %v16730_v3 = vld [vmem:[#allocation57_spill] sm:$0xff]  ;;  %v16733_v5 = vld [vmem:[#allocation87_spill] sm:$0xff]  ;;  %v1474_v40 = vsel %vm1348_vm4, %v1442_v32, %v8196_v25 }
 0x1ae   : > { %v11997_v37 = vpop.permute.xlu0 %8474  ;;  %2398 = vrot.lane.b32.xlu1 %v16729_v21, %s9277_s23  ;;  %v1344_v8 = vsel %vm1316_vm3, %v16730_v3, %v7872_v39  ;;  %16732 = vst [vmem:[#allocation96_spill] sm:$0xff] %v12013_v4  ;;  %v1506_v27 = vsel %vm1380_vm5, %v1474_v40, %v8272_v24  ;;  %v16740_v32 = vld [vmem:[#allocation89_spill] sm:$0xff]  ;;  %v8041_v40 = vunpack.i.l.bf16 %v16741_v54 }
 0x1af   : > { %v1376_v52 = vsel %vm1348_vm4, %v1344_v8, %v7952_v9  ;;  %v12022_v9 = vunpack.i.l.bf16 %v11518_v55  ;;  %v16736_v8 = vld [vmem:[#allocation56_spill] sm:$0xff]  ;;  %v1443_v24 = vsel %vm1316_vm3, %v16740_v32, %v8117_v47 }
 0x1b0   : > { %2396 = vrot.lane.b32.xlu0 %v16733_v5, %s9277_s23  ;;  %v12017_v39 = vpop.permute.xlu1 %8489  ;;  %v1409_v3 = vsel %vm1380_vm5, %v1376_v52, %v8036_v53  ;;  %v1345_v62 = vsel %vm1316_vm3, %v16736_v8, %v7876_v60  ;;  %v16739_v53 = vld [vmem:[#allocation203_spill] sm:$0xff]  ;;  %v1851_v60 = vrot.slane %v11269_v30, 1  ;;  %v16746_v30 = vld [vmem:[#allocation178_spill] sm:$0xff] }
 0x1b1   : > { %16734 = vst [vmem:[#allocation113_spill] sm:$0xff] %v12017_v39  ;;  %16735 = vst [vmem:[#allocation22_spill] sm:$0xff] %v12022_v9  ;;  %2942 = vmatmul.mubr.f32.gmra.mrb[56].mxu0 %v1409_v3  ;;  %v16738_v39 = vld [vmem:[#allocation173_spill] sm:$0xff]  ;;  %v1377_v25 = vsel %vm1348_vm4, %v1345_v62, %v7956_v58  ;;  %v8121_v52 = vunpack.i.l.bf16 %v16739_v53  ;;  %v1850_v3 = vrot.slane %v11234_v45, 1  ;;  %v1475_v58 = vsel %vm1348_vm4, %v1443_v24, %v12013_v4  ;;  %v16744_v62 = vld [vmem:[#allocation107_spill] sm:$0xff] }
 0x1b2   : > { %v12029_v21 = vpop.permute.xlu0 %8484  ;;  %2402 = vrot.lane.b32.xlu1 %v16738_v39, %s9277_s23  ;;  %2946 = vmatprep.mubr.f32.mxu0 %v1506_v27  ;;  %v1410_v27 = vsel %vm1380_vm5, %v1377_v25, %v8037_v38  ;;  %v1507_v47 = vsel %vm1380_vm5, %v1475_v58, %v12022_v9  ;;  %v7881_v45 = vunpack.i.l.bf16 %v16744_v62  ;;  %v16747_v39 = vld [vmem:[#allocation61_spill] sm:$0xff]  ;;  %v16748_v38 = vld [vmem:[#allocation75_spill] sm:$0xff]  ;;  %v16750_v58 = vld [vmem:[#allocation70_spill] sm:$0xff] }
 0x1b3   : > { %16737 = vst [vmem:[#allocation36_spill] sm:$0xff] %v12029_v21  ;;  %v7961_v25 = vunpack.i.l.bf16 %v16748_v38  ;;  %v1444_v62 = vsel %vm1316_vm3, %v16750_v58, %v8121_v52  ;;  %v1853_v52 = vrot.slane %v11526_v20, 1  ;;  %v16772_v21 = vld [vmem:[#allocation188_spill] sm:$0xff]  ;;  %v16775_v5 = vld [vmem:[#allocation195_spill] sm:$0xff] }
 0x1b4   : > { %2400 = vrot.lane.b32.xlu0 %v16742_v34, %s9277_s23  ;;  %v12042_v8 = vpop.permute.xlu1 %8499  ;;  %v12056_v34 = vpop.f32.mrb[8].mxu1 }
 0x1b5   : > { %16743 = vst [vmem:[#allocation120_spill] sm:$0xff] %v12042_v8  ;;  %2947 = vmatmul.mubr.f32.gmra.mrb[58].mxu0 %v1410_v27  ;;  %v1346_v8 = vsel %vm1316_vm3, %v16747_v39, %v7877_v42  ;;  %v12061_v27 = vsel %vm552_vm1, %v1850_v3, %v1851_v60  ;;  %v12091_v20 = vsel %vm552_vm1, %v1851_v60, %v1853_v52 }
 0x1b6   : > { %v12050_v32 = vpop.permute.xlu0 %8494  ;;  %2406 = vrot.lane.b32.xlu1 %v16746_v30, %s9277_s23  ;;  %2951 = vmatprep.mubr.f32.mxu0 %v1507_v47  ;;  %v1378_v24 = vsel %vm1348_vm4, %v1346_v8, %v7957_v0  ;;  %16749 = vst [vmem:[#allocation23_spill] sm:$0xff] %v12061_v27  ;;  %v8042_v30 = vunpack.i.h.bf16 %v16741_v54  ;;  %v16751_v47 = vld [vmem:[#allocation177_spill] sm:$0xff]  ;;  %v1476_v0 = vsel %vm1348_vm4, %v1444_v62, %v12013_v4  ;;  %v16753_v54 = vld [vmem:[#allocation63_spill] sm:$0xff]  ;;  %16755 = vst [vmem:[#allocation37_spill] sm:$0xff] %v12091_v20 }
 0x1b7   : > { %16745 = vst [vmem:[#allocation117_spill] sm:$0xff] %v12050_v32  ;;  %v12065_v32 = vpop.f32.mrb[9].mxu1  ;;  %v1411_v42 = vsel %vm1380_vm5, %v1378_v24, %v8041_v40  ;;  %v1508_v3 = vsel %vm1380_vm5, %v1476_v0, %v12022_v9  ;;  %v1347_v38 = vsel %vm1316_vm3, %v16753_v54, %v7881_v45  ;;  %v16754_v24 = vld [vmem:[#allocation176_spill] sm:$0xff]  ;;  %v16758_v54 = vld [vmem:[#allocation186_spill] sm:$0xff]  ;;  %v16763_v9 = vld [vmem:[#allocation183_spill] sm:$0xff] }
 0x1b8   : > { %2404 = vrot.lane.b32.xlu0 %v16751_v47, %s9277_s23  ;;  %v12070_v39 = vpop.permute.xlu1 %8509  ;;  %v1379_v40 = vsel %vm1348_vm4, %v1347_v38, %v7961_v25  ;;  %v12097_v0 = vpop.f32.mrb[10].mxu1  ;;  %v16759_v38 = vld [vmem:[#allocation182_spill] sm:$0xff]  ;;  %v16767_v4 = vld [vmem:[#allocation191_spill] sm:$0xff] }
 0x1b9   : > { %2952 = vmatmul.mubr.f32.gmra.mrb[60].mxu0 %v1411_v42  ;;  %v1412_v62 = vsel %vm1380_vm5, %v1379_v40, %v8042_v30  ;;  %v12099_v45 = vpop.f32.mrb[11].mxu1 }
 0x1ba   : > { %v12078_v8 = vpop.permute.xlu0 %8504  ;;  %2410 = vrot.lane.b32.xlu1 %v12061_v27, %s9277_s23  ;;  %2956 = vmatprep.mubr.f32.mxu0 %v1508_v3  ;;  %v12119_v3 = vpop.f32.mrb[12].mxu1 }
 0x1bb   : > { %16752 = vst [vmem:[#allocation134_spill] sm:$0xff] %v12078_v8  ;;  %16756 = vst [vmem:[#allocation152_spill] sm:$0xff] %v12119_v3  ;;  %v12121_v52 = vpop.f32.mrb[13].mxu1  ;;  %v16796_v3 = vld [vmem:[#allocation90_spill] sm:$0xff] }
 0x1bc   : > { %2408 = vrot.lane.b32.xlu0 %v16754_v24, %s9277_s23  ;;  %v12087_v58 = vpop.permute.xlu1 %8519  ;;  %16757 = vst [vmem:[#allocation207_spill] sm:$0xff] %v12121_v52  ;;  %v12139_v40 = vpop.f32.mrb[14].mxu1  ;;  %v16769_v24 = vld [vmem:[#allocation187_spill] sm:$0xff]  ;;  %v16798_v52 = vld [vmem:[#allocation122_spill] sm:$0xff] }
 0x1bd   : > { %2957 = vmatmul.mubr.f32.gmra.mrb[62].mxu0 %v1412_v62  ;;  %16760 = vst [vmem:[#allocation100_spill] sm:$0xff] %v12139_v40  ;;  %v12141_v62 = vpop.f32.mrb[15].mxu1 }
 0x1be   : > { %v12093_v42 = vpop.permute.xlu0 %8514  ;;  %7339 = vmatprep.mubr.msk.f32.mxu0 %vm1316_vm3, %v10898_v14  ;;  %16761 = vst [vmem:[#allocation116_spill] sm:$0xff] %v12141_v62  ;;  %v12160_v47 = vpop.f32.mrb[16].mxu1  ;;  %v16777_v62 = vld [vmem:[#allocation196_spill] sm:$0xff] }
 0x1bf   : > { %16770 = vst [vmem:[#allocation184_spill] sm:$0xff] %v12160_v47 }
 0x1c0   : > { %2412 = vrot.lane.b32.xlu0 %v12091_v20, %s9277_s23  ;;  %v12103_v25 = vpop.permute.xlu1 %8529  ;;  %v16765_v20 = vld [vmem:[#allocation190_spill] sm:$0xff] }
 0x1c1   : > { %7340 = vmatmul.mubr.msk.f32.vlgmr.msra.gmra.mrb[64].mxu0 %vm1316_vm3, %v10901_v13 }
 0x1c2   : > { %v12107_v30 = vpop.permute.xlu0 %8524  ;;  %7342 = vmatprep.mubr.msk.f32.mxu0 %vm1316_vm3, %v10942_v18 }
 0x1c4   : > { %v12111_v60 = vpop.permute.xlu1 %8539 }
 0x1c5   : > { %7343 = vmatmul.mubr.msk.f32.gmra.mrb[66].mxu0 %vm1316_vm3, %v10945_v49 }
 0x1c6   : > { %v12115_v14 = vpop.permute.xlu0 %8534  ;;  %7345 = vmatprep.mubr.msk.f32.mxu0 %vm1316_vm3, %v10925_v1 }
 0x1c8   : > { %v12123_v13 = vpop.permute.xlu1 %8549 }
 0x1c9   : > { %7346 = vmatmul.mubr.msk.f32.gmra.mrb[68].mxu0 %vm1316_vm3, %v10928_v26 }
 0x1ca   : > { %v12127_v18 = vpop.permute.xlu0 %8544  ;;  %7348 = vmatprep.mubr.msk.f32.mxu0 %vm1316_vm3, %v16526_v7 }
 0x1cc   : > { %v12131_v49 = vpop.permute.xlu1 %8559 }
 0x1cd   : > { %7349 = vmatmul.mubr.msk.f32.gmra.mrb[70].mxu0 %vm1316_vm3, %v16758_v54 }
 0x1ce   : > { %v12135_v1 = vpop.permute.xlu0 %8554  ;;  %7351 = vmatprep.mubr.msk.f32.mxu0 %vm1316_vm3, %v16759_v38  ;;  %v8352_v38 = vunpack.i.h.bf16 %v11687_v61  ;;  %v16774_v61 = vld [vmem:[#allocation98_spill] sm:$0xff] }
 0x1d0   : > { %v12143_v26 = vpop.permute.xlu1 %8569 }
 0x1d1   : > { %16762 = vst [vmem:[#allocation25_spill] sm:$0xff] %v12143_v26  ;;  %7352 = vmatmul.mubr.msk.f32.gmra.mrb[72].mxu0 %vm1316_vm3, %v16763_v9  ;;  %v12162_v9 = vpop.f32.mrb[17].mxu1  ;;  %v8277_v26 = vunpack.i.h.bf16 %v11518_v55 }
 0x1d2   : > { %v12147_v7 = vpop.permute.xlu0 %8564  ;;  %7354 = vmatprep.mubr.msk.f32.mxu0 %vm1316_vm3, %v16765_v20  ;;  %16771 = vst [vmem:[#allocation35_spill] sm:$0xff] %v12162_v9  ;;  %v16776_v9 = vld [vmem:[#allocation16_spill] sm:$0xff] }
 0x1d3   : > { %16764 = vst [vmem:[#allocation34_spill] sm:$0xff] %v12147_v7 }
 0x1d4   : > { %v12151_v54 = vpop.permute.xlu1 %8579 }
 0x1d5   : > { %16766 = vst [vmem:[#allocation24_spill] sm:$0xff] %v12151_v54  ;;  %7355 = vmatmul.mubr.msk.f32.gmra.mrb[74].mxu0 %vm1316_vm3, %v16767_v4  ;;  %v8507_v4 = vunpack.i.h.bf16 %v12078_v8 }
 0x1d6   : > { %v12156_v27 = vpop.permute.xlu0 %8574  ;;  %7357 = vmatprep.mubr.msk.f32.mxu0 %vm1316_vm3, %v16769_v24 }
 0x1d7   : > { %16768 = vst [vmem:[#allocation144_spill] sm:$0xff] %v12156_v27  ;;  %v2536_v27 = vsel %vm1316_vm3, %v16774_v61, %v8352_v38  ;;  %v16778_v61 = vld [vmem:[#allocation192_spill] sm:$0xff] }
 0x1d8   : > { %v8585_v40 = vpop.permute.xlu1 %8584 }
 0x1d9   : > { %v8586_v20 = vunpack.i.l.bf16 %v8585_v40  ;;  %7358 = vmatmul.mubr.msk.f32.gmra.mrb[76].mxu0 %vm1316_vm3, %v16772_v21  ;;  %v2504_v21 = vsel %vm1380_vm5, %v16776_v9, %v8277_v26 }
 0x1da   : > { %v12168_v54 = vpop.permute.xlu0 %2230  ;;  %7360 = vmatprep.mubr.msk.f32.mxu0 %vm1316_vm3, %v16775_v5  ;;  %v12186_v5 = vpop.f32.mrb[18].mxu1 }
 0x1db   : > { %16773 = vst [vmem:[#allocation206_spill] sm:$0xff] %v12168_v54  ;;  %v2568_v24 = vsel %vm1348_vm4, %v2536_v27, %v8586_v20  ;;  %16779 = vst [vmem:[#allocation99_spill] sm:$0xff] %v12186_v5  ;;  %v12188_v27 = vpop.f32.mrb[19].mxu1  ;;  %v16786_v54 = vld [vmem:[#allocation205_spill] sm:$0xff] }
 0x1dc   : > { %v12175_v47 = vpop.permute.xlu1 %8594  ;;  %v2600_v55 = vsel %vm1380_vm5, %v2568_v24, %v8507_v4  ;;  %16780 = vst [vmem:[#allocation115_spill] sm:$0xff] %v12188_v27  ;;  %v16781_v4 = vld [vmem:[#allocation198_spill] sm:$0xff]  ;;  %v12206_v24 = vpop.f32.mrb[20].mxu1  ;;  %v8511_v27 = vunpack.i.l.bf16 %v12070_v39 }
 0x1dd   : > { %3354 = vmatprep.mubr.f32.mxu1 %v2600_v55  ;;  %7361 = vmatmul.mubr.msk.f32.gmra.mrb[78].mxu0 %vm1316_vm3, %v16777_v62  ;;  %16782 = vst [vmem:[#allocation29_spill] sm:$0xff] %v12206_v24  ;;  %v12208_v55 = vpop.f32.mrb[21].mxu1  ;;  %v16787_v24 = vld [vmem:[#allocation201_spill] sm:$0xff] }
 0x1de   : > { %v12182_v8 = vpop.permute.xlu0 %8589  ;;  %3355 = vmatmul.mubr.f32.vlgmr.msra.gmra.mrb[32].mxu1 %v2504_v21  ;;  %7363 = vmatprep.mubr.msk.f32.mxu0 %vm1316_vm3, %v16778_v61  ;;  %16783 = vst [vmem:[#allocation45_spill] sm:$0xff] %v12208_v55  ;;  %v16784_v21 = vld [vmem:[#allocation199_spill] sm:$0xff]  ;;  %v16785_v61 = vld [vmem:[#allocation204_spill] sm:$0xff]  ;;  %v12226_v55 = vpop.f32.mrb[22].mxu1  ;;  %v2537_v7 = vsel %vm1316_vm3, %v16796_v3, %v8511_v27 }
 0x1df   : > { %16788 = vst [vmem:[#allocation31_spill] sm:$0xff] %v12226_v55  ;;  %v12228_v5 = vpop.f32.mrb[23].mxu1  ;;  %v8587_v55 = vunpack.i.h.bf16 %v8585_v40 }
 0x1e0   : > { %v12190_v38 = vpop.permute.xlu1 %8604  ;;  %16789 = vst [vmem:[#allocation139_spill] sm:$0xff] %v12228_v5 }
 0x1e1   : > { %7364 = vmatmul.mubr.msk.f32.gmra.mrb[80].mxu0 %vm1316_vm3, %v16546_v29 }
 0x1e2   : > { %v12194_v20 = vpop.permute.xlu0 %8599  ;;  %7366 = vmatprep.mubr.msk.f32.mxu0 %vm1316_vm3, %v11054_v31 }
 0x1e4   : > { %v12198_v62 = vpop.permute.xlu1 %8614 }
 0x1e5   : > { %7367 = vmatmul.mubr.msk.f32.gmra.mrb[82].mxu0 %vm1316_vm3, %v11057_v41 }
 0x1e6   : > { %v12202_v26 = vpop.permute.xlu0 %8609  ;;  %7369 = vmatprep.mubr.msk.f32.mxu0 %vm1316_vm3, %v16781_v4 }
 0x1e8   : > { %v12210_v29 = vpop.permute.xlu1 %8624 }
 0x1e9   : > { %7370 = vmatmul.mubr.msk.f32.gmra.mrb[84].mxu0 %vm1316_vm3, %v16784_v21 }
 0x1ea   : > { %v12214_v31 = vpop.permute.xlu0 %8619  ;;  %7372 = vmatprep.mubr.msk.f32.mxu0 %vm1316_vm3, %v16785_v61 }
 0x1ec   : > { %v12218_v41 = vpop.permute.xlu1 %8634 }
 0x1ed   : > { %7373 = vmatmul.mubr.msk.f32.gmra.mrb[86].mxu0 %vm1316_vm3, %v16786_v54 }
 0x1ee   : > { %v12222_v4 = vpop.permute.xlu0 %8629  ;;  %7375 = vmatprep.mubr.msk.f32.mxu0 %vm1316_vm3, %v16787_v24  ;;  %v12243_v24 = vpop.f32.mrb[24].mxu1 }
 0x1ef   : > { %16793 = vst [vmem:[#allocation102_spill] sm:$0xff] %v12243_v24 }
 0x1f0   : > { %v12230_v21 = vpop.permute.xlu1 %8644 }
 0x1f1   : > { %16790 = vst [vmem:[#allocation46_spill] sm:$0xff] %v12230_v21  ;;  %7376 = vmatmul.mubr.msk.f32.gmra.mrb[88].mxu0 %vm1316_vm3, %v16561_v15  ;;  %v12249_v15 = vpop.f32.mrb[25].mxu1  ;;  %v8512_v21 = vunpack.i.h.bf16 %v12070_v39  ;;  %v8356_v39 = vunpack.i.l.bf16 %v11721_v48 }
 0x1f2   : > { %v12234_v61 = vpop.permute.xlu0 %8639  ;;  %7378 = vmatprep.mubr.msk.f32.mxu0 %vm1316_vm3, %v11111_v36  ;;  %16795 = vst [vmem:[#allocation32_spill] sm:$0xff] %v12249_v15  ;;  %v8431_v36 = vunpack.i.l.bf16 %v11867_v16  ;;  %v8516_v15 = vunpack.i.l.bf16 %v12093_v42 }
 0x1f3   : > { %16791 = vst [vmem:[#allocation81_spill] sm:$0xff] %v12234_v61  ;;  %v2538_v3 = vsel %vm1316_vm3, %v16798_v52, %v8512_v21 }
 0x1f4   : > { %v12238_v54 = vpop.permute.xlu1 %8654 }
 0x1f5   : > { %16792 = vst [vmem:[#allocation209_spill] sm:$0xff] %v12238_v54  ;;  %7379 = vmatmul.mubr.msk.f32.gmra.mrb[90].mxu0 %vm1316_vm3, %v11114_v17  ;;  %v8591_v54 = vunpack.i.l.bf16 %v12182_v8  ;;  %v8122_v17 = vunpack.i.h.bf16 %v16739_v53  ;;  %v8592_v53 = vunpack.i.h.bf16 %v12182_v8 }
 0x1f6   : > { %v12245_v5 = vpop.permute.xlu0 %8649  ;;  %7381 = vmatprep.mubr.msk.f32.mxu0 %vm1316_vm3, %v11489_v6  ;;  %v2569_v6 = vsel %vm1348_vm4, %v2537_v7, %v8587_v55  ;;  %v2505_v7 = vsel %vm1380_vm5, %v16776_v9, %v8431_v36  ;;  %v8357_v9 = vunpack.i.h.bf16 %v11721_v48 }
 0x1f7   : > { %16794 = vst [vmem:[#allocation68_spill] sm:$0xff] %v12245_v5  ;;  %v16797_v5 = vld [vmem:[#allocation11_spill] sm:$0xff]  ;;  %v2570_v27 = vsel %vm1348_vm4, %v2538_v3, %v8591_v54  ;;  %v8517_v54 = vunpack.i.h.bf16 %v12093_v42  ;;  %v8436_v3 = vunpack.i.l.bf16 %v11896_v57  ;;  %v16801_v42 = vld [vmem:[#allocation88_spill] sm:$0xff] }
 0x1f8   : > { %v2359_v40 = vpop.permute.xlu1 %2358 }
 0x1f9   : > { %7382 = vmatmul.mubr.msk.f32.gmra.mrb[92].mxu0 %vm1316_vm3, %v11572_v10  ;;  %v8432_v10 = vunpack.i.h.bf16 %v11867_v16  ;;  %v2602_v55 = vsel %vm1380_vm5, %v2570_v27, %v2359_v40  ;;  %v16800_v16 = vld [vmem:[#allocation94_spill] sm:$0xff]  ;;  %v2539_v40 = vsel %vm1316_vm3, %v16646_v12, %v8516_v15  ;;  %v8361_v12 = vunpack.i.l.bf16 %v11712_v51 }
 0x1fa   : > { %v2357_v24 = vpop.permute.xlu0 %2356  ;;  %7384 = vmatprep.mubr.msk.f32.mxu0 %vm1316_vm3, %v16797_v5  ;;  %v2444_v8 = vsel %vm1316_vm3, %v16800_v16, %v8122_v17  ;;  %v8521_v15 = vunpack.i.l.bf16 %v12087_v58 }
 0x1fb   : > { %v2601_v61 = vsel %vm1380_vm5, %v2569_v6, %v2357_v24  ;;  %v12275_v24 = vpop.f32.mrb[26].mxu1  ;;  %v16799_v6 = vld [vmem:[#allocation20_spill] sm:$0xff]  ;;  %v2474_v36 = vsel %vm1348_vm4, %v2444_v8, %v8356_v39 }
 0x1fc   : > { %3359 = vmatprep.mubr.f32.mxu1 %v2601_v61  ;;  %v8281_v52 = vunpack.i.l.bf16 %v16799_v6  ;;  %v12280_v61 = vpop.f32.mrb[27].mxu1  ;;  %v2506_v27 = vsel %vm1380_vm5, %v2474_v36, %v8432_v10  ;;  %v8282_v48 = vunpack.i.h.bf16 %v16799_v6  ;;  %v2363_v16 = vpop.permute.xlu1 %2362  ;;  %v2540_v10 = vsel %vm1316_vm3, %v16642_v2, %v8517_v54 }
 0x1fd   : > { %3360 = vmatmul.mubr.f32.gmra.mrb[34].mxu1 %v2505_v7  ;;  %7385 = vmatmul.mubr.msk.f32.gmra.mrb[94].mxu0 %vm1316_vm3, %v16797_v5  ;;  %v8596_v7 = vunpack.i.l.bf16 %v12175_v47 }
 0x1fe   : > { %v2361_v21 = vpop.permute.xlu0 %2360  ;;  %3364 = vmatprep.mubr.f32.mxu1 %v2602_v55  ;;  %v2571_v55 = vsel %vm1348_vm4, %v2539_v40, %v8592_v53  ;;  %v2445_v39 = vsel %vm1316_vm3, %v16801_v42, %v8281_v52  ;;  %v8437_v53 = vunpack.i.h.bf16 %v11896_v57  ;;  %v12305_v40 = vpop.f32.mrb[28].mxu1  ;;  %v2446_v2 = vsel %vm1316_vm3, %v10385_v11, %v8282_v48 }
 0x1ff   : > { %v2603_v17 = vsel %vm1380_vm5, %v2571_v55, %v2361_v21  ;;  %v2475_v8 = vsel %vm1348_vm4, %v2445_v39, %v8357_v9  ;;  %v8597_v21 = vunpack.i.h.bf16 %v12175_v47  ;;  %v2572_v36 = vsel %vm1348_vm4, %v2540_v10, %v8596_v7  ;;  %v12310_v9 = vpop.f32.mrb[29].mxu1 }
 0x200   : > { %v2507_v6 = vsel %vm1380_vm5, %v2475_v8, %v8436_v3  ;;  %v2604_v52 = vsel %vm1380_vm5, %v2572_v36, %v2363_v16  ;;  %v8362_v57 = vunpack.i.h.bf16 %v11712_v51  ;;  %v8522_v47 = vunpack.i.h.bf16 %v12087_v58  ;;  %v2367_v48 = vpop.permute.xlu1 %2366 }
 0x201   : > { %3365 = vmatmul.mubr.f32.gmra.mrb[36].mxu1 %v2506_v27  ;;  %v8286_v27 = vunpack.i.l.bf16 %v11546_v50  ;;  %v2476_v54 = vsel %vm1348_vm4, %v2446_v2, %v8361_v12  ;;  %v2541_v3 = vsel %vm1316_vm3, %v16655_v46, %v8521_v15  ;;  %v8441_v7 = vunpack.i.l.bf16 %v11889_v33 }
 0x202   : > { %3369 = vmatprep.mubr.f32.mxu1 %v2603_v17  ;;  %v2365_v55 = vpop.permute.xlu0 %2364  ;;  %v8601_v17 = vunpack.i.l.bf16 %v12194_v20  ;;  %v2508_v16 = vsel %vm1380_vm5, %v2476_v54, %v8437_v53  ;;  %v2573_v42 = vsel %vm1348_vm4, %v2541_v3, %v8597_v21  ;;  %v8287_v51 = vunpack.i.h.bf16 %v11546_v50  ;;  %v12335_v21 = vpop.f32.mrb[30].mxu1 }
 0x203   : > { %v2605_v11 = vsel %vm1380_vm5, %v2573_v42, %v2365_v55  ;;  %v2447_v58 = vsel %vm1316_vm3, %v10382_v43, %v8286_v27  ;;  %v8366_v46 = vunpack.i.l.bf16 %v11744_v35  ;;  %v8526_v39 = vunpack.i.l.bf16 %v12107_v30 }
 0x204   : > { %v2477_v12 = vsel %vm1348_vm4, %v2447_v58, %v8362_v57  ;;  %v2542_v15 = vsel %vm1316_vm3, %v16649_v19, %v8522_v47  ;;  %v8442_v8 = vunpack.i.h.bf16 %v11889_v33  ;;  %v8602_v10 = vunpack.i.h.bf16 %v12194_v20  ;;  %v2371_v3 = vpop.permute.xlu1 %2370 }
 0x205   : > { %3370 = vmatmul.mubr.f32.gmra.mrb[38].mxu1 %v2507_v6  ;;  %v2509_v50 = vsel %vm1380_vm5, %v2477_v12, %v8441_v7  ;;  %v2574_v53 = vsel %vm1348_vm4, %v2542_v15, %v8601_v17  ;;  %v8291_v6 = vunpack.i.l.bf16 %v11538_v59  ;;  %v2448_v19 = vsel %vm1316_vm3, %v16575_v56, %v8287_v51  ;;  %v16802_v7 = vld [vmem:[#allocation15_spill] sm:$0xff] }
 0x206   : > { %3374 = vmatprep.mubr.f32.mxu1 %v2604_v52  ;;  %v2606_v43 = vsel %vm1380_vm5, %v2574_v53, %v2367_v48  ;;  %v2369_v36 = vpop.permute.xlu0 %2368  ;;  %v12340_v52 = vpop.f32.mrb[31].mxu1  ;;  %v8367_v33 = vunpack.i.h.bf16 %v11744_v35  ;;  %v8527_v20 = vunpack.i.h.bf16 %v12107_v30  ;;  %v2478_v27 = vsel %vm1348_vm4, %v2448_v19, %v8366_v46 }
 0x207   : > { %v2543_v55 = vsel %vm1316_vm3, %v16663_v23, %v8526_v39  ;;  %v8446_v2 = vunpack.i.l.bf16 %v11922_v22  ;;  %v8606_v57 = vunpack.i.l.bf16 %v12190_v38  ;;  %v2510_v47 = vsel %vm1380_vm5, %v2478_v27, %v8442_v8  ;;  %v12358_v23 = vld [vmem:[%s15542_s5] ss:$0 sm:$0xff]  ;;  %v16809_v27 = vld [vmem:[#allocation78_spill] sm:$0xff] }
 0x208   : > { %v2575_v54 = vsel %vm1348_vm4, %v2543_v55, %v8602_v10  ;;  %v8292_v35 = vunpack.i.h.bf16 %v11538_v59  ;;  %v2449_v30 = vsel %vm1316_vm3, %v16576_v44, %v8291_v6  ;;  %v8371_v17 = vunpack.i.l.bf16 %v16802_v7  ;;  %v16804_v39 = vld [vmem:[#allocation73_spill] sm:$0xff]  ;;  %v16806_v6 = vld [vmem:[#allocation28_spill] sm:$0xff] }
 0x209   : > { %3375 = vmatmul.mubr.f32.gmra.mrb[40].mxu1 %v2508_v16  ;;  %v2607_v56 = vsel %vm1380_vm5, %v2575_v54, %v2369_v36  ;;  %v8531_v16 = vunpack.i.l.bf16 %v12103_v25  ;;  %v2479_v42 = vsel %vm1348_vm4, %v2449_v30, %v8367_v33  ;;  %v8447_v59 = vunpack.i.h.bf16 %v11922_v22  ;;  %v16805_v22 = vld [vmem:[#allocation118_spill] sm:$0xff]  ;;  %v16808_v33 = vld [vmem:[#allocation137_spill] sm:$0xff] }
 0x20a   : > { %3379 = vmatprep.mubr.f32.mxu1 %v2605_v11  ;;  %v16803_v11 = vld [vmem:[#allocation145_spill] sm:$0xff]  ;;  %v8607_v48 = vunpack.i.h.bf16 %v12190_v38  ;;  %v2511_v44 = vsel %vm1380_vm5, %v2479_v42, %v8446_v2  ;;  %v8296_v12 = vunpack.i.l.bf16 %v16804_v39  ;;  %v2373_v53 = vpop.permute.xlu0 %2372  ;;  %v2450_v38 = vsel %vm1316_vm3, %v16805_v22, %v8292_v35 }
 0x20b   : > { %v2544_v51 = vsel %vm1316_vm3, %v16803_v11, %v8527_v20  ;;  %v2480_v19 = vsel %vm1348_vm4, %v2450_v38, %v8371_v17  ;;  %v2545_v20 = vsel %vm1316_vm3, %v16808_v33, %v8531_v16  ;;  %v8451_v55 = vunpack.i.l.bf16 %v16809_v27  ;;  %v2375_v17 = vpop.permute.xlu1 %2374  ;;  %v16811_v42 = vld [vmem:[#allocation93_spill] sm:$0xff] }
 0x20c   : > { %v2576_v46 = vsel %vm1348_vm4, %v2544_v51, %v8606_v57  ;;  %v8611_v2 = vunpack.i.l.bf16 %v12202_v26  ;;  %v2512_v57 = vsel %vm1380_vm5, %v2480_v19, %v8447_v59  ;;  %v2577_v54 = vsel %vm1348_vm4, %v2545_v20, %v8607_v48  ;;  %v16812_v59 = vld [vmem:[#allocation181_spill] sm:$0xff]  ;;  %v16816_v19 = vld [vmem:[#allocation130_spill] sm:$0xff] }
 0x20d   : > { %3380 = vmatmul.mubr.f32.gmra.mrb[42].mxu1 %v2509_v50  ;;  %v2608_v8 = vsel %vm1380_vm5, %v2576_v46, %v2371_v3  ;;  %v8372_v50 = vunpack.i.h.bf16 %v16802_v7  ;;  %v16810_v3 = vld [vmem:[#allocation119_spill] sm:$0xff]  ;;  %v8297_v7 = vunpack.i.h.bf16 %v16804_v39  ;;  %v8376_v11 = vunpack.i.l.bf16 %v16811_v42  ;;  %v16815_v22 = vld [vmem:[#allocation21_spill] sm:$0xff]  ;;  %v16817_v20 = vld [vmem:[#allocation14_spill] sm:$0xff] }
 0x20e   : > { %3384 = vmatprep.mubr.f32.mxu1 %v2606_v43  ;;  %v8532_v43 = vunpack.i.h.bf16 %v12103_v25  ;;  %v2451_v30 = vsel %vm1316_vm3, %v16810_v3, %v8296_v12  ;;  %v8536_v51 = vunpack.i.l.bf16 %v12115_v14  ;;  %v8452_v46 = vunpack.i.h.bf16 %v16809_v27 }
 0x20f   : > { %v2481_v16 = vsel %vm1348_vm4, %v2451_v30, %v8372_v50  ;;  %v8612_v12 = vunpack.i.h.bf16 %v12202_v26  ;;  %v8301_v38 = vunpack.i.l.bf16 %v16815_v22  ;;  %v2452_v26 = vsel %vm1316_vm3, %v16816_v19, %v8297_v7 }
 0x210   : > { %v2513_v39 = vsel %vm1380_vm5, %v2481_v16, %v8451_v55  ;;  %v8537_v33 = vunpack.i.h.bf16 %v12115_v14  ;;  %v2482_v55 = vsel %vm1348_vm4, %v2452_v26, %v8376_v11  ;;  %v16821_v16 = vld [vmem:[#allocation18_spill] sm:$0xff]  ;;  %v2379_v11 = vpop.permute.xlu1 %2378 }
 0x211   : > { %3385 = vmatmul.mubr.f32.gmra.mrb[44].mxu1 %v2510_v47 }
 0x212   : > { %3389 = vmatprep.mubr.f32.mxu1 %v2607_v56  ;;  %v2609_v56 = vsel %vm1380_vm5, %v2577_v54, %v2373_v53 }
 0x213   : > { %v2803_v58 = vpop.f32.mrb[0].mxu0 }
 0x214   : > { %v2804_v15 = vadd.f32 %v12358_v23, %v2803_v58  ;;  %v2805_v10 = vpop.f32.mrb[1].mxu0 }
 0x215   : > { %3390 = vmatmul.mubr.f32.gmra.mrb[46].mxu1 %v2511_v44  ;;  %v16814_v44 = vld [vmem:[#allocation140_spill] sm:$0xff] }
 0x216   : > { %3394 = vmatprep.mubr.f32.mxu1 %v2608_v8  ;;  %v12377_v36 = vadd.f32 %v16806_v6, %v2804_v15  ;;  %v2546_v58 = vsel %vm1316_vm3, %v16814_v44, %v8532_v43  ;;  %v8377_v6 = vunpack.i.h.bf16 %v16811_v42  ;;  %v2377_v43 = vpop.permute.xlu0 %2376  ;;  %v8381_v42 = vunpack.i.l.bf16 %v16821_v16 }
 0x217   : > { %v2808_v47 = vpop.f32.mrb[2].mxu0  ;;  %v2578_v8 = vsel %vm1348_vm4, %v2546_v58, %v8611_v2  ;;  %v16819_v2 = vld [vmem:[#allocation149_spill] sm:$0xff]  ;;  %v8541_v44 = vunpack.i.l.bf16 %v12111_v60 }
 0x218   : > { %16807 = vst [vmem:[#allocation42_spill] sm:$0xff] %v12377_v36  ;;  %v2809_v25 = vadd.f32 %v12358_v23, %v2808_v47  ;;  %v2810_v35 = vpop.f32.mrb[3].mxu0  ;;  %v2610_v50 = vsel %vm1380_vm5, %v2578_v8, %v2375_v17  ;;  %v16820_v47 = vld [vmem:[#allocation202_spill] sm:$0xff]  ;;  %v8302_v17 = vunpack.i.h.bf16 %v16815_v22  ;;  %v16823_v58 = vld [vmem:[#allocation97_spill] sm:$0xff] }
 0x219   : > { %3395 = vmatmul.mubr.f32.gmra.mrb[48].mxu1 %v2512_v57  ;;  %v2547_v57 = vsel %vm1316_vm3, %v16819_v2, %v8536_v51  ;;  %v8456_v54 = vunpack.i.l.bf16 %v16820_v47  ;;  %v16822_v51 = vld [vmem:[#allocation125_spill] sm:$0xff]  ;;  %v8457_v8 = vunpack.i.h.bf16 %v16820_v47  ;;  %v8542_v2 = vunpack.i.h.bf16 %v12111_v60 }
 0x21a   : > { %3399 = vmatprep.mubr.f32.mxu1 %v2609_v56  ;;  %v12395_v48 = vadd.f32 %v16812_v59, %v2809_v25  ;;  %v8616_v25 = vunpack.i.l.bf16 %v12198_v62  ;;  %v2514_v56 = vsel %vm1380_vm5, %v2482_v55, %v8452_v46  ;;  %v2579_v3 = vsel %vm1348_vm4, %v2547_v57, %v8612_v12  ;;  %v16827_v55 = vld [vmem:[#allocation129_spill] sm:$0xff] }
 0x21b   : > { %v2813_v15 = vpop.f32.mrb[4].mxu0  ;;  %v2611_v30 = vsel %vm1380_vm5, %v2579_v3, %v2377_v43  ;;  %v2453_v59 = vsel %vm1316_vm3, %v16822_v51, %v8301_v38  ;;  %v16826_v38 = vld [vmem:[#allocation109_spill] sm:$0xff]  ;;  %v16832_v51 = vld [vmem:[#allocation128_spill] sm:$0xff] }
 0x21c   : > { %16813 = vst [vmem:[#allocation33_spill] sm:$0xff] %v12395_v48  ;;  %v2814_v10 = vadd.f32 %v12358_v23, %v2813_v15  ;;  %v2815_v53 = vpop.f32.mrb[5].mxu0  ;;  %v2483_v12 = vsel %vm1348_vm4, %v2453_v59, %v8377_v6  ;;  %v8306_v43 = vunpack.i.l.bf16 %v16826_v38  ;;  %v16828_v57 = vld [vmem:[#allocation17_spill] sm:$0xff]  ;;  %v8307_v59 = vunpack.i.h.bf16 %v16826_v38 }
 0x21d   : > { %3400 = vmatmul.mubr.f32.gmra.mrb[50].mxu1 %v2513_v39  ;;  %v16825_v39 = vld [vmem:[#allocation150_spill] sm:$0xff] }
 0x21e   : > { %3404 = vmatprep.mubr.f32.mxu1 %v2610_v50  ;;  %v12411_v27 = vadd.f32 %v16817_v20, %v2814_v10  ;;  %v2548_v15 = vsel %vm1316_vm3, %v16825_v39, %v8537_v33  ;;  %v8617_v10 = vunpack.i.h.bf16 %v12198_v62  ;;  %v2515_v50 = vsel %vm1380_vm5, %v2483_v12, %v8456_v54  ;;  %v2381_v33 = vpop.permute.xlu0 %2380  ;;  %v16833_v12 = vld [vmem:[#allocation179_spill] sm:$0xff] }
 0x21f   : > { %v2818_v35 = vpop.f32.mrb[6].mxu0  ;;  %v2580_v22 = vsel %vm1348_vm4, %v2548_v15, %v8616_v25  ;;  %v8382_v20 = vunpack.i.h.bf16 %v16821_v16  ;;  %v2454_v62 = vsel %vm1316_vm3, %v16827_v55, %v8302_v17  ;;  %v16830_v25 = vld [vmem:[#allocation146_spill] sm:$0xff]  ;;  %v8386_v39 = vunpack.i.l.bf16 %v16833_v12  ;;  %v16837_v55 = vld [vmem:[#allocation95_spill] sm:$0xff] }
 0x220   : > { %16818 = vst [vmem:[#allocation189_spill] sm:$0xff] %v12411_v27  ;;  %v2819_v14 = vadd.f32 %v12358_v23, %v2818_v35  ;;  %v2820_v7 = vpop.f32.mrb[7].mxu0  ;;  %v2612_v26 = vsel %vm1380_vm5, %v2580_v22, %v2379_v11  ;;  %v2484_v54 = vsel %vm1348_vm4, %v2454_v62, %v8381_v42  ;;  %v16831_v35 = vld [vmem:[#allocation114_spill] sm:$0xff]  ;;  %v2455_v42 = vsel %vm1316_vm3, %v16832_v51, %v8306_v43 }
 0x221   : > { %3405 = vmatmul.mubr.f32.gmra.mrb[52].mxu1 %v2514_v56  ;;  %v2549_v56 = vsel %vm1316_vm3, %v16830_v25, %v8541_v44  ;;  %v8461_v3 = vunpack.i.l.bf16 %v16831_v35  ;;  %v2383_v44 = vpop.permute.xlu1 %2382  ;;  %v8546_v15 = vunpack.i.l.bf16 %v12127_v18  ;;  %v8462_v22 = vunpack.i.h.bf16 %v16831_v35 }
 0x222   : > { %3409 = vmatprep.mubr.f32.mxu1 %v2611_v30  ;;  %v12428_v46 = vadd.f32 %v16823_v58, %v2819_v14  ;;  %v8621_v14 = vunpack.i.l.bf16 %v12214_v31  ;;  %v2516_v30 = vsel %vm1380_vm5, %v2484_v54, %v8457_v8  ;;  %v2581_v16 = vsel %vm1348_vm4, %v2549_v56, %v8617_v10  ;;  %v16834_v8 = vld [vmem:[#allocation27_spill] sm:$0xff] }
 0x223   : > { %v2823_v53 = vpop.f32.mrb[8].mxu0  ;;  %v2613_v17 = vsel %vm1380_vm5, %v2581_v16, %v2381_v33  ;;  %v2485_v58 = vsel %vm1348_vm4, %v2455_v42, %v8382_v20  ;;  %v8622_v43 = vunpack.i.h.bf16 %v12214_v31  ;;  %v8311_v62 = vunpack.i.l.bf16 %v16837_v55  ;;  %v16838_v54 = vld [vmem:[#allocation135_spill] sm:$0xff] }
 0x224   : > { %16824 = vst [vmem:[#allocation43_spill] sm:$0xff] %v12428_v46  ;;  %v2824_v19 = vadd.f32 %v12358_v23, %v2823_v53  ;;  %v2825_v6 = vpop.f32.mrb[9].mxu0  ;;  %v2517_v38 = vsel %vm1380_vm5, %v2485_v58, %v8461_v3  ;;  %v2456_v31 = vsel %vm1316_vm3, %v16838_v54, %v8307_v59  ;;  %v8547_v25 = vunpack.i.h.bf16 %v12127_v18  ;;  %v16840_v3 = vld [vmem:[#allocation158_spill] sm:$0xff]  ;;  %v16847_v54 = vld [vmem:[#allocation133_spill] sm:$0xff] }
 0x225   : > { %3410 = vmatmul.mubr.f32.gmra.mrb[54].mxu1 %v2515_v50  ;;  %v16836_v50 = vld [vmem:[#allocation147_spill] sm:$0xff]  ;;  %v2486_v35 = vsel %vm1348_vm4, %v2456_v31, %v8386_v39  ;;  %v8626_v16 = vunpack.i.l.bf16 %v12210_v29  ;;  %v8312_v42 = vunpack.i.h.bf16 %v16837_v55  ;;  %v16842_v59 = vld [vmem:[#allocation6_spill] sm:$0xff]  ;;  %v2387_v58 = vpop.permute.xlu1 %2386  ;;  %v8552_v31 = vunpack.i.h.bf16 %v12123_v13 }
 0x226   : > { %3414 = vmatprep.mubr.f32.mxu1 %v2612_v26  ;;  %v12445_v47 = vadd.f32 %v16828_v57, %v2824_v19  ;;  %v2550_v53 = vsel %vm1316_vm3, %v16836_v50, %v8542_v2  ;;  %v8387_v57 = vunpack.i.h.bf16 %v16833_v12  ;;  %v2385_v2 = vpop.permute.xlu0 %2384  ;;  %v16843_v12 = vld [vmem:[#allocation131_spill] sm:$0xff] }
 0x227   : > { %v2828_v7 = vpop.f32.mrb[10].mxu0  ;;  %v2582_v26 = vsel %vm1348_vm4, %v2550_v53, %v8621_v14  ;;  %v2551_v14 = vsel %vm1316_vm3, %v16840_v3, %v8546_v15  ;;  %v2457_v39 = vsel %vm1316_vm3, %v16843_v12, %v8311_v62  ;;  %v8551_v15 = vunpack.i.l.bf16 %v12123_v13  ;;  %v16845_v53 = vld [vmem:[#allocation159_spill] sm:$0xff] }
 0x228   : > { %16829 = vst [vmem:[#allocation80_spill] sm:$0xff] %v12445_v47  ;;  %v2829_v60 = vadd.f32 %v12358_v23, %v2828_v7  ;;  %v2830_v11 = vpop.f32.mrb[11].mxu0  ;;  %v2614_v20 = vsel %vm1380_vm5, %v2582_v26, %v2383_v44  ;;  %v8391_v44 = vunpack.i.l.bf16 %v16842_v59  ;;  %v2487_v50 = vsel %vm1348_vm4, %v2457_v39, %v8387_v57  ;;  %v16849_v3 = vld [vmem:[#allocation151_spill] sm:$0xff] }
 0x229   : > { %3415 = vmatmul.mubr.f32.gmra.mrb[56].mxu1 %v2516_v30  ;;  %v16841_v30 = vld [vmem:[#allocation26_spill] sm:$0xff]  ;;  %v2583_v11 = vsel %vm1348_vm4, %v2551_v14, %v8622_v43  ;;  %v8392_v57 = vunpack.i.h.bf16 %v16842_v59  ;;  %v2553_v14 = vsel %vm1316_vm3, %v16849_v3, %v8551_v15  ;;  %v2391_v59 = vpop.permute.xlu1 %2390  ;;  %v8556_v39 = vunpack.i.l.bf16 %v12135_v1 }
 0x22a   : > { %3419 = vmatprep.mubr.f32.mxu1 %v2613_v17  ;;  %v12463_v10 = vadd.f32 %v16834_v8, %v2829_v60  ;;  %v8466_v7 = vunpack.i.l.bf16 %v16841_v30  ;;  %v2518_v60 = vsel %vm1380_vm5, %v2486_v35, %v8462_v22  ;;  %v2552_v22 = vsel %vm1316_vm3, %v16845_v53, %v8547_v25 }
 0x22b   : > { %v2833_v19 = vpop.f32.mrb[12].mxu0  ;;  %v8467_v43 = vunpack.i.h.bf16 %v16841_v30  ;;  %v16850_v30 = vld [vmem:[#allocation180_spill] sm:$0xff]  ;;  %v8476_v3 = vunpack.i.l.bf16 %v11997_v37 }
 0x22c   : > { %16835 = vst [vmem:[#allocation208_spill] sm:$0xff] %v12463_v10  ;;  %v2834_v6 = vadd.f32 %v12358_v23, %v2833_v19  ;;  %v2835_v33 = vpop.f32.mrb[13].mxu0  ;;  %v2519_v19 = vsel %vm1380_vm5, %v2487_v50, %v8466_v7  ;;  %v8471_v7 = vunpack.i.l.bf16 %v16850_v30  ;;  %v16854_v50 = vld [vmem:[#allocation156_spill] sm:$0xff] }
 0x22d   : > { %3420 = vmatmul.mubr.f32.gmra.mrb[58].mxu1 %v2517_v38  ;;  %v8627_v38 = vunpack.i.h.bf16 %v12210_v29  ;;  %v2458_v29 = vsel %vm1316_vm3, %v16847_v54, %v8312_v42  ;;  %v2554_v53 = vsel %vm1316_vm3, %v16854_v50, %v8552_v31  ;;  %v16858_v31 = vld [vmem:[#allocation83_spill] sm:$0xff] }
 0x22e   : > { %3424 = vmatprep.mubr.f32.mxu1 %v2614_v20  ;;  %v12479_v56 = vadd.f32 %v12009_v63, %v2834_v6  ;;  %v2615_v63 = vsel %vm1380_vm5, %v2583_v11, %v2385_v2  ;;  %v2584_v6 = vsel %vm1348_vm4, %v2552_v22, %v8626_v16  ;;  %v16846_v20 = vld [vmem:[#allocation12_spill] sm:$0xff]  ;;  %v2389_v2 = vpop.permute.xlu0 %2388  ;;  %v2488_v35 = vsel %vm1348_vm4, %v2458_v29, %v8391_v44 }
 0x22f   : > { %v2838_v17 = vpop.f32.mrb[14].mxu0  ;;  %v8316_v33 = vunpack.i.l.bf16 %v16846_v20  ;;  %v2616_v55 = vsel %vm1380_vm5, %v2584_v6, %v2387_v58  ;;  %v8631_v16 = vunpack.i.l.bf16 %v12222_v4  ;;  %v2585_v11 = vsel %vm1348_vm4, %v2553_v14, %v8627_v38  ;;  %v16852_v58 = vld [vmem:[#allocation132_spill] sm:$0xff] }
 0x230   : > { %16839 = vst [vmem:[#allocation101_spill] sm:$0xff] %v12479_v56  ;;  %v2839_v18 = vadd.f32 %v12358_v23, %v2838_v17  ;;  %v2840_v51 = vpop.f32.mrb[15].mxu0  ;;  %v8317_v42 = vunpack.i.h.bf16 %v16846_v20  ;;  %v8396_v12 = vunpack.i.l.bf16 %v16852_v58  ;;  %v8472_v22 = vunpack.i.h.bf16 %v16850_v30 }
 0x231   : > { %3425 = vmatmul.mubr.f32.gmra.mrb[60].mxu1 %v2518_v60  ;;  %v2520_v60 = vsel %vm1380_vm5, %v2488_v35, %v8467_v43  ;;  %v8632_v43 = vunpack.i.h.bf16 %v12222_v4  ;;  %v2555_v35 = vsel %vm1316_vm3, %v16858_v31, %v8556_v39  ;;  %v8636_v14 = vunpack.i.l.bf16 %v12218_v41 }
 0x232   : > { %3429 = vmatprep.mubr.f32.mxu1 %v2615_v63  ;;  %v12496_v8 = vadd.f32 %v12003_v28, %v2839_v18  ;;  %v16851_v63 = vld [vmem:[#allocation79_spill] sm:$0xff]  ;;  %v8637_v39 = vunpack.i.h.bf16 %v12218_v41 }
 0x233   : > { %v2843_v26 = vpop.f32.mrb[16].mxu0  ;;  %v2459_v51 = vsel %vm1316_vm3, %v16851_v63, %v8316_v33 }
 0x234   : > { %16844 = vst [vmem:[#allocation127_spill] sm:$0xff] %v12496_v8  ;;  %v2844_v28 = vadd.f32 %v12358_v23, %v2843_v26  ;;  %v2845_v62 = vpop.f32.mrb[17].mxu0  ;;  %v2489_v44 = vsel %vm1348_vm4, %v2459_v51, %v8392_v57  ;;  %v2586_v26 = vsel %vm1348_vm4, %v2554_v53, %v8631_v16  ;;  %v16856_v57 = vld [vmem:[#allocation148_spill] sm:$0xff]  ;;  %v2587_v16 = vsel %vm1348_vm4, %v2555_v35, %v8632_v43  ;;  %v16863_v43 = vld [vmem:[#allocation185_spill] sm:$0xff] }
 0x235   : > { %3430 = vmatmul.mubr.f32.gmra.mrb[62].mxu1 %v2519_v19  ;;  %v2521_v38 = vsel %vm1380_vm5, %v2489_v44, %v8471_v7  ;;  %v2618_v20 = vsel %vm1380_vm5, %v2586_v26, %v2391_v59  ;;  %v2393_v62 = vpop.permute.xlu0 %2392  ;;  %v2460_v4 = vsel %vm1316_vm3, %v16856_v57, %v8317_v42  ;;  %v8561_v51 = vunpack.i.l.bf16 %v12131_v49  ;;  %v16862_v44 = vld [vmem:[#allocation169_spill] sm:$0xff] }
 0x236   : > { %3434 = vmatprep.mubr.f32.mxu1 %v2616_v55  ;;  %v12513_v25 = vadd.f32 %v12065_v32, %v2844_v28  ;;  %v2617_v32 = vsel %vm1380_vm5, %v2585_v11, %v2389_v2  ;;  %v8397_v55 = vunpack.i.h.bf16 %v16852_v58  ;;  %v8557_v2 = vunpack.i.h.bf16 %v12135_v1  ;;  %v16859_v11 = vld [vmem:[#allocation19_spill] sm:$0xff] }
 0x237   : > { %v2848_v17 = vpop.f32.mrb[18].mxu0  ;;  %v2490_v29 = vsel %vm1348_vm4, %v2460_v4, %v8396_v12  ;;  %v8477_v12 = vunpack.i.h.bf16 %v11997_v37  ;;  %v16864_v37 = vld [vmem:[#allocation142_spill] sm:$0xff]  ;;  %v16868_v4 = vld [vmem:[#allocation77_spill] sm:$0xff] }
 0x238   : > { %16848 = vst [vmem:[#allocation41_spill] sm:$0xff] %v12513_v25  ;;  %v2849_v13 = vadd.f32 %v12358_v23, %v2848_v17  ;;  %v2850_v18 = vpop.f32.mrb[19].mxu0  ;;  %v2522_v30 = vsel %vm1380_vm5, %v2490_v29, %v8472_v22  ;;  %v2556_v58 = vsel %vm1316_vm3, %v16862_v44, %v8557_v2  ;;  %v8481_v2 = vunpack.i.l.bf16 %v16868_v4  ;;  %v16869_v29 = vld [vmem:[#allocation81_spill] sm:$0xff] }
 0x239   : > { %3435 = vmatmul.mubr.f32.gmra.mrb[64].mxu1 %v2520_v60  ;;  %v16860_v18 = vld [vmem:[#allocation138_spill] sm:$0xff]  ;;  %v2588_v22 = vsel %vm1348_vm4, %v2556_v58, %v8636_v14  ;;  %v8641_v31 = vunpack.i.l.bf16 %v16869_v29  ;;  %v8482_v58 = vunpack.i.h.bf16 %v16868_v4  ;;  %v16881_v4 = vld [vmem:[#allocation36_spill] sm:$0xff] }
 0x23a   : > { %3439 = vmatprep.mubr.f32.mxu1 %v2617_v32  ;;  %v12531_v15 = vadd.f32 %v12056_v34, %v2849_v13  ;;  %v16855_v34 = vld [vmem:[#allocation10_spill] sm:$0xff]  ;;  %v8401_v13 = vunpack.i.l.bf16 %v16859_v11  ;;  %v2395_v32 = vpop.permute.xlu1 %2394 }
 0x23b   : > { %v2853_v19 = vpop.f32.mrb[20].mxu0  ;;  %v8321_v28 = vunpack.i.l.bf16 %v16855_v34  ;;  %v8322_v17 = vunpack.i.h.bf16 %v16855_v34  ;;  %v16865_v34 = vld [vmem:[#allocation207_spill] sm:$0xff] }
 0x23c   : > { %16853 = vst [vmem:[#allocation67_spill] sm:$0xff] %v12531_v15  ;;  %v2854_v6 = vadd.f32 %v12358_v23, %v2853_v19  ;;  %v2855_v33 = vpop.f32.mrb[21].mxu0  ;;  %v2620_v19 = vsel %vm1380_vm5, %v2588_v22, %v2395_v32  ;;  %v16872_v32 = vld [vmem:[#allocation34_spill] sm:$0xff] }
 0x23d   : > { %3440 = vmatmul.mubr.f32.gmra.mrb[66].mxu1 %v2521_v38  ;;  %v2461_v63 = vsel %vm1316_vm3, %v16860_v18, %v8321_v28  ;;  %v8326_v38 = vunpack.i.l.bf16 %v16863_v43  ;;  %v2462_v41 = vsel %vm1316_vm3, %v16864_v37, %v8322_v17  ;;  %v8562_v33 = vunpack.i.h.bf16 %v12131_v49 }
 0x23e   : > { %3444 = vmatprep.mubr.f32.mxu1 %v2618_v20  ;;  %v12547_v54 = vadd.f32 %v12099_v45, %v2854_v6  ;;  %v2619_v45 = vsel %vm1380_vm5, %v2587_v16, %v2393_v62  ;;  %v2491_v59 = vsel %vm1348_vm4, %v2461_v63, %v8397_v55  ;;  %v8402_v6 = vunpack.i.h.bf16 %v16859_v11  ;;  %v2397_v20 = vpop.permute.xlu0 %2396  ;;  %v16867_v62 = vld [vmem:[#allocation85_spill] sm:$0xff]  ;;  %v16871_v11 = vld [vmem:[#allocation111_spill] sm:$0xff]  ;;  %v16873_v63 = vld [vmem:[#allocation152_spill] sm:$0xff] }
 0x23f   : > { %v2858_v7 = vpop.f32.mrb[22].mxu0  ;;  %v2523_v50 = vsel %vm1380_vm5, %v2491_v59, %v8476_v3  ;;  %v2492_v55 = vsel %vm1348_vm4, %v2462_v41, %v8401_v13  ;;  %v2557_v57 = vsel %vm1316_vm3, %v16867_v62, %v8561_v51  ;;  %v16870_v16 = vld [vmem:[#allocation141_spill] sm:$0xff]  ;;  %v8406_v13 = vunpack.i.l.bf16 %v16871_v11  ;;  %v16875_v59 = vld [vmem:[#allocation164_spill] sm:$0xff]  ;;  %v16880_v62 = vld [vmem:[#allocation87_spill] sm:$0xff] }
 0x240   : > { %16857 = vst [vmem:[#allocation52_spill] sm:$0xff] %v12547_v54  ;;  %v2859_v1 = vadd.f32 %v12358_v23, %v2858_v7  ;;  %v2860_v60 = vpop.f32.mrb[23].mxu0  ;;  %v2524_v35 = vsel %vm1380_vm5, %v2492_v55, %v8477_v12  ;;  %v2589_v14 = vsel %vm1348_vm4, %v2557_v57, %v8637_v39  ;;  %v8566_v18 = vunpack.i.l.bf16 %v16872_v32 }
 0x241   : > { %3445 = vmatmul.mubr.f32.gmra.mrb[68].mxu1 %v2522_v30  ;;  %v2621_v30 = vsel %vm1380_vm5, %v2589_v14, %v2397_v20  ;;  %v2399_v60 = vpop.permute.xlu1 %2398  ;;  %v2558_v44 = vsel %vm1316_vm3, %v16875_v59, %v8562_v33  ;;  %v8642_v12 = vunpack.i.h.bf16 %v16869_v29  ;;  %v16877_v20 = vld [vmem:[#allocation157_spill] sm:$0xff]  ;;  %v8567_v41 = vunpack.i.h.bf16 %v16872_v32  ;;  %v16878_v33 = vld [vmem:[#allocation116_spill] sm:$0xff]  ;;  %v16882_v29 = vld [vmem:[#allocation46_spill] sm:$0xff] }
 0x242   : > { %3449 = vmatprep.mubr.f32.mxu1 %v2619_v45  ;;  %v12564_v42 = vadd.f32 %v12097_v0, %v2859_v1  ;;  %v2463_v1 = vsel %vm1316_vm3, %v16870_v16, %v8326_v38  ;;  %v8327_v45 = vunpack.i.h.bf16 %v16863_v43  ;;  %v2559_v57 = vsel %vm1316_vm3, %v16880_v62, %v8566_v18  ;;  %v16886_v18 = vld [vmem:[#allocation100_spill] sm:$0xff] }
 0x243   : > { %v2863_v53 = vpop.f32.mrb[24].mxu0  ;;  %v2493_v17 = vsel %vm1348_vm4, %v2463_v1, %v8402_v6  ;;  %v2401_v6 = vpop.permute.xlu0 %2400  ;;  %v2591_v14 = vsel %vm1348_vm4, %v2559_v57, %v8642_v12  ;;  %v16883_v1 = vld [vmem:[#allocation7_spill] sm:$0xff]  ;;  %v8487_v12 = vunpack.i.h.bf16 %v16881_v4 }
 0x244   : > { %16861 = vst [vmem:[#allocation126_spill] sm:$0xff] %v12564_v42  ;;  %v2864_v0 = vadd.f32 %v12358_v23, %v2863_v53  ;;  %v2865_v26 = vpop.f32.mrb[25].mxu0  ;;  %v2525_v39 = vsel %vm1380_vm5, %v2493_v17, %v8481_v2  ;;  %v2590_v53 = vsel %vm1348_vm4, %v2558_v44, %v8641_v31  ;;  %v2464_v37 = vsel %vm1316_vm3, %v16877_v20, %v8327_v45  ;;  %v16884_v17 = vld [vmem:[#allocation153_spill] sm:$0xff]  ;;  %v16888_v44 = vld [vmem:[#allocation174_spill] sm:$0xff] }
 0x245   : > { %3450 = vmatmul.mubr.f32.gmra.mrb[70].mxu1 %v2523_v50  ;;  %v2622_v43 = vsel %vm1380_vm5, %v2590_v53, %v2399_v60  ;;  %v8407_v26 = vunpack.i.h.bf16 %v16871_v11  ;;  %v2494_v55 = vsel %vm1348_vm4, %v2464_v37, %v8406_v13  ;;  %v8486_v2 = vunpack.i.l.bf16 %v16881_v4  ;;  %v2403_v60 = vpop.permute.xlu1 %2402  ;;  %v16885_v13 = vld [vmem:[#allocation25_spill] sm:$0xff]  ;;  %v16890_v37 = vld [vmem:[#allocation155_spill] sm:$0xff] }
 0x246   : > { %3454 = vmatprep.mubr.f32.mxu1 %v2620_v19  ;;  %v12581_v28 = vadd.f32 %v16865_v34, %v2864_v0  ;;  %v16876_v0 = vld [vmem:[#allocation9_spill] sm:$0xff]  ;;  %v8646_v31 = vunpack.i.l.bf16 %v16882_v29  ;;  %v8411_v45 = vunpack.i.l.bf16 %v16883_v1  ;;  %v8571_v32 = vunpack.i.l.bf16 %v16885_v13  ;;  %v16893_v4 = vld [vmem:[#allocation171_spill] sm:$0xff] }
 0x247   : > { %v2868_v3 = vpop.f32.mrb[26].mxu0  ;;  %v8331_v19 = vunpack.i.l.bf16 %v16876_v0  ;;  %v8332_v16 = vunpack.i.h.bf16 %v16876_v0  ;;  %v2405_v20 = vpop.permute.xlu0 %2404 }
 0x248   : > { %16866 = vst [vmem:[#allocation124_spill] sm:$0xff] %v12581_v28  ;;  %v2869_v49 = vadd.f32 %v12358_v23, %v2868_v3  ;;  %v2870_v7 = vpop.f32.mrb[27].mxu0 }
 0x249   : > { %3455 = vmatmul.mubr.f32.gmra.mrb[72].mxu1 %v2524_v35  ;;  %v2526_v35 = vsel %vm1380_vm5, %v2494_v55, %v8482_v58  ;;  %v2465_v11 = vsel %vm1316_vm3, %v16884_v17, %v8331_v19  ;;  %v2560_v58 = vsel %vm1316_vm3, %v16888_v44, %v8567_v41  ;;  %v2466_v41 = vsel %vm1316_vm3, %v16890_v37, %v8332_v16  ;;  %v16891_v55 = vld [vmem:[#allocation35_spill] sm:$0xff] }
 0x24a   : > { %3459 = vmatprep.mubr.f32.mxu1 %v2621_v30  ;;  %v12599_v51 = vadd.f32 %v16873_v63, %v2869_v49  ;;  %v2623_v30 = vsel %vm1380_vm5, %v2591_v14, %v2401_v6  ;;  %v2495_v59 = vsel %vm1348_vm4, %v2465_v11, %v8407_v26  ;;  %v8412_v6 = vunpack.i.h.bf16 %v16883_v1  ;;  %v2407_v11 = vpop.permute.xlu1 %2406 }
 0x24b   : > { %v2873_v50 = vpop.f32.mrb[28].mxu0  ;;  %v2496_v57 = vsel %vm1348_vm4, %v2466_v41, %v8411_v45 }
 0x24c   : > { %16874 = vst [vmem:[#allocation38_spill] sm:$0xff] %v12599_v51  ;;  %v2874_v22 = vadd.f32 %v12358_v23, %v2873_v50  ;;  %v2875_v38 = vpop.f32.mrb[29].mxu0  ;;  %v2527_v50 = vsel %vm1380_vm5, %v2495_v59, %v8486_v2  ;;  %v2561_v2 = vsel %vm1316_vm3, %v16893_v4, %v8571_v32  ;;  %v2528_v14 = vsel %vm1380_vm5, %v2496_v57, %v8487_v12  ;;  %v16897_v32 = vld [vmem:[#allocation193_spill] sm:$0xff]  ;;  %v16898_v59 = vld [vmem:[#allocation144_spill] sm:$0xff] }
 0x24d   : > { %3460 = vmatmul.mubr.f32.gmra.mrb[74].mxu1 %v2525_v39  ;;  %v8647_v39 = vunpack.i.h.bf16 %v16882_v29  ;;  %v16894_v29 = vld [vmem:[#allocation113_spill] sm:$0xff]  ;;  %v8576_v44 = vunpack.i.l.bf16 %v16898_v59  ;;  %v8417_v41 = vunpack.i.h.bf16 %v16897_v32  ;;  %v8577_v4 = vunpack.i.h.bf16 %v16898_v59  ;;  %v16910_v59 = vld [vmem:[#allocation30_spill] sm:$0xff] }
 0x24e   : > { %3464 = vmatprep.mubr.f32.mxu1 %v2622_v43  ;;  %v12615_v34 = vadd.f32 %v16878_v33, %v2874_v22  ;;  %v2592_v22 = vsel %vm1348_vm4, %v2560_v58, %v8646_v31  ;;  %v16889_v43 = vld [vmem:[#allocation136_spill] sm:$0xff]  ;;  %v8572_v33 = vunpack.i.h.bf16 %v16885_v13  ;;  %v8491_v31 = vunpack.i.l.bf16 %v16894_v29 }
 0x24f   : > { %v2878_v3 = vpop.f32.mrb[30].mxu0  ;;  %v8336_v38 = vunpack.i.l.bf16 %v16889_v43  ;;  %v2624_v19 = vsel %vm1380_vm5, %v2592_v22, %v2403_v60  ;;  %v16896_v60 = vld [vmem:[#allocation154_spill] sm:$0xff]  ;;  %v8337_v17 = vunpack.i.h.bf16 %v16889_v43  ;;  %v16899_v58 = vld [vmem:[#allocation184_spill] sm:$0xff] }
 0x250   : > { %16879 = vst [vmem:[#allocation197_spill] sm:$0xff] %v12615_v34  ;;  %v2879_v49 = vadd.f32 %v12358_v23, %v2878_v3  ;;  %v2880_v7 = vpop.f32.mrb[31].mxu0 }
 0x251   : > { %3465 = vmatmul.mubr.f32.gmra.mrb[76].mxu1 %v2526_v35  ;;  %v16895_v35 = vld [vmem:[#allocation68_spill] sm:$0xff]  ;;  %v2467_v45 = vsel %vm1316_vm3, %v16896_v60, %v8336_v38 }
 0x252   : > { %3469 = vmatprep.mubr.f32.mxu1 %v2623_v30  ;;  %v12632_v63 = vadd.f32 %v16886_v18, %v2879_v49  ;;  %v8651_v3 = vunpack.i.l.bf16 %v16895_v35  ;;  %v2593_v30 = vsel %vm1348_vm4, %v2561_v2, %v8647_v39  ;;  %v2497_v13 = vsel %vm1348_vm4, %v2467_v45, %v8412_v6  ;;  %v16901_v39 = vld [vmem:[#allocation173_spill] sm:$0xff]  ;;  %v16904_v2 = vld [vmem:[#allocation115_spill] sm:$0xff] }
 0x253   : > { %v2883_v53 = vpop.f32.mrb[32].mxu0  ;;  %v2625_v16 = vsel %vm1380_vm5, %v2593_v30, %v2405_v20  ;;  %v8416_v18 = vunpack.i.l.bf16 %v16897_v32  ;;  %v8652_v22 = vunpack.i.h.bf16 %v16895_v35  ;;  %v2529_v43 = vsel %vm1380_vm5, %v2497_v13, %v8491_v31  ;;  %v16906_v35 = vld [vmem:[#allocation177_spill] sm:$0xff]  ;;  %v16909_v13 = vld [vmem:[#allocation160_spill] sm:$0xff] }
 0x254   : > { %16887 = vst [vmem:[#allocation53_spill] sm:$0xff] %v12632_v63  ;;  %v2884_v0 = vadd.f32 %v12358_v23, %v2883_v53  ;;  %v2885_v26 = vpop.f32.mrb[33].mxu0  ;;  %v8492_v53 = vunpack.i.h.bf16 %v16894_v29  ;;  %v16908_v30 = vld [vmem:[#allocation209_spill] sm:$0xff] }
 0x255   : > { %3470 = vmatmul.mubr.f32.gmra.mrb[78].mxu1 %v2527_v50  ;;  %v2562_v50 = vsel %vm1316_vm3, %v16901_v39, %v8572_v33  ;;  %v2409_v33 = vpop.permute.xlu0 %2408 }
 0x256   : > { %3474 = vmatprep.mubr.f32.mxu1 %v2624_v19  ;;  %v12649_v62 = vadd.f32 %v16891_v55, %v2884_v0  ;;  %v2594_v0 = vsel %vm1348_vm4, %v2562_v50, %v8651_v3  ;;  %v16902_v19 = vld [vmem:[#allocation13_spill] sm:$0xff]  ;;  %v16903_v55 = vld [vmem:[#allocation166_spill] sm:$0xff]  ;;  %v2563_v3 = vsel %vm1316_vm3, %v16906_v35, %v8576_v44  ;;  %v8421_v44 = vunpack.i.l.bf16 %v16910_v59  ;;  %v16911_v50 = vld [vmem:[#allocation24_spill] sm:$0xff] }
 0x257   : > { %v2888_v49 = vpop.f32.mrb[34].mxu0  ;;  %v8341_v26 = vunpack.i.l.bf16 %v16902_v19  ;;  %v2626_v20 = vsel %vm1380_vm5, %v2594_v0, %v2407_v11  ;;  %v2468_v57 = vsel %vm1316_vm3, %v16903_v55, %v8337_v17  ;;  %v2595_v60 = vsel %vm1348_vm4, %v2563_v3, %v8652_v22  ;;  %v16914_v0 = vld [vmem:[#allocation178_spill] sm:$0xff]  ;;  %v16916_v3 = vld [vmem:[#allocation163_spill] sm:$0xff] }
 0x258   : > { %16892 = vst [vmem:[#allocation165_spill] sm:$0xff] %v12649_v62  ;;  %v2889_v7 = vadd.f32 %v12358_v23, %v2888_v49  ;;  %v2890_v1 = vpop.f32.mrb[35].mxu0  ;;  %v2498_v31 = vsel %vm1348_vm4, %v2468_v57, %v8416_v18  ;;  %v2627_v17 = vsel %vm1380_vm5, %v2595_v60, %v2409_v33  ;;  %v8342_v18 = vunpack.i.h.bf16 %v16902_v19  ;;  %v16920_v60 = vld [vmem:[#allocation23_spill] sm:$0xff] }
 0x259   : > { %3475 = vmatmul.mubr.f32.gmra.mrb[80].mxu1 %v2528_v14  ;;  %v16907_v14 = vld [vmem:[#allocation117_spill] sm:$0xff]  ;;  %v2469_v32 = vsel %vm1316_vm3, %v16909_v13, %v8341_v26  ;;  %v8581_v22 = vunpack.i.l.bf16 %v16911_v50  ;;  %v8657_v19 = vunpack.i.h.bf16 %v16908_v30  ;;  %v8422_v35 = vunpack.i.h.bf16 %v16910_v59 }
 0x25a   : > { %3479 = vmatprep.mubr.f32.mxu1 %v2625_v16  ;;  %v12667_v12 = vadd.f32 %v16899_v58, %v2889_v7  ;;  %v8496_v49 = vunpack.i.l.bf16 %v16907_v14  ;;  %v8656_v7 = vunpack.i.l.bf16 %v16908_v30  ;;  %v2530_v16 = vsel %vm1380_vm5, %v2498_v31, %v8492_v53  ;;  %v2411_v58 = vpop.permute.xlu1 %2410  ;;  %v16917_v30 = vld [vmem:[#allocation45_spill] sm:$0xff] }
 0x25b   : > { %v2893_v38 = vpop.f32.mrb[36].mxu0  ;;  %v2499_v39 = vsel %vm1348_vm4, %v2469_v32, %v8417_v41  ;;  %v8582_v53 = vunpack.i.h.bf16 %v16911_v50  ;;  %v8497_v26 = vunpack.i.h.bf16 %v16907_v14  ;;  %v2470_v14 = vsel %vm1316_vm3, %v16916_v3, %v8342_v18  ;;  %v16922_v50 = vld [vmem:[#allocation162_spill] sm:$0xff] }
 0x25c   : > { %16900 = vst [vmem:[#allocation92_spill] sm:$0xff] %v12667_v12  ;;  %v2894_v6 = vadd.f32 %v12358_v23, %v2893_v38  ;;  %v2895_v37 = vpop.f32.mrb[37].mxu0 }
 0x25d   : > { %3480 = vmatmul.mubr.f32.gmra.mrb[82].mxu1 %v2529_v43  ;;  %v16912_v43 = vld [vmem:[#allocation99_spill] sm:$0xff] }
 0x25e   : > { %3484 = vmatprep.mubr.f32.mxu1 %v2626_v20  ;;  %v12683_v29 = vadd.f32 %v16904_v2, %v2894_v6  ;;  %v2564_v6 = vsel %vm1316_vm3, %v16914_v0, %v8577_v4  ;;  %v2531_v20 = vsel %vm1380_vm5, %v2499_v39, %v8496_v49  ;;  %v16915_v2 = vld [vmem:[#allocation112_spill] sm:$0xff]  ;;  %v2413_v4 = vpop.permute.xlu0 %2412 }
 0x25f   : > { %v2898_v1 = vpop.f32.mrb[38].mxu0  ;;  %v2596_v33 = vsel %vm1348_vm4, %v2564_v6, %v8656_v7  ;;  %v8346_v31 = vunpack.i.l.bf16 %v16915_v2  ;;  %v2500_v7 = vsel %vm1348_vm4, %v2470_v14, %v8421_v44  ;;  %v8347_v44 = vunpack.i.h.bf16 %v16915_v2  ;;  %v16924_v0 = vld [vmem:[#allocation8_spill] sm:$0xff] }
 0x260   : > { %16905 = vst [vmem:[#allocation123_spill] sm:$0xff] %v12683_v29  ;;  %v2899_v45 = vadd.f32 %v12358_v23, %v2898_v1  ;;  %v2900_v11 = vpop.f32.mrb[39].mxu0  ;;  %v2628_v55 = vsel %vm1380_vm5, %v2596_v33, %v2411_v58  ;;  %v2532_v13 = vsel %vm1380_vm5, %v2500_v7, %v8497_v26  ;;  %v8426_v6 = vunpack.i.l.bf16 %v16924_v0  ;;  %v16925_v26 = vld [vmem:[#allocation206_spill] sm:$0xff] }
 0x261   : > { %3485 = vmatmul.mubr.f32.gmra.mrb[84].mxu1 %v2530_v16  ;;  %v16919_v16 = vld [vmem:[#allocation176_spill] sm:$0xff] }
 0x262   : > { %3489 = vmatprep.mubr.f32.mxu1 %v2627_v17  ;;  %v12702_v38 = vadd.f32 %v16912_v43, %v2899_v45  ;;  %v2565_v1 = vsel %vm1316_vm3, %v16919_v16, %v8581_v22  ;;  %v2566_v45 = vsel %vm1316_vm3, %v16920_v60, %v8582_v53  ;;  %v16921_v17 = vld [vmem:[#allocation120_spill] sm:$0xff]  ;;  %v2471_v22 = vsel %vm1316_vm3, %v16922_v50, %v8346_v31  ;;  %v16935_v50 = vld [vmem:[#allocation167_spill] sm:$0xff] }
 0x263   : > { %v2903_v37 = vpop.f32.mrb[40].mxu0  ;;  %v8501_v11 = vunpack.i.l.bf16 %v16921_v17  ;;  %v2597_v59 = vsel %vm1348_vm4, %v2565_v1, %v8657_v19  ;;  %v16923_v53 = vld [vmem:[#allocation96_spill] sm:$0xff]  ;;  %v8427_v60 = vunpack.i.h.bf16 %v16924_v0 }
 0x264   : > { %16913 = vst [vmem:[#allocation104_spill] sm:$0xff] %v12702_v38  ;;  %v2904_v41 = vadd.f32 %v12358_v23, %v2903_v37  ;;  %v2905_v57 = vpop.f32.mrb[41].mxu0  ;;  %v2629_v58 = vsel %vm1380_vm5, %v2597_v59, %v2413_v4  ;;  %v2598_v43 = vsel %vm1348_vm4, %v2566_v45, %v16923_v53  ;;  %v16927_v37 = vld [vmem:[#allocation29_spill] sm:$0xff]  ;;  %v16929_v4 = vld [vmem:[#allocation22_spill] sm:$0xff]  ;;  %v16931_v16 = vld [vmem:[#allocation172_spill] sm:$0xff] }
 0x265   : > { %3490 = vmatmul.mubr.f32.gmra.mrb[86].mxu1 %v2531_v20  ;;  %v16926_v20 = vld [vmem:[#allocation37_spill] sm:$0xff]  ;;  %v2630_v3 = vsel %vm1380_vm5, %v2598_v43, %v16929_v4  ;;  %v2472_v1 = vsel %vm1316_vm3, %v16931_v16, %v8347_v44  ;;  %v16932_v45 = vld [vmem:[#allocation139_spill] sm:$0xff] }
 0x266   : > { %3494 = vmatprep.mubr.f32.mxu1 %v2628_v55  ;;  %v12717_v49 = vadd.f32 %v16917_v30, %v2904_v41  ;;  %v2567_v19 = vsel %vm1316_vm3, %v16926_v20, %v16925_v26  ;;  %v2501_v41 = vsel %vm1348_vm4, %v2471_v22, %v8422_v35  ;;  %v8502_v55 = vunpack.i.h.bf16 %v16921_v17  ;;  %v16930_v30 = vld [vmem:[#allocation91_spill] sm:$0xff] }
 0x267   : > { %v2908_v32 = vpop.f32.mrb[42].mxu0  ;;  %v2533_v57 = vsel %vm1380_vm5, %v2501_v41, %v8501_v11  ;;  %v8351_v7 = vunpack.i.l.bf16 %v16930_v30  ;;  %v2599_v35 = vsel %vm1348_vm4, %v2567_v19, %v16923_v53  ;;  %v2502_v11 = vsel %vm1348_vm4, %v2472_v1, %v8426_v6  ;;  %v16936_v53 = vld [vmem:[#allocation31_spill] sm:$0xff] }
 0x268   : > { %16918 = vst [vmem:[#allocation40_spill] sm:$0xff] %v12717_v49  ;;  %v2909_v18 = vadd.f32 %v12358_v23, %v2908_v32  ;;  %v2910_v39 = vpop.f32.mrb[43].mxu0  ;;  %v2534_v59 = vsel %vm1380_vm5, %v2502_v11, %v8502_v55 }
 0x269   : > { %3495 = vmatmul.mubr.f32.gmra.mrb[88].mxu1 %v2532_v13  ;;  %v16934_v13 = vld [vmem:[#allocation134_spill] sm:$0xff]  ;;  %v2631_v39 = vsel %vm1380_vm5, %v2599_v35, %v16929_v4  ;;  %v2473_v22 = vsel %vm1316_vm3, %v16935_v50, %v8351_v7 }
 0x26a   : > { %3499 = vmatprep.mubr.f32.mxu1 %v2629_v58  ;;  %v12739_v33 = vadd.f32 %v16927_v37, %v2909_v18  ;;  %v8506_v32 = vunpack.i.l.bf16 %v16934_v13  ;;  %v2503_v0 = vsel %vm1348_vm4, %v2473_v22, %v8427_v60  ;;  %v16938_v37 = vld [vmem:[#allocation32_spill] sm:$0xff] }
 0x26b   : > { %v2913_v2 = vpop.f32.mrb[44].mxu0 }
 0x26c   : > { %16928 = vst [vmem:[#allocation72_spill] sm:$0xff] %v12739_v33  ;;  %v2914_v31 = vadd.f32 %v12358_v23, %v2913_v2  ;;  %v2915_v14 = vpop.f32.mrb[45].mxu0  ;;  %v2535_v6 = vsel %vm1380_vm5, %v2503_v0, %v8506_v32 }
 0x26d   : > { %3500 = vmatmul.mubr.f32.gmra.mrb[90].mxu1 %v2533_v57 }
 0x26e   : > { %3504 = vmatprep.mubr.f32.mxu1 %v2630_v3  ;;  %v12754_v17 = vadd.f32 %v16932_v45, %v2914_v31  ;;  %v16940_v31 = vld [vmem:[#allocation102_spill] sm:$0xff] }
 0x26f   : > { %v2918_v18 = vpop.f32.mrb[46].mxu0 }
 0x270   : > { %16933 = vst [vmem:[#allocation50_spill] sm:$0xff] %v12754_v17  ;;  %v2919_v58 = vadd.f32 %v12358_v23, %v2918_v18  ;;  %v2920_v44 = vpop.f32.mrb[47].mxu0 }
 0x271   : > { %3505 = vmatmul.mubr.f32.gmra.mrb[92].mxu1 %v2534_v59 }
 0x272   : > { %3509 = vmatprep.mubr.f32.mxu1 %v2631_v39  ;;  %v12765_v43 = vadd.f32 %v16936_v53, %v2919_v58 }
 0x273   : > { %v2923_v26 = vpop.f32.mrb[48].mxu0 }
 0x274   : > { %16937 = vst [vmem:[#allocation143_spill] sm:$0xff] %v12765_v43  ;;  %v2924_v20 = vadd.f32 %v12358_v23, %v2923_v26  ;;  %v2925_v19 = vpop.f32.mrb[49].mxu0 }
 0x275   : > { %3510 = vmatmul.mubr.f32.gmra.mrb[94].mxu1 %v2535_v6 }
 0x276   : > { %v12771_v41 = vadd.f32 %v16938_v37, %v2924_v20 }
 0x277   : > { %v2928_v55 = vpop.f32.mrb[50].mxu0 }
 0x278   : > { %16939 = vst [vmem:[#allocation39_spill] sm:$0xff] %v12771_v41  ;;  %v2929_v57 = vadd.f32 %v12358_v23, %v2928_v55  ;;  %v2930_v2 = vpop.f32.mrb[51].mxu0 }
 0x27a   : > { %v12775_v4 = vadd.f32 %v16940_v31, %v2929_v57 }
 0x27b   : > { %v2933_v3 = vpop.f32.mrb[52].mxu0 }
 0x27c   : > { %16941 = vst [vmem:[#allocation194_spill] sm:$0xff] %v12775_v4  ;;  %v2934_v14 = vadd.f32 %v12358_v23, %v2933_v3  ;;  %v2935_v30 = vpop.f32.mrb[53].mxu0 }
 0x27e   : > { %v12779_v7 = vadd.f32 %v12280_v61, %v2934_v14  ;;  %v12822_v14 = vld [vmem:[%s15543_s6] ss:$0 sm:$0xff] }
 0x27f   : > { %v2938_v16 = vpop.f32.mrb[54].mxu0 }
 0x280   : > { %16942 = vst [vmem:[#allocation51_spill] sm:$0xff] %v12779_v7  ;;  %v2939_v1 = vadd.f32 %v12358_v23, %v2938_v16  ;;  %v2940_v35 = vpop.f32.mrb[55].mxu0 }
 0x282   : > { %v12783_v60 = vadd.f32 %v12275_v24, %v2939_v1 }
 0x284   : > { %16943 = vst [vmem:[#allocation84_spill] sm:$0xff] %v12783_v60  ;;  %v2943_v45 = vpop.f32.mrb[56].mxu0 }
 0x285   : > { %v2944_v11 = vadd.f32 %v12358_v23, %v2943_v45  ;;  %v2945_v13 = vpop.f32.mrb[57].mxu0 }
 0x287   : > { %v12787_v32 = vadd.f32 %v12310_v9, %v2944_v11 }
 0x288   : > { %v2948_v59 = vpop.f32.mrb[58].mxu0 }
 0x289   : > { %16944 = vst [vmem:[#allocation210_spill] sm:$0xff] %v12787_v32  ;;  %v2949_v18 = vadd.f32 %v12358_v23, %v2948_v59  ;;  %v2950_v58 = vpop.f32.mrb[59].mxu0 }
 0x28b   : > { %v12791_v61 = vadd.f32 %v12305_v40, %v2949_v18 }
 0x28c   : > { %v2953_v39 = vpop.f32.mrb[60].mxu0 }
 0x28d   : > { %16945 = vst [vmem:[#allocation103_spill] sm:$0xff] %v12791_v61  ;;  %v2954_v44 = vadd.f32 %v12358_v23, %v2953_v39  ;;  %v2955_v50 = vpop.f32.mrb[61].mxu0 }
 0x28f   : > { %v12795_v24 = vadd.f32 %v12340_v52, %v2954_v44 }
 0x290   : > { %v2958_v22 = vpop.f32.mrb[62].mxu0 }
 0x291   : > { %16946 = vst [vmem:[#allocation49_spill] sm:$0xff] %v12795_v24  ;;  %v2959_v53 = vadd.f32 %v12358_v23, %v2958_v22  ;;  %v2960_v0 = vpop.f32.mrb[63].mxu0 }
 0x293   : > { %v12799_v9 = vadd.f32 %v12335_v21, %v2959_v53 }
 0x294   : > { %v7341_v6 = vpop.f32.mrb[64].mxu0 }
 0x295   : > { %16947 = vst [vmem:[#allocation71_spill] sm:$0xff] %v12799_v9  ;;  %v3581_v26 = vpop.f32.mrb[65].mxu0 }
 0x298   : > { %v7344_v20 = vpop.f32.mrb[66].mxu0 }
 0x299   : > { %v3591_v19 = vpop.f32.mrb[67].mxu0 }
 0x29c   : > { %v12801_v40 = vpop.f32.mrb[68].mxu0 }
 0x29d   : > { %v3601_v37 = vpop.f32.mrb[69].mxu0 }
 0x2a0   : > { %v12803_v55 = vpop.f32.mrb[70].mxu0 }
 0x2a1   : > { %v12805_v57 = vpop.f32.mrb[71].mxu0 }
 0x2a4   : > { %v12807_v52 = vpop.f32.mrb[72].mxu0 }
 0x2a5   : > { %v12809_v2 = vpop.f32.mrb[73].mxu0 }
 0x2a8   : > { %v12811_v23 = vpop.f32.mrb[74].mxu0 }
 0x2a9   : > { %v12813_v31 = vpop.f32.mrb[75].mxu0 }
 0x2ac   : > { %v12815_v21 = vpop.f32.mrb[76].mxu0 }
 0x2ad   : > { %v12817_v3 = vpop.f32.mrb[77].mxu0 }
 0x2b0   : > { %v12824_v30 = vpop.f32.mrb[78].mxu0 }
 0x2b1   : > { %v3356_v16 = vpop.f32.mrb[32].mxu1  ;;  %v12826_v1 = vpop.f32.mrb[79].mxu0 }
 0x2b2   : > { %v3357_v35 = vadd.f32 %v12822_v14, %v3356_v16  ;;  %v3358_v45 = vpop.f32.mrb[33].mxu1 }
 0x2b4   : > { %v12829_v11 = vadd.f32 %v3581_v26, %v3357_v35  ;;  %v12831_v13 = vpop.f32.mrb[80].mxu0 }
 0x2b5   : > { %v12833_v59 = vpop.f32.mrb[81].mxu0 }
 0x2b6   : > { %16948 = vst [vmem:[#allocation62_spill] sm:$0xff] %v12829_v11  ;;  %v3740_v35 = vmul.f32 %v12829_v11, %v12377_v36 }
 0x2b8   : > { %v12835_v18 = vpop.f32.mrb[82].mxu0  ;;  %v7083_v45 = vmul.f32 -1.442695, %v3740_v35 }
 0x2b9   : > { %v12837_v58 = vpop.f32.mrb[83].mxu0 }
 0x2ba   : > { %8954 = vpow2.f32 %v7083_v45 }
 0x2bc   : > { %v12839_v39 = vpop.f32.mrb[84].mxu0 }
 0x2bd   : > { %v12841_v44 = vpop.f32.mrb[85].mxu0 }
 0x2c0   : > { %v12843_v50 = vpop.f32.mrb[86].mxu0 }
 0x2c1   : > { %v12845_v22 = vpop.f32.mrb[87].mxu0 }
 0x2c4   : > { %v12847_v53 = vpop.f32.mrb[88].mxu0 }
 0x2c5   : > { %v12849_v0 = vpop.f32.mrb[89].mxu0 }
 0x2c8   : > { %v12851_v26 = vpop.f32.mrb[90].mxu0 }
 0x2c9   : > { %16949 = vst [vmem:[#allocation44_spill] sm:$0xff] %v12851_v26  ;;  %v12853_v16 = vpop.f32.mrb[91].mxu0 }
 0x2ca   : > { %16950 = vst [vmem:[#allocation161_spill] sm:$0xff] %v12853_v16 }
 0x2cc   : > { %v12857_v5 = vpop.f32.mrb[92].mxu0 }
 0x2cd   : > { %16951 = vst [vmem:[#allocation60_spill] sm:$0xff] %v12857_v5  ;;  %v12859_v9 = vpop.f32.mrb[93].mxu0 }
 0x2ce   : > { %16952 = vst [vmem:[#allocation170_spill] sm:$0xff] %v12859_v9 }
 0x2d0   : > { %v3361_v24 = vpop.f32.mrb[34].mxu1  ;;  %v12867_v11 = vpop.f32.mrb[94].mxu0 }
 0x2d1   : > { %v3362_v61 = vadd.f32 %v12822_v14, %v3361_v24  ;;  %v3363_v32 = vpop.f32.mrb[35].mxu1  ;;  %v12871_v5 = vpop.f32.mrb[95].mxu0 }
 0x2d3   : > { %v12862_v60 = vadd.f32 %v7341_v6, %v3362_v61 }
 0x2d4   : > { %v3366_v7 = vpop.f32.mrb[36].mxu1 }
 0x2d5   : > { %16953 = vst [vmem:[#allocation110_spill] sm:$0xff] %v12862_v60  ;;  %v3741_v26 = vmul.f32 %v12862_v60, %v12395_v48  ;;  %v3367_v16 = vadd.f32 %v12822_v14, %v3366_v7  ;;  %v3368_v4 = vpop.f32.mrb[37].mxu1  ;;  %v8955_v7 = vpop.eup %8954 }
 0x2d6   : > { %v3868_v60 = vadd.f32 1.0, %v8955_v7 }
 0x2d7   : > { %v7084_v35 = vmul.f32 -1.442695, %v3741_v26  ;;  %v12869_v36 = vadd.f32 %v3591_v19, %v3367_v16 }
 0x2d8   : > { %v3371_v9 = vpop.f32.mrb[38].mxu1 }
 0x2d9   : > { %16954 = vst [vmem:[#allocation106_spill] sm:$0xff] %v12869_v36  ;;  %8956 = vpow2.f32 %v7084_v35  ;;  %v3742_v32 = vmul.f32 %v12869_v36, %v12411_v27  ;;  %v3372_v61 = vadd.f32 %v12822_v14, %v3371_v9  ;;  %v3373_v24 = vpop.f32.mrb[39].mxu1 }
 0x2db   : > { %v7085_v6 = vmul.f32 -1.442695, %v3742_v32  ;;  %v12876_v45 = vadd.f32 %v7344_v20, %v3372_v61 }
 0x2dc   : > { %v3376_v4 = vpop.f32.mrb[40].mxu1 }
 0x2dd   : > { %16955 = vst [vmem:[#allocation48_spill] sm:$0xff] %v12876_v45  ;;  %8958 = vpow2.f32 %v7085_v6  ;;  %v3743_v19 = vmul.f32 %v12876_v45, %v12428_v46  ;;  %v3377_v26 = vadd.f32 %v12822_v14, %v3376_v4  ;;  %v3378_v16 = vpop.f32.mrb[41].mxu1 }
 0x2df   : > { %v7086_v35 = vmul.f32 -1.442695, %v3743_v19  ;;  %v12881_v48 = vadd.f32 %v3601_v37, %v3377_v26 }
 0x2e0   : > { %v3381_v36 = vpop.f32.mrb[42].mxu1 }
 0x2e1   : > { %16956 = vst [vmem:[#allocation121_spill] sm:$0xff] %v12881_v48  ;;  %8960 = vpow2.f32 %v7086_v35  ;;  %v3744_v9 = vmul.f32 %v12881_v48, %v12445_v47  ;;  %v3382_v20 = vadd.f32 %v12822_v14, %v3381_v36  ;;  %v3383_v32 = vpop.f32.mrb[43].mxu1 }
 0x2e2   : > { %8962 = vrcp.f32 %v3868_v60 }
 0x2e3   : > { %v8957_v61 = vpop.eup %8956  ;;  %v7087_v24 = vmul.f32 -1.442695, %v3744_v9  ;;  %v12887_v6 = vadd.f32 %v12801_v40, %v3382_v20 }
 0x2e4   : > { %v3869_v4 = vadd.f32 1.0, %v8957_v61  ;;  %v3386_v16 = vpop.f32.mrb[44].mxu1 }
 0x2e5   : > { %16957 = vst [vmem:[#allocation59_spill] sm:$0xff] %v12887_v6  ;;  %8964 = vpow2.f32 %v7087_v24  ;;  %v3745_v37 = vmul.f32 %v12887_v6, %v12463_v10  ;;  %v3387_v7 = vadd.f32 %v12822_v14, %v3386_v16  ;;  %v3388_v19 = vpop.f32.mrb[45].mxu1 }
 0x2e6   : > { %8966 = vrcp.f32 %v3869_v4 }
 0x2e7   : > { %v8959_v26 = vpop.eup %8958  ;;  %v7088_v35 = vmul.f32 -1.442695, %v3745_v37  ;;  %v12893_v36 = vadd.f32 %v12805_v57, %v3387_v7 }
 0x2e8   : > { %v3870_v60 = vadd.f32 1.0, %v8959_v26  ;;  %v3391_v9 = vpop.f32.mrb[46].mxu1 }
 0x2e9   : > { %16958 = vst [vmem:[#allocation47_spill] sm:$0xff] %v12893_v36  ;;  %8968 = vpow2.f32 %v7088_v35  ;;  %v3746_v40 = vmul.f32 %v12893_v36, %v12479_v56  ;;  %v3392_v20 = vadd.f32 %v12822_v14, %v3391_v9  ;;  %v3393_v32 = vpop.f32.mrb[47].mxu1 }
 0x2ea   : > { %8970 = vrcp.f32 %v3870_v60  ;;  %v9082_v32 = vld [vmem:[%s9955_s22] sm:$0xff] }
 0x2eb   : > { %v8961_v61 = vpop.eup %8960  ;;  %v7089_v24 = vmul.f32 -1.442695, %v3746_v40  ;;  %v12899_v4 = vadd.f32 %v12803_v55, %v3392_v20 }
 0x2ec   : > { %v3871_v16 = vadd.f32 1.0, %v8961_v61  ;;  %v3396_v37 = vpop.f32.mrb[48].mxu1  ;;  %v12901_v57 = vpop.eup %8962 }
 0x2ed   : > { %16959 = vst [vmem:[#allocation200_spill] sm:$0xff] %v12899_v4  ;;  %8972 = vpow2.f32 %v7089_v24  ;;  %v3747_v7 = vmul.f32 %v12899_v4, %v12496_v8  ;;  %v3397_v19 = vadd.f32 %v12822_v14, %v3396_v37  ;;  %v3398_v26 = vpop.f32.mrb[49].mxu1  ;;  %v12913_v61 = vmul.f32 %v9082_v32, %v12901_v57 }
 0x2ee   : > { %8974 = vrcp.f32 %v3871_v16 }
 0x2ef   : > { %v8965_v35 = vpop.eup %8964  ;;  %v7090_v60 = vmul.f32 -1.442695, %v3747_v7  ;;  %v12907_v9 = vadd.f32 %v12809_v2, %v3397_v19  ;;  %16961 = vst [vmem:[#allocation82_spill] sm:$0xff] %v12913_v61  ;;  %v9083_v7 = vld [vmem:[%s9955_s22 + $0x8] sm:$0xff] }
 0x2f0   : > { %v12909_v55 = vpop.eup %8966  ;;  %v3872_v40 = vadd.f32 1.0, %v8965_v35  ;;  %v3401_v20 = vpop.f32.mrb[50].mxu1 }
 0x2f1   : > { %16960 = vst [vmem:[#allocation58_spill] sm:$0xff] %v12907_v9  ;;  %8976 = vpow2.f32 %v7090_v60  ;;  %v3748_v24 = vmul.f32 %v12907_v9, %v12513_v25  ;;  %v3402_v37 = vadd.f32 %v12822_v14, %v3401_v20  ;;  %v3403_v16 = vpop.f32.mrb[51].mxu1  ;;  %v12920_v2 = vmul.f32 %v9083_v7, %v12909_v55 }
 0x2f2   : > { %8978 = vrcp.f32 %v3872_v40  ;;  %v9084_v40 = vld [vmem:[%s9955_s22 + $0x10] sm:$0xff] }
 0x2f3   : > { %16962 = vst [vmem:[#allocation211_spill] sm:$0xff] %v12920_v2  ;;  %v8969_v19 = vpop.eup %8968  ;;  %v7091_v26 = vmul.f32 -1.442695, %v3748_v24  ;;  %v12923_v35 = vadd.f32 %v12807_v52, %v3402_v37  ;;  %v8658_v60 = vpack.i.bf16 %v12920_v2, %v12913_v61  ;;  %v9085_v61 = vld [vmem:[%s9955_s22 + $0x18] sm:$0xff] }
 0x2f4   : > { %v12927_v32 = vpop.eup %8970  ;;  %v3873_v9 = vadd.f32 1.0, %v8969_v19  ;;  %v3406_v25 = vpop.f32.mrb[52].mxu1 }
 0x2f5   : > { %16963 = vst [vmem:[#allocation105_spill] sm:$0xff] %v12923_v35  ;;  %8980 = vpow2.f32 %v7091_v26  ;;  %v3749_v20 = vmul.f32 %v12923_v35, %v12531_v15  ;;  %v3407_v16 = vadd.f32 %v12822_v14, %v3406_v25  ;;  %v3408_v7 = vpop.f32.mrb[53].mxu1  ;;  %8659 = vrot.lane.b32.xlu1 %v8658_v60, %s9275_s18  ;;  %v12935_v52 = vmul.f32 %v9084_v40, %v12927_v32 }
 0x2f6   : > { %8982 = vrcp.f32 %v3873_v9 }
 0x2f7   : > { %16964 = vst [vmem:[#allocation54_spill] sm:$0xff] %v12935_v52  ;;  %v8973_v24 = vpop.eup %8972  ;;  %v7092_v37 = vmul.f32 -1.442695, %v3749_v20  ;;  %v12938_v19 = vadd.f32 %v12813_v31, %v3407_v16  ;;  %4064 = vrot.lane.b32.xlu0 %v12935_v52, %s9275_s18 }
 0x2f8   : > { %v12942_v26 = vpop.eup %8974  ;;  %v3874_v25 = vadd.f32 1.0, %v8973_v24  ;;  %v3411_v7 = vpop.f32.mrb[54].mxu1 }
 0x2f9   : > { %16965 = vst [vmem:[#allocation69_spill] sm:$0xff] %v12938_v19  ;;  %8984 = vpow2.f32 %v7092_v37  ;;  %v3750_v60 = vmul.f32 %v12938_v19, %v12547_v54  ;;  %v3412_v40 = vadd.f32 %v12822_v14, %v3411_v7  ;;  %v3413_v9 = vpop.f32.mrb[55].mxu1  ;;  %v12949_v20 = vmul.f32 %v9085_v61, %v12942_v26  ;;  %v9119_v54 = vld [vmem:[%s9383_s17 + $0x28] sm:$0xff] }
 0x2fa   : > { %8986 = vrcp.f32 %v3874_v25  ;;  %v9086_v9 = vld [vmem:[%s9955_s22 + $0x20] sm:$0xff] }
 0x2fb   : > { %16966 = vst [vmem:[#allocation66_spill] sm:$0xff] %v12949_v20  ;;  %v8977_v31 = vpop.eup %8976  ;;  %v7093_v16 = vmul.f32 -1.442695, %v3750_v60  ;;  %v12952_v52 = vadd.f32 %v12811_v23, %v3412_v40  ;;  %4066 = vrot.lane.b32.xlu1 %v12949_v20, %s9275_s18 }
 0x2fc   : > { %v12956_v24 = vpop.eup %8978  ;;  %v3875_v37 = vadd.f32 1.0, %v8977_v31  ;;  %v3416_v2 = vpop.f32.mrb[56].mxu1 }
 0x2fd   : > { %16967 = vst [vmem:[#allocation55_spill] sm:$0xff] %v12952_v52  ;;  %8988 = vpow2.f32 %v7093_v16  ;;  %v3751_v7 = vmul.f32 %v12952_v52, %v12564_v42  ;;  %v3417_v61 = vadd.f32 %v12822_v14, %v3416_v2  ;;  %v3418_v25 = vpop.f32.mrb[57].mxu1  ;;  %v12963_v60 = vmul.f32 %v9086_v9, %v12956_v24  ;;  %v9087_v9 = vld [vmem:[%s9955_s22 + $0x28] sm:$0xff] }
 0x2fe   : > { %8990 = vrcp.f32 %v3875_v37 }
 0x2ff   : > { %16968 = vst [vmem:[#allocation168_spill] sm:$0xff] %v12963_v60  ;;  %v8981_v23 = vpop.eup %8980  ;;  %v7094_v40 = vmul.f32 -1.442695, %v3751_v7  ;;  %v12966_v20 = vadd.f32 %v12817_v3, %v3417_v61  ;;  %4068 = vrot.lane.b32.xlu0 %v12963_v60, %s9275_s18 }
 0x300   : > { %v12970_v31 = vpop.eup %8982  ;;  %v3876_v16 = vadd.f32 1.0, %v8981_v23  ;;  %v3421_v19 = vpop.f32.mrb[58].mxu1 }
 0x301   : > { %16969 = vst [vmem:[#allocation65_spill] sm:$0xff] %v12966_v20  ;;  %8992 = vpow2.f32 %v7094_v40  ;;  %v3752_v2 = vmul.f32 %v12966_v20, %v12581_v28  ;;  %v3422_v25 = vadd.f32 %v12822_v14, %v3421_v19  ;;  %v3423_v37 = vpop.f32.mrb[59].mxu1  ;;  %v12977_v7 = vmul.f32 %v9087_v9, %v12970_v31  ;;  %v9088_v9 = vld [vmem:[%s9955_s22 + $0x30] sm:$0xff] }
 0x302   : > { %8994 = vrcp.f32 %v3876_v16  ;;  %v13372_v52 = vmul.f32 %v9119_v54, %v12970_v31 }
 0x303   : > { %16970 = vst [vmem:[#allocation175_spill] sm:$0xff] %v12977_v7  ;;  %v8985_v3 = vpop.eup %8984  ;;  %v7095_v61 = vmul.f32 -1.442695, %v3752_v2  ;;  %v12980_v60 = vadd.f32 %v12815_v21, %v3422_v25  ;;  %4070 = vrot.lane.b32.xlu1 %v12977_v7, %s9275_s18 }
 0x304   : > { %v12984_v23 = vpop.eup %8986  ;;  %v3877_v40 = vadd.f32 1.0, %v8985_v3  ;;  %v3426_v20 = vpop.f32.mrb[60].mxu1  ;;  %17034 = vst [vmem:[#allocation149_spill] sm:$0xff] %v13372_v52 }
 0x305   : > { %16971 = vst [vmem:[#allocation74_spill] sm:$0xff] %v12980_v60  ;;  %8996 = vpow2.f32 %v7095_v61  ;;  %v3753_v19 = vmul.f32 %v12980_v60, %v12599_v51  ;;  %v3427_v37 = vadd.f32 %v12822_v14, %v3426_v20  ;;  %v3428_v16 = vpop.f32.mrb[61].mxu1  ;;  %v12991_v2 = vmul.f32 %v9088_v9, %v12984_v23  ;;  %v9089_v9 = vld [vmem:[%s9955_s22 + $0x38] sm:$0xff] }
 0x306   : > { %8998 = vrcp.f32 %v3877_v40 }
 0x307   : > { %16972 = vst [vmem:[#allocation108_spill] sm:$0xff] %v12991_v2  ;;  %v8989_v21 = vpop.eup %8988  ;;  %v7096_v25 = vmul.f32 -1.442695, %v3753_v19  ;;  %v12994_v7 = vadd.f32 %v12826_v1, %v3427_v37  ;;  %4072 = vrot.lane.b32.xlu0 %v12991_v2, %s9275_s18 }
 0x308   : > { %v12998_v3 = vpop.eup %8990  ;;  %v3878_v61 = vadd.f32 1.0, %v8989_v21  ;;  %v3431_v28 = vpop.f32.mrb[62].mxu1 }
 0x309   : > { %16973 = vst [vmem:[#allocation76_spill] sm:$0xff] %v12994_v7  ;;  %9000 = vpow2.f32 %v7096_v25  ;;  %v3754_v20 = vmul.f32 %v12994_v7, %v12615_v34  ;;  %v3432_v16 = vadd.f32 %v12822_v14, %v3431_v28  ;;  %v3433_v40 = vpop.f32.mrb[63].mxu1  ;;  %v13005_v19 = vmul.f32 %v9089_v9, %v12998_v3  ;;  %v9090_v9 = vld [vmem:[%s9955_s22 + $0x40] sm:$0xff] }
 0x30a   : > { %9002 = vrcp.f32 %v3878_v61 }
 0x30b   : > { %16974 = vst [vmem:[#allocation57_spill] sm:$0xff] %v13005_v19  ;;  %v8993_v1 = vpop.eup %8992  ;;  %v7097_v37 = vmul.f32 -1.442695, %v3754_v20  ;;  %v13008_v2 = vadd.f32 %v12824_v30, %v3432_v16  ;;  %4074 = vrot.lane.b32.xlu1 %v13005_v19, %s9275_s18 }
 0x30c   : > { %v13012_v21 = vpop.eup %8994  ;;  %v3879_v25 = vadd.f32 1.0, %v8993_v1  ;;  %v3436_v7 = vpop.f32.mrb[64].mxu1 }
 0x30d   : > { %16975 = vst [vmem:[#allocation64_spill] sm:$0xff] %v13008_v2  ;;  %9004 = vpow2.f32 %v7097_v37  ;;  %v3755_v28 = vmul.f32 %v13008_v2, %v12632_v63  ;;  %v3437_v40 = vadd.f32 %v12822_v14, %v3436_v7  ;;  %v3438_v61 = vpop.f32.mrb[65].mxu1  ;;  %v13019_v20 = vmul.f32 %v9090_v9, %v13012_v21  ;;  %v9091_v9 = vld [vmem:[%s9955_s22 + $0x48] sm:$0xff] }
 0x30e   : > { %9006 = vrcp.f32 %v3879_v25 }
 0x30f   : > { %16976 = vst [vmem:[#allocation56_spill] sm:$0xff] %v13019_v20  ;;  %v8997_v30 = vpop.eup %8996  ;;  %v7098_v16 = vmul.f32 -1.442695, %v3755_v28  ;;  %v13022_v19 = vadd.f32 %v12833_v59, %v3437_v40  ;;  %4076 = vrot.lane.b32.xlu0 %v13019_v20, %s9275_s18 }
 0x310   : > { %v13026_v1 = vpop.eup %8998  ;;  %v3880_v37 = vadd.f32 1.0, %v8997_v30  ;;  %v3441_v34 = vpop.f32.mrb[66].mxu1 }
 0x311   : > { %16977 = vst [vmem:[#allocation203_spill] sm:$0xff] %v13022_v19  ;;  %9008 = vpow2.f32 %v7098_v16  ;;  %v3756_v7 = vmul.f32 %v13022_v19, %v12649_v62  ;;  %v3442_v61 = vadd.f32 %v12822_v14, %v3441_v34  ;;  %v3443_v25 = vpop.f32.mrb[67].mxu1  ;;  %v13033_v28 = vmul.f32 %v9091_v9, %v13026_v1  ;;  %v9092_v9 = vld [vmem:[%s9955_s22 + $0x50] sm:$0xff] }
 0x312   : > { %9010 = vrcp.f32 %v3880_v37 }
 0x313   : > { %16978 = vst [vmem:[#allocation89_spill] sm:$0xff] %v13033_v28  ;;  %v9001_v59 = vpop.eup %9000  ;;  %v7099_v40 = vmul.f32 -1.442695, %v3756_v7  ;;  %v13036_v20 = vadd.f32 %v12831_v13, %v3442_v61  ;;  %4078 = vrot.lane.b32.xlu1 %v13033_v28, %s9275_s18 }
 0x314   : > { %v13040_v30 = vpop.eup %9002  ;;  %v3881_v16 = vadd.f32 1.0, %v9001_v59  ;;  %v3446_v19 = vpop.f32.mrb[68].mxu1 }
 0x315   : > { %16979 = vst [vmem:[#allocation86_spill] sm:$0xff] %v13036_v20  ;;  %9012 = vpow2.f32 %v7099_v40  ;;  %v3757_v34 = vmul.f32 %v13036_v20, %v12667_v12  ;;  %v3447_v25 = vadd.f32 %v12822_v14, %v3446_v19  ;;  %v3448_v37 = vpop.f32.mrb[69].mxu1  ;;  %v13047_v7 = vmul.f32 %v9092_v9, %v13040_v30  ;;  %v9093_v9 = vld [vmem:[%s9955_s22 + $0x58] sm:$0xff] }
 0x316   : > { %9014 = vrcp.f32 %v3881_v16 }
 0x317   : > { %16980 = vst [vmem:[#allocation107_spill] sm:$0xff] %v13047_v7  ;;  %v9005_v13 = vpop.eup %9004  ;;  %v7100_v61 = vmul.f32 -1.442695, %v3757_v34  ;;  %v13050_v28 = vadd.f32 %v12837_v58, %v3447_v25  ;;  %4080 = vrot.lane.b32.xlu0 %v13047_v7, %s9275_s18 }
 0x318   : > { %v13054_v59 = vpop.eup %9006  ;;  %v3882_v40 = vadd.f32 1.0, %v9005_v13  ;;  %v3451_v20 = vpop.f32.mrb[70].mxu1 }
 0x319   : > { %16981 = vst [vmem:[#allocation61_spill] sm:$0xff] %v13050_v28  ;;  %9016 = vpow2.f32 %v7100_v61  ;;  %v3758_v19 = vmul.f32 %v13050_v28, %v12683_v29  ;;  %v3452_v37 = vadd.f32 %v12822_v14, %v3451_v20  ;;  %v3453_v16 = vpop.f32.mrb[71].mxu1  ;;  %v13061_v34 = vmul.f32 %v9093_v9, %v13054_v59  ;;  %v9094_v9 = vld [vmem:[%s9955_s22 + $0x60] sm:$0xff]  ;;  %v9115_v29 = vld [vmem:[%s9383_s17 + $0x10] sm:$0xff] }
 0x31a   : > { %9018 = vrcp.f32 %v3882_v40 }
 0x31b   : > { %16982 = vst [vmem:[#allocation75_spill] sm:$0xff] %v13061_v34  ;;  %v9009_v58 = vpop.eup %9008  ;;  %v7101_v25 = vmul.f32 -1.442695, %v3758_v19  ;;  %v13064_v7 = vadd.f32 %v12835_v18, %v3452_v37  ;;  %4082 = vrot.lane.b32.xlu1 %v13061_v34, %s9275_s18 }
 0x31c   : > { %v13068_v13 = vpop.eup %9010  ;;  %v3883_v61 = vadd.f32 1.0, %v9009_v58  ;;  %v3456_v28 = vpop.f32.mrb[72].mxu1 }
 0x31d   : > { %16983 = vst [vmem:[#allocation70_spill] sm:$0xff] %v13064_v7  ;;  %9020 = vpow2.f32 %v7101_v25  ;;  %v3759_v20 = vmul.f32 %v13064_v7, %v12702_v38  ;;  %v3457_v16 = vadd.f32 %v12822_v14, %v3456_v28  ;;  %v3458_v40 = vpop.f32.mrb[73].mxu1  ;;  %v13075_v19 = vmul.f32 %v9094_v9, %v13068_v13  ;;  %v9095_v9 = vld [vmem:[%s9955_s22 + $0x68] sm:$0xff] }
 0x31e   : > { %9022 = vrcp.f32 %v3883_v61 }
 0x31f   : > { %16984 = vst [vmem:[#allocation63_spill] sm:$0xff] %v13075_v19  ;;  %v9013_v18 = vpop.eup %9012  ;;  %v7102_v37 = vmul.f32 -1.442695, %v3759_v20  ;;  %v13078_v34 = vadd.f32 %v12841_v44, %v3457_v16  ;;  %4084 = vrot.lane.b32.xlu0 %v13075_v19, %s9275_s18 }
 0x320   : > { %v13082_v58 = vpop.eup %9014  ;;  %v3884_v25 = vadd.f32 1.0, %v9013_v18  ;;  %v3461_v7 = vpop.f32.mrb[74].mxu1 }
 0x321   : > { %16985 = vst [vmem:[#allocation186_spill] sm:$0xff] %v13078_v34  ;;  %9024 = vpow2.f32 %v7102_v37  ;;  %v3760_v28 = vmul.f32 %v13078_v34, %v12717_v49  ;;  %v3462_v40 = vadd.f32 %v12822_v14, %v3461_v7  ;;  %v3463_v61 = vpop.f32.mrb[75].mxu1  ;;  %v13089_v20 = vmul.f32 %v9095_v9, %v13082_v58  ;;  %v9096_v9 = vld [vmem:[%s9955_s22 + $0x70] sm:$0xff] }
 0x322   : > { %9026 = vrcp.f32 %v3884_v25 }
 0x323   : > { %16986 = vst [vmem:[#allocation182_spill] sm:$0xff] %v13089_v20  ;;  %v9017_v44 = vpop.eup %9016  ;;  %v7103_v16 = vmul.f32 -1.442695, %v3760_v28  ;;  %v13092_v19 = vadd.f32 %v12839_v39, %v3462_v40  ;;  %4086 = vrot.lane.b32.xlu1 %v13089_v20, %s9275_s18 }
 0x324   : > { %v13096_v18 = vpop.eup %9018  ;;  %v3885_v37 = vadd.f32 1.0, %v9017_v44  ;;  %v3466_v34 = vpop.f32.mrb[76].mxu1 }
 0x325   : > { %16987 = vst [vmem:[#allocation183_spill] sm:$0xff] %v13092_v19  ;;  %9028 = vpow2.f32 %v7103_v16  ;;  %v3761_v7 = vmul.f32 %v13092_v19, %v12739_v33  ;;  %v3467_v61 = vadd.f32 %v12822_v14, %v3466_v34  ;;  %v3468_v25 = vpop.f32.mrb[77].mxu1  ;;  %v13103_v28 = vmul.f32 %v9096_v9, %v13096_v18  ;;  %v9097_v9 = vld [vmem:[%s9955_s22 + $0x78] sm:$0xff] }
 0x326   : > { %9030 = vrcp.f32 %v3885_v37 }
 0x327   : > { %16988 = vst [vmem:[#allocation190_spill] sm:$0xff] %v13103_v28  ;;  %v9021_v39 = vpop.eup %9020  ;;  %v7104_v40 = vmul.f32 -1.442695, %v3761_v7  ;;  %v13106_v20 = vadd.f32 %v12845_v22, %v3467_v61  ;;  %4088 = vrot.lane.b32.xlu0 %v13103_v28, %s9275_s18 }
 0x328   : > { %v13110_v44 = vpop.eup %9022  ;;  %v3886_v16 = vadd.f32 1.0, %v9021_v39  ;;  %v3471_v19 = vpop.f32.mrb[78].mxu1 }
 0x329   : > { %16989 = vst [vmem:[#allocation191_spill] sm:$0xff] %v13106_v20  ;;  %9032 = vpow2.f32 %v7104_v40  ;;  %v3762_v34 = vmul.f32 %v13106_v20, %v12754_v17  ;;  %v3472_v25 = vadd.f32 %v12822_v14, %v3471_v19  ;;  %v3473_v37 = vpop.f32.mrb[79].mxu1  ;;  %v13117_v7 = vmul.f32 %v9097_v9, %v13110_v44  ;;  %v9098_v9 = vld [vmem:[%s9955_s22 + $0x80] sm:$0xff] }
 0x32a   : > { %9034 = vrcp.f32 %v3886_v16 }
 0x32b   : > { %16990 = vst [vmem:[#allocation187_spill] sm:$0xff] %v13117_v7  ;;  %v9025_v22 = vpop.eup %9024  ;;  %v7105_v61 = vmul.f32 -1.442695, %v3762_v34  ;;  %v13120_v28 = vadd.f32 %v12843_v50, %v3472_v25  ;;  %4090 = vrot.lane.b32.xlu1 %v13117_v7, %s9275_s18 }
 0x32c   : > { %v13124_v39 = vpop.eup %9026  ;;  %v3887_v40 = vadd.f32 1.0, %v9025_v22  ;;  %v3476_v20 = vpop.f32.mrb[80].mxu1 }
 0x32d   : > { %16991 = vst [vmem:[#allocation188_spill] sm:$0xff] %v13120_v28  ;;  %9036 = vpow2.f32 %v7105_v61  ;;  %v3763_v19 = vmul.f32 %v13120_v28, %v12765_v43  ;;  %v3477_v37 = vadd.f32 %v12822_v14, %v3476_v20  ;;  %v3478_v16 = vpop.f32.mrb[81].mxu1  ;;  %v13131_v34 = vmul.f32 %v9098_v9, %v13124_v39  ;;  %v9099_v9 = vld [vmem:[%s9955_s22 + $0x88] sm:$0xff] }
 0x32e   : > { %9038 = vrcp.f32 %v3887_v40 }
 0x32f   : > { %16992 = vst [vmem:[#allocation98_spill] sm:$0xff] %v13131_v34  ;;  %v9029_v50 = vpop.eup %9028  ;;  %v7106_v25 = vmul.f32 -1.442695, %v3763_v19  ;;  %v13134_v7 = vadd.f32 %v12849_v0, %v3477_v37  ;;  %4092 = vrot.lane.b32.xlu0 %v13131_v34, %s9275_s18 }
 0x330   : > { %v13138_v22 = vpop.eup %9030  ;;  %v3888_v61 = vadd.f32 1.0, %v9029_v50  ;;  %v3481_v28 = vpop.f32.mrb[82].mxu1 }
 0x331   : > { %16993 = vst [vmem:[#allocation195_spill] sm:$0xff] %v13134_v7  ;;  %9040 = vpow2.f32 %v7106_v25  ;;  %v3764_v20 = vmul.f32 %v13134_v7, %v12771_v41  ;;  %v3482_v16 = vadd.f32 %v12822_v14, %v3481_v28  ;;  %v3483_v40 = vpop.f32.mrb[83].mxu1  ;;  %v13145_v19 = vmul.f32 %v9099_v9, %v13138_v22  ;;  %v16996_v28 = vld [vmem:[#allocation194_spill] sm:$0xff]  ;;  %v9100_v41 = vld [vmem:[%s9955_s22 + $0x90] sm:$0xff] }
 0x332   : > { %9042 = vrcp.f32 %v3888_v61 }
 0x333   : > { %16994 = vst [vmem:[#allocation16_spill] sm:$0xff] %v13145_v19  ;;  %v9033_v0 = vpop.eup %9032  ;;  %v7107_v37 = vmul.f32 -1.442695, %v3764_v20  ;;  %v13148_v34 = vadd.f32 %v12847_v53, %v3482_v16  ;;  %4094 = vrot.lane.b32.xlu1 %v13145_v19, %s9275_s18  ;;  %v16998_v19 = vld [vmem:[#allocation161_spill] sm:$0xff] }
 0x334   : > { %v13152_v50 = vpop.eup %9034  ;;  %v3889_v25 = vadd.f32 1.0, %v9033_v0  ;;  %v3486_v7 = vpop.f32.mrb[84].mxu1 }
 0x335   : > { %16995 = vst [vmem:[#allocation196_spill] sm:$0xff] %v13148_v34  ;;  %9044 = vpow2.f32 %v7107_v37  ;;  %v3765_v40 = vmul.f32 %v13148_v34, %v16996_v28  ;;  %v3487_v9 = vadd.f32 %v12822_v14, %v3486_v7  ;;  %v3488_v61 = vpop.f32.mrb[85].mxu1  ;;  %v13159_v20 = vmul.f32 %v9100_v41, %v13152_v50  ;;  %v17000_v7 = vld [vmem:[#allocation51_spill] sm:$0xff]  ;;  %v9101_v28 = vld [vmem:[%s9955_s22 + $0x98] sm:$0xff] }
 0x336   : > { %9046 = vrcp.f32 %v3889_v25 }
 0x337   : > { %16997 = vst [vmem:[#allocation192_spill] sm:$0xff] %v13159_v20  ;;  %v9037_v53 = vpop.eup %9036  ;;  %v7108_v16 = vmul.f32 -1.442695, %v3765_v40  ;;  %v13162_v43 = vadd.f32 %v16998_v19, %v3487_v9  ;;  %4096 = vrot.lane.b32.xlu0 %v13159_v20, %s9275_s18  ;;  %v17002_v20 = vld [vmem:[#allocation44_spill] sm:$0xff] }
 0x338   : > { %v13166_v0 = vpop.eup %9038  ;;  %v3890_v37 = vadd.f32 1.0, %v9037_v53  ;;  %v3491_v34 = vpop.f32.mrb[86].mxu1 }
 0x339   : > { %16999 = vst [vmem:[#allocation198_spill] sm:$0xff] %v13162_v43  ;;  %9048 = vpow2.f32 %v7108_v16  ;;  %v3766_v61 = vmul.f32 %v13162_v43, %v17000_v7  ;;  %v3492_v41 = vadd.f32 %v12822_v14, %v3491_v34  ;;  %v3493_v25 = vpop.f32.mrb[87].mxu1  ;;  %v13173_v40 = vmul.f32 %v9101_v28, %v13166_v0  ;;  %v17004_v34 = vld [vmem:[#allocation84_spill] sm:$0xff]  ;;  %v9102_v7 = vld [vmem:[%s9955_s22 + $0xa0] sm:$0xff] }
 0x33a   : > { %9050 = vrcp.f32 %v3890_v37 }
 0x33b   : > { %17001 = vst [vmem:[#allocation199_spill] sm:$0xff] %v13173_v40  ;;  %v9041_v19 = vpop.eup %9040  ;;  %v7109_v9 = vmul.f32 -1.442695, %v3766_v61  ;;  %v13176_v17 = vadd.f32 %v17002_v20, %v3492_v41  ;;  %4098 = vrot.lane.b32.xlu1 %v13173_v40, %s9275_s18  ;;  %v17006_v40 = vld [vmem:[#allocation170_spill] sm:$0xff] }
 0x33c   : > { %v13180_v53 = vpop.eup %9042  ;;  %v3891_v16 = vadd.f32 1.0, %v9041_v19  ;;  %v3496_v43 = vpop.f32.mrb[88].mxu1 }
 0x33d   : > { %17003 = vst [vmem:[#allocation204_spill] sm:$0xff] %v13176_v17  ;;  %9052 = vpow2.f32 %v7109_v9  ;;  %v3767_v25 = vmul.f32 %v13176_v17, %v17004_v34  ;;  %v3497_v28 = vadd.f32 %v12822_v14, %v3496_v43  ;;  %v3498_v37 = vpop.f32.mrb[89].mxu1  ;;  %v13187_v61 = vmul.f32 %v9102_v7, %v13180_v53  ;;  %v17008_v43 = vld [vmem:[#allocation210_spill] sm:$0xff] }
 0x33e   : > { %9054 = vrcp.f32 %v3891_v16  ;;  %v9103_v34 = vld [vmem:[%s9955_s22 + $0xa8] sm:$0xff] }
 0x33f   : > { %17005 = vst [vmem:[#allocation205_spill] sm:$0xff] %v13187_v61  ;;  %v9045_v20 = vpop.eup %9044  ;;  %v7110_v41 = vmul.f32 -1.442695, %v3767_v25  ;;  %v13190_v33 = vadd.f32 %v17006_v40, %v3497_v28  ;;  %4100 = vrot.lane.b32.xlu0 %v13187_v61, %s9275_s18  ;;  %v17010_v61 = vld [vmem:[#allocation60_spill] sm:$0xff] }
 0x340   : > { %v13194_v19 = vpop.eup %9046  ;;  %v3892_v9 = vadd.f32 1.0, %v9045_v20  ;;  %v3501_v17 = vpop.f32.mrb[90].mxu1 }
 0x341   : > { %17007 = vst [vmem:[#allocation201_spill] sm:$0xff] %v13190_v33  ;;  %9056 = vpow2.f32 %v7110_v41  ;;  %v3768_v37 = vmul.f32 %v13190_v33, %v17008_v43  ;;  %v3502_v7 = vadd.f32 %v12822_v14, %v3501_v17  ;;  %v3503_v16 = vpop.f32.mrb[91].mxu1  ;;  %v13201_v25 = vmul.f32 %v9103_v34, %v13194_v19  ;;  %v17012_v17 = vld [vmem:[#allocation103_spill] sm:$0xff] }
 0x342   : > { %9058 = vrcp.f32 %v3892_v9  ;;  %v9104_v43 = vld [vmem:[%s9955_s22 + $0xb0] sm:$0xff] }
 0x343   : > { %17009 = vst [vmem:[#allocation90_spill] sm:$0xff] %v13201_v25  ;;  %v9049_v40 = vpop.eup %9048  ;;  %v7111_v28 = vmul.f32 -1.442695, %v3768_v37  ;;  %v13204_v49 = vadd.f32 %v17010_v61, %v3502_v7  ;;  %4102 = vrot.lane.b32.xlu1 %v13201_v25, %s9275_s18 }
 0x344   : > { %v13208_v20 = vpop.eup %9050  ;;  %v3893_v41 = vadd.f32 1.0, %v9049_v40  ;;  %v3506_v33 = vpop.f32.mrb[92].mxu1 }
 0x345   : > { %17011 = vst [vmem:[#allocation122_spill] sm:$0xff] %v13204_v49  ;;  %9060 = vpow2.f32 %v7111_v28  ;;  %v3769_v16 = vmul.f32 %v13204_v49, %v17012_v17  ;;  %v3507_v34 = vadd.f32 %v12822_v14, %v3506_v33  ;;  %v3508_v9 = vpop.f32.mrb[93].mxu1  ;;  %v13215_v37 = vmul.f32 %v9104_v43, %v13208_v20  ;;  %v17015_v33 = vld [vmem:[#allocation49_spill] sm:$0xff]  ;;  %v9105_v17 = vld [vmem:[%s9955_s22 + $0xb8] sm:$0xff] }
 0x346   : > { %9062 = vrcp.f32 %v3893_v41 }
 0x347   : > { %17013 = vst [vmem:[#allocation20_spill] sm:$0xff] %v13215_v37  ;;  %v9053_v61 = vpop.eup %9052  ;;  %v7112_v7 = vmul.f32 -1.442695, %v3769_v16  ;;  %v13218_v25 = vadd.f32 %v12871_v5, %v3507_v34  ;;  %4104 = vrot.lane.b32.xlu0 %v13215_v37, %s9275_s18 }
 0x348   : > { %v13222_v40 = vpop.eup %9054  ;;  %v3894_v28 = vadd.f32 1.0, %v9053_v61  ;;  %v3511_v49 = vpop.f32.mrb[94].mxu1 }
 0x349   : > { %17014 = vst [vmem:[#allocation94_spill] sm:$0xff] %v13218_v25  ;;  %9064 = vpow2.f32 %v7112_v7  ;;  %v3770_v9 = vmul.f32 %v13218_v25, %v17015_v33  ;;  %v3512_v43 = vadd.f32 %v12822_v14, %v3511_v49  ;;  %v3513_v41 = vpop.f32.mrb[95].mxu1  ;;  %v13229_v16 = vmul.f32 %v9105_v17, %v13222_v40  ;;  %v17018_v49 = vld [vmem:[#allocation71_spill] sm:$0xff]  ;;  %v9114_v25 = vld [vmem:[%s9383_s17 + $0x8] sm:$0xff] }
 0x34a   : > { %9066 = vrcp.f32 %v3894_v28  ;;  %v9106_v41 = vld [vmem:[%s9955_s22 + $0xc0] sm:$0xff] }
 0x34b   : > { %17016 = vst [vmem:[#allocation88_spill] sm:$0xff] %v13229_v16  ;;  %v9057_v5 = vpop.eup %9056  ;;  %v7113_v34 = vmul.f32 -1.442695, %v3770_v9  ;;  %v13232_v37 = vadd.f32 %v12867_v11, %v3512_v43  ;;  %4106 = vrot.lane.b32.xlu1 %v13229_v16, %s9275_s18 }
 0x34c   : > { %v13236_v61 = vpop.eup %9058  ;;  %v3895_v7 = vadd.f32 1.0, %v9057_v5  ;;  %v9107_v5 = vld [vmem:[%s9955_s22 + $0xc8] sm:$0xff] }
 0x34d   : > { %17017 = vst [vmem:[#allocation15_spill] sm:$0xff] %v13232_v37  ;;  %9068 = vpow2.f32 %v7113_v34  ;;  %v3771_v14 = vmul.f32 %v13232_v37, %v17018_v49  ;;  %v13242_v17 = vmul.f32 %v9106_v41, %v13236_v61  ;;  %v9108_v41 = vld [vmem:[%s9955_s22 + $0xd0] sm:$0xff]  ;;  %v9110_v37 = vld [vmem:[%s9955_s22 + $0xe0] sm:$0xff] }
 0x34e   : > { %9070 = vrcp.f32 %v3895_v7 }
 0x34f   : > { %17019 = vst [vmem:[#allocation145_spill] sm:$0xff] %v13242_v17  ;;  %v9061_v28 = vpop.eup %9060  ;;  %v7114_v9 = vmul.f32 -1.442695, %v3771_v14  ;;  %4108 = vrot.lane.b32.xlu0 %v13242_v17, %s9275_s18 }
 0x350   : > { %v13246_v11 = vpop.eup %9062  ;;  %v3896_v43 = vadd.f32 1.0, %v9061_v28 }
 0x351   : > { %9072 = vpow2.f32 %v7114_v9  ;;  %v13250_v34 = vmul.f32 %v9107_v5, %v13246_v11  ;;  %v9109_v5 = vld [vmem:[%s9955_s22 + $0xd8] sm:$0xff] }
 0x352   : > { %9074 = vrcp.f32 %v3896_v43 }
 0x353   : > { %17020 = vst [vmem:[#allocation73_spill] sm:$0xff] %v13250_v34  ;;  %v9065_v16 = vpop.eup %9064  ;;  %4110 = vrot.lane.b32.xlu1 %v13250_v34, %s9275_s18 }
 0x354   : > { %v13254_v7 = vpop.eup %9066  ;;  %v3897_v14 = vadd.f32 1.0, %v9065_v16 }
 0x355   : > { %v13258_v17 = vmul.f32 %v9108_v41, %v13254_v7 }
 0x356   : > { %9076 = vrcp.f32 %v3897_v14 }
 0x357   : > { %17021 = vst [vmem:[#allocation118_spill] sm:$0xff] %v13258_v17  ;;  %v9069_v28 = vpop.eup %9068  ;;  %4112 = vrot.lane.b32.xlu0 %v13258_v17, %s9275_s18 }
 0x358   : > { %v13262_v9 = vpop.eup %9070  ;;  %v3898_v43 = vadd.f32 1.0, %v9069_v28 }
 0x359   : > { %v13266_v34 = vmul.f32 %v9109_v5, %v13262_v9 }
 0x35a   : > { %9078 = vrcp.f32 %v3898_v43  ;;  %v9111_v43 = vld [vmem:[%s9955_s22 + $0xe8] sm:$0xff] }
 0x35b   : > { %17022 = vst [vmem:[#allocation28_spill] sm:$0xff] %v13266_v34  ;;  %v9073_v16 = vpop.eup %9072  ;;  %4114 = vrot.lane.b32.xlu1 %v13266_v34, %s9275_s18  ;;  %v9112_v34 = vld [vmem:[%s9955_s22 + $0xf0] sm:$0xff] }
 0x35c   : > { %v13270_v14 = vpop.eup %9074  ;;  %v3899_v41 = vadd.f32 1.0, %v9073_v16 }
 0x35d   : > { %v13274_v17 = vmul.f32 %v9110_v37, %v13270_v14 }
 0x35e   : > { %9080 = vrcp.f32 %v3899_v41 }
 0x35f   : > { %17023 = vst [vmem:[#allocation137_spill] sm:$0xff] %v13274_v17  ;;  %4116 = vrot.lane.b32.xlu0 %v13274_v17, %s9275_s18  ;;  %v9113_v17 = vld [vmem:[%s9383_s17] sm:$0xff] }
 0x360   : > { %v13278_v28 = vpop.eup %9076  ;;  %v13296_v49 = vmul.f32 %v9113_v17, %v12901_v57 }
 0x361   : > { %v13282_v5 = vmul.f32 %v9111_v43, %v13278_v28 }
 0x362   : > { %17026 = vst [vmem:[#allocation93_spill] sm:$0xff] %v13296_v49 }
 0x363   : > { %17024 = vst [vmem:[#allocation78_spill] sm:$0xff] %v13282_v5  ;;  %4118 = vrot.lane.b32.xlu1 %v13282_v5, %s9275_s18  ;;  %v13302_v5 = vmul.f32 %v9114_v25, %v12909_v55 }
 0x364   : > { %v13286_v16 = vpop.eup %9078 }
 0x365   : > { %v13290_v37 = vmul.f32 %v9112_v34, %v13286_v16  ;;  %17027 = vst [vmem:[#allocation181_spill] sm:$0xff] %v13302_v5  ;;  %v13306_v34 = vmul.f32 %v9115_v29, %v12927_v32  ;;  %v9117_v29 = vld [vmem:[%s9383_s17 + $0x18] sm:$0xff] }
 0x366   : > { %v13322_v32 = vmul.f32 %v9117_v29, %v12942_v26 }
 0x367   : > { %17025 = vst [vmem:[#allocation119_spill] sm:$0xff] %v13290_v37  ;;  %4120 = vrot.lane.b32.xlu0 %v13290_v37, %s9275_s18  ;;  %v8660_v41 = vpop.permute.xlu1 %8659  ;;  %17028 = vst [vmem:[#allocation140_spill] sm:$0xff] %v13306_v34  ;;  %v9116_v37 = vld [vmem:[%s9955_s22 + $0xf8] sm:$0xff] }
 0x368   : > { %v13298_v43 = vpop.eup %9080  ;;  %v8662_v33 = vunpack.i.h.bf16 %v8660_v41  ;;  %v8661_v38 = vunpack.i.l.bf16 %v8660_v41  ;;  %17030 = vst [vmem:[#allocation130_spill] sm:$0xff] %v13322_v32 }
 0x369   : > { %v4065_v12 = vpop.permute.xlu0 %4064  ;;  %v13310_v62 = vmul.f32 %v9116_v37, %v13298_v43 }
 0x36a   : > { %v4157_v57 = vsel %vm1316_vm3, %v13302_v5, %v8662_v33  ;;  %v4156_v17 = vsel %vm1316_vm3, %v13296_v49, %v8661_v38  ;;  %v4158_v55 = vsel %vm1316_vm3, %v13306_v34, %v4065_v12  ;;  %v9118_v34 = vld [vmem:[%s9383_s17 + $0x20] sm:$0xff] }
 0x36b   : > { %17029 = vst [vmem:[#allocation21_spill] sm:$0xff] %v13310_v62  ;;  %v4221_v25 = vrot.slane %v4157_v57, 7  ;;  %v4220_v41 = vrot.slane %v4156_v17, 7  ;;  %v4223_v2 = vrot.slane %v4158_v55, 7  ;;  %4122 = vrot.lane.b32.xlu1 %v13310_v62, %s9275_s18  ;;  %v4991_v57 = vld [vmem:[%s15541_s4] sm:$0xff]  ;;  %v4992_v17 = vld [vmem:[%s15541_s4 + $0x8] sm:$0xff]  ;;  %v13349_v49 = vmul.f32 %v9118_v34, %v12956_v24 }
 0x36c   : > { %v7564_v5 = vpack.c.bf16 %v4992_v17, %v4991_v57  ;;  %v4993_v24 = vld [vmem:[%s15541_s4 + $0x10] sm:$0xff]  ;;  %v17032_v57 = vld [vmem:[#allocation5_spill] sm:$0xff] }
 0x36d   : > { %v13325_v37 = vsel %vm393_vm0, %v4221_v25, 0.0  ;;  %v13328_v33 = vsel %vm393_vm0, %v4220_v41, %v4221_v25  ;;  %v13331_v38 = vsel %vm393_vm0, 0.0, %v4220_v41  ;;  %v4067_v12 = vpop.permute.xlu1 %4066  ;;  %v13343_v25 = vsel %vm393_vm0, 0.0, %v4223_v2  ;;  %17031 = vst [vmem:[#allocation14_spill] sm:$0xff] %v13349_v49 }
 0x36e   : > { %v4159_v26 = vsel %vm1316_vm3, %v13322_v32, %v4067_v12  ;;  %v4378_v55 = vrot.slane %v13331_v38, 1  ;;  %v4379_v41 = vrot.slane %v13328_v33, 1  ;;  %v4381_v62 = vrot.slane %v13325_v37, 1  ;;  %7565 = vmatpush1.bf16.msra.mxu1 %v7564_v5 }
 0x36f   : > { %v4224_v29 = vrot.slane %v4159_v26, 7  ;;  %v4383_v60 = vrot.slane %v13343_v25, 1  ;;  %v8668_v31 = vpack.i.bf16 %v13343_v25, %v13328_v33 }
 0x370   : > { %v13355_v32 = vsel %vm552_vm1, %v4378_v55, %v4379_v41  ;;  %v17033_v55 = vmov 0.0|0.0   ;;  %v13375_v5 = vsel %vm552_vm1, %v4379_v41, %v4381_v62 }
 0x371   : > { %v13352_v63 = vsel %vm393_vm0, %v4223_v2, %v4224_v29  ;;  %v4069_v12 = vpop.permute.xlu0 %4068  ;;  %v4994_v2 = vld [vmem:[%s15541_s4 + $0x18] sm:$0xff]  ;;  %v8663_v17 = vpack.i.bf16 %v13355_v32, %v17032_v57  ;;  %7566 = vmatprep.subr.bf16.mxu1 %v17033_v55  ;;  %v13381_v42 = vsel %vm393_vm0, %v4224_v29, 0.0 }
 0x372   : > { %v4384_v26 = vrot.slane %v13352_v63, 1  ;;  %v4160_v51 = vsel %vm1316_vm3, %v13349_v49, %v4069_v12  ;;  %v7567_v49 = vpack.c.bf16 %v4994_v2, %v4993_v24  ;;  %v4386_v29 = vrot.slane %v13381_v42, 1  ;;  %v9120_v24 = vld [vmem:[%s9383_s17 + $0x30] sm:$0xff] }
 0x373   : > { %v4226_v34 = vrot.slane %v4160_v51, 7  ;;  %8664 = vrot.lane.b32.xlu0 %v8663_v17, %s9276_s19  ;;  %v13402_v2 = vmul.f32 %v9120_v24, %v12984_v23  ;;  %v4461_v46 = vrot.slane %v13381_v42, 2  ;;  %v4459_v42 = vrot.slane %v13352_v63, 2 }
 0x374   : > { %v13378_v12 = vsel %vm552_vm1, %v4383_v60, %v4384_v26  ;;  %7568 = vmatpush1.bf16.msra.mxu1 %v7567_v49  ;;  %v13422_v15 = vsel %vm552_vm1, %v4384_v26, %v4386_v29  ;;  %v9122_v29 = vld [vmem:[%s9383_s17 + $0x40] sm:$0xff] }
 0x375   : > { %v4071_v51 = vpop.permute.xlu1 %4070  ;;  %v8673_v57 = vpack.i.bf16 %v13378_v12, %v13375_v5  ;;  %v13387_v54 = vsel %vm393_vm0, 0.0, %v4226_v34  ;;  %7569 = vmatprep.subr.bf16.mxu1 %v17033_v55  ;;  %17035 = vst [vmem:[#allocation202_spill] sm:$0xff] %v13402_v2  ;;  %17037 = vst [vmem:[#allocation125_spill] sm:$0xff] %v13422_v15 }
 0x376   : > { %v4161_v62 = vsel %vm1316_vm3, %v13372_v52, %v4071_v51  ;;  %v8678_v17 = vpack.i.bf16 %v13387_v54, %v13352_v63  ;;  %v4388_v51 = vrot.slane %v13387_v54, 1  ;;  %v9121_v52 = vld [vmem:[%s9383_s17 + $0x38] sm:$0xff] }
 0x377   : > { %v4227_v60 = vrot.slane %v4161_v62, 7  ;;  %8674 = vrot.lane.b32.xlu1 %v8673_v57, %s9276_s19  ;;  %8669 = vrot.lane.b32.xlu0 %v8668_v31, %s9276_s19  ;;  %v4995_v62 = vld [vmem:[%s15541_s4 + $0x20] sm:$0xff]  ;;  %v13419_v35 = vmul.f32 %v9121_v52, %v12998_v3 }
 0x379   : > { %v13397_v41 = vsel %vm393_vm0, %v4226_v34, %v4227_v60  ;;  %v4073_v49 = vpop.permute.xlu0 %4072  ;;  %v4996_v34 = vld [vmem:[%s15541_s4 + $0x28] sm:$0xff]  ;;  %17036 = vst [vmem:[#allocation18_spill] sm:$0xff] %v13419_v35  ;;  %v13428_v56 = vsel %vm393_vm0, %v4227_v60, 0.0 }
 0x37a   : > { %v4389_v57 = vrot.slane %v13397_v41, 1  ;;  %v4162_v23 = vsel %vm1316_vm3, %v13402_v2, %v4073_v49  ;;  %v7570_v31 = vpack.c.bf16 %v4996_v34, %v4995_v62  ;;  %v4391_v26 = vrot.slane %v13428_v56, 1 }
 0x37b   : > { %8679 = vrot.lane.b32.xlu1 %v8678_v17, %s9276_s19  ;;  %v4229_v24 = vrot.slane %v4162_v23, 7 }
 0x37c   : > { %v13425_v36 = vsel %vm552_vm1, %v4388_v51, %v4389_v57  ;;  %7571 = vmatpush1.bf16.msra.mxu1 %v7570_v31  ;;  %v13445_v51 = vmul.f32 %v9122_v29, %v13012_v21  ;;  %v4997_v31 = vld [vmem:[%s15541_s4 + $0x30] sm:$0xff]  ;;  %v9123_v29 = vld [vmem:[%s9383_s17 + $0x48] sm:$0xff] }
 0x37d   : > { %17038 = vst [vmem:[#allocation97_spill] sm:$0xff] %v13425_v36  ;;  %v4075_v4 = vpop.permute.xlu1 %4074  ;;  %v8683_v49 = vpack.i.bf16 %v13425_v36, %v13422_v15  ;;  %v13433_v17 = vsel %vm393_vm0, 0.0, %v4229_v24  ;;  %7572 = vmatprep.subr.bf16.mxu1 %v17033_v55  ;;  %v13462_v2 = vmul.f32 %v9123_v29, %v13026_v1  ;;  %v4999_v29 = vld [vmem:[%s15541_s4 + $0x40] sm:$0xff]  ;;  %v5030_v36 = vld [vmem:[%s15541_s4 + $0x138] sm:$0xff] }
 0x37e   : > { %17039 = vst [vmem:[#allocation150_spill] sm:$0xff] %v13433_v17  ;;  %v4163_v52 = vsel %vm1316_vm3, %v13419_v35, %v4075_v4  ;;  %17040 = vst [vmem:[#allocation109_spill] sm:$0xff] %v13445_v51  ;;  %v8688_v34 = vpack.i.bf16 %v13433_v17, %v13397_v41  ;;  %v4393_v4 = vrot.slane %v13433_v17, 1  ;;  %v13465_v35 = vsel %vm552_vm1, %v4389_v57, %v4391_v26 }
 0x37f   : > { %v4230_v3 = vrot.slane %v4163_v52, 7  ;;  %8684 = vrot.lane.b32.xlu0 %v8683_v49, %s9276_s19  ;;  %17041 = vst [vmem:[#allocation129_spill] sm:$0xff] %v13462_v2  ;;  %17042 = vst [vmem:[#allocation17_spill] sm:$0xff] %v13465_v35 }
 0x381   : > { %v13441_v60 = vsel %vm393_vm0, %v4229_v24, %v4230_v3  ;;  %v4077_v62 = vpop.permute.xlu0 %4076  ;;  %v4998_v24 = vld [vmem:[%s15541_s4 + $0x38] sm:$0xff]  ;;  %v13471_v48 = vsel %vm393_vm0, %v4230_v3, 0.0 }
 0x382   : > { %v4394_v23 = vrot.slane %v13441_v60, 1  ;;  %v4164_v21 = vsel %vm1316_vm3, %v13445_v51, %v4077_v62  ;;  %v7573_v49 = vpack.c.bf16 %v4998_v24, %v4997_v31  ;;  %v4396_v3 = vrot.slane %v13471_v48, 1 }
 0x383   : > { %8689 = vrot.lane.b32.xlu0 %v8688_v34, %s9276_s19  ;;  %v4232_v52 = vrot.slane %v4164_v21, 7 }
 0x384   : > { %v13468_v8 = vsel %vm552_vm1, %v4393_v4, %v4394_v23  ;;  %7574 = vmatpush1.bf16.msra.mxu1 %v7573_v49  ;;  %v9124_v4 = vld [vmem:[%s9383_s17 + $0x50] sm:$0xff] }
 0x385   : > { %17043 = vst [vmem:[#allocation146_spill] sm:$0xff] %v13468_v8  ;;  %v4079_v47 = vpop.permute.xlu1 %4078  ;;  %v8693_v62 = vpack.i.bf16 %v13468_v8, %v13465_v35  ;;  %v13476_v34 = vsel %vm393_vm0, 0.0, %v4232_v52  ;;  %7575 = vmatprep.subr.bf16.mxu1 %v17033_v55  ;;  %v13488_v31 = vmul.f32 %v9124_v4, %v13040_v30  ;;  %v9125_v4 = vld [vmem:[%s9383_s17 + $0x58] sm:$0xff]  ;;  %v5029_v35 = vld [vmem:[%s15541_s4 + $0x130] sm:$0xff] }
 0x386   : > { %17044 = vst [vmem:[#allocation114_spill] sm:$0xff] %v13476_v34  ;;  %v4165_v1 = vsel %vm1316_vm3, %v13462_v2, %v4079_v47  ;;  %v8698_v21 = vpack.i.bf16 %v13476_v34, %v13441_v60  ;;  %v4398_v47 = vrot.slane %v13476_v34, 1  ;;  %v13505_v51 = vmul.f32 %v9125_v4, %v13054_v59 }
 0x387   : > { %v4233_v57 = vrot.slane %v4165_v1, 7  ;;  %8694 = vrot.lane.b32.xlu1 %v8693_v62, %s9276_s19  ;;  %17046 = vst [vmem:[#allocation179_spill] sm:$0xff] %v13488_v31  ;;  %v13508_v2 = vsel %vm552_vm1, %v4394_v23, %v4396_v3 }
 0x388   : > { %17047 = vst [vmem:[#allocation27_spill] sm:$0xff] %v13505_v51  ;;  %17048 = vst [vmem:[#allocation147_spill] sm:$0xff] %v13508_v2 }
 0x389   : > { %v13484_v26 = vsel %vm393_vm0, %v4232_v52, %v4233_v57  ;;  %v4081_v24 = vpop.permute.xlu0 %4080  ;;  %v5000_v52 = vld [vmem:[%s15541_s4 + $0x48] sm:$0xff]  ;;  %v13514_v27 = vsel %vm393_vm0, %v4233_v57, 0.0 }
 0x38a   : > { %17045 = vst [vmem:[#allocation128_spill] sm:$0xff] %v13484_v26  ;;  %v4399_v49 = vrot.slane %v13484_v26, 1  ;;  %v4166_v30 = vsel %vm1316_vm3, %v13488_v31, %v4081_v24  ;;  %v7576_v62 = vpack.c.bf16 %v5000_v52, %v4999_v29  ;;  %v4401_v3 = vrot.slane %v13514_v27, 1 }
 0x38b   : > { %8699 = vrot.lane.b32.xlu1 %v8698_v21, %s9276_s19  ;;  %v4235_v1 = vrot.slane %v4166_v30, 7 }
 0x38c   : > { %v13511_v6 = vsel %vm552_vm1, %v4398_v47, %v4399_v49  ;;  %7577 = vmatpush1.bf16.msra.mxu1 %v7576_v62  ;;  %v9126_v47 = vld [vmem:[%s9383_s17 + $0x60] sm:$0xff] }
 0x38d   : > { %17049 = vst [vmem:[#allocation95_spill] sm:$0xff] %v13511_v6  ;;  %v4083_v10 = vpop.permute.xlu1 %4082  ;;  %v8703_v24 = vpack.i.bf16 %v13511_v6, %v13508_v2  ;;  %v13519_v21 = vsel %vm393_vm0, 0.0, %v4235_v1  ;;  %7578 = vmatprep.subr.bf16.mxu1 %v17033_v55  ;;  %v13531_v29 = vmul.f32 %v9126_v47, %v13068_v13  ;;  %v5002_v13 = vld [vmem:[%s15541_s4 + $0x58] sm:$0xff] }
 0x38e   : > { %17050 = vst [vmem:[#allocation135_spill] sm:$0xff] %v13519_v21  ;;  %v4167_v59 = vsel %vm1316_vm3, %v13505_v51, %v4083_v10  ;;  %v8708_v30 = vpack.i.bf16 %v13519_v21, %v13484_v26  ;;  %v4403_v10 = vrot.slane %v13519_v21, 1  ;;  %v9127_v51 = vld [vmem:[%s9383_s17 + $0x68] sm:$0xff] }
 0x38f   : > { %v4236_v23 = vrot.slane %v4167_v59, 7  ;;  %8704 = vrot.lane.b32.xlu0 %v8703_v24, %s9276_s19  ;;  %17051 = vst [vmem:[#allocation158_spill] sm:$0xff] %v13531_v29  ;;  %v4456_v24 = vrot.slane %v13325_v37, 2  ;;  %v13550_v4 = vmul.f32 %v9127_v51, %v13082_v58  ;;  %v13553_v37 = vsel %vm552_vm1, %v4399_v49, %v4401_v3 }
 0x390   : > { %17053 = vst [vmem:[#allocation6_spill] sm:$0xff] %v13553_v37  ;;  %v17056_v49 = vrot.slane %v13328_v33, 2 }
 0x391   : > { %v13527_v57 = vsel %vm393_vm0, %v4235_v1, %v4236_v23  ;;  %v4085_v52 = vpop.permute.xlu0 %4084  ;;  %v5001_v1 = vld [vmem:[%s15541_s4 + $0x50] sm:$0xff]  ;;  %17052 = vst [vmem:[#allocation26_spill] sm:$0xff] %v13550_v4  ;;  %v13560_v6 = vsel %vm393_vm0, %v4236_v23, 0.0 }
 0x392   : > { %v4404_v62 = vrot.slane %v13527_v57, 1  ;;  %v4168_v59 = vsel %vm1316_vm3, %v13531_v29, %v4085_v52  ;;  %v7579_v47 = vpack.c.bf16 %v5002_v13, %v5001_v1  ;;  %v13572_v3 = vsel %vm630_vm2, %v17056_v49, %v4456_v24  ;;  %v9128_v13 = vld [vmem:[%s9383_s17 + $0x70] sm:$0xff] }
 0x393   : > { %8709 = vrot.lane.b32.xlu0 %v8708_v30, %s9276_s19  ;;  %v4238_v31 = vrot.slane %v4168_v59, 7  ;;  %v13585_v24 = vmul.f32 %v9128_v13, %v13096_v18  ;;  %v5004_v18 = vld [vmem:[%s15541_s4 + $0x68] sm:$0xff]  ;;  %v9129_v13 = vld [vmem:[%s9383_s17 + $0x78] sm:$0xff] }
 0x394   : > { %v13556_v45 = vsel %vm552_vm1, %v4403_v10, %v4404_v62  ;;  %7580 = vmatpush1.bf16.msra.mxu1 %v7579_v47  ;;  %v4406_v10 = vrot.slane %v13560_v6, 1 }
 0x395   : > { %17054 = vst [vmem:[#allocation131_spill] sm:$0xff] %v13556_v45  ;;  %v4087_v52 = vpop.permute.xlu1 %4086  ;;  %v8713_v30 = vpack.i.bf16 %v13556_v45, %v13553_v37  ;;  %v13565_v58 = vsel %vm393_vm0, 0.0, %v4238_v31  ;;  %7581 = vmatprep.subr.bf16.mxu1 %v17033_v55  ;;  %17057 = vst [vmem:[#allocation12_spill] sm:$0xff] %v13585_v24  ;;  %v4458_v45 = vrot.slane %v13343_v25, 2 }
 0x396   : > { %17055 = vst [vmem:[#allocation159_spill] sm:$0xff] %v13565_v58  ;;  %v4169_v51 = vsel %vm1316_vm3, %v13550_v4, %v4087_v52  ;;  %v8718_v47 = vpack.i.bf16 %v13565_v58, %v13527_v57  ;;  %v4408_v52 = vrot.slane %v13565_v58, 1  ;;  %v13611_v37 = vsel %vm552_vm1, %v4404_v62, %v4406_v10  ;;  %v5024_v10 = vld [vmem:[%s15541_s4 + $0x108] sm:$0xff] }
 0x397   : > { %v4239_v23 = vrot.slane %v4169_v51, 7  ;;  %8714 = vrot.lane.b32.xlu1 %v8713_v30, %s9276_s19  ;;  %4794 = vrot.lane.b32.xlu0 %v13572_v3, %s9276_s19  ;;  %v13592_v51 = vsel %vm630_vm2, %v4459_v42, %v4461_v46  ;;  %v13607_v46 = vmul.f32 %v9129_v13, %v13110_v44  ;;  %17060 = vst [vmem:[#allocation180_spill] sm:$0xff] %v13611_v37 }
 0x398   : > { %17058 = vst [vmem:[#allocation133_spill] sm:$0xff] %v13592_v51  ;;  %v13627_v62 = vsel %vm630_vm2, %v4458_v45, %v4459_v42 }
 0x399   : > { %v13581_v1 = vsel %vm393_vm0, %v4238_v31, %v4239_v23  ;;  %v4089_v59 = vpop.permute.xlu0 %4088  ;;  %v5003_v31 = vld [vmem:[%s15541_s4 + $0x60] sm:$0xff]  ;;  %17059 = vst [vmem:[#allocation151_spill] sm:$0xff] %v13607_v46 }
 0x39a   : > { %v4409_v30 = vrot.slane %v13581_v1, 1  ;;  %v4170_v49 = vsel %vm1316_vm3, %v13585_v24, %v4089_v59  ;;  %v7582_v29 = vpack.c.bf16 %v5004_v18, %v5003_v31  ;;  %v13617_v59 = vsel %vm393_vm0, %v4239_v23, 0.0  ;;  %v5023_v23 = vld [vmem:[%s15541_s4 + $0x100] sm:$0xff] }
 0x39b   : > { %8719 = vrot.lane.b32.xlu1 %v8718_v47, %s9276_s19  ;;  %4798 = vrot.lane.b32.xlu0 %v13592_v51, %s9276_s19  ;;  %v4241_v4 = vrot.slane %v4170_v49, 7  ;;  %v13640_v45 = vpack.c.bf16 %v5024_v10, %v5023_v23  ;;  %v9130_v18 = vld [vmem:[%s9383_s17 + $0x80] sm:$0xff]  ;;  %v5006_v23 = vld [vmem:[%s15541_s4 + $0x78] sm:$0xff] }
 0x39c   : > { %v13614_v2 = vsel %vm552_vm1, %v4408_v52, %v4409_v30  ;;  %7583 = vmatpush1.bf16.msra.mxu1 %v7582_v29  ;;  %v4411_v52 = vrot.slane %v13617_v59, 1  ;;  %v13647_v49 = vmul.f32 %v9130_v18, %v13124_v39  ;;  %v5025_v18 = vld [vmem:[%s15541_s4 + $0x110] sm:$0xff] }
 0x39d   : > { %17061 = vst [vmem:[#allocation79_spill] sm:$0xff] %v13614_v2  ;;  %v4091_v47 = vpop.permute.xlu1 %4090  ;;  %v8723_v24 = vpack.i.bf16 %v13614_v2, %v13611_v37  ;;  %v13622_v44 = vsel %vm393_vm0, 0.0, %v4241_v4  ;;  %7584 = vmatprep.subr.bf16.mxu1 %v17033_v55  ;;  %7613 = vmatpush1.bf16.msra.mxu0 %v13640_v45  ;;  %v9131_v37 = vld [vmem:[%s9383_s17 + $0x88] sm:$0xff] }
 0x39e   : > { %17062 = vst [vmem:[#allocation132_spill] sm:$0xff] %v13622_v44  ;;  %v4171_v31 = vsel %vm1316_vm3, %v13607_v46, %v4091_v47  ;;  %17064 = vst [vmem:[#allocation10_spill] sm:$0xff] %v13647_v49  ;;  %v8728_v47 = vpack.i.bf16 %v13622_v44, %v13581_v1  ;;  %7614 = vmatprep.subr.bf16.mxu0 %v17033_v55  ;;  %v5026_v46 = vld [vmem:[%s15541_s4 + $0x118] sm:$0xff]  ;;  %v13672_v8 = vmul.f32 %v9131_v37, %v13138_v22 }
 0x39f   : > { %v4242_v29 = vrot.slane %v4171_v31, 7  ;;  %4796 = vrot.lane.b32.xlu1 %v13627_v62, %s9276_s19  ;;  %8724 = vrot.lane.b32.xlu0 %v8723_v24, %s9276_s19  ;;  %v4413_v31 = vrot.slane %v13622_v44, 1 }
 0x3a0   : > { %17065 = vst [vmem:[#allocation148_spill] sm:$0xff] %v13672_v8 }
 0x3a1   : > { %v13643_v42 = vsel %vm393_vm0, %v4241_v4, %v4242_v29  ;;  %v4093_v13 = vpop.permute.xlu0 %4092  ;;  %v5005_v4 = vld [vmem:[%s15541_s4 + $0x70] sm:$0xff] }
 0x3a2   : > { %17063 = vst [vmem:[#allocation156_spill] sm:$0xff] %v13643_v42  ;;  %v4414_v24 = vrot.slane %v13643_v42, 1  ;;  %v4172_v39 = vsel %vm1316_vm3, %v13647_v49, %v4093_v13  ;;  %v7585_v10 = vpack.c.bf16 %v5006_v23, %v5005_v4  ;;  %v13675_v13 = vsel %vm552_vm1, %v4409_v30, %v4411_v52  ;;  %v5027_v30 = vld [vmem:[%s15541_s4 + $0x120] sm:$0xff] }
 0x3a3   : > { %8729 = vrot.lane.b32.xlu0 %v8728_v47, %s9276_s19  ;;  %v4244_v2 = vrot.slane %v4172_v39, 7  ;;  %17066 = vst [vmem:[#allocation83_spill] sm:$0xff] %v13675_v13  ;;  %v13681_v4 = vsel %vm393_vm0, %v4242_v29, 0.0  ;;  %v13685_v39 = vpack.c.bf16 %v5026_v46, %v5025_v18  ;;  %v5028_v29 = vld [vmem:[%s15541_s4 + $0x128] sm:$0xff]  ;;  %v9132_v18 = vld [vmem:[%s9383_s17 + $0x90] sm:$0xff] }
 0x3a4   : > { %v13678_v47 = vsel %vm552_vm1, %v4413_v31, %v4414_v24  ;;  %7586 = vmatpush1.bf16.msra.mxu1 %v7585_v10  ;;  %v4416_v46 = vrot.slane %v13681_v4, 1  ;;  %v13703_v31 = vpack.c.bf16 %v5028_v29, %v5027_v30  ;;  %v5007_v30 = vld [vmem:[%s15541_s4 + $0x80] sm:$0xff]  ;;  %v9133_v29 = vld [vmem:[%s9383_s17 + $0x98] sm:$0xff] }
 0x3a5   : > { %17067 = vst [vmem:[#allocation19_spill] sm:$0xff] %v13678_v47  ;;  %v4095_v23 = vpop.permute.xlu1 %4094  ;;  %v8733_v49 = vpack.i.bf16 %v13678_v47, %v13675_v13  ;;  %v13688_v22 = vsel %vm393_vm0, 0.0, %v4244_v2  ;;  %7587 = vmatprep.subr.bf16.mxu1 %v17033_v55  ;;  %7616 = vmatpush1.bf16.msra.mxu0 %v13685_v39 }
 0x3a6   : > { %17068 = vst [vmem:[#allocation138_spill] sm:$0xff] %v13688_v22  ;;  %v4173_v37 = vsel %vm1316_vm3, %v13672_v8, %v4095_v23  ;;  %7617 = vmatprep.subr.bf16.mxu0 %v17033_v55  ;;  %v13710_v23 = vmul.f32 %v9132_v18, %v13152_v50  ;;  %v13727_v18 = vmul.f32 %v9133_v29, %v13166_v0 }
 0x3a7   : > { %v4245_v52 = vrot.slane %v4173_v37, 7  ;;  %8734 = vrot.lane.b32.xlu1 %v8733_v49, %s9276_s19  ;;  %v8738_v49 = vpack.i.bf16 %v13688_v22, %v13643_v42  ;;  %v4418_v37 = vrot.slane %v13688_v22, 1 }
 0x3a8   : > { %17070 = vst [vmem:[#allocation185_spill] sm:$0xff] %v13710_v23  ;;  %17071 = vst [vmem:[#allocation142_spill] sm:$0xff] %v13727_v18 }
 0x3a9   : > { %v13706_v10 = vsel %vm393_vm0, %v4244_v2, %v4245_v52  ;;  %v4097_v8 = vpop.permute.xlu0 %4096  ;;  %v5008_v2 = vld [vmem:[%s15541_s4 + $0x88] sm:$0xff]  ;;  %7619 = vmatpush1.bf16.msra.mxu0 %v13703_v31 }
 0x3aa   : > { %17069 = vst [vmem:[#allocation169_spill] sm:$0xff] %v13706_v10  ;;  %v4419_v47 = vrot.slane %v13706_v10, 1  ;;  %v4174_v50 = vsel %vm1316_vm3, %v13710_v23, %v4097_v8  ;;  %v7588_v13 = vpack.c.bf16 %v5008_v2, %v5007_v30  ;;  %7620 = vmatprep.subr.bf16.mxu0 %v17033_v55  ;;  %v4466_v30 = vrot.slane %v13428_v56, 2  ;;  %v5031_v56 = vld [vmem:[%s15541_s4 + $0x140] sm:$0xff] }
 0x3ab   : > { %8739 = vrot.lane.b32.xlu1 %v8738_v49, %s9276_s19  ;;  %v4247_v8 = vrot.slane %v4174_v50, 7  ;;  %v13738_v49 = vsel %vm552_vm1, %v4414_v24, %v4416_v46  ;;  %v13746_v2 = vsel %vm393_vm0, %v4245_v52, 0.0  ;;  %v13750_v50 = vpack.c.bf16 %v5030_v36, %v5029_v35  ;;  %v5032_v36 = vld [vmem:[%s15541_s4 + $0x148] sm:$0xff] }
 0x3ac   : > { %17072 = vst [vmem:[#allocation207_spill] sm:$0xff] %v13738_v49  ;;  %v13741_v0 = vsel %vm552_vm1, %v4418_v37, %v4419_v47  ;;  %7589 = vmatpush1.bf16.msra.mxu1 %v7588_v13  ;;  %v4468_v13 = vrot.slane %v13433_v17, 2  ;;  %v4421_v52 = vrot.slane %v13746_v2, 1  ;;  %v13774_v51 = vpack.c.bf16 %v5032_v36, %v5031_v56  ;;  %v9135_v17 = vld [vmem:[%s9383_s17 + $0xa8] sm:$0xff] }
 0x3ad   : > { %17073 = vst [vmem:[#allocation85_spill] sm:$0xff] %v13741_v0  ;;  %v4099_v29 = vpop.permute.xlu1 %4098  ;;  %v8743_v23 = vpack.i.bf16 %v13741_v0, %v13738_v49  ;;  %17074 = vst [vmem:[#allocation77_spill] sm:$0xff] %v13750_v50  ;;  %v13754_v46 = vsel %vm393_vm0, 0.0, %v4247_v8  ;;  %7590 = vmatprep.subr.bf16.mxu1 %v17033_v55  ;;  %7622 = vmatpush1.bf16.msra.mxu0 %v13750_v50  ;;  %v5034_v50 = vld [vmem:[%s15541_s4 + $0x158] sm:$0xff] }
 0x3ae   : > { %17075 = vst [vmem:[#allocation81_spill] sm:$0xff] %v13754_v46  ;;  %v4175_v37 = vsel %vm1316_vm3, %v13727_v18, %v4099_v29  ;;  %v9134_v29 = vld [vmem:[%s9383_s17 + $0xa0] sm:$0xff]  ;;  %7623 = vmatprep.subr.bf16.mxu0 %v17033_v55  ;;  %v17077_v18 = vrot.slane %v13397_v41, 2  ;;  %v8748_v49 = vpack.i.bf16 %v13754_v46, %v13706_v10  ;;  %v4423_v56 = vrot.slane %v13754_v46, 1 }
 0x3af   : > { %v4248_v35 = vrot.slane %v4175_v37, 7  ;;  %8744 = vrot.lane.b32.xlu0 %v8743_v23, %s9276_s19  ;;  %v13771_v24 = vmul.f32 %v9134_v29, %v13180_v53  ;;  %v13788_v53 = vmul.f32 %v9135_v17, %v13194_v19  ;;  %v5010_v19 = vld [vmem:[%s15541_s4 + $0x98] sm:$0xff]  ;;  %v4474_v17 = vrot.slane %v13484_v26, 2 }
 0x3b0   : > { %v13779_v37 = vsel %vm630_vm2, %v17077_v18, %v4466_v30  ;;  %v17081_v18 = vrot.slane %v13441_v60, 2  ;;  %v4476_v29 = vrot.slane %v13514_v27, 2  ;;  %v4478_v26 = vrot.slane %v13519_v21, 2 }
 0x3b1   : > { %17076 = vst [vmem:[#allocation141_spill] sm:$0xff] %v13771_v24  ;;  %17078 = vst [vmem:[#allocation111_spill] sm:$0xff] %v13779_v37  ;;  %v13782_v23 = vsel %vm393_vm0, %v4247_v8, %v4248_v35  ;;  %v4101_v0 = vpop.permute.xlu0 %4100  ;;  %v5009_v8 = vld [vmem:[%s15541_s4 + $0x90] sm:$0xff]  ;;  %7625 = vmatpush1.bf16.msra.mxu0 %v13774_v51  ;;  %v13818_v27 = vsel %vm552_vm1, %v4419_v47, %v4421_v52  ;;  %v4463_v21 = vrot.slane %v13387_v54, 2 }
 0x3b2   : > { %17079 = vst [vmem:[#allocation34_spill] sm:$0xff] %v13782_v23  ;;  %17080 = vst [vmem:[#allocation152_spill] sm:$0xff] %v13788_v53  ;;  %v13796_v30 = vsel %vm630_vm2, %v4468_v13, %v17081_v18  ;;  %v4176_v36 = vsel %vm1316_vm3, %v13771_v24, %v4101_v0  ;;  %v7591_v13 = vpack.c.bf16 %v5010_v19, %v5009_v8  ;;  %v5033_v18 = vld [vmem:[%s15541_s4 + $0x150] sm:$0xff]  ;;  %v17084_v0 = vrot.slane %v13782_v23, 1 }
 0x3b3   : > { %17082 = vst [vmem:[#allocation164_spill] sm:$0xff] %v13796_v30  ;;  %8749 = vrot.lane.b32.xlu0 %v8748_v49, %s9276_s19  ;;  %v4250_v15 = vrot.slane %v4176_v36, 7  ;;  %17083 = vst [vmem:[#allocation9_spill] sm:$0xff] %v13818_v27  ;;  %7626 = vmatprep.subr.bf16.mxu0 %v17033_v55  ;;  %v13827_v8 = vsel %vm393_vm0, %v4248_v35, 0.0  ;;  %v8763_v47 = vpack.i.bf16 %v13796_v30, %v13779_v37  ;;  %v17087_v35 = vrot.slane %v13527_v57, 2  ;;  %v5011_v30 = vld [vmem:[%s15541_s4 + $0xa0] sm:$0xff] }
 0x3b4   : > { %v13823_v49 = vsel %vm552_vm1, %v4423_v56, %v17084_v0  ;;  %7592 = vmatpush1.bf16.msra.mxu1 %v7591_v13  ;;  %v13833_v52 = vpack.c.bf16 %v5034_v50, %v5033_v18  ;;  %v5036_v50 = vld [vmem:[%s15541_s4 + $0x168] sm:$0xff]  ;;  %v9136_v18 = vld [vmem:[%s9383_s17 + $0xb0] sm:$0xff] }
 0x3b5   : > { %17085 = vst [vmem:[#allocation157_spill] sm:$0xff] %v13823_v49  ;;  %v4103_v19 = vpop.permute.xlu1 %4102  ;;  %v8753_v24 = vpack.i.bf16 %v13823_v49, %v13818_v27  ;;  %v13836_v56 = vsel %vm393_vm0, 0.0, %v4250_v15  ;;  %v13843_v0 = vsel %vm630_vm2, %v4478_v26, %v17087_v35  ;;  %7593 = vmatprep.subr.bf16.mxu1 %v17033_v55  ;;  %v5035_v49 = vld [vmem:[%s15541_s4 + $0x160] sm:$0xff]  ;;  %v9137_v26 = vld [vmem:[%s9383_s17 + $0xb8] sm:$0xff]  ;;  %v4426_v27 = vrot.slane %v13827_v8, 1 }
 0x3b6   : > { %17086 = vst [vmem:[#allocation116_spill] sm:$0xff] %v13836_v56  ;;  %v4177_v36 = vsel %vm1316_vm3, %v13788_v53, %v4103_v19  ;;  %17088 = vst [vmem:[#allocation87_spill] sm:$0xff] %v13843_v0  ;;  %v13856_v19 = vmul.f32 %v9136_v18, %v13208_v20  ;;  %v13860_v35 = vmul.f32 %v9137_v26, %v13222_v40  ;;  %7628 = vmatpush1.bf16.msra.mxu0 %v13833_v52 }
 0x3b7   : > { %v4251_v13 = vrot.slane %v4177_v36, 7  ;;  %8754 = vrot.lane.b32.xlu1 %v8753_v24, %s9276_s19  ;;  %8764 = vrot.lane.b32.xlu0 %v8763_v47, %s9276_s19  ;;  %v13863_v53 = vsel %vm630_vm2, %v4474_v17, %v4476_v29  ;;  %v13868_v24 = vpack.c.bf16 %v5036_v50, %v5035_v49  ;;  %v4473_v47 = vrot.slane %v13476_v34, 2 }
 0x3b8   : > { %17089 = vst [vmem:[#allocation36_spill] sm:$0xff] %v13856_v19  ;;  %17090 = vst [vmem:[#allocation46_spill] sm:$0xff] %v13860_v35  ;;  %v8758_v40 = vpack.i.bf16 %v13836_v56, %v13782_v23  ;;  %v8773_v29 = vpack.i.bf16 %v13843_v0, %v13863_v53  ;;  %7629 = vmatprep.subr.bf16.mxu0 %v17033_v55  ;;  %v4471_v18 = vrot.slane %v13471_v48, 2  ;;  %v4428_v26 = vrot.slane %v13836_v56, 1  ;;  %v5012_v0 = vld [vmem:[%s15541_s4 + $0xa8] sm:$0xff] }
 0x3b9   : > { %17091 = vst [vmem:[#allocation7_spill] sm:$0xff] %v13863_v53  ;;  %v13872_v20 = vsel %vm393_vm0, %v4250_v15, %v4251_v13  ;;  %v4105_v36 = vpop.permute.xlu0 %4104  ;;  %v17093_v50 = vrot.slane %v13397_v41, 2  ;;  %v13898_v49 = vsel %vm630_vm2, %v4473_v47, %v4474_v17  ;;  %v5038_v53 = vld [vmem:[%s15541_s4 + $0x178] sm:$0xff]  ;;  %v13920_v47 = vsel %vm393_vm0, %v4251_v13, 0.0 }
 0x3ba   : > { %17092 = vst [vmem:[#allocation153_spill] sm:$0xff] %v13872_v20  ;;  %v4178_v48 = vsel %vm1316_vm3, %v13856_v19, %v4105_v36  ;;  %17094 = vst [vmem:[#allocation25_spill] sm:$0xff] %v13898_v49  ;;  %v17095_v36 = vrot.slane %v13782_v23, 1  ;;  %v17097_v17 = vrot.slane %v13872_v20, 1  ;;  %7631 = vmatpush1.bf16.msra.mxu0 %v13868_v24  ;;  %v4431_v19 = vrot.slane %v13920_v47, 1 }
 0x3bb   : > { %v13885_v15 = vsel %vm630_vm2, %v4463_v21, %v17093_v50  ;;  %8759 = vrot.lane.b32.xlu1 %v8758_v40, %s9276_s19  ;;  %8774 = vrot.lane.b32.xlu0 %v8773_v29, %s9276_s19  ;;  %v7594_v21 = vpack.c.bf16 %v5012_v0, %v5011_v30  ;;  %v5037_v50 = vld [vmem:[%s15541_s4 + $0x170] sm:$0xff]  ;;  %v4253_v34 = vrot.slane %v4178_v48, 7  ;;  %v4486_v0 = vrot.slane %v13617_v59, 2  ;;  %v9139_v59 = vld [vmem:[%s9383_s17 + $0xc8] sm:$0xff] }
 0x3bc   : > { %v13910_v40 = vsel %vm552_vm1, %v17095_v36, %v4426_v27  ;;  %v13915_v30 = vsel %vm552_vm1, %v4428_v26, %v17097_v17  ;;  %7632 = vmatprep.subr.bf16.mxu0 %v17033_v55  ;;  %v13925_v27 = vpack.c.bf16 %v5038_v53, %v5037_v50  ;;  %v17099_v26 = vrot.slane %v13441_v60, 2  ;;  %v5039_v53 = vld [vmem:[%s15541_s4 + $0x180] sm:$0xff] }
 0x3bd   : > { %17096 = vst [vmem:[#allocation100_spill] sm:$0xff] %v13910_v40  ;;  %17098 = vst [vmem:[#allocation174_spill] sm:$0xff] %v13915_v30  ;;  %v4107_v29 = vpop.permute.xlu1 %4106  ;;  %v8778_v48 = vpack.i.bf16 %v13915_v30, %v13910_v40  ;;  %7595 = vmatpush1.bf16.msra.mxu1 %v7594_v21  ;;  %v13934_v13 = vsel %vm393_vm0, 0.0, %v4253_v34  ;;  %v5040_v21 = vld [vmem:[%s15541_s4 + $0x188] sm:$0xff]  ;;  %v9138_v50 = vld [vmem:[%s9383_s17 + $0xc0] sm:$0xff]  ;;  %v13956_v37 = vmul.f32 %v9139_v59, %v13246_v11  ;;  %v4496_v40 = vrot.slane %v13746_v2, 2 }
 0x3be   : > { %v13930_v36 = vsel %vm630_vm2, %v17099_v26, %v4471_v18  ;;  %17101 = vst [vmem:[#allocation155_spill] sm:$0xff] %v13934_v13  ;;  %v4179_v17 = vsel %vm1316_vm3, %v13860_v35, %v4107_v29  ;;  %7596 = vmatprep.subr.bf16.mxu1 %v17033_v55  ;;  %v13950_v26 = vmul.f32 %v9138_v50, %v13236_v61  ;;  %v4481_v35 = vrot.slane %v13560_v6, 2 }
 0x3bf   : > { %17100 = vst [vmem:[#allocation136_spill] sm:$0xff] %v13930_v36  ;;  %v4254_v18 = vrot.slane %v4179_v17, 7  ;;  %4800 = vrot.lane.b32.xlu1 %v13885_v15, %s9276_s19  ;;  %8779 = vrot.lane.b32.xlu0 %v8778_v48, %s9276_s19  ;;  %v8768_v29 = vpack.i.bf16 %v13898_v49, %v13930_v36  ;;  %17103 = vst [vmem:[#allocation171_spill] sm:$0xff] %v13956_v37  ;;  %v4488_v17 = vrot.slane %v13622_v44, 2  ;;  %v4483_v61 = vrot.slane %v13565_v58, 2  ;;  %v5042_v49 = vld [vmem:[%s15541_s4 + $0x198] sm:$0xff] }
 0x3c0   : > { %17102 = vst [vmem:[#allocation35_spill] sm:$0xff] %v13950_v26  ;;  %7634 = vmatpush1.bf16.msra.mxu0 %v13925_v27  ;;  %v13962_v48 = vpack.c.bf16 %v5040_v21, %v5039_v53  ;;  %v17104_v50 = vrot.slane %v13581_v1, 2  ;;  %v8783_v6 = vpack.i.bf16 %v13934_v13, %v13872_v20  ;;  %v4433_v53 = vrot.slane %v13934_v13, 1 }
 0x3c1   : > { %v13971_v11 = vsel %vm393_vm0, %v4253_v34, %v4254_v18  ;;  %v4109_v59 = vpop.permute.xlu0 %4108  ;;  %7635 = vmatprep.subr.bf16.mxu0 %v17033_v55  ;;  %v17107_v44 = vrot.slane %v13643_v42, 2  ;;  %v5013_v34 = vld [vmem:[%s15541_s4 + $0xb0] sm:$0xff]  ;;  %v4498_v58 = vrot.slane %v13754_v46, 2  ;;  %v17109_v2 = vrot.slane %v13872_v20, 1 }
 0x3c2   : > { %v13968_v30 = vsel %vm630_vm2, %v17104_v50, %v4486_v0  ;;  %17106 = vst [vmem:[#allocation68_spill] sm:$0xff] %v13971_v11  ;;  %v5014_v50 = vld [vmem:[%s15541_s4 + $0xb8] sm:$0xff]  ;;  %v4180_v21 = vsel %vm1316_vm3, %v13950_v26, %v4109_v59  ;;  %v4493_v46 = vrot.slane %v13688_v22, 2  ;;  %v17125_v22 = vrot.slane %v13971_v11, 1 }
 0x3c3   : > { %17105 = vst [vmem:[#allocation113_spill] sm:$0xff] %v13968_v30  ;;  %v13982_v0 = vsel %vm630_vm2, %v4488_v17, %v17107_v44  ;;  %8769 = vrot.lane.b32.xlu1 %v8768_v29, %s9276_s19  ;;  %8784 = vrot.lane.b32.xlu0 %v8783_v6, %s9276_s19  ;;  %v7597_v44 = vpack.c.bf16 %v5014_v50, %v5013_v34  ;;  %v5041_v17 = vld [vmem:[%s15541_s4 + $0x190] sm:$0xff]  ;;  %v4256_v36 = vrot.slane %v4180_v21, 7  ;;  %v17111_v29 = vrot.slane %v13971_v11, 1 }
 0x3c4   : > { %17108 = vst [vmem:[#allocation154_spill] sm:$0xff] %v13982_v0  ;;  %v14006_v59 = vsel %vm552_vm1, %v17109_v2, %v4431_v19  ;;  %7637 = vmatpush1.bf16.msra.mxu0 %v13962_v48  ;;  %v14015_v34 = vsel %vm393_vm0, %v4254_v18, 0.0  ;;  %v8803_v21 = vpack.i.bf16 %v13982_v0, %v13968_v30  ;;  %v14022_v19 = vpack.c.bf16 %v5042_v49, %v5041_v17  ;;  %v5044_v49 = vld [vmem:[%s15541_s4 + $0x1a8] sm:$0xff]  ;;  %v5046_v0 = vld [vmem:[%s15541_s4 + $0x1b8] sm:$0xff] }
 0x3c5   : > { %17110 = vst [vmem:[#allocation193_spill] sm:$0xff] %v14006_v59  ;;  %v14011_v6 = vsel %vm552_vm1, %v4433_v53, %v17111_v29  ;;  %v4111_v50 = vpop.permute.xlu1 %4110  ;;  %7598 = vmatpush1.bf16.msra.mxu1 %v7597_v44  ;;  %7638 = vmatprep.subr.bf16.mxu0 %v17033_v55  ;;  %v14025_v53 = vsel %vm393_vm0, 0.0, %v4256_v36  ;;  %v17114_v2 = vrot.slane %v13782_v23, 2  ;;  %v5043_v44 = vld [vmem:[%s15541_s4 + $0x1a0] sm:$0xff] }
 0x3c6   : > { %17112 = vst [vmem:[#allocation144_spill] sm:$0xff] %v14011_v6  ;;  %v8788_v26 = vpack.i.bf16 %v14011_v6, %v14006_v59  ;;  %17113 = vst [vmem:[#allocation184_spill] sm:$0xff] %v14025_v53  ;;  %v4181_v18 = vsel %vm1316_vm3, %v13956_v37, %v4111_v50  ;;  %7599 = vmatprep.subr.bf16.mxu1 %v17033_v55  ;;  %v17116_v50 = vrot.slane %v13581_v1, 2  ;;  %v4436_v6 = vrot.slane %v14015_v34, 1  ;;  %v9140_v59 = vld [vmem:[%s9383_s17 + $0xd0] sm:$0xff] }
 0x3c7   : > { %v14032_v29 = vsel %vm630_vm2, %v4498_v58, %v17114_v2  ;;  %v4257_v17 = vrot.slane %v4181_v18, 7  ;;  %8804 = vrot.lane.b32.xlu0 %v8803_v21, %s9276_s19  ;;  %v17118_v2 = vrot.slane %v13706_v10, 2  ;;  %v14056_v18 = vmul.f32 %v9140_v59, %v13254_v7 }
 0x3c8   : > { %17115 = vst [vmem:[#allocation173_spill] sm:$0xff] %v14032_v29  ;;  %8789 = vrot.lane.b32.xlu1 %v8788_v26, %s9276_s19  ;;  %v14046_v58 = vsel %vm630_vm2, %v4483_v61, %v17116_v50  ;;  %7640 = vmatpush1.bf16.msra.mxu0 %v14022_v19  ;;  %v14059_v26 = vpack.c.bf16 %v5044_v49, %v5043_v44  ;;  %v17121_v21 = vrot.slane %v13527_v57, 2  ;;  %v4438_v59 = vrot.slane %v14025_v53, 1  ;;  %v9141_v49 = vld [vmem:[%s9383_s17 + $0xd8] sm:$0xff] }
 0x3c9   : > { %17117 = vst [vmem:[#allocation13_spill] sm:$0xff] %v14046_v58  ;;  %v14051_v37 = vsel %vm630_vm2, %v17118_v2, %v4496_v40  ;;  %17120 = vst [vmem:[#allocation115_spill] sm:$0xff] %v14056_v18  ;;  %v14067_v50 = vsel %vm393_vm0, %v4256_v36, %v4257_v17  ;;  %v4113_v40 = vpop.permute.xlu0 %4112  ;;  %v8793_v2 = vpack.i.bf16 %v14025_v53, %v13971_v11  ;;  %7641 = vmatprep.subr.bf16.mxu0 %v17033_v55 }
 0x3ca   : > { %17119 = vst [vmem:[#allocation166_spill] sm:$0xff] %v14051_v37  ;;  %v14064_v61 = vsel %vm630_vm2, %v17121_v21, %v4481_v35  ;;  %17123 = vst [vmem:[#allocation117_spill] sm:$0xff] %v14067_v50  ;;  %v8813_v7 = vpack.i.bf16 %v14032_v29, %v14051_v37  ;;  %v14078_v35 = vmul.f32 %v9141_v49, %v13262_v9  ;;  %v5015_v21 = vld [vmem:[%s15541_s4 + $0xc0] sm:$0xff]  ;;  %v5016_v29 = vld [vmem:[%s15541_s4 + $0xc8] sm:$0xff]  ;;  %v4491_v37 = vrot.slane %v13681_v4, 2 }
 0x3cb   : > { %17122 = vst [vmem:[#allocation177_spill] sm:$0xff] %v14064_v61  ;;  %v8798_v36 = vpack.i.bf16 %v14046_v58, %v14064_v61  ;;  %v4182_v44 = vsel %vm1316_vm3, %v14056_v18, %v4113_v40  ;;  %v7600_v9 = vpack.c.bf16 %v5016_v29, %v5015_v21  ;;  %v5045_v49 = vld [vmem:[%s15541_s4 + $0x1b0] sm:$0xff]  ;;  %v14104_v40 = vsel %vm552_vm1, %v17125_v22, %v4436_v6 }
 0x3cc   : > { %17124 = vst [vmem:[#allocation209_spill] sm:$0xff] %v14078_v35  ;;  %8794 = vrot.lane.b32.xlu1 %v8793_v2, %s9276_s19  ;;  %8814 = vrot.lane.b32.xlu0 %v8813_v7, %s9276_s19  ;;  %v4259_v30 = vrot.slane %v4182_v44, 7  ;;  %17126 = vst [vmem:[#allocation160_spill] sm:$0xff] %v14104_v40  ;;  %v17127_v2 = vrot.slane %v14067_v50, 1  ;;  %v4506_v7 = vrot.slane %v13920_v47, 2  ;;  %v14114_v21 = vsel %vm393_vm0, %v4257_v17, 0.0 }
 0x3cd   : > { %7643 = vmatpush1.bf16.msra.mxu0 %v14059_v26  ;;  %v4115_v4 = vpop.permute.xlu1 %4114  ;;  %7601 = vmatpush1.bf16.msra.mxu1 %v7600_v9  ;;  %v14119_v22 = vpack.c.bf16 %v5046_v0, %v5045_v49  ;;  %v17131_v17 = vrot.slane %v13706_v10, 2  ;;  %v5047_v0 = vld [vmem:[%s15541_s4 + $0x1c0] sm:$0xff]  ;;  %v5048_v9 = vld [vmem:[%s15541_s4 + $0x1c8] sm:$0xff] }
 0x3ce   : > { %v14109_v29 = vsel %vm552_vm1, %v4438_v59, %v17127_v2  ;;  %7644 = vmatprep.subr.bf16.mxu0 %v17033_v55  ;;  %v14123_v59 = vsel %vm393_vm0, 0.0, %v4259_v30  ;;  %v4183_v47 = vsel %vm1316_vm3, %v14078_v35, %v4115_v4  ;;  %7602 = vmatprep.subr.bf16.mxu1 %v17033_v55  ;;  %v9142_v4 = vld [vmem:[%s9383_s17 + $0xe0] sm:$0xff]  ;;  %v17135_v35 = vrot.slane %v13643_v42, 2 }
 0x3cf   : > { %17128 = vst [vmem:[#allocation30_spill] sm:$0xff] %v14109_v29  ;;  %v8818_v44 = vpack.i.bf16 %v14109_v29, %v14104_v40  ;;  %17129 = vst [vmem:[#allocation24_spill] sm:$0xff] %v14119_v22  ;;  %v14130_v2 = vsel %vm630_vm2, %v4493_v46, %v17131_v17  ;;  %v4260_v49 = vrot.slane %v4183_v47, 7  ;;  %v14143_v6 = vmul.f32 %v9142_v4, %v13270_v14  ;;  %v9143_v46 = vld [vmem:[%s9383_s17 + $0xe8] sm:$0xff]  ;;  %v5018_v40 = vld [vmem:[%s15541_s4 + $0xd8] sm:$0xff] }
 0x3d0   : > { %17130 = vst [vmem:[#allocation99_spill] sm:$0xff] %v14123_v59  ;;  %17132 = vst [vmem:[#allocation178_spill] sm:$0xff] %v14130_v2  ;;  %8799 = vrot.lane.b32.xlu1 %v8798_v36, %s9276_s19  ;;  %v14147_v17 = vmul.f32 %v9143_v46, %v13278_v28  ;;  %v14152_v18 = vsel %vm630_vm2, %v17135_v35, %v4491_v37  ;;  %v4508_v29 = vrot.slane %v13934_v13, 2  ;;  %v4441_v47 = vrot.slane %v14114_v21, 1 }
 0x3d1   : > { %8819 = vrot.lane.b32.xlu0 %v8818_v44, %s9276_s19  ;;  %17133 = vst [vmem:[#allocation112_spill] sm:$0xff] %v14143_v6  ;;  %17136 = vst [vmem:[#allocation45_spill] sm:$0xff] %v14152_v18  ;;  %7646 = vmatpush1.bf16.msra.mxu0 %v14119_v22  ;;  %v14157_v36 = vpack.c.bf16 %v5048_v9, %v5047_v0  ;;  %v17138_v14 = vrot.slane %v13872_v20, 2  ;;  %v14165_v28 = vsel %vm393_vm0, %v4259_v30, %v4260_v49  ;;  %v4117_v4 = vpop.permute.xlu0 %4116  ;;  %v5050_v9 = vld [vmem:[%s15541_s4 + $0x1d8] sm:$0xff]  ;;  %v5059_v22 = vld [vmem:[%s15541_s4 + $0x220] sm:$0xff] }
 0x3d2   : > { %17134 = vst [vmem:[#allocation163_spill] sm:$0xff] %v14147_v17  ;;  %17140 = vst [vmem:[#allocation120_spill] sm:$0xff] %v14165_v28  ;;  %v8808_v37 = vpack.i.bf16 %v14130_v2, %v14152_v18  ;;  %v8823_v35 = vpack.i.bf16 %v14123_v59, %v14067_v50  ;;  %7647 = vmatprep.subr.bf16.mxu0 %v17033_v55  ;;  %v4443_v0 = vrot.slane %v14123_v59, 1  ;;  %v4516_v2 = vrot.slane %v14114_v21, 2 }
 0x3d3   : > { %17137 = vst [vmem:[#allocation176_spill] sm:$0xff] %v14157_v36  ;;  %v14162_v44 = vsel %vm630_vm2, %v17138_v14, %v4506_v7  ;;  %v17141_v7 = vrot.slane %v13971_v11, 2  ;;  %v5017_v14 = vld [vmem:[%s15541_s4 + $0xd0] sm:$0xff]  ;;  %v4184_v46 = vsel %vm1316_vm3, %v14143_v6, %v4117_v4  ;;  %v4518_v13 = vrot.slane %v14123_v59, 2 }
 0x3d4   : > { %17139 = vst [vmem:[#allocation23_spill] sm:$0xff] %v14162_v44  ;;  %8809 = vrot.lane.b32.xlu1 %v8808_v37, %s9276_s19  ;;  %v4262_v18 = vrot.slane %v4184_v46, 7  ;;  %v17143_v21 = vrot.slane %v14067_v50, 1  ;;  %v17145_v37 = vrot.slane %v14165_v28, 1 }
 0x3d5   : > { %v14178_v30 = vsel %vm630_vm2, %v4508_v29, %v17141_v7  ;;  %8824 = vrot.lane.b32.xlu0 %v8823_v35, %s9276_s19  ;;  %v7603_v29 = vpack.c.bf16 %v5018_v40, %v5017_v14  ;;  %v5049_v7 = vld [vmem:[%s15541_s4 + $0x1d0] sm:$0xff]  ;;  %7649 = vmatpush1.bf16.msra.mxu0 %v14157_v36  ;;  %v4501_v35 = vrot.slane %v13827_v8, 2  ;;  %v14212_v14 = vsel %vm393_vm0, %v4260_v49, 0.0  ;;  %v4119_v6 = vpop.permute.xlu1 %4118 }
 0x3d6   : > { %17142 = vst [vmem:[#allocation162_spill] sm:$0xff] %v14178_v30  ;;  %v14202_v4 = vsel %vm552_vm1, %v17143_v21, %v4441_v47  ;;  %v14207_v40 = vsel %vm552_vm1, %v4443_v0, %v17145_v37  ;;  %v8843_v47 = vpack.i.bf16 %v14178_v30, %v14162_v44  ;;  %7650 = vmatprep.subr.bf16.mxu0 %v17033_v55  ;;  %v14220_v0 = vsel %vm393_vm0, 0.0, %v4262_v18 }
 0x3d7   : > { %17144 = vst [vmem:[#allocation96_spill] sm:$0xff] %v14202_v4  ;;  %17146 = vst [vmem:[#allocation8_spill] sm:$0xff] %v14207_v40  ;;  %v8828_v46 = vpack.i.bf16 %v14207_v40, %v14202_v4  ;;  %7604 = vmatpush1.bf16.msra.mxu1 %v7603_v29  ;;  %v4185_v8 = vsel %vm1316_vm3, %v14147_v17, %v4119_v6  ;;  %v17148_v49 = vrot.slane %v14165_v28, 2  ;;  %v5019_v29 = vld [vmem:[%s15541_s4 + $0xe0] sm:$0xff]  ;;  %v5020_v40 = vld [vmem:[%s15541_s4 + $0xe8] sm:$0xff]  ;;  %v4503_v17 = vrot.slane %v13836_v56, 2 }
 0x3d8   : > { %17147 = vst [vmem:[#allocation206_spill] sm:$0xff] %v14220_v0  ;;  %v14229_v37 = vpack.c.bf16 %v5050_v9, %v5049_v7  ;;  %7605 = vmatprep.subr.bf16.mxu1 %v17033_v55  ;;  %v5051_v6 = vld [vmem:[%s15541_s4 + $0x1e0] sm:$0xff]  ;;  %v9144_v9 = vld [vmem:[%s9383_s17 + $0xf0] sm:$0xff]  ;;  %v17152_v4 = vrot.slane %v14067_v50, 2  ;;  %v4446_v30 = vrot.slane %v14212_v14, 1  ;;  %v9145_v56 = vld [vmem:[%s9383_s17 + $0xf8] sm:$0xff] }
 0x3d9   : > { %v14227_v21 = vsel %vm630_vm2, %v4518_v13, %v17148_v49  ;;  %v4263_v13 = vrot.slane %v4185_v8, 7  ;;  %8829 = vrot.lane.b32.xlu1 %v8828_v46, %s9276_s19  ;;  %8844 = vrot.lane.b32.xlu0 %v8843_v47, %s9276_s19  ;;  %v14246_v7 = vmul.f32 %v9144_v9, %v13286_v16  ;;  %v5052_v49 = vld [vmem:[%s15541_s4 + $0x1e8] sm:$0xff]  ;;  %v7606_v46 = vpack.c.bf16 %v5020_v40, %v5019_v29  ;;  %v4121_v16 = vpop.permute.xlu0 %4120 }
 0x3da   : > { %17149 = vst [vmem:[#allocation37_spill] sm:$0xff] %v14227_v21  ;;  %17150 = vst [vmem:[#allocation29_spill] sm:$0xff] %v14229_v37  ;;  %v14254_v59 = vsel %vm630_vm2, %v17152_v4, %v4516_v2  ;;  %7652 = vmatpush1.bf16.msra.mxu0 %v14229_v37  ;;  %v14258_v8 = vpack.c.bf16 %v5052_v49, %v5051_v6  ;;  %v8833_v9 = vpack.i.bf16 %v14220_v0, %v14165_v28  ;;  %v5058_v37 = vld [vmem:[%s15541_s4 + $0x218] sm:$0xff] }
 0x3db   : > { %17151 = vst [vmem:[#allocation22_spill] sm:$0xff] %v14246_v7  ;;  %17153 = vst [vmem:[#allocation91_spill] sm:$0xff] %v14254_v59  ;;  %v14261_v47 = vsel %vm393_vm0, %v4262_v18, %v4263_v13  ;;  %v8853_v44 = vpack.i.bf16 %v14227_v21, %v14254_v59  ;;  %v14269_v2 = vmul.f32 %v9145_v56, %v13298_v43  ;;  %7653 = vmatprep.subr.bf16.mxu0 %v17033_v55  ;;  %v5021_v43 = vld [vmem:[%s15541_s4 + $0xf0] sm:$0xff]  ;;  %v5022_v56 = vld [vmem:[%s15541_s4 + $0xf8] sm:$0xff] }
 0x3dc   : > { %17154 = vst [vmem:[#allocation172_spill] sm:$0xff] %v14258_v8  ;;  %17155 = vst [vmem:[#allocation139_spill] sm:$0xff] %v14261_v47  ;;  %v17157_v4 = vrot.slane %v13782_v23, 2  ;;  %v4448_v18 = vrot.slane %v14220_v0, 1  ;;  %v4449_v29 = vrot.slane %v14261_v47, 1  ;;  %v17159_v6 = vrot.slane %v13872_v20, 2  ;;  %7607 = vmatpush1.bf16.msra.mxu1 %v7606_v46 }
 0x3dd   : > { %17156 = vst [vmem:[#allocation134_spill] sm:$0xff] %v14269_v2  ;;  %v4186_v21 = vsel %vm1316_vm3, %v14246_v7, %v4121_v16  ;;  %8834 = vrot.lane.b32.xlu1 %v8833_v9, %s9276_s19  ;;  %8854 = vrot.lane.b32.xlu0 %v8853_v44, %s9276_s19  ;;  %v5053_v46 = vld [vmem:[%s15541_s4 + $0x1f0] sm:$0xff]  ;;  %v4123_v44 = vpop.permute.xlu1 %4122  ;;  %v17166_v7 = vrot.slane %v14067_v50, 2 }
 0x3de   : > { %v14275_v40 = vsel %vm630_vm2, %v17157_v4, %v4501_v35  ;;  %v14282_v49 = vsel %vm630_vm2, %v4503_v17, %v17159_v6  ;;  %v4511_v35 = vrot.slane %v14015_v34, 2  ;;  %v4346_v4 = vsel %vm393_vm0, %v4263_v13, 0.0  ;;  %v5054_v6 = vld [vmem:[%s15541_s4 + $0x1f8] sm:$0xff]  ;;  %7655 = vmatpush1.bf16.msra.mxu0 %v14258_v8  ;;  %7608 = vmatprep.subr.bf16.mxu1 %v17033_v55 }
 0x3df   : > { %17158 = vst [vmem:[#allocation167_spill] sm:$0xff] %v14275_v40  ;;  %17160 = vst [vmem:[#allocation31_spill] sm:$0xff] %v14282_v49  ;;  %v7609_v17 = vpack.c.bf16 %v5022_v56, %v5021_v43  ;;  %v4513_v34 = vrot.slane %v14025_v53, 2  ;;  %v4265_v59 = vrot.slane %v4186_v21, 7  ;;  %v17161_v13 = vrot.slane %v14165_v28, 1  ;;  %7656 = vmatprep.subr.bf16.mxu0 %v17033_v55 }
 0x3e0   : > { %v14309_v9 = vsel %vm552_vm1, %v4448_v18, %v4449_v29  ;;  %v8838_v43 = vpack.i.bf16 %v14282_v49, %v14275_v40  ;;  %v14318_v21 = vpack.c.bf16 %v5054_v6, %v5053_v46  ;;  %v4187_v18 = vsel %vm1316_vm3, %v14269_v2, %v4123_v44  ;;  %v5055_v46 = vld [vmem:[%s15541_s4 + $0x200] sm:$0xff]  ;;  %v5056_v6 = vld [vmem:[%s15541_s4 + $0x208] sm:$0xff] }
 0x3e1   : > { %v14306_v16 = vsel %vm552_vm1, %v17161_v13, %v4446_v30  ;;  %17163 = vst [vmem:[#allocation102_spill] sm:$0xff] %v14309_v9  ;;  %v4451_v30 = vrot.slane %v4346_v4, 1  ;;  %v14321_v13 = vsel %vm393_vm0, 0.0, %v4265_v59  ;;  %v14328_v53 = vsel %vm630_vm2, %v4513_v34, %v17166_v7  ;;  %7610 = vmatpush1.bf16.msra.mxu1 %v7609_v17 }
 0x3e2   : > { %17162 = vst [vmem:[#allocation32_spill] sm:$0xff] %v14306_v16  ;;  %v8858_v56 = vpack.i.bf16 %v14309_v9, %v14306_v16  ;;  %17164 = vst [vmem:[#allocation161_spill] sm:$0xff] %v14318_v21  ;;  %v4266_v20 = vrot.slane %v4187_v18, 7  ;;  %8839 = vrot.lane.b32.xlu1 %v8838_v43, %s9276_s19  ;;  %v17168_v44 = vrot.slane %v13971_v11, 2  ;;  %v4524_v7 = vrot.slane %v14261_v47, 2  ;;  %7658 = vmatpush1.bf16.msra.mxu0 %v14318_v21 }
 0x3e3   : > { %17165 = vst [vmem:[#allocation44_spill] sm:$0xff] %v14321_v13  ;;  %17167 = vst [vmem:[#allocation170_spill] sm:$0xff] %v14328_v53  ;;  %v4526_v17 = vrot.slane %v4346_v4, 2  ;;  %v14345_v34 = vpack.c.bf16 %v5056_v6, %v5055_v46  ;;  %7675 = vmatprep.subr.bf16.mxu1 %v17033_v55  ;;  %v8868_v18 = vpack.i.bf16 %v14321_v13, %v14261_v47  ;;  %v4453_v9 = vrot.slane %v13331_v38, 2 }
 0x3e4   : > { %8859 = vrot.lane.b32.xlu0 %v8858_v56, %s9276_s19  ;;  %v14341_v2 = vsel %vm630_vm2, %v17168_v44, %v4511_v35  ;;  %v14349_v43 = vsel %vm393_vm0, %v4265_v59, %v4266_v20  ;;  %v4598_v35 = vrot.slane %v14321_v13, 2  ;;  %v14358_v4 = vsel %vm552_vm1, %v4449_v29, %v4451_v30 }
 0x3e5   : > { %17169 = vst [vmem:[#allocation60_spill] sm:$0xff] %v14341_v2  ;;  %17170 = vst [vmem:[#allocation5_spill] sm:$0xff] %v14349_v43  ;;  %v8848_v56 = vpack.i.bf16 %v14328_v53, %v14341_v2  ;;  %v4599_v44 = vrot.slane %v14349_v43, 2  ;;  %7660 = vmatprep.subr.bf16.mxu0 %v14345_v34  ;;  %v4347_v46 = vsel %vm393_vm0, %v4266_v20, 0.0  ;;  %v14365_v59 = vsel %vm630_vm2, %v4524_v7, %v4526_v17 }
 0x3e6   : > { %17171 = vst [vmem:[#allocation212_spill] sm:$0xff] %v14358_v4  ;;  %17172 = vst [vmem:[#allocation213_spill] sm:$0xff] %v14365_v59  ;;  %v8863_v29 = vpack.i.bf16 %v13331_v38, %v14358_v4  ;;  %v4564_v16 = vrot.slane %v4347_v46, 1  ;;  %v4562_v20 = vrot.slane %v14349_v43, 1  ;;  %v4521_v17 = vrot.slane %v14212_v14, 2 }
 0x3e7   : > { %8849 = vrot.lane.b32.xlu1 %v8848_v56, %s9276_s19  ;;  %v14368_v6 = vsel %vm630_vm2, %v4598_v35, %v4599_v44  ;;  %v4523_v56 = vrot.slane %v14220_v0, 2  ;;  %v4601_v47 = vrot.slane %v4347_v46, 2  ;;  %v4561_v46 = vrot.slane %v14321_v13, 1 }
 0x3e8   : > { %8869 = vrot.lane.b32.xlu0 %v8868_v18, %s9276_s19  ;;  %17173 = vst [vmem:[#allocation214_spill] sm:$0xff] %v14368_v6  ;;  %v8883_v30 = vpack.i.bf16 %v14368_v6, %v14365_v59  ;;  %v17174_v18 = vrot.slane %v13328_v33, 2 }
 0x3e9   : > { %v14385_v4 = vpop.permute.xlu1 %8674  ;;  %v14394_v14 = vsel %vm630_vm2, %v4523_v56, %v4524_v7  ;;  %v14413_v7 = vsel %vm552_vm1, %v4561_v46, %v4562_v20 }
 0x3ea   : > { %v14383_v35 = vsel %vm630_vm2, %v4453_v9, %v17174_v18  ;;  %v8677_v59 = vunpack.i.h.bf16 %v14385_v4  ;;  %17176 = vst [vmem:[#allocation216_spill] sm:$0xff] %v14394_v14  ;;  %v17177_v9 = vrot.slane %v14165_v28, 2  ;;  %17179 = vst [vmem:[#allocation218_spill] sm:$0xff] %v14413_v7 }
 0x3eb   : > { %8864 = vrot.lane.b32.xlu1 %v8863_v29, %s9276_s19  ;;  %v8873_v6 = vpack.i.bf16 %v14383_v35, %v14349_v43  ;;  %v14391_v29 = vsel %vm552_vm1, %v4562_v20, %v4564_v16 }
 0x3ec   : > { %8884 = vrot.lane.b32.xlu0 %v8883_v30, %s9276_s19  ;;  %17175 = vst [vmem:[#allocation215_spill] sm:$0xff] %v14391_v29  ;;  %v14402_v30 = vsel %vm630_vm2, %v17177_v9, %v4521_v17  ;;  %v14407_v18 = vsel %vm1348_vm4, %v13343_v25, %v8677_v59 }
 0x3ed   : > { %17178 = vst [vmem:[#allocation217_spill] sm:$0xff] %v14402_v30  ;;  %5414 = vmatprep.mubr.f32.mxu0 %v14407_v18  ;;  %v8878_v16 = vpack.i.bf16 %v14394_v14, %v14402_v30  ;;  %v14422_v25 = vpop.permute.xlu1 %8679 }
 0x3ef   : > { %8874 = vrot.lane.b32.xlu1 %v8873_v6, %s9276_s19  ;;  %v14416_v6 = vsel %vm630_vm2, %v4599_v44, %v4601_v47 }
 0x3f0   : > { %4890 = vrot.lane.b32.xlu0 %v14391_v29, %s9276_s19  ;;  %17180 = vst [vmem:[#allocation219_spill] sm:$0xff] %v14416_v6  ;;  %v8888_v17 = vpack.i.bf16 %v14413_v7, %v14416_v6  ;;  %v14440_v29 = vpop.permute.xlu0 %8664 }
 0x3f3   : > { %8879 = vrot.lane.b32.xlu1 %v8878_v16, %s9276_s19 }
 0x3f4   : > { %v8670_v7 = vpop.permute.xlu0 %8669 }
 0x3f5   : > { %v8671_v10 = vunpack.i.l.bf16 %v8670_v7  ;;  %v8672_v58 = vunpack.i.h.bf16 %v8670_v7  ;;  %v8667_v7 = vunpack.i.h.bf16 %v14440_v29 }
 0x3f7   : > { %8889 = vrot.lane.b32.xlu1 %v8888_v17, %s9276_s19 }
 0x3f8   : > { %v8685_v13 = vpop.permute.xlu0 %8684 }
 0x3f9   : > { %v14424_v59 = vpop.permute.xlu1 %8694  ;;  %v8687_v61 = vunpack.i.h.bf16 %v8685_v13 }
 0x3fc   : > { %v14450_v14 = vpop.permute.xlu0 %8689 }
 0x3fd   : > { %v14426_v56 = vpop.permute.xlu1 %8699 }
 0x401   : > { %v14454_v30 = vpop.permute.xlu0 %8704 }
 0x405   : > { %v14458_v53 = vpop.permute.xlu0 %8709 }
 0x409   : > { %v14428_v9 = vpop.permute.xlu1 %8714  ;;  %v4795_v49 = vpop.permute.xlu0 %4794 }
 0x40d   : > { %v14430_v20 = vpop.permute.xlu1 %8719  ;;  %v14466_v40 = vpop.permute.xlu0 %4798 }
 0x411   : > { %v14432_v46 = vpop.permute.xlu1 %4796 }
 0x419   : > { %v14434_v47 = vpop.permute.xlu1 %8734 }
 0x41d   : > { %v14436_v44 = vpop.permute.xlu1 %8739 }
 0x41e   : > { %17181 = vst [vmem:[#allocation220_spill] sm:$0xff] %v14436_v44  ;;  %v8686_v44 = vunpack.i.l.bf16 %v8685_v13  ;;  %v8676_v13 = vunpack.i.l.bf16 %v14385_v4  ;;  %v8697_v4 = vunpack.i.h.bf16 %v14424_v59 }
 0x429   : > { %v14438_v16 = vpop.permute.xlu1 %8754 }
 0x42a   : > { %17182 = vst [vmem:[#allocation221_spill] sm:$0xff] %v14438_v16 }
 0x42d   : > { %v14442_v17 = vpop.permute.xlu1 %8759 }
 0x42e   : > { %17183 = vst [vmem:[#allocation222_spill] sm:$0xff] %v14442_v17 }
 0x431   : > { %v14444_v43 = vpop.permute.xlu1 %4800 }
 0x435   : > { %v14446_v6 = vpop.permute.xlu1 %8769 }
 0x43a   : > { %v14448_v0 = vpop.permute.xlu1 %8789 }
 0x43b   : > { %17184 = vst [vmem:[#allocation223_spill] sm:$0xff] %v14448_v0 }
 0x43e   : > { %v14452_v28 = vpop.permute.xlu1 %8794 }
 0x43f   : > { %17185 = vst [vmem:[#allocation224_spill] sm:$0xff] %v14452_v28  ;;  %v14472_v28 = vpop.permute.xlu0 %8724 }
 0x442   : > { %v14456_v50 = vpop.permute.xlu1 %8799 }
 0x443   : > { %v14487_v16 = vpop.permute.xlu0 %8729 }
 0x446   : > { %v14460_v11 = vpop.permute.xlu1 %8809 }
 0x447   : > { %17186 = vst [vmem:[#allocation225_spill] sm:$0xff] %v14460_v11 }
 0x44b   : > { %v14462_v2 = vpop.permute.xlu1 %8829 }
 0x44c   : > { %17187 = vst [vmem:[#allocation226_spill] sm:$0xff] %v14462_v2  ;;  %v14483_v2 = vunpack.i.l.bf16 %v14440_v29 }
 0x44f   : > { %v14464_v23 = vpop.permute.xlu1 %8834 }
 0x450   : > { %17188 = vst [vmem:[#allocation227_spill] sm:$0xff] %v14464_v23  ;;  %v17194_v23 = vld [vmem:[#allocation11_spill] sm:$0xff] }
 0x454   : > { %v14468_v0 = vpop.permute.xlu1 %8839 }
 0x455   : > { %17189 = vst [vmem:[#allocation228_spill] sm:$0xff] %v14468_v0 }
 0x459   : > { %v14470_v17 = vpop.permute.xlu1 %8849 }
 0x45a   : > { %17190 = vst [vmem:[#allocation229_spill] sm:$0xff] %v14470_v17 }
 0x45d   : > { %v14474_v21 = vpop.permute.xlu1 %8864 }
 0x45e   : > { %17191 = vst [vmem:[#allocation230_spill] sm:$0xff] %v14474_v21  ;;  %v8867_v8 = vunpack.i.h.bf16 %v14474_v21  ;;  %v5057_v21 = vld [vmem:[%s15541_s4 + $0x210] sm:$0xff] }
 0x45f   : > { %v7663_v36 = vpack.c.bf16 %v5058_v37, %v5057_v21  ;;  %v4958_v37 = vsel %vm1348_vm4, %v13375_v5, %v4795_v49  ;;  %v5061_v5 = vld [vmem:[%s15541_s4 + $0x230] sm:$0xff] }
 0x460   : > { %v4925_v0 = vsel %vm1348_vm4, %v17194_v23, %v8867_v8  ;;  %v4926_v8 = vsel %vm1348_vm4, %v17194_v23, %v8671_v10  ;;  %v8681_v10 = vunpack.i.l.bf16 %v14422_v25 }
 0x461   : > { %v14489_v17 = vpop.permute.xlu1 %8874  ;;  %5189 = vmatprep.mubr.f32.mxu1 %v4925_v0 }
 0x462   : > { %17195 = vst [vmem:[#allocation11_spill] sm:$0xff] %v14489_v17  ;;  %v8877_v42 = vunpack.i.h.bf16 %v14489_v17  ;;  %7116 = vmatmul.mubr.msk.f32.vlgmr.msra.gmra.mrb[96].mxu1 %vm14478_vm6, %v14483_v2  ;;  %v14508_v17 = vpop.permute.xlu0 %8744 }
 0x463   : > { %5194 = vmatprep.mubr.f32.mxu1 %v4926_v8  ;;  %7691 = vmatpush1.bf16.msra.mxu1 %v13640_v45  ;;  %v5060_v45 = vld [vmem:[%s15541_s4 + $0x228] sm:$0xff]  ;;  %v17199_v8 = vld [vmem:[#allocation133_spill] sm:$0xff] }
 0x464   : > { %v4957_v0 = vsel %vm1348_vm4, %v13355_v32, %v8877_v42  ;;  %7676 = vmatprep.subr.bf16.mxu1 %v17033_v55  ;;  %v4898_v32 = vsel %vm1348_vm4, %v13352_v63, %v8686_v44  ;;  %v4927_v42 = vsel %vm1348_vm4, %v14383_v35, %v8672_v58  ;;  %v7667_v21 = vpack.c.bf16 %v5060_v45, %v5059_v22 }
 0x465   : > { %5415 = vmatmul.mubr.f32.vlgmr.msra.gmra.mrb[96].mxu0 %v4957_v0  ;;  %v4895_v63 = vsel %vm1348_vm4, %v13331_v38, %v8667_v7  ;;  %v4899_v58 = vsel %vm1348_vm4, %v13387_v54, %v8687_v61  ;;  %v8682_v22 = vunpack.i.h.bf16 %v14422_v25  ;;  %v4928_v38 = vsel %vm1348_vm4, %v13572_v3, %v8681_v10  ;;  %v17197_v25 = vld [vmem:[#allocation77_spill] sm:$0xff] }
 0x466   : > { %7662 = vmatpush3.bf16.msra.mxu0 %v14345_v34  ;;  %7118 = vmatmul.mubr.msk.f32.gmra.mrb[98].mxu1 %vm14478_vm6, %v14483_v2  ;;  %v8696_v34 = vunpack.i.l.bf16 %v14424_v59  ;;  %v14544_v49 = vpop.permute.xlu0 %8749  ;;  %v4959_v54 = vsel %vm1348_vm4, %v13378_v12, %v14432_v46  ;;  %v4896_v35 = vsel %vm1348_vm4, %v13328_v33, %v8676_v13  ;;  %v8706_v33 = vunpack.i.l.bf16 %v14454_v30  ;;  %v17198_v59 = vld [vmem:[#allocation150_spill] sm:$0xff]  ;;  %v17200_v7 = vld [vmem:[#allocation97_spill] sm:$0xff]  ;;  %v17203_v13 = vld [vmem:[#allocation111_spill] sm:$0xff] }
 0x467   : > { %5419 = vmatprep.mubr.f32.mxu0 %v4898_v32  ;;  %5199 = vmatprep.mubr.f32.mxu1 %v4927_v42  ;;  %v4929_v12 = vsel %vm1348_vm4, %v13627_v62, %v8682_v22  ;;  %v4901_v46 = vsel %vm1348_vm4, %v17198_v59, %v8697_v4  ;;  %v8692_v44 = vunpack.i.h.bf16 %v14450_v14  ;;  %v4961_v45 = vsel %vm1348_vm4, %v17200_v7, %v14444_v43  ;;  %v17201_v43 = vld [vmem:[#allocation17_spill] sm:$0xff]  ;;  %v17205_v22 = vld [vmem:[#allocation128_spill] sm:$0xff] }
 0x468   : > { %7664 = vmatprep.subr.bf16.mxu0 %v7663_v36  ;;  %7692 = vmatpush1.bf16.msra.mxu1 %v13685_v39  ;;  %v5062_v39 = vld [vmem:[%s15541_s4 + $0x238] sm:$0xff]  ;;  %v4900_v3 = vsel %vm1348_vm4, %v13397_v41, %v8696_v34  ;;  %v8707_v10 = vunpack.i.h.bf16 %v14454_v30  ;;  %v8716_v30 = vunpack.i.l.bf16 %v14428_v9  ;;  %v8772_v4 = vunpack.i.h.bf16 %v14446_v6 }
 0x469   : > { %5420 = vmatmul.mubr.f32.gmra.mrb[98].mxu0 %v4958_v37  ;;  %7677 = vmatprep.subr.bf16.mxu1 %v17033_v55  ;;  %v7671_v61 = vpack.c.bf16 %v5062_v39, %v5061_v5  ;;  %v4931_v42 = vsel %vm1348_vm4, %v13885_v15, %v8692_v44  ;;  %v17204_v5 = vld [vmem:[#allocation146_spill] sm:$0xff]  ;;  %v8717_v39 = vunpack.i.h.bf16 %v14428_v9  ;;  %v8721_v59 = vunpack.i.l.bf16 %v14430_v20 }
 0x46a   : > { %5200 = vmatmul.mubr.f32.gmra.mrb[100].mxu1 %v4895_v63  ;;  %5424 = vmatprep.mubr.f32.mxu0 %v4899_v58  ;;  %v8765_v41 = vpop.permute.xlu0 %8764  ;;  %v8771_v63 = vunpack.i.l.bf16 %v14446_v6 }
 0x46b   : > { %5204 = vmatprep.mubr.f32.mxu1 %v4928_v38  ;;  %7666 = vmatpush3.bf16.msra.mxu0 %v7663_v36  ;;  %v8691_v36 = vunpack.i.l.bf16 %v14450_v14  ;;  %v8766_v0 = vunpack.i.l.bf16 %v8765_v41  ;;  %v4902_v14 = vsel %vm1348_vm4, %v13441_v60, %v8706_v33  ;;  %v8767_v37 = vunpack.i.h.bf16 %v8765_v41  ;;  %v17202_v60 = vld [vmem:[#allocation114_spill] sm:$0xff] }
 0x46c   : > { %7693 = vmatpush1.bf16.msra.mxu1 %v13703_v31  ;;  %7668 = vmatprep.subr.bf16.mxu0 %v7667_v21  ;;  %v17196_v31 = vld [vmem:[#allocation125_spill] sm:$0xff]  ;;  %v4904_v38 = vsel %vm1348_vm4, %v17205_v22, %v8716_v30  ;;  %v8727_v33 = vunpack.i.h.bf16 %v14472_v28  ;;  %v17216_v30 = vld [vmem:[#allocation87_spill] sm:$0xff] }
 0x46d   : > { %5425 = vmatmul.mubr.f32.gmra.mrb[100].mxu0 %v4959_v54  ;;  %7678 = vmatprep.subr.bf16.mxu1 %v17033_v55  ;;  %v4960_v29 = vsel %vm1348_vm4, %v17196_v31, %v14466_v40  ;;  %v4930_v40 = vsel %vm1348_vm4, %v17199_v8, %v8691_v36  ;;  %v17208_v36 = vld [vmem:[#allocation135_spill] sm:$0xff]  ;;  %v17209_v31 = vld [vmem:[#allocation136_spill] sm:$0xff] }
 0x46e   : > { %5205 = vmatmul.mubr.f32.gmra.mrb[102].mxu1 %v4896_v35  ;;  %5429 = vmatprep.mubr.f32.mxu0 %v4900_v3  ;;  %v8726_v35 = vunpack.i.l.bf16 %v14472_v28 }
 0x46f   : > { %5209 = vmatprep.mubr.f32.mxu1 %v4929_v12  ;;  %7670 = vmatpush3.bf16.msra.mxu0 %v7667_v21  ;;  %v4903_v21 = vsel %vm1348_vm4, %v17202_v60, %v8707_v10  ;;  %v4905_v12 = vsel %vm1348_vm4, %v17208_v36, %v8717_v39  ;;  %v17214_v10 = vld [vmem:[#allocation7_spill] sm:$0xff]  ;;  %v17220_v39 = vld [vmem:[#allocation177_spill] sm:$0xff] }
 0x470   : > { %7694 = vmatpush1.bf16.msra.mxu1 %v17197_v25  ;;  %7672 = vmatprep.subr.bf16.mxu0 %v7671_v61  ;;  %v17210_v25 = vld [vmem:[#allocation95_spill] sm:$0xff] }
 0x471   : > { %5430 = vmatmul.mubr.f32.gmra.mrb[102].mxu0 %v4960_v29  ;;  %7679 = vmatprep.subr.bf16.mxu1 %v17033_v55 }
 0x472   : > { %5210 = vmatmul.mubr.f32.gmra.mrb[104].mxu1 %v14407_v18  ;;  %5434 = vmatprep.mubr.f32.mxu0 %v4901_v46  ;;  %v8701_v18 = vunpack.i.l.bf16 %v14426_v56 }
 0x473   : > { %5214 = vmatprep.mubr.f32.mxu1 %v4930_v40  ;;  %7674 = vmatpush3.bf16.msra.mxu0 %v7671_v61  ;;  %v8775_v61 = vpop.permute.xlu0 %8774 }
 0x474   : > { %7695 = vmatpush1.bf16.msra.mxu1 %v13774_v51  ;;  %v4962_v51 = vsel %vm1348_vm4, %v17201_v43, %v8766_v0  ;;  %v4932_v34 = vsel %vm1348_vm4, %v17203_v13, %v8701_v18  ;;  %v8776_v29 = vunpack.i.l.bf16 %v8775_v61  ;;  %v8777_v40 = vunpack.i.h.bf16 %v8775_v61 }
 0x475   : > { %5435 = vmatmul.mubr.f32.gmra.mrb[104].mxu0 %v4961_v45  ;;  %7680 = vmatprep.subr.bf16.mxu1 %v17033_v55  ;;  %v8736_v0 = vunpack.i.l.bf16 %v14434_v47  ;;  %v8722_v45 = vunpack.i.h.bf16 %v14430_v20  ;;  %v8737_v43 = vunpack.i.h.bf16 %v14434_v47  ;;  %v17218_v47 = vld [vmem:[#allocation24_spill] sm:$0xff]  ;;  %v8747_v61 = vunpack.i.h.bf16 %v14508_v17 }
 0x476   : > { %5215 = vmatmul.mubr.f32.gmra.mrb[106].mxu1 %v4898_v32  ;;  %5439 = vmatprep.mubr.f32.mxu0 %v4902_v14  ;;  %v8702_v32 = vunpack.i.h.bf16 %v14426_v56  ;;  %v8711_v56 = vunpack.i.l.bf16 %v14458_v53 }
 0x477   : > { %5219 = vmatprep.mubr.f32.mxu1 %v4931_v42  ;;  %v14618_v41 = vpop.permute.xlu0 %8779  ;;  %v17215_v42 = vld [vmem:[#allocation131_spill] sm:$0xff]  ;;  %v4908_v20 = vsel %vm1348_vm4, %v13581_v1, %v8736_v0  ;;  %v4937_v60 = vsel %vm1348_vm4, %v17216_v30, %v8722_v45 }
 0x478   : > { %7696 = vmatpush1.bf16.msra.mxu1 %v13833_v52  ;;  %v4963_v52 = vsel %vm1348_vm4, %v17204_v5, %v8767_v37  ;;  %v4934_v6 = vsel %vm1348_vm4, %v17209_v31, %v8711_v56  ;;  %v4967_v37 = vsel %vm1348_vm4, %v17215_v42, %v8777_v40  ;;  %v17231_v40 = vld [vmem:[#allocation225_spill] sm:$0xff]  ;;  %v17235_v42 = vld [vmem:[#allocation154_spill] sm:$0xff] }
 0x479   : > { %5440 = vmatmul.mubr.f32.gmra.mrb[106].mxu0 %v4962_v51  ;;  %7681 = vmatprep.subr.bf16.mxu1 %v17033_v55  ;;  %v8731_v51 = vunpack.i.l.bf16 %v14487_v16 }
 0x47a   : > { %5220 = vmatmul.mubr.f32.gmra.mrb[108].mxu1 %v4899_v58  ;;  %5444 = vmatprep.mubr.f32.mxu0 %v4903_v21  ;;  %v17206_v58 = vld [vmem:[#allocation164_spill] sm:$0xff] }
 0x47b   : > { %5224 = vmatprep.mubr.f32.mxu1 %v4932_v34  ;;  %v4933_v54 = vsel %vm1348_vm4, %v17206_v58, %v8702_v32  ;;  %v14636_v18 = vpop.permute.xlu0 %8784  ;;  %v17217_v32 = vld [vmem:[#allocation180_spill] sm:$0xff]  ;;  %v8746_v34 = vunpack.i.l.bf16 %v14508_v17  ;;  %v17228_v17 = vld [vmem:[#allocation221_spill] sm:$0xff] }
 0x47c   : > { %7697 = vmatpush1.bf16.msra.mxu1 %v13868_v24  ;;  %v17207_v24 = vld [vmem:[#allocation147_spill] sm:$0xff]  ;;  %v8757_v45 = vunpack.i.h.bf16 %v17228_v17 }
 0x47d   : > { %5445 = vmatmul.mubr.f32.gmra.mrb[108].mxu0 %v4963_v52  ;;  %7682 = vmatprep.subr.bf16.mxu1 %v17033_v55  ;;  %v4964_v9 = vsel %vm1348_vm4, %v17207_v24, %v8771_v63  ;;  %v17219_v63 = vld [vmem:[#allocation132_spill] sm:$0xff]  ;;  %v8732_v52 = vunpack.i.h.bf16 %v14487_v16 }
 0x47e   : > { %5225 = vmatmul.mubr.f32.gmra.mrb[110].mxu1 %v4900_v3  ;;  %5449 = vmatprep.mubr.f32.mxu0 %v4904_v38  ;;  %v8712_v3 = vunpack.i.h.bf16 %v14458_v53  ;;  %v4906_v53 = vsel %vm1348_vm4, %v13527_v57, %v8726_v35  ;;  %v17213_v57 = vld [vmem:[#allocation159_spill] sm:$0xff]  ;;  %v4909_v5 = vsel %vm1348_vm4, %v17219_v63, %v8737_v43  ;;  %v17224_v16 = vld [vmem:[#allocation220_spill] sm:$0xff]  ;;  %v17225_v35 = vld [vmem:[#allocation13_spill] sm:$0xff]  ;;  %v8812_v43 = vunpack.i.h.bf16 %v17231_v40 }
 0x47f   : > { %5229 = vmatprep.mubr.f32.mxu1 %v4933_v54  ;;  %v4907_v7 = vsel %vm1348_vm4, %v17213_v57, %v8727_v33  ;;  %v8805_v1 = vpop.permute.xlu0 %8804  ;;  %v17222_v54 = vld [vmem:[#allocation176_spill] sm:$0xff]  ;;  %v4939_v36 = vsel %vm1348_vm4, %v17225_v35, %v8732_v52  ;;  %v17241_v63 = vld [vmem:[#allocation222_spill] sm:$0xff] }
 0x480   : > { %7698 = vmatpush1.bf16.msra.mxu1 %v13925_v27  ;;  %v4965_v27 = vsel %vm1348_vm4, %v17210_v25, %v8772_v4  ;;  %v8806_v22 = vunpack.i.l.bf16 %v8805_v1  ;;  %v17223_v4 = vld [vmem:[#allocation156_spill] sm:$0xff]  ;;  %v8756_v25 = vunpack.i.l.bf16 %v17228_v17  ;;  %v8761_v52 = vunpack.i.l.bf16 %v17241_v63 }
 0x481   : > { %5450 = vmatmul.mubr.f32.gmra.mrb[110].mxu0 %v4964_v9  ;;  %7683 = vmatprep.subr.bf16.mxu1 %v17033_v55  ;;  %v4910_v24 = vsel %vm1348_vm4, %v17223_v4, %v8746_v34  ;;  %v8741_v9 = vunpack.i.l.bf16 %v17224_v16  ;;  %v17233_v57 = vld [vmem:[#allocation172_spill] sm:$0xff]  ;;  %v17240_v34 = vld [vmem:[#allocation85_spill] sm:$0xff]  ;;  %v8787_v4 = vunpack.i.h.bf16 %v14636_v18 }
 0x482   : > { %5230 = vmatmul.mubr.f32.gmra.mrb[112].mxu1 %v4901_v46  ;;  %5454 = vmatprep.mubr.f32.mxu0 %v4905_v12  ;;  %v17211_v46 = vld [vmem:[#allocation25_spill] sm:$0xff] }
 0x483   : > { %5234 = vmatprep.mubr.f32.mxu1 %v4934_v6  ;;  %v4935_v44 = vsel %vm1348_vm4, %v17211_v46, %v8712_v3  ;;  %v17226_v3 = vld [vmem:[#allocation83_spill] sm:$0xff] }
 0x484   : > { %7699 = vmatpush1.bf16.msra.mxu1 %v13962_v48  ;;  %v17212_v48 = vld [vmem:[#allocation6_spill] sm:$0xff]  ;;  %v4970_v6 = vsel %vm1348_vm4, %v17226_v3, %v8806_v22  ;;  %v17249_v3 = vld [vmem:[#allocation223_spill] sm:$0xff] }
 0x485   : > { %5455 = vmatmul.mubr.f32.gmra.mrb[112].mxu0 %v4965_v27  ;;  %7684 = vmatprep.subr.bf16.mxu1 %v17033_v55  ;;  %v4966_v28 = vsel %vm1348_vm4, %v17212_v48, %v8776_v29  ;;  %v17227_v29 = vld [vmem:[#allocation29_spill] sm:$0xff]  ;;  %v17229_v27 = vld [vmem:[#allocation138_spill] sm:$0xff]  ;;  %v8811_v48 = vunpack.i.l.bf16 %v17231_v40 }
 0x486   : > { %5235 = vmatmul.mubr.f32.gmra.mrb[114].mxu1 %v4902_v14  ;;  %5459 = vmatprep.mubr.f32.mxu0 %v4906_v53  ;;  %v4936_v14 = vsel %vm1348_vm4, %v17214_v10, %v8721_v59  ;;  %v4911_v33 = vsel %vm1348_vm4, %v17229_v27, %v8747_v61  ;;  %v17230_v59 = vld [vmem:[#allocation113_spill] sm:$0xff]  ;;  %v8792_v27 = vunpack.i.h.bf16 %v17249_v3 }
 0x487   : > { %5239 = vmatprep.mubr.f32.mxu1 %v4935_v44  ;;  %v4940_v44 = vsel %vm1348_vm4, %v17230_v59, %v8741_v9  ;;  %v17246_v9 = vld [vmem:[#allocation34_spill] sm:$0xff] }
 0x488   : > { %7700 = vmatpush1.bf16.msra.mxu1 %v14022_v19  ;;  %v8801_v19 = vunpack.i.l.bf16 %v14456_v50 }
 0x489   : > { %5460 = vmatmul.mubr.f32.gmra.mrb[114].mxu0 %v4966_v28  ;;  %7685 = vmatprep.subr.bf16.mxu1 %v17033_v55  ;;  %v17232_v28 = vld [vmem:[#allocation19_spill] sm:$0xff] }
 0x48a   : > { %5240 = vmatmul.mubr.f32.gmra.mrb[116].mxu1 %v4903_v21  ;;  %5464 = vmatprep.mubr.f32.mxu0 %v4907_v7  ;;  %v8802_v21 = vunpack.i.h.bf16 %v14456_v50  ;;  %v4938_v50 = vsel %vm1348_vm4, %v17220_v39, %v8731_v51  ;;  %v17236_v51 = vld [vmem:[#allocation207_spill] sm:$0xff] }
 0x48b   : > { %5244 = vmatprep.mubr.f32.mxu1 %v4936_v14  ;;  %v17234_v14 = vld [vmem:[#allocation169_spill] sm:$0xff] }
 0x48c   : > { %7701 = vmatpush1.bf16.msra.mxu1 %v14059_v26  ;;  %v4968_v26 = vsel %vm1348_vm4, %v17217_v32, %v8801_v19  ;;  %v4912_v19 = vsel %vm1348_vm4, %v17234_v14, %v8756_v25  ;;  %v17238_v32 = vld [vmem:[#allocation81_spill] sm:$0xff] }
 0x48d   : > { %5465 = vmatmul.mubr.f32.gmra.mrb[116].mxu0 %v4967_v37  ;;  %7686 = vmatprep.subr.bf16.mxu1 %v17033_v55 }
 0x48e   : > { %5245 = vmatmul.mubr.f32.gmra.mrb[118].mxu1 %v4904_v38  ;;  %5469 = vmatprep.mubr.f32.mxu0 %v4908_v20  ;;  %v17221_v38 = vld [vmem:[#allocation79_spill] sm:$0xff] }
 0x48f   : > { %5249 = vmatprep.mubr.f32.mxu1 %v4937_v60  ;;  %v4969_v56 = vsel %vm1348_vm4, %v17221_v38, %v8802_v21  ;;  %v4972_v60 = vsel %vm1348_vm4, %v17236_v51, %v8811_v48  ;;  %v17237_v21 = vld [vmem:[#allocation161_spill] sm:$0xff]  ;;  %v17243_v38 = vld [vmem:[#allocation166_spill] sm:$0xff] }
 0x490   : > { %7702 = vmatpush1.bf16.msra.mxu1 %v17218_v47  ;;  %v17258_v51 = vld [vmem:[#allocation170_spill] sm:$0xff] }
 0x491   : > { %5470 = vmatmul.mubr.f32.gmra.mrb[118].mxu0 %v4968_v26  ;;  %7687 = vmatprep.subr.bf16.mxu1 %v17033_v55  ;;  %v4913_v26 = vsel %vm1348_vm4, %v17238_v32, %v8757_v45 }
 0x492   : > { %5250 = vmatmul.mubr.f32.gmra.mrb[120].mxu1 %v4905_v12  ;;  %5474 = vmatprep.mubr.f32.mxu0 %v4909_v5  ;;  %v8807_v12 = vunpack.i.h.bf16 %v8805_v1  ;;  %v4973_v1 = vsel %vm1348_vm4, %v17240_v34, %v8812_v43 }
 0x493   : > { %5254 = vmatprep.mubr.f32.mxu1 %v4938_v50  ;;  %v17242_v50 = vld [vmem:[#allocation178_spill] sm:$0xff] }
 0x494   : > { %7703 = vmatpush1.bf16.msra.mxu1 %v17222_v54  ;;  %v4971_v0 = vsel %vm1348_vm4, %v17232_v28, %v8807_v12  ;;  %v8786_v54 = vunpack.i.l.bf16 %v14636_v18 }
 0x495   : > { %5475 = vmatmul.mubr.f32.gmra.mrb[120].mxu0 %v4969_v56  ;;  %7688 = vmatprep.subr.bf16.mxu1 %v17033_v55  ;;  %v4944_v56 = vsel %vm1348_vm4, %v17243_v38, %v8761_v52  ;;  %v17262_v52 = vld [vmem:[#allocation117_spill] sm:$0xff] }
 0x496   : > { %5255 = vmatmul.mubr.f32.gmra.mrb[122].mxu1 %v4906_v53  ;;  %5479 = vmatprep.mubr.f32.mxu0 %v4910_v24  ;;  %v8742_v53 = vunpack.i.h.bf16 %v17224_v16 }
 0x497   : > { %5259 = vmatprep.mubr.f32.mxu1 %v4939_v36 }
 0x498   : > { %7704 = vmatpush1.bf16.msra.mxu1 %v17227_v29  ;;  %v4941_v37 = vsel %vm1348_vm4, %v17235_v42, %v8742_v53 }
 0x499   : > { %5480 = vmatmul.mubr.f32.gmra.mrb[122].mxu0 %v4970_v6  ;;  %7689 = vmatprep.subr.bf16.mxu1 %v17033_v55 }
 0x49a   : > { %5260 = vmatmul.mubr.f32.gmra.mrb[124].mxu1 %v4907_v7  ;;  %5484 = vmatprep.mubr.f32.mxu0 %v4911_v33  ;;  %v8751_v7 = vunpack.i.l.bf16 %v14544_v49 }
 0x49b   : > { %5264 = vmatprep.mubr.f32.mxu1 %v4940_v44 }
 0x49c   : > { %7705 = vmatpush1.bf16.msra.mxu1 %v17233_v57  ;;  %v17255_v57 = vld [vmem:[#allocation60_spill] sm:$0xff] }
 0x49d   : > { %5485 = vmatmul.mubr.f32.gmra.mrb[124].mxu0 %v4971_v0  ;;  %7690 = vmatprep.subr.bf16.mxu1 %v17033_v55  ;;  %v8752_v55 = vunpack.i.h.bf16 %v14544_v49  ;;  %v14707_v49 = vpop.permute.xlu0 %8814 }
 0x49e   : > { %5265 = vmatmul.mubr.f32.gmra.mrb[126].mxu1 %v4908_v20  ;;  %5489 = vmatprep.mubr.f32.mxu0 %v4912_v19  ;;  %v17239_v20 = vld [vmem:[#allocation45_spill] sm:$0xff] }
 0x49f   : > { %5269 = vmatprep.mubr.f32.mxu1 %v4941_v37  ;;  %v4942_v47 = vsel %vm1348_vm4, %v17239_v20, %v8751_v7  ;;  %v4943_v22 = vsel %vm1348_vm4, %v17242_v50, %v8752_v55  ;;  %v17256_v7 = vld [vmem:[#allocation68_spill] sm:$0xff]  ;;  %v17257_v37 = vld [vmem:[#allocation227_spill] sm:$0xff] }
 0x4a0   : > { %7706 = vmatpush1.bf16.msra.mxu1 %v17237_v21  ;;  %v8836_v43 = vunpack.i.l.bf16 %v17257_v37  ;;  %v17259_v21 = vld [vmem:[#allocation226_spill] sm:$0xff] }
 0x4a1   : > { %5490 = vmatmul.mubr.f32.gmra.mrb[126].mxu0 %v4972_v60  ;;  %v8831_v32 = vunpack.i.l.bf16 %v17259_v21 }
 0x4a2   : > { %5270 = vmatmul.mubr.f32.gmra.mrb[128].mxu1 %v4909_v5  ;;  %5494 = vmatprep.mubr.f32.mxu0 %v4913_v26  ;;  %v8762_v5 = vunpack.i.h.bf16 %v17241_v63  ;;  %v8832_v63 = vunpack.i.h.bf16 %v17259_v21  ;;  %v17283_v21 = vld [vmem:[#allocation160_spill] sm:$0xff] }
 0x4a3   : > { %5274 = vmatprep.mubr.f32.mxu1 %v4942_v47  ;;  %v17261_v47 = vld [vmem:[#allocation91_spill] sm:$0xff] }
 0x4a4   : > { %v4952_v34 = vsel %vm1348_vm4, %v17261_v47, %v8836_v43 }
 0x4a5   : > { %5495 = vmatmul.mubr.f32.gmra.mrb[128].mxu0 %v4973_v1 }
 0x4a6   : > { %5275 = vmatmul.mubr.f32.gmra.mrb[130].mxu1 %v4910_v24  ;;  %7403 = vmatprep.mubr.msk.f32.mxu0 %vm1348_vm4, %v13627_v62  ;;  %v8820_v62 = vpop.permute.xlu0 %8819 }
 0x4a7   : > { %5279 = vmatprep.mubr.f32.mxu1 %v4943_v22  ;;  %v8821_v48 = vunpack.i.l.bf16 %v8820_v62  ;;  %v8822_v14 = vunpack.i.h.bf16 %v8820_v62  ;;  %v17264_v62 = vld [vmem:[#allocation99_spill] sm:$0xff] }
 0x4a9   : > { %7404 = vmatmul.mubr.msk.f32.vlgmr.msra.gmra.mrb[130].mxu0 %vm1348_vm4, %v17199_v8  ;;  %v17244_v8 = vld [vmem:[#allocation173_spill] sm:$0xff] }
 0x4aa   : > { %5280 = vmatmul.mubr.f32.gmra.mrb[132].mxu1 %v4911_v33  ;;  %7406 = vmatprep.mubr.msk.f32.mxu0 %vm1348_vm4, %v13885_v15  ;;  %v4945_v61 = vsel %vm1348_vm4, %v17244_v8, %v8762_v5  ;;  %v8781_v15 = vunpack.i.l.bf16 %v14618_v41  ;;  %v8825_v16 = vpop.permute.xlu0 %8824  ;;  %v17263_v5 = vld [vmem:[#allocation37_spill] sm:$0xff] }
 0x4ab   : > { %5284 = vmatprep.mubr.f32.mxu1 %v4944_v56  ;;  %v8826_v53 = vunpack.i.l.bf16 %v8825_v16  ;;  %v8827_v0 = vunpack.i.h.bf16 %v8825_v16  ;;  %v17267_v16 = vld [vmem:[#allocation11_spill] sm:$0xff] }
 0x4ac   : > { %v14736_v36 = vsel %vm1348_vm4, %v17246_v9, %v8781_v15  ;;  %v17268_v9 = vld [vmem:[#allocation216_spill] sm:$0xff] }
 0x4ad   : > { %7407 = vmatmul.mubr.msk.f32.gmra.mrb[132].mxu0 %vm1348_vm4, %v17203_v13  ;;  %v17245_v13 = vld [vmem:[#allocation167_spill] sm:$0xff]  ;;  %v4950_v45 = vsel %vm1348_vm4, %v17255_v57, %v8826_v53  ;;  %v4951_v60 = vsel %vm1348_vm4, %v17258_v51, %v8827_v0  ;;  %v17277_v0 = vld [vmem:[#allocation157_spill] sm:$0xff] }
 0x4ae   : > { %5285 = vmatmul.mubr.f32.gmra.mrb[134].mxu1 %v4912_v19  ;;  %7409 = vmatprep.mubr.msk.f32.mxu0 %vm1348_vm4, %v17206_v58  ;;  %v4946_v24 = vsel %vm1348_vm4, %v17245_v13, %v8786_v54  ;;  %v8782_v58 = vunpack.i.h.bf16 %v14618_v41  ;;  %v8791_v41 = vunpack.i.l.bf16 %v17249_v3  ;;  %v14745_v6 = vpop.permute.xlu0 %8844  ;;  %v4921_v54 = vsel %vm1348_vm4, %v17264_v62, %v8832_v63  ;;  %v17274_v53 = vld [vmem:[#allocation219_spill] sm:$0xff] }
 0x4af   : > { %5289 = vmatprep.mubr.f32.mxu1 %v4945_v61  ;;  %v17265_v61 = vld [vmem:[#allocation217_spill] sm:$0xff] }
 0x4b1   : > { %7410 = vmatmul.mubr.msk.f32.gmra.mrb[134].mxu0 %vm1348_vm4, %v17209_v31  ;;  %v17247_v31 = vld [vmem:[#allocation224_spill] sm:$0xff] }
 0x4b2   : > { %5290 = vmatmul.mubr.f32.gmra.mrb[136].mxu1 %v4913_v26  ;;  %7412 = vmatprep.mubr.msk.f32.mxu0 %vm1348_vm4, %v17211_v46  ;;  %v8796_v18 = vunpack.i.l.bf16 %v17247_v31  ;;  %v17248_v46 = vld [vmem:[#allocation31_spill] sm:$0xff]  ;;  %v8797_v17 = vunpack.i.h.bf16 %v17247_v31  ;;  %v14771_v40 = vpop.permute.xlu0 %8854  ;;  %v17260_v26 = vld [vmem:[#allocation184_spill] sm:$0xff] }
 0x4b3   : > { %5294 = vmatprep.mubr.f32.mxu1 %v4946_v24  ;;  %v4947_v12 = vsel %vm1348_vm4, %v17248_v46, %v8787_v4  ;;  %v14801_v55 = vsel %vm1348_vm4, %v17260_v26, %v8822_v14  ;;  %v17279_v14 = vld [vmem:[#allocation174_spill] sm:$0xff] }
 0x4b4   : > { %v17284_v26 = vld [vmem:[#allocation30_spill] sm:$0xff] }
 0x4b5   : > { %7413 = vmatmul.mubr.msk.f32.gmra.mrb[136].mxu0 %vm1348_vm4, %v17214_v10  ;;  %v17250_v10 = vld [vmem:[#allocation116_spill] sm:$0xff] }
 0x4b6   : > { %5295 = vmatmul.mubr.f32.gmra.mrb[138].mxu1 %v14736_v36  ;;  %7415 = vmatprep.mubr.msk.f32.mxu0 %vm1348_vm4, %v17216_v30  ;;  %v14751_v29 = vsel %vm1348_vm4, %v17250_v10, %v8782_v58  ;;  %v17251_v30 = vld [vmem:[#allocation23_spill] sm:$0xff]  ;;  %v8860_v19 = vpop.permute.xlu0 %8859  ;;  %v8876_v58 = vunpack.i.l.bf16 %v17267_v16 }
 0x4b7   : > { %5299 = vmatprep.mubr.f32.mxu1 %v4947_v12  ;;  %v4948_v25 = vsel %vm1348_vm4, %v17251_v30, %v8796_v18  ;;  %v8861_v56 = vunpack.i.l.bf16 %v8860_v19  ;;  %v8862_v4 = vunpack.i.h.bf16 %v8860_v19  ;;  %v17269_v18 = vld [vmem:[#allocation230_spill] sm:$0xff] }
 0x4b8   : > { %v17270_v12 = vld [vmem:[#allocation206_spill] sm:$0xff] }
 0x4b9   : > { %7416 = vmatmul.mubr.msk.f32.gmra.mrb[138].mxu0 %vm1348_vm4, %v17220_v39  ;;  %v17252_v39 = vld [vmem:[#allocation153_spill] sm:$0xff]  ;;  %v4923_v3 = vsel %vm1348_vm4, %v17270_v12, %v8862_v4  ;;  %v17293_v12 = vld [vmem:[#allocation215_spill] sm:$0xff] }
 0x4ba   : > { %5300 = vmatmul.mubr.f32.gmra.mrb[140].mxu1 %v14751_v29  ;;  %7418 = vmatprep.mubr.msk.f32.mxu0 %vm1348_vm4, %v17225_v35  ;;  %v14764_v33 = vsel %vm1348_vm4, %v17252_v39, %v8791_v41  ;;  %v17253_v35 = vld [vmem:[#allocation162_spill] sm:$0xff]  ;;  %v8870_v1 = vpop.permute.xlu0 %8869  ;;  %v17271_v41 = vld [vmem:[#allocation213_spill] sm:$0xff]  ;;  %v8817_v39 = vunpack.i.h.bf16 %v14707_v49 }
 0x4bb   : > { %5304 = vmatprep.mubr.f32.mxu1 %v4948_v25  ;;  %v4949_v44 = vsel %vm1348_vm4, %v17253_v35, %v8797_v17  ;;  %v8871_v22 = vunpack.i.l.bf16 %v8870_v1  ;;  %v4956_v10 = vsel %vm1348_vm4, %v17271_v41, %v8876_v58  ;;  %v8816_v17 = vunpack.i.l.bf16 %v14707_v49  ;;  %v17291_v58 = vld [vmem:[#allocation212_spill] sm:$0xff] }
 0x4bd   : > { %7419 = vmatmul.mubr.msk.f32.gmra.mrb[140].mxu0 %vm1348_vm4, %v17230_v59  ;;  %v17254_v59 = vld [vmem:[#allocation155_spill] sm:$0xff]  ;;  %v4954_v15 = vsel %vm1348_vm4, %v17265_v61, %v8871_v22 }
 0x4be   : > { %5305 = vmatmul.mubr.f32.gmra.mrb[142].mxu1 %v14764_v33  ;;  %7421 = vmatprep.mubr.msk.f32.mxu0 %vm1348_vm4, %v17235_v42  ;;  %v14777_v28 = vsel %vm1348_vm4, %v17254_v59, %v8792_v27  ;;  %v14788_v42 = vsel %vm1348_vm4, %v17256_v7, %v8821_v48  ;;  %v17273_v27 = vld [vmem:[#allocation214_spill] sm:$0xff]  ;;  %v17276_v48 = vld [vmem:[#allocation228_spill] sm:$0xff]  ;;  %v17280_v7 = vld [vmem:[#allocation193_spill] sm:$0xff]  ;;  %v8885_v63 = vpop.permute.xlu0 %8884 }
 0x4bf   : > { %5309 = vmatprep.mubr.f32.mxu1 %v4949_v44  ;;  %v8841_v59 = vunpack.i.l.bf16 %v17276_v48  ;;  %v8842_v49 = vunpack.i.h.bf16 %v17276_v48  ;;  %v8887_v16 = vunpack.i.h.bf16 %v8885_v63 }
 0x4c1   : > { %7422 = vmatmul.mubr.msk.f32.gmra.mrb[142].mxu0 %vm1348_vm4, %v17239_v20  ;;  %v8837_v20 = vunpack.i.h.bf16 %v17257_v37  ;;  %v4977_v19 = vsel %vm1348_vm4, %v17279_v14, %v8842_v49  ;;  %v17281_v37 = vld [vmem:[#allocation229_spill] sm:$0xff] }
 0x4c2   : > { %5310 = vmatmul.mubr.f32.gmra.mrb[144].mxu1 %v14777_v28  ;;  %7424 = vmatprep.mubr.msk.f32.mxu0 %vm1348_vm4, %v17242_v50  ;;  %v4920_v50 = vsel %vm1348_vm4, %v17262_v52, %v8831_v32  ;;  %v8851_v43 = vunpack.i.l.bf16 %v17281_v37  ;;  %v8880_v32 = vpop.permute.xlu1 %8879 }
 0x4c3   : > { %5314 = vmatprep.mubr.f32.mxu1 %v4950_v45  ;;  %v8881_v52 = vunpack.i.l.bf16 %v8880_v32 }
 0x4c5   : > { %7425 = vmatmul.mubr.msk.f32.gmra.mrb[144].mxu0 %vm1348_vm4, %v17243_v38  ;;  %v4953_v38 = vsel %vm1348_vm4, %v17263_v5, %v8837_v20  ;;  %v8857_v20 = vunpack.i.h.bf16 %v14771_v40 }
 0x4c6   : > { %5315 = vmatmul.mubr.f32.gmra.mrb[146].mxu1 %v14788_v42  ;;  %7427 = vmatprep.mubr.msk.f32.mxu0 %vm1348_vm4, %v17244_v8  ;;  %v8872_v8 = vunpack.i.h.bf16 %v8870_v1  ;;  %v8890_v1 = vpop.permute.xlu1 %8889 }
 0x4c7   : > { %5319 = vmatprep.mubr.f32.mxu1 %v4951_v60  ;;  %v8852_v60 = vunpack.i.h.bf16 %v17281_v37 }
 0x4c8   : > { %v4955_v31 = vsel %vm1348_vm4, %v17268_v9, %v8872_v8  ;;  %v4891_v8 = vpop.permute.xlu0 %4890 }
 0x4c9   : > { %7428 = vmatmul.mubr.msk.f32.gmra.mrb[146].mxu0 %vm1348_vm4, %v17245_v13  ;;  %v17266_v13 = vld [vmem:[#allocation120_spill] sm:$0xff] }
 0x4ca   : > { %5320 = vmatmul.mubr.f32.gmra.mrb[148].mxu1 %v14801_v55  ;;  %7430 = vmatprep.mubr.msk.f32.mxu0 %vm1348_vm4, %v17248_v46  ;;  %v4922_v24 = vsel %vm1348_vm4, %v17266_v13, %v8861_v56  ;;  %v8866_v46 = vunpack.i.l.bf16 %v17269_v18  ;;  %v17287_v56 = vld [vmem:[#allocation32_spill] sm:$0xff]  ;;  %v17290_v13 = vld [vmem:[#allocation5_spill] sm:$0xff]  ;;  %v17292_v18 = vld [vmem:[#allocation218_spill] sm:$0xff] }
 0x4cb   : > { %5324 = vmatprep.mubr.f32.mxu1 %v4952_v34  ;;  %v4984_v62 = vsel %vm1348_vm4, %v17287_v56, %v8881_v52 }
 0x4cd   : > { %7431 = vmatmul.mubr.msk.f32.gmra.mrb[148].mxu0 %vm1348_vm4, %v17251_v30  ;;  %v17272_v30 = vld [vmem:[#allocation139_spill] sm:$0xff] }
 0x4ce   : > { %5325 = vmatmul.mubr.f32.gmra.mrb[150].mxu1 %v4920_v50  ;;  %7433 = vmatprep.mubr.msk.f32.mxu0 %vm1348_vm4, %v17253_v35  ;;  %v4924_v25 = vsel %vm1348_vm4, %v17272_v30, %v8866_v46  ;;  %v17275_v35 = vld [vmem:[#allocation9_spill] sm:$0xff]  ;;  %v4987_v46 = vsel %vm1348_vm4, %v17292_v18, %v8887_v16 }
 0x4cf   : > { %5329 = vmatprep.mubr.f32.mxu1 %v4953_v38  ;;  %v4974_v44 = vsel %vm1348_vm4, %v17275_v35, %v8816_v17  ;;  %v8882_v38 = vunpack.i.h.bf16 %v8880_v32 }
 0x4d1   : > { %7434 = vmatmul.mubr.msk.f32.gmra.mrb[150].mxu0 %vm1348_vm4, %v17255_v57  ;;  %v4975_v57 = vsel %vm1348_vm4, %v17277_v0, %v8817_v39 }
 0x4d2   : > { %5330 = vmatmul.mubr.f32.gmra.mrb[152].mxu1 %v4921_v54  ;;  %7436 = vmatprep.mubr.msk.f32.mxu0 %vm1348_vm4, %v17258_v51  ;;  %v17282_v51 = vld [vmem:[#allocation144_spill] sm:$0xff] }
 0x4d3   : > { %5334 = vmatprep.mubr.f32.mxu1 %v4954_v15  ;;  %v17289_v15 = vld [vmem:[#allocation102_spill] sm:$0xff] }
 0x4d4   : > { %v4985_v4 = vsel %vm1348_vm4, %v17289_v15, %v8882_v38 }
 0x4d5   : > { %7437 = vmatmul.mubr.msk.f32.gmra.mrb[152].mxu0 %vm1348_vm4, %v17261_v47  ;;  %v17285_v47 = vld [vmem:[#allocation96_spill] sm:$0xff] }
 0x4d6   : > { %5335 = vmatmul.mubr.f32.gmra.mrb[154].mxu1 %v4922_v24  ;;  %7439 = vmatprep.mubr.msk.f32.mxu0 %vm1348_vm4, %v17263_v5  ;;  %v8892_v5 = vunpack.i.h.bf16 %v8890_v1 }
 0x4d7   : > { %5339 = vmatprep.mubr.f32.mxu1 %v4955_v31  ;;  %v8891_v31 = vunpack.i.l.bf16 %v8890_v1 }
 0x4d9   : > { %7440 = vmatmul.mubr.msk.f32.gmra.mrb[154].mxu0 %vm1348_vm4, %v17265_v61  ;;  %v8886_v61 = vunpack.i.l.bf16 %v8885_v63 }
 0x4da   : > { %5340 = vmatmul.mubr.f32.gmra.mrb[156].mxu1 %v4923_v3  ;;  %7442 = vmatprep.mubr.msk.f32.mxu0 %vm1348_vm4, %v17268_v9 }
 0x4db   : > { %5344 = vmatprep.mubr.f32.mxu1 %v4956_v10  ;;  %v4986_v9 = vsel %vm1348_vm4, %v17291_v58, %v8886_v61 }
 0x4dd   : > { %7443 = vmatmul.mubr.msk.f32.gmra.mrb[156].mxu0 %vm1348_vm4, %v17271_v41 }
 0x4de   : > { %5345 = vmatmul.mubr.f32.gmra.mrb[158].mxu1 %v4924_v25  ;;  %7445 = vmatprep.mubr.msk.f32.mxu0 %vm1348_vm4, %v17273_v27 }
 0x4df   : > { %5499 = vmatprep.mubr.f32.mxu1 %v14736_v36  ;;  %v17278_v36 = vld [vmem:[#allocation100_spill] sm:$0xff] }
 0x4e0   : > { %v4976_v45 = vsel %vm1348_vm4, %v17278_v36, %v8841_v59 }
 0x4e1   : > { %7446 = vmatmul.mubr.msk.f32.gmra.mrb[158].mxu0 %vm1348_vm4, %v17274_v53 }
 0x4e2   : > { %5500 = vmatmul.mubr.f32.vlgmr.msra.gmra.mrb[130].mxu1 %v4974_v44  ;;  %7448 = vmatprep.mubr.msk.f32.mxu0 %vm1348_vm4, %v17194_v23 }
 0x4e3   : > { %5504 = vmatprep.mubr.f32.mxu1 %v14751_v29  ;;  %v8846_v29 = vunpack.i.l.bf16 %v14745_v6 }
 0x4e5   : > { %7449 = vmatmul.mubr.msk.f32.gmra.mrb[160].mxu0 %vm1348_vm4, %v17194_v23  ;;  %v8847_v23 = vunpack.i.h.bf16 %v14745_v6  ;;  %v8856_v6 = vunpack.i.l.bf16 %v14771_v40  ;;  %v17288_v40 = vld [vmem:[#allocation44_spill] sm:$0xff] }
 0x4e6   : > { %5505 = vmatmul.mubr.f32.gmra.mrb[132].mxu1 %v4975_v57 }
 0x4e7   : > { %5509 = vmatprep.mubr.f32.mxu1 %v14764_v33  ;;  %v4978_v33 = vsel %vm1348_vm4, %v17280_v7, %v8846_v29  ;;  %v4982_v34 = vsel %vm1348_vm4, %v17285_v47, %v8856_v6 }
 0x4ea   : > { %5510 = vmatmul.mubr.f32.gmra.mrb[134].mxu1 %v4976_v45 }
 0x4eb   : > { %5514 = vmatprep.mubr.f32.mxu1 %v14777_v28  ;;  %v4979_v28 = vsel %vm1348_vm4, %v17282_v51, %v8847_v23 }
 0x4ee   : > { %5515 = vmatmul.mubr.f32.gmra.mrb[136].mxu1 %v4977_v19 }
 0x4ef   : > { %5519 = vmatprep.mubr.f32.mxu1 %v14788_v42  ;;  %v4980_v42 = vsel %vm1348_vm4, %v17283_v21, %v8851_v43 }
 0x4f2   : > { %5520 = vmatmul.mubr.f32.gmra.mrb[138].mxu1 %v4978_v33 }
 0x4f3   : > { %5524 = vmatprep.mubr.f32.mxu1 %v14801_v55  ;;  %v4981_v55 = vsel %vm1348_vm4, %v17284_v26, %v8852_v60 }
 0x4f6   : > { %5525 = vmatmul.mubr.f32.gmra.mrb[140].mxu1 %v4979_v28 }
 0x4f7   : > { %5529 = vmatprep.mubr.f32.mxu1 %v4920_v50  ;;  %v17286_v50 = vld [vmem:[#allocation8_spill] sm:$0xff] }
 0x4f8   : > { %v4983_v22 = vsel %vm1348_vm4, %v17286_v50, %v8857_v20 }
 0x4fa   : > { %5530 = vmatmul.mubr.f32.gmra.mrb[142].mxu1 %v4980_v42 }
 0x4fb   : > { %5534 = vmatprep.mubr.f32.mxu1 %v4921_v54  ;;  %v4989_v54 = vsel %vm1348_vm4, %v17288_v40, %v8892_v5 }
 0x4fe   : > { %5535 = vmatmul.mubr.f32.gmra.mrb[144].mxu1 %v4981_v55 }
 0x4ff   : > { %5539 = vmatprep.mubr.f32.mxu1 %v4922_v24  ;;  %v4990_v24 = vsel %vm1348_vm4, %v17290_v13, %v4891_v8 }
 0x502   : > { %5540 = vmatmul.mubr.f32.gmra.mrb[146].mxu1 %v4982_v34 }
 0x503   : > { %5544 = vmatprep.mubr.f32.mxu1 %v4923_v3  ;;  %v4988_v3 = vsel %vm1348_vm4, %v17293_v12, %v8891_v31 }
 0x506   : > { %5545 = vmatmul.mubr.f32.gmra.mrb[148].mxu1 %v4983_v22 }
 0x507   : > { %5549 = vmatprep.mubr.f32.mxu1 %v4924_v25 }
 0x50a   : > { %5550 = vmatmul.mubr.f32.gmra.mrb[150].mxu1 %v4984_v62 }
 0x50b   : > { %5554 = vmatprep.mubr.f32.mxu1 %v4989_v54 }
 0x50e   : > { %5555 = vmatmul.mubr.f32.gmra.mrb[152].mxu1 %v4985_v4 }
 0x50f   : > { %5559 = vmatprep.mubr.f32.mxu1 %v4990_v24 }
 0x512   : > { %5560 = vmatmul.mubr.f32.gmra.mrb[154].mxu1 %v4986_v9 }
 0x513   : > { %7120 = vmatprep.mubr.msk.f32.mxu1 %vm14478_vm6, %v14483_v2 }
 0x516   : > { %5565 = vmatmul.mubr.f32.gmra.mrb[156].mxu1 %v4987_v46 }
 0x517   : > { %7122 = vmatprep.mubr.msk.f32.mxu1 %vm14478_vm6, %v14483_v2 }
 0x51a   : > { %5570 = vmatmul.mubr.f32.gmra.mrb[158].mxu1 %v4988_v3 }
 0x535   : > { %v5191_v41 = vpop.f32.mrb[96].mxu1 }
 0x536   : > { %v5193_v10 = vpop.f32.mrb[97].mxu1 }
 0x538   : > { %v5416_v17 = vpop.f32.mrb[96].mxu0 }
 0x539   : > { %v14912_v30 = vadd.f32 %v5416_v17, %v5191_v41  ;;  %v5196_v25 = vpop.f32.mrb[98].mxu1  ;;  %v5418_v27 = vpop.f32.mrb[97].mxu0 }
 0x53a   : > { %v5198_v39 = vpop.f32.mrb[99].mxu1 }
 0x53c   : > { %v5421_v53 = vpop.f32.mrb[98].mxu0 }
 0x53d   : > { %v14914_v35 = vadd.f32 %v5421_v53, %v5196_v25  ;;  %v5201_v44 = vpop.f32.mrb[100].mxu1  ;;  %v5423_v48 = vpop.f32.mrb[99].mxu0 }
 0x53e   : > { %v5203_v59 = vpop.f32.mrb[101].mxu1 }
 0x540   : > { %v5426_v11 = vpop.f32.mrb[100].mxu0 }
 0x541   : > { %v14916_v2 = vadd.f32 %v5426_v11, %v5201_v44  ;;  %v5206_v0 = vpop.f32.mrb[102].mxu1  ;;  %v5428_v57 = vpop.f32.mrb[101].mxu0 }
 0x542   : > { %v5208_v49 = vpop.f32.mrb[103].mxu1 }
 0x544   : > { %v5431_v36 = vpop.f32.mrb[102].mxu0 }
 0x545   : > { %v14918_v45 = vadd.f32 %v5431_v36, %v5206_v0  ;;  %v5211_v29 = vpop.f32.mrb[104].mxu1  ;;  %v5433_v14 = vpop.f32.mrb[103].mxu0 }
 0x546   : > { %v5213_v19 = vpop.f32.mrb[105].mxu1 }
 0x548   : > { %v5436_v23 = vpop.f32.mrb[104].mxu0 }
 0x549   : > { %v14920_v7 = vadd.f32 %v5436_v23, %v5211_v29  ;;  %v5216_v33 = vpop.f32.mrb[106].mxu1  ;;  %v5438_v37 = vpop.f32.mrb[105].mxu0 }
 0x54a   : > { %v5218_v43 = vpop.f32.mrb[107].mxu1 }
 0x54c   : > { %v5441_v51 = vpop.f32.mrb[106].mxu0 }
 0x54d   : > { %v14922_v28 = vadd.f32 %v5441_v51, %v5216_v33  ;;  %v5221_v60 = vpop.f32.mrb[108].mxu1  ;;  %v5443_v21 = vpop.f32.mrb[107].mxu0 }
 0x54e   : > { %v5223_v42 = vpop.f32.mrb[109].mxu1 }
 0x550   : > { %v5446_v6 = vpop.f32.mrb[108].mxu0 }
 0x551   : > { %v14924_v32 = vadd.f32 %v5446_v6, %v5221_v60  ;;  %v5226_v26 = vpop.f32.mrb[110].mxu1  ;;  %v5448_v55 = vpop.f32.mrb[109].mxu0  ;;  %v9279_v6 = vmov 32  }
 0x552   : > { %v5228_v20 = vpop.f32.mrb[111].mxu1  ;;  %8893 = vset.pattern.permute.xlu0 %v9279_v6 }
 0x553   : > { %v9280_v20 = vmov 33  }
 0x554   : > { %v5451_v47 = vpop.f32.mrb[110].mxu0  ;;  %8894 = vset.pattern.permute.xlu1 %v9280_v20 }
 0x555   : > { %v14926_v34 = vadd.f32 %v5451_v47, %v5226_v26  ;;  %v5231_v1 = vpop.f32.mrb[112].mxu1  ;;  %v5453_v63 = vpop.f32.mrb[111].mxu0 }
 0x556   : > { %v5233_v52 = vpop.f32.mrb[113].mxu1 }
 0x558   : > { %v5456_v50 = vpop.f32.mrb[112].mxu0 }
 0x559   : > { %v14928_v22 = vadd.f32 %v5456_v50, %v5231_v1  ;;  %v5236_v5 = vpop.f32.mrb[114].mxu1  ;;  %v5458_v38 = vpop.f32.mrb[113].mxu0 }
 0x55a   : > { %v5238_v56 = vpop.f32.mrb[115].mxu1 }
 0x55c   : > { %v5461_v62 = vpop.f32.mrb[114].mxu0 }
 0x55d   : > { %v14930_v40 = vadd.f32 %v5461_v62, %v5236_v5  ;;  %v5241_v54 = vpop.f32.mrb[116].mxu1  ;;  %v5463_v8 = vpop.f32.mrb[115].mxu0 }
 0x55e   : > { %v5243_v61 = vpop.f32.mrb[117].mxu1 }
 0x560   : > { %v5466_v15 = vpop.f32.mrb[116].mxu0 }
 0x561   : > { %v14932_v4 = vadd.f32 %v5466_v15, %v5241_v54  ;;  %v5246_v13 = vpop.f32.mrb[118].mxu1  ;;  %v5468_v24 = vpop.f32.mrb[117].mxu0 }
 0x562   : > { %v5248_v16 = vpop.f32.mrb[119].mxu1 }
 0x564   : > { %v5471_v58 = vpop.f32.mrb[118].mxu0 }
 0x565   : > { %v14934_v9 = vadd.f32 %v5471_v58, %v5246_v13  ;;  %v5251_v31 = vpop.f32.mrb[120].mxu1  ;;  %v5473_v18 = vpop.f32.mrb[119].mxu0 }
 0x566   : > { %v5253_v46 = vpop.f32.mrb[121].mxu1 }
 0x568   : > { %v5476_v12 = vpop.f32.mrb[120].mxu0 }
 0x569   : > { %v14936_v3 = vadd.f32 %v5476_v12, %v5251_v31  ;;  %v5256_v41 = vpop.f32.mrb[122].mxu1  ;;  %v5478_v10 = vpop.f32.mrb[121].mxu0 }
 0x56a   : > { %v5258_v17 = vpop.f32.mrb[123].mxu1 }
 0x56c   : > { %v5481_v25 = vpop.f32.mrb[122].mxu0 }
 0x56d   : > { %v5482_v27 = vadd.f32 %v5481_v25, %v5256_v41  ;;  %v5261_v39 = vpop.f32.mrb[124].mxu1  ;;  %v5483_v53 = vpop.f32.mrb[123].mxu0 }
 0x56e   : > { %v5263_v44 = vpop.f32.mrb[125].mxu1 }
 0x570   : > { %v5486_v48 = vpop.f32.mrb[124].mxu0 }
 0x571   : > { %v5487_v59 = vadd.f32 %v5486_v48, %v5261_v39  ;;  %v5266_v11 = vpop.f32.mrb[126].mxu1  ;;  %v5488_v0 = vpop.f32.mrb[125].mxu0 }
 0x572   : > { %v5268_v57 = vpop.f32.mrb[127].mxu1 }
 0x574   : > { %v5491_v49 = vpop.f32.mrb[126].mxu0 }
 0x575   : > { %v5492_v36 = vadd.f32 %v5491_v49, %v5266_v11  ;;  %v5271_v29 = vpop.f32.mrb[128].mxu1  ;;  %v5493_v14 = vpop.f32.mrb[127].mxu0 }
 0x576   : > { %v5273_v19 = vpop.f32.mrb[129].mxu1 }
 0x578   : > { %v5496_v23 = vpop.f32.mrb[128].mxu0 }
 0x579   : > { %v5497_v33 = vadd.f32 %v5496_v23, %v5271_v29  ;;  %v5498_v37 = vpop.f32.mrb[129].mxu0 }
 0x57c   : > { %v7405_v43 = vpop.f32.mrb[130].mxu0 }
 0x57d   : > { %v5647_v51 = vadd.f32 %v7405_v43, %v14914_v35  ;;  %v5641_v60 = vpop.f32.mrb[131].mxu0 }
 0x57e   : > { %v5642_v21 = vadd.f32 %v5641_v60, %v14912_v30 }
 0x57f   : > { %5834 = vrot.lane.b32.xlu0 %v5647_v51, %s9275_s18 }
 0x580   : > { %v7408_v42 = vpop.f32.mrb[132].mxu0  ;;  %5832 = vrot.lane.b32.xlu1 %v5642_v21, %s9275_s18 }
 0x581   : > { %v5657_v26 = vadd.f32 %v7408_v42, %v14918_v45  ;;  %v5651_v55 = vpop.f32.mrb[133].mxu0 }
 0x582   : > { %v5652_v47 = vadd.f32 %v5651_v55, %v14916_v2 }
 0x583   : > { %5962 = vrot.lane.b32.xlu0 %v5647_v51, %s9281_s15 }
 0x584   : > { %v7411_v30 = vpop.f32.mrb[134].mxu0  ;;  %5960 = vrot.lane.b32.xlu1 %v5642_v21, %s9281_s15 }
 0x585   : > { %v5667_v35 = vadd.f32 %v7411_v30, %v14922_v28  ;;  %v5661_v1 = vpop.f32.mrb[135].mxu0 }
 0x586   : > { %v5662_v63 = vadd.f32 %v5661_v1, %v14920_v7 }
 0x587   : > { %5838 = vrot.lane.b32.xlu0 %v5657_v26, %s9275_s18 }
 0x588   : > { %v7414_v45 = vpop.f32.mrb[136].mxu0  ;;  %5836 = vrot.lane.b32.xlu1 %v5652_v47, %s9275_s18 }
 0x589   : > { %v5677_v52 = vadd.f32 %v7414_v45, %v14926_v34  ;;  %v5671_v50 = vpop.f32.mrb[137].mxu0 }
 0x58a   : > { %v5672_v2 = vadd.f32 %v5671_v50, %v14924_v32 }
 0x58b   : > { %5966 = vrot.lane.b32.xlu0 %v5657_v26, %s9281_s15 }
 0x58c   : > { %v7417_v5 = vpop.f32.mrb[138].mxu0  ;;  %5964 = vrot.lane.b32.xlu1 %v5652_v47, %s9281_s15 }
 0x58d   : > { %v5687_v28 = vadd.f32 %v7417_v5, %v14930_v40  ;;  %v5681_v38 = vpop.f32.mrb[139].mxu0 }
 0x58e   : > { %v5682_v7 = vadd.f32 %v5681_v38, %v14928_v22 }
 0x58f   : > { %5842 = vrot.lane.b32.xlu0 %v5667_v35, %s9275_s18 }
 0x590   : > { %v7420_v56 = vpop.f32.mrb[140].mxu0  ;;  %5840 = vrot.lane.b32.xlu1 %v5662_v63, %s9275_s18 }
 0x591   : > { %v5697_v34 = vadd.f32 %v7420_v56, %v14934_v9  ;;  %v5691_v62 = vpop.f32.mrb[141].mxu0 }
 0x592   : > { %v5692_v32 = vadd.f32 %v5691_v62, %v14932_v4 }
 0x593   : > { %5970 = vrot.lane.b32.xlu0 %v5667_v35, %s9281_s15 }
 0x594   : > { %v7423_v54 = vpop.f32.mrb[142].mxu0  ;;  %5968 = vrot.lane.b32.xlu1 %v5662_v63, %s9281_s15 }
 0x595   : > { %v5707_v8 = vadd.f32 %v7423_v54, %v5482_v27  ;;  %v5701_v40 = vpop.f32.mrb[143].mxu0 }
 0x596   : > { %v5702_v61 = vadd.f32 %v5701_v40, %v14936_v3 }
 0x597   : > { %5846 = vrot.lane.b32.xlu0 %v5677_v52, %s9275_s18 }
 0x598   : > { %v7426_v22 = vpop.f32.mrb[144].mxu0  ;;  %5844 = vrot.lane.b32.xlu1 %v5672_v2, %s9275_s18 }
 0x599   : > { %v5717_v15 = vadd.f32 %v7426_v22, %v5492_v36  ;;  %v5711_v13 = vpop.f32.mrb[145].mxu0 }
 0x59a   : > { %v5712_v24 = vadd.f32 %v5711_v13, %v5487_v59 }
 0x59b   : > { %5974 = vrot.lane.b32.xlu0 %v5677_v52, %s9281_s15 }
 0x59c   : > { %v7429_v4 = vpop.f32.mrb[146].mxu0  ;;  %5972 = vrot.lane.b32.xlu1 %v5672_v2, %s9281_s15 }
 0x59d   : > { %v5721_v16 = vpop.f32.mrb[147].mxu0 }
 0x59e   : > { %v5722_v58 = vadd.f32 %v5721_v16, %v5497_v33 }
 0x59f   : > { %5850 = vrot.lane.b32.xlu0 %v5687_v28, %s9275_s18 }
 0x5a0   : > { %v7432_v9 = vpop.f32.mrb[148].mxu0  ;;  %5848 = vrot.lane.b32.xlu1 %v5682_v7, %s9275_s18 }
 0x5a1   : > { %v5731_v31 = vpop.f32.mrb[149].mxu0 }
 0x5a3   : > { %5978 = vrot.lane.b32.xlu0 %v5687_v28, %s9281_s15 }
 0x5a4   : > { %v7435_v18 = vpop.f32.mrb[150].mxu0  ;;  %5976 = vrot.lane.b32.xlu1 %v5682_v7, %s9281_s15 }
 0x5a5   : > { %v5741_v46 = vpop.f32.mrb[151].mxu0 }
 0x5a7   : > { %5854 = vrot.lane.b32.xlu0 %v5697_v34, %s9275_s18 }
 0x5a8   : > { %v7438_v12 = vpop.f32.mrb[152].mxu0  ;;  %5852 = vrot.lane.b32.xlu1 %v5692_v32, %s9275_s18 }
 0x5a9   : > { %v5751_v3 = vpop.f32.mrb[153].mxu0 }
 0x5ab   : > { %5982 = vrot.lane.b32.xlu0 %v5697_v34, %s9281_s15 }
 0x5ac   : > { %v7441_v41 = vpop.f32.mrb[154].mxu0  ;;  %5980 = vrot.lane.b32.xlu1 %v5692_v32, %s9281_s15 }
 0x5ad   : > { %v5761_v10 = vpop.f32.mrb[155].mxu0 }
 0x5af   : > { %5858 = vrot.lane.b32.xlu0 %v5707_v8, %s9275_s18 }
 0x5b0   : > { %v7444_v17 = vpop.f32.mrb[156].mxu0  ;;  %5856 = vrot.lane.b32.xlu1 %v5702_v61, %s9275_s18 }
 0x5b1   : > { %v5771_v25 = vpop.f32.mrb[157].mxu0 }
 0x5b3   : > { %5986 = vrot.lane.b32.xlu0 %v5707_v8, %s9281_s15 }
 0x5b4   : > { %v14980_v27 = vpop.f32.mrb[158].mxu0  ;;  %5984 = vrot.lane.b32.xlu1 %v5702_v61, %s9281_s15 }
 0x5b5   : > { %v5501_v39 = vpop.f32.mrb[130].mxu1  ;;  %v5781_v53 = vpop.f32.mrb[159].mxu0 }
 0x5b6   : > { %v5727_v44 = vadd.f32 %v7429_v4, %v5501_v39  ;;  %v5503_v48 = vpop.f32.mrb[131].mxu1 }
 0x5b7   : > { %5862 = vrot.lane.b32.xlu0 %v5717_v15, %s9275_s18 }
 0x5b8   : > { %5860 = vrot.lane.b32.xlu1 %v5712_v24, %s9275_s18  ;;  %v14985_v59 = vpop.f32.mrb[160].mxu0 }
 0x5b9   : > { %v5506_v11 = vpop.f32.mrb[132].mxu1  ;;  %v5791_v0 = vpop.f32.mrb[161].mxu0 }
 0x5ba   : > { %v5732_v57 = vadd.f32 %v5731_v31, %v5506_v11  ;;  %v5508_v49 = vpop.f32.mrb[133].mxu1  ;;  %v17297_v11 = vld [vmem:[#allocation62_spill] sm:$0xff] }
 0x5bb   : > { %5990 = vrot.lane.b32.xlu0 %v5717_v15, %s9281_s15 }
 0x5bc   : > { %5988 = vrot.lane.b32.xlu1 %v5712_v24, %s9281_s15 }
 0x5bd   : > { %v5511_v36 = vpop.f32.mrb[134].mxu1 }
 0x5be   : > { %v5737_v29 = vadd.f32 %v7432_v9, %v5511_v36  ;;  %v5513_v14 = vpop.f32.mrb[135].mxu1  ;;  %v17298_v36 = vld [vmem:[#allocation43_spill] sm:$0xff] }
 0x5bf   : > { %5866 = vrot.lane.b32.xlu0 %v5727_v44, %s9275_s18 }
 0x5c0   : > { %5864 = vrot.lane.b32.xlu1 %v5722_v58, %s9275_s18 }
 0x5c1   : > { %v5516_v19 = vpop.f32.mrb[136].mxu1 }
 0x5c2   : > { %v5742_v23 = vadd.f32 %v5741_v46, %v5516_v19  ;;  %v5518_v33 = vpop.f32.mrb[137].mxu1  ;;  %v17294_v46 = vld [vmem:[#allocation33_spill] sm:$0xff] }
 0x5c3   : > { %5994 = vrot.lane.b32.xlu0 %v5727_v44, %s9281_s15 }
 0x5c4   : > { %5992 = vrot.lane.b32.xlu1 %v5722_v58, %s9281_s15 }
 0x5c5   : > { %v5521_v37 = vpop.f32.mrb[138].mxu1 }
 0x5c6   : > { %v5747_v43 = vadd.f32 %v7435_v18, %v5521_v37  ;;  %v5523_v51 = vpop.f32.mrb[139].mxu1 }
 0x5c7   : > { %5870 = vrot.lane.b32.xlu0 %v5737_v29, %s9275_s18  ;;  %v17300_v51 = vld [vmem:[#allocation208_spill] sm:$0xff] }
 0x5c8   : > { %5868 = vrot.lane.b32.xlu1 %v5732_v57, %s9275_s18 }
 0x5c9   : > { %v5526_v60 = vpop.f32.mrb[140].mxu1 }
 0x5ca   : > { %v5752_v21 = vadd.f32 %v5751_v3, %v5526_v60  ;;  %v5528_v42 = vpop.f32.mrb[141].mxu1 }
 0x5cb   : > { %5998 = vrot.lane.b32.xlu0 %v5737_v29, %s9281_s15  ;;  %v17301_v42 = vld [vmem:[#allocation189_spill] sm:$0xff] }
 0x5cc   : > { %5996 = vrot.lane.b32.xlu1 %v5732_v57, %s9281_s15 }
 0x5cd   : > { %v5531_v26 = vpop.f32.mrb[142].mxu1 }
 0x5ce   : > { %v5757_v55 = vadd.f32 %v7438_v12, %v5531_v26  ;;  %v5533_v47 = vpop.f32.mrb[143].mxu1 }
 0x5cf   : > { %5874 = vrot.lane.b32.xlu0 %v5747_v43, %s9275_s18  ;;  %v17302_v47 = vld [vmem:[#allocation59_spill] sm:$0xff] }
 0x5d0   : > { %5872 = vrot.lane.b32.xlu1 %v5742_v23, %s9275_s18 }
 0x5d1   : > { %v5536_v30 = vpop.f32.mrb[144].mxu1 }
 0x5d2   : > { %v5762_v35 = vadd.f32 %v5761_v10, %v5536_v30  ;;  %v5538_v1 = vpop.f32.mrb[145].mxu1  ;;  %v17295_v10 = vld [vmem:[#allocation110_spill] sm:$0xff] }
 0x5d3   : > { %6002 = vrot.lane.b32.xlu0 %v5747_v43, %s9281_s15 }
 0x5d4   : > { %6000 = vrot.lane.b32.xlu1 %v5742_v23, %s9281_s15  ;;  %v17299_v23 = vld [vmem:[#allocation48_spill] sm:$0xff] }
 0x5d5   : > { %v5541_v63 = vpop.f32.mrb[146].mxu1 }
 0x5d6   : > { %v5767_v45 = vadd.f32 %v7441_v41, %v5541_v63  ;;  %v5543_v52 = vpop.f32.mrb[147].mxu1 }
 0x5d7   : > { %5878 = vrot.lane.b32.xlu0 %v5757_v55, %s9275_s18 }
 0x5d8   : > { %5876 = vrot.lane.b32.xlu1 %v5752_v21, %s9275_s18 }
 0x5d9   : > { %v5546_v50 = vpop.f32.mrb[148].mxu1 }
 0x5da   : > { %v5772_v2 = vadd.f32 %v5771_v25, %v5546_v50  ;;  %v5548_v5 = vpop.f32.mrb[149].mxu1  ;;  %v17304_v50 = vld [vmem:[#allocation106_spill] sm:$0xff] }
 0x5db   : > { %6006 = vrot.lane.b32.xlu0 %v5757_v55, %s9281_s15 }
 0x5dc   : > { %6004 = vrot.lane.b32.xlu1 %v5752_v21, %s9281_s15 }
 0x5dd   : > { %v5551_v28 = vpop.f32.mrb[150].mxu1 }
 0x5de   : > { %v5777_v38 = vadd.f32 %v7444_v17, %v5551_v28  ;;  %v5553_v7 = vpop.f32.mrb[151].mxu1 }
 0x5df   : > { %5882 = vrot.lane.b32.xlu0 %v5767_v45, %s9275_s18 }
 0x5e0   : > { %5880 = vrot.lane.b32.xlu1 %v5762_v35, %s9275_s18 }
 0x5e1   : > { %v5556_v56 = vpop.f32.mrb[152].mxu1 }
 0x5e2   : > { %v5782_v34 = vadd.f32 %v5781_v53, %v5556_v56  ;;  %v5558_v62 = vpop.f32.mrb[153].mxu1  ;;  %v17296_v53 = vld [vmem:[#allocation42_spill] sm:$0xff] }
 0x5e3   : > { %6010 = vrot.lane.b32.xlu0 %v5767_v45, %s9281_s15  ;;  %v17303_v45 = vld [vmem:[#allocation80_spill] sm:$0xff]  ;;  %v17306_v62 = vld [vmem:[#allocation127_spill] sm:$0xff] }
 0x5e4   : > { %6008 = vrot.lane.b32.xlu1 %v5762_v35, %s9281_s15 }
 0x5e5   : > { %v5561_v32 = vpop.f32.mrb[154].mxu1 }
 0x5e6   : > { %v5787_v54 = vadd.f32 %v14980_v27, %v5561_v32  ;;  %v5563_v8 = vpop.f32.mrb[155].mxu1 }
 0x5e7   : > { %5886 = vrot.lane.b32.xlu0 %v5777_v38, %s9275_s18 }
 0x5e8   : > { %5884 = vrot.lane.b32.xlu1 %v5772_v2, %s9275_s18 }
 0x5e9   : > { %v5566_v40 = vpop.f32.mrb[156].mxu1 }
 0x5ea   : > { %v5792_v61 = vadd.f32 %v5791_v0, %v5566_v40  ;;  %v5568_v22 = vpop.f32.mrb[157].mxu1  ;;  %v17307_v40 = vld [vmem:[#allocation200_spill] sm:$0xff] }
 0x5eb   : > { %6014 = vrot.lane.b32.xlu0 %v5777_v38, %s9281_s15  ;;  %v17305_v38 = vld [vmem:[#allocation121_spill] sm:$0xff] }
 0x5ec   : > { %6012 = vrot.lane.b32.xlu1 %v5772_v2, %s9281_s15 }
 0x5ed   : > { %v5571_v15 = vpop.f32.mrb[158].mxu1 }
 0x5ee   : > { %v5797_v13 = vadd.f32 %v14985_v59, %v5571_v15  ;;  %v5573_v24 = vpop.f32.mrb[159].mxu1 }
 0x5ef   : > { %5890 = vrot.lane.b32.xlu0 %v5787_v54, %s9275_s18 }
 0x5f0   : > { %5888 = vrot.lane.b32.xlu1 %v5782_v34, %s9275_s18 }
 0x5f1   : > { %v5835_v4 = vpop.permute.xlu0 %5834 }
 0x5f2   : > { %v5833_v16 = vpop.permute.xlu1 %5832  ;;  %v5929_v12 = vadd.f32 %v5835_v4, %v17294_v46 }
 0x5f3   : > { %6018 = vrot.lane.b32.xlu0 %v5787_v54, %s9281_s15  ;;  %v5928_v44 = vadd.f32 %v5833_v16, %v17296_v53 }
 0x5f4   : > { %6016 = vrot.lane.b32.xlu1 %v5782_v34, %s9281_s15 }
 0x5f5   : > { %v5963_v58 = vpop.permute.xlu0 %5962 }
 0x5f6   : > { %v5961_v9 = vpop.permute.xlu1 %5960  ;;  %v6057_v17 = vadd.f32 %v5963_v58, %v17295_v10  ;;  %v17309_v58 = vld [vmem:[#allocation47_spill] sm:$0xff] }
 0x5f7   : > { %5894 = vrot.lane.b32.xlu0 %v5797_v13, %s9275_s18  ;;  %v6056_v0 = vadd.f32 %v5961_v9, %v17297_v11 }
 0x5f8   : > { %5892 = vrot.lane.b32.xlu1 %v5792_v61, %s9275_s18  ;;  %s284_s18 = sand.u32 1, %s9264_s25  }
 0x5f9   : > { %v5839_v31 = vpop.permute.xlu0 %5838  ;;  %s7012_s16 = sshll.u32 %s284_s18, 8  ;;  %s15496_s28 = scalar_lea.sflag [#allocation3], %s284_s18 }
 0x5fa   : > { %v5837_v18 = vpop.permute.xlu1 %5836  ;;  %v5931_v29 = vadd.f32 %v5839_v31, %v17298_v36  ;;  %s15199_s20 = scalar_lea.vmem [#allocation2], %s7012_s16 }
 0x5fb   : > { %6022 = vrot.lane.b32.xlu0 %v5797_v13, %s9281_s15  ;;  %v5930_v26 = vadd.f32 %v5837_v18, %v17301_v42  ;;  %v17308_v13 = vld [vmem:[#allocation101_spill] sm:$0xff]  ;;  %s6934_s23 = sshll.u32 %s15199_s20, 4  ;;  %s15490_s23 = int_to_ptr.vmem [resolvable:$true] %s6934_s23 }
 0x5fc   : > { %6020 = vrot.lane.b32.xlu1 %v5792_v61, %s9281_s15  ;;  %p9217_p0 = scmp.lt.s32.totalorder %s15490_s23, %s9215_s13 }
 0x5fd   : > { %v5967_v3 = vpop.permute.xlu0 %5966 }
 0x5fe   : > { %v5965_v41 = vpop.permute.xlu1 %5964  ;;  %v6059_v33 = vadd.f32 %v5967_v3, %v17299_v23 }
 0x5ff   : > { %6095 = vperm.xlu0 %8893, %v5929_v12   ;;  %v6058_v2 = vadd.f32 %v5965_v41, %v17304_v50 }
 0x600   : > { %6285 = vperm.xlu1 %8894, %v5929_v12   ;;  %v17310_v12 = vld [vmem:[#allocation67_spill] sm:$0xff] }
 0x601   : > { %v5843_v25 = vpop.permute.xlu0 %5842 }
 0x602   : > { %v5841_v27 = vpop.permute.xlu1 %5840  ;;  %v5933_v60 = vadd.f32 %v5843_v25, %v17300_v51 }
 0x603   : > { %6479 = vperm.xlu0 %8893, %v6057_v17   ;;  %v5932_v52 = vadd.f32 %v5841_v27, %v17303_v45 }
 0x604   : > { %6701 = vperm.xlu1 %8894, %v6057_v17   ;;  %v17311_v17 = vld [vmem:[#allocation105_spill] sm:$0xff] }
 0x605   : > { %v5971_v39 = vpop.permute.xlu0 %5970 }
 0x606   : > { %v5969_v48 = vpop.permute.xlu1 %5968  ;;  %v6061_v30 = vadd.f32 %v5971_v39, %v17302_v47 }
 0x607   : > { %8896 = vset.pattern.permute.xlu0 %v9280_v20  ;;  %v6060_v7 = vadd.f32 %v5969_v48, %v17305_v38  ;;  %v17320_v38 = vld [vmem:[#allocation124_spill] sm:$0xff] }
 0x608   : > { %8895 = vset.pattern.permute.xlu1 %v9279_v6  ;;  %6281 = vperm.xlu0 %8896, %v5928_v44  }
 0x609   : > { %v5847_v59 = vpop.permute.xlu0 %5846  ;;  %6090 = vperm.xlu1 %8895, %v5928_v44   ;;  %v17312_v44 = vld [vmem:[#allocation41_spill] sm:$0xff] }
 0x60a   : > { %v5845_v57 = vpop.permute.xlu1 %5844  ;;  %v5935_v32 = vadd.f32 %v5847_v59, %v17306_v62 }
 0x60b   : > { %v5934_v24 = vadd.f32 %v5845_v57, %v17308_v13 }
 0x60c   : > { %6697 = vperm.xlu0 %8896, %v6056_v0  }
 0x60d   : > { %v5975_v49 = vpop.permute.xlu0 %5974  ;;  %6474 = vperm.xlu1 %8895, %v6056_v0   ;;  %v17313_v0 = vld [vmem:[#allocation58_spill] sm:$0xff] }
 0x60e   : > { %v5973_v14 = vpop.permute.xlu1 %5972  ;;  %v6063_v61 = vadd.f32 %v5975_v49, %v17307_v40 }
 0x60f   : > { %v6062_v9 = vadd.f32 %v5973_v14, %v17309_v58 }
 0x610   : > { %6293 = vperm.xlu0 %8896, %v5931_v29  }
 0x611   : > { %v5851_v19 = vpop.permute.xlu0 %5850  ;;  %6105 = vperm.xlu1 %8895, %v5931_v29   ;;  %v17314_v29 = vld [vmem:[#allocation126_spill] sm:$0xff] }
 0x612   : > { %v15031_v37 = vpop.permute.xlu1 %5848  ;;  %v5937_v3 = vadd.f32 %v5851_v19, %v17310_v12  ;;  %v17324_v12 = vld [vmem:[#allocation197_spill] sm:$0xff] }
 0x613   : > { %v5936_v48 = vadd.f32 %v15031_v37, %v17312_v44 }
 0x614   : > { %6709 = vperm.xlu0 %8896, %v6059_v33  }
 0x615   : > { %v5979_v43 = vpop.permute.xlu0 %5978  ;;  %6489 = vperm.xlu1 %8895, %v6059_v33   ;;  %v17315_v33 = vld [vmem:[#allocation55_spill] sm:$0xff] }
 0x616   : > { %v15034_v21 = vpop.permute.xlu1 %5976  ;;  %v6065_v25 = vadd.f32 %v5979_v43, %v17311_v17 }
 0x617   : > { %v6064_v57 = vadd.f32 %v15034_v21, %v17313_v0 }
 0x618   : > { %6301 = vperm.xlu0 %8896, %v5933_v60  }
 0x619   : > { %v15037_v55 = vpop.permute.xlu0 %5854  ;;  %6100 = vperm.xlu1 %8895, %v5930_v26  }
 0x61a   : > { %v15040_v35 = vpop.permute.xlu1 %5852  ;;  %v5939_v14 = vadd.f32 %v15037_v55, %v17314_v29  ;;  %v17317_v55 = vld [vmem:[#allocation69_spill] sm:$0xff] }
 0x61c   : > { %6717 = vperm.xlu0 %8896, %v6061_v30  }
 0x61d   : > { %v15042_v1 = vpop.permute.xlu0 %5982  ;;  %8897 = vset.pattern.permute.xlu1 %v9280_v20 }
 0x61e   : > { %6289 = vperm.xlu1 %8897, %v5930_v26   ;;  %v15045_v63 = vpop.permute.xlu1 %5980  ;;  %v6067_v37 = vadd.f32 %v15042_v1, %v17315_v33 }
 0x61f   : > { %v6066_v47 = vadd.f32 %v15045_v63, %v17317_v55 }
 0x620   : > { %8901 = vset.pattern.permute.xlu0 %v9279_v6 }
 0x621   : > { %v15050_v5 = vpop.permute.xlu0 %5858  ;;  %6110 = vperm.xlu0 %8901, %v5932_v52  }
 0x622   : > { %8898 = vset.pattern.permute.xlu1 %v9279_v6  ;;  %v15053_v28 = vpop.permute.xlu1 %5856 }
 0x623   : > { %6484 = vperm.xlu1 %8898, %v6058_v2  }
 0x625   : > { %v15056_v56 = vpop.permute.xlu0 %5986  ;;  %6494 = vperm.xlu0 %8901, %v6060_v7  }
 0x626   : > { %v15058_v34 = vpop.permute.xlu1 %5984 }
 0x627   : > { %8899 = vset.pattern.permute.xlu1 %v9280_v20 }
 0x628   : > { %6705 = vperm.xlu1 %8899, %v6058_v2  }
 0x629   : > { %v15062_v54 = vpop.permute.xlu0 %5862  ;;  %8904 = vset.pattern.permute.xlu0 %v9280_v20 }
 0x62a   : > { %6309 = vperm.xlu0 %8904, %v5935_v32   ;;  %v15065_v8 = vpop.permute.xlu1 %5860 }
 0x62c   : > { %8900 = vset.pattern.permute.xlu1 %v9279_v6 }
 0x62d   : > { %v15069_v22 = vpop.permute.xlu0 %5990  ;;  %6115 = vperm.xlu1 %8900, %v5933_v60   ;;  %v17316_v60 = vld [vmem:[#allocation52_spill] sm:$0xff] }
 0x62e   : > { %6725 = vperm.xlu0 %8904, %v6063_v61   ;;  %v15071_v15 = vpop.permute.xlu1 %5988  ;;  %v5938_v21 = vadd.f32 %v15040_v35, %v17316_v60  ;;  %v17318_v35 = vld [vmem:[#allocation38_spill] sm:$0xff] }
 0x62f   : > { %v5941_v45 = vadd.f32 %v15050_v5, %v17318_v35 }
 0x631   : > { %v15074_v4 = vpop.permute.xlu0 %5866  ;;  %6499 = vperm.xlu1 %8900, %v6061_v30  }
 0x632   : > { %8905 = vset.pattern.permute.xlu0 %v9279_v6  ;;  %v15077_v16 = vpop.permute.xlu1 %5864 }
 0x633   : > { %6120 = vperm.xlu0 %8905, %v5934_v24  }
 0x635   : > { %v15080_v31 = vpop.permute.xlu0 %5994  ;;  %8902 = vset.pattern.permute.xlu1 %v9280_v20 }
 0x636   : > { %6297 = vperm.xlu1 %8902, %v5932_v52   ;;  %v15083_v18 = vpop.permute.xlu1 %5992  ;;  %v17319_v52 = vld [vmem:[#allocation74_spill] sm:$0xff] }
 0x637   : > { %6504 = vperm.xlu0 %8905, %v6062_v9   ;;  %v6069_v50 = vadd.f32 %v15056_v56, %v17319_v52  ;;  %v17321_v56 = vld [vmem:[#allocation65_spill] sm:$0xff] }
 0x639   : > { %v15085_v46 = vpop.permute.xlu0 %5870 }
 0x63a   : > { %6713 = vperm.xlu1 %8902, %v6060_v7   ;;  %v15088_v41 = vpop.permute.xlu1 %5868  ;;  %v5940_v7 = vadd.f32 %v15053_v28, %v17320_v38  ;;  %v17322_v28 = vld [vmem:[#allocation53_spill] sm:$0xff] }
 0x63b   : > { %8908 = vset.pattern.permute.xlu0 %v9280_v20  ;;  %v5943_v13 = vadd.f32 %v15062_v54, %v17322_v28  ;;  %v5942_v54 = vadd.f32 %v15065_v8, %v17324_v12  ;;  %v9148_v28 = vld [vmem:[%s9383_s17] sm:$0xff]  ;;  %v17331_v12 = vld [vmem:[#allocation92_spill] sm:$0xff] }
 0x63c   : > { %6317 = vperm.xlu0 %8908, %v5937_v3  }
 0x63d   : > { %v15091_v10 = vpop.permute.xlu0 %5998 }
 0x63e   : > { %8903 = vset.pattern.permute.xlu1 %v9279_v6  ;;  %v15095_v27 = vpop.permute.xlu1 %5996 }
 0x63f   : > { %6125 = vperm.xlu1 %8903, %v5935_v32   ;;  %v6068_v32 = vadd.f32 %v15058_v34, %v17321_v56  ;;  %v17330_v56 = vld [vmem:[#allocation93_spill] sm:$0xff] }
 0x640   : > { %6733 = vperm.xlu0 %8908, %v6065_v25  }
 0x641   : > { %v15097_v39 = vpop.permute.xlu0 %5874 }
 0x642   : > { %v15099_v53 = vpop.permute.xlu1 %5872 }
 0x643   : > { %6509 = vperm.xlu1 %8903, %v6063_v61  }
 0x644   : > { %8909 = vset.pattern.permute.xlu0 %v9279_v6 }
 0x645   : > { %v15104_v59 = vpop.permute.xlu0 %6002  ;;  %6130 = vperm.xlu0 %8909, %v5936_v48  }
 0x646   : > { %v15106_v11 = vpop.permute.xlu1 %6000 }
 0x647   : > { %8906 = vset.pattern.permute.xlu1 %v9280_v20 }
 0x648   : > { %6305 = vperm.xlu1 %8906, %v5934_v24   ;;  %v17323_v24 = vld [vmem:[#allocation64_spill] sm:$0xff] }
 0x649   : > { %v15111_v49 = vpop.permute.xlu0 %5878  ;;  %6514 = vperm.xlu0 %8909, %v6064_v57   ;;  %v6071_v58 = vadd.f32 %v15069_v22, %v17323_v24  ;;  %v17325_v22 = vld [vmem:[#allocation76_spill] sm:$0xff] }
 0x64a   : > { %v15113_v36 = vpop.permute.xlu1 %5876 }
 0x64c   : > { %6721 = vperm.xlu1 %8906, %v6062_v9  }
 0x64d   : > { %v15117_v19 = vpop.permute.xlu0 %6006  ;;  %8912 = vset.pattern.permute.xlu0 %v9280_v20 }
 0x64e   : > { %6325 = vperm.xlu0 %8912, %v5939_v14   ;;  %v15120_v23 = vpop.permute.xlu1 %6004 }
 0x650   : > { %8907 = vset.pattern.permute.xlu1 %v9279_v6 }
 0x651   : > { %v15125_v43 = vpop.permute.xlu0 %5882  ;;  %6135 = vperm.xlu1 %8907, %v5937_v3  }
 0x652   : > { %6741 = vperm.xlu0 %8912, %v6067_v37   ;;  %v15127_v51 = vpop.permute.xlu1 %5880 }
 0x655   : > { %6519 = vperm.xlu1 %8907, %v6065_v25   ;;  %v15131_v42 = vpop.permute.xlu0 %6010  ;;  %v6070_v25 = vadd.f32 %v15071_v15, %v17325_v22 }
 0x656   : > { %8913 = vset.pattern.permute.xlu0 %v9279_v6  ;;  %v15134_v26 = vpop.permute.xlu1 %6008 }
 0x657   : > { %6140 = vperm.xlu0 %8913, %v5938_v21  }
 0x659   : > { %8910 = vset.pattern.permute.xlu1 %v9280_v20  ;;  %v15139_v30 = vpop.permute.xlu0 %5886 }
 0x65a   : > { %6313 = vperm.xlu1 %8910, %v5936_v48   ;;  %v15141_v1 = vpop.permute.xlu1 %5884  ;;  %v9146_v48 = vld [vmem:[%s9383_s17 + $0x8] sm:$0xff] }
 0x65b   : > { %6524 = vperm.xlu0 %8913, %v6066_v47  }
 0x65d   : > { %v15148_v2 = vpop.permute.xlu0 %6014 }
 0x65e   : > { %6729 = vperm.xlu1 %8910, %v6064_v57   ;;  %v15151_v63 = vpop.permute.xlu1 %6012  ;;  %v17326_v57 = vld [vmem:[#allocation181_spill] sm:$0xff] }
 0x65f   : > { %8916 = vset.pattern.permute.xlu0 %v9280_v20 }
 0x660   : > { %6333 = vperm.xlu0 %8916, %v5941_v45  }
 0x661   : > { %v15155_v5 = vpop.permute.xlu0 %5890 }
 0x662   : > { %8911 = vset.pattern.permute.xlu1 %v9279_v6  ;;  %v15158_v62 = vpop.permute.xlu1 %5888 }
 0x663   : > { %6145 = vperm.xlu1 %8911, %v5939_v14   ;;  %v17327_v14 = vld [vmem:[#allocation165_spill] sm:$0xff] }
 0x664   : > { %6749 = vperm.xlu0 %8916, %v6069_v50   ;;  %v5944_v33 = vadd.f32 %v15077_v16, %v17327_v14 }
 0x665   : > { %v15163_v40 = vpop.permute.xlu0 %6018 }
 0x666   : > { %v15165_v61 = vpop.permute.xlu1 %6016 }
 0x667   : > { %6529 = vperm.xlu1 %8911, %v6067_v37  }
 0x668   : > { %8917 = vset.pattern.permute.xlu0 %v9279_v6 }
 0x669   : > { %6150 = vperm.xlu0 %8917, %v5940_v7   ;;  %v15172_v34 = vpop.permute.xlu0 %5894 }
 0x66a   : > { %v15175_v9 = vpop.permute.xlu1 %5892 }
 0x66b   : > { %8914 = vset.pattern.permute.xlu1 %v9280_v20 }
 0x66c   : > { %6321 = vperm.xlu1 %8914, %v5938_v21   ;;  %v9147_v21 = vld [vmem:[%s9955_s22 + $0x8] sm:$0xff] }
 0x66d   : > { %6534 = vperm.xlu0 %8917, %v6068_v32   ;;  %v15179_v3 = vpop.permute.xlu0 %6022 }
 0x66e   : > { %v15182_v17 = vpop.permute.xlu1 %6020 }
 0x670   : > { %6737 = vperm.xlu1 %8914, %v6066_v47   ;;  %v17328_v47 = vld [vmem:[#allocation211_spill] sm:$0xff] }
 0x671   : > { %8920 = vset.pattern.permute.xlu0 %v9280_v20 }
 0x672   : > { %6341 = vperm.xlu0 %8920, %v5943_v13  }
 0x674   : > { %8915 = vset.pattern.permute.xlu1 %v9279_v6 }
 0x675   : > { %6155 = vperm.xlu1 %8915, %v5941_v45   ;;  %v17329_v45 = vld [vmem:[#allocation203_spill] sm:$0xff] }
 0x676   : > { %6757 = vperm.xlu0 %8920, %v6071_v58   ;;  %v6072_v52 = vadd.f32 %v15083_v18, %v17329_v45  ;;  %v5945_v18 = vadd.f32 %v15074_v4, %v17331_v12 }
 0x679   : > { %6539 = vperm.xlu1 %8915, %v6069_v50  }
 0x67a   : > { %8921 = vset.pattern.permute.xlu0 %v9279_v6 }
 0x67b   : > { %6160 = vperm.xlu0 %8921, %v5942_v54  }
 0x67d   : > { %8918 = vset.pattern.permute.xlu1 %v9280_v20 }
 0x67e   : > { %v6096_v44 = vpop.permute.xlu0 %6095  ;;  %6329 = vperm.xlu1 %8918, %v5940_v7  }
 0x67f   : > { %v6249_v0 = vmul.f32 %v9146_v48, %v6096_v44  ;;  %6544 = vperm.xlu0 %8921, %v6070_v25   ;;  %v6286_v8 = vpop.permute.xlu1 %6285  ;;  %v9149_v48 = vld [vmem:[%s9955_s22] sm:$0xff] }
 0x680   : > { %v6409_v29 = vmul.f32 %v6286_v8, %v17326_v57  ;;  %v17332_v8 = vld [vmem:[#allocation86_spill] sm:$0xff] }
 0x681   : > { %v6073_v57 = vadd.f32 %v15080_v31, %v17332_v8  ;;  %v17340_v8 = vld [vmem:[#allocation140_spill] sm:$0xff] }
 0x682   : > { %v6441_v37 = vadd.f32 %v6409_v29, %v6249_v0  ;;  %v6480_v60 = vpop.permute.xlu0 %6479  ;;  %6745 = vperm.xlu1 %8918, %v6068_v32   ;;  %v17333_v29 = vld [vmem:[#allocation82_spill] sm:$0xff] }
 0x683   : > { %v6633_v15 = vmul.f32 %v9147_v21, %v6480_v60  ;;  %6170 = vperm.xlu0 %8921, %v5944_v33   ;;  %v6702_v55 = vpop.permute.xlu1 %6701  ;;  %v17334_v21 = vld [vmem:[#allocation130_spill] sm:$0xff] }
 0x684   : > { %v6825_v35 = vmul.f32 %v6702_v55, %v17328_v47  ;;  %v9150_v55 = vld [vmem:[%s9383_s17 + $0x18] sm:$0xff] }
 0x685   : > { %v6665_v50 = vadd.f32 %v6633_v15, %v6441_v37 }
 0x686   : > { %8919 = vset.pattern.permute.xlu1 %v9279_v6 }
 0x687   : > { %v6857_v38 = vadd.f32 %v6825_v35, %v6665_v50  ;;  %v6282_v16 = vpop.permute.xlu0 %6281  ;;  %6165 = vperm.xlu1 %8919, %v5943_v13   ;;  %6554 = vperm.xlu0 %8921, %v6072_v52   ;;  %v17335_v35 = vld [vmem:[#allocation123_spill] sm:$0xff] }
 0x688   : > { %v6091_v7 = vpop.permute.xlu1 %6090  ;;  %v6408_v32 = vmul.f32 %v6282_v16, %v17330_v56  ;;  %v5946_v45 = vadd.f32 %v15088_v41, %v17335_v35  ;;  %v17343_v35 = vld [vmem:[#allocation186_spill] sm:$0xff] }
 0x689   : > { %6889 = vst.msk [vmem:[%s15199_s20 + $0x8] sm:$0xff] %vm1316_vm3, %v6857_v38  ;;  %v6248_v24 = vmul.f32 %v9148_v28, %v6091_v7  ;;  %v17336_v7 = vld [vmem:[#allocation61_spill] sm:$0xff] }
 0x68a   : > { %v6074_v56 = vadd.f32 %v15095_v27, %v17336_v7  ;;  %v17344_v7 = vld [vmem:[#allocation72_spill] sm:$0xff] }
 0x68b   : > { %v6698_v22 = vpop.permute.xlu0 %6697  ;;  %6549 = vperm.xlu1 %8919, %v6071_v58   ;;  %8924 = vset.pattern.permute.xlu0 %v9280_v20  ;;  %v6440_v44 = vadd.f32 %v6408_v32, %v6248_v24  ;;  %v17337_v32 = vld [vmem:[#allocation66_spill] sm:$0xff] }
 0x68c   : > { %6349 = vperm.xlu0 %8924, %v5945_v18   ;;  %v6475_v13 = vpop.permute.xlu1 %6474  ;;  %v6824_v14 = vmul.f32 %v6698_v22, %v17333_v29 }
 0x68d   : > { %v6632_v0 = vmul.f32 %v9149_v48, %v6475_v13  ;;  %v17338_v13 = vld [vmem:[#allocation104_spill] sm:$0xff]  ;;  %v17339_v48 = vld [vmem:[#allocation70_spill] sm:$0xff] }
 0x68f   : > { %v6664_v37 = vadd.f32 %v6632_v0, %v6440_v44  ;;  %v6294_v60 = vpop.permute.xlu0 %6293  ;;  %8922 = vset.pattern.permute.xlu1 %v9280_v20  ;;  %v5947_v44 = vadd.f32 %v15085_v46, %v17338_v13  ;;  %v6075_v0 = vadd.f32 %v15091_v10, %v17339_v48  ;;  %v17346_v13 = vld [vmem:[#allocation183_spill] sm:$0xff] }
 0x690   : > { %6337 = vperm.xlu1 %8922, %v5942_v54   ;;  %6765 = vperm.xlu0 %8924, %v6073_v57   ;;  %v6106_v4 = vpop.permute.xlu1 %6105  ;;  %v6411_v15 = vmul.f32 %v6294_v60, %v17334_v21  ;;  %v9151_v54 = vld [vmem:[%s9955_s22 + $0x18] sm:$0xff] }
 0x691   : > { %v6856_v58 = vadd.f32 %v6824_v14, %v6664_v37  ;;  %v6251_v47 = vmul.f32 %v9150_v55, %v6106_v4  ;;  %v9152_v37 = vld [vmem:[%s9383_s17 + $0x10] sm:$0xff]  ;;  %v17342_v55 = vld [vmem:[#allocation54_spill] sm:$0xff] }
 0x692   : > { %v9153_v4 = vld [vmem:[%s9955_s22 + $0x10] sm:$0xff] }
 0x693   : > { %6888 = vst.msk [vmem:[%s15199_s20] sm:$0xff] %vm1316_vm3, %v6856_v58  ;;  %v6710_v31 = vpop.permute.xlu0 %6709  ;;  %v6443_v38 = vadd.f32 %v6411_v15, %v6251_v47  ;;  %v17341_v58 = vld [vmem:[#allocation40_spill] sm:$0xff] }
 0x694   : > { %6753 = vperm.xlu1 %8922, %v6070_v25   ;;  %8925 = vset.pattern.permute.xlu0 %v9279_v6  ;;  %v6490_v50 = vpop.permute.xlu1 %6489  ;;  %v6827_v28 = vmul.f32 %v6710_v31, %v17337_v32  ;;  %v5948_v21 = vadd.f32 %v15099_v53, %v17341_v58  ;;  %v6076_v31 = vadd.f32 %v15106_v11, %v17343_v35  ;;  %v17349_v58 = vld [vmem:[#allocation50_spill] sm:$0xff] }
 0x695   : > { %v6635_v16 = vmul.f32 %v9151_v54, %v6490_v50  ;;  %6180 = vperm.xlu0 %8925, %v5946_v45   ;;  %v5949_v32 = vadd.f32 %v15097_v39, %v17344_v7  ;;  %v17347_v39 = vld [vmem:[#allocation175_spill] sm:$0xff] }
 0x697   : > { %v6667_v24 = vadd.f32 %v6635_v16, %v6443_v38  ;;  %v6302_v12 = vpop.permute.xlu0 %6301 }
 0x698   : > { %6345 = vperm.xlu1 %8922, %v5944_v33   ;;  %v6101_v41 = vpop.permute.xlu1 %6100 }
 0x699   : > { %v6859_v22 = vadd.f32 %v6827_v28, %v6667_v24  ;;  %6564 = vperm.xlu0 %8925, %v6074_v56   ;;  %v6250_v60 = vmul.f32 %v9152_v37, %v6101_v41  ;;  %v17345_v28 = vld [vmem:[#allocation149_spill] sm:$0xff] }
 0x69a   : > { %v6413_v24 = vmul.f32 %v6302_v12, %v17345_v28  ;;  %v17353_v28 = vld [vmem:[#allocation18_spill] sm:$0xff] }
 0x69b   : > { %6891 = vst.msk [vmem:[%s15199_s20 + $0x18] sm:$0xff] %vm1316_vm3, %v6859_v22  ;;  %v6718_v25 = vpop.permute.xlu0 %6717 }
 0x69c   : > { %6761 = vperm.xlu1 %8922, %v6072_v52  }
 0x69d   : > { %8928 = vset.pattern.permute.xlu0 %v9280_v20  ;;  %v6290_v27 = vpop.permute.xlu1 %6289 }
 0x69e   : > { %6357 = vperm.xlu0 %8928, %v5947_v44   ;;  %v6410_v29 = vmul.f32 %v6290_v27, %v17340_v8  ;;  %v6077_v27 = vadd.f32 %v15104_v59, %v17346_v13  ;;  %v9157_v59 = vld [vmem:[%s9955_s22 + $0x20] sm:$0xff] }
 0x6a0   : > { %v6111_v33 = vpop.permute.xlu0 %6110  ;;  %8923 = vset.pattern.permute.xlu1 %v9279_v6  ;;  %v6442_v10 = vadd.f32 %v6410_v29, %v6250_v60  ;;  %v17348_v60 = vld [vmem:[#allocation14_spill] sm:$0xff] }
 0x6a1   : > { %6175 = vperm.xlu1 %8923, %v5945_v18  }
 0x6a2   : > { %6773 = vperm.xlu0 %8928, %v6075_v0   ;;  %v6485_v14 = vpop.permute.xlu1 %6484 }
 0x6a3   : > { %v6634_v46 = vmul.f32 %v9153_v4, %v6485_v14  ;;  %v9156_v14 = vld [vmem:[%s9383_s17 + $0x20] sm:$0xff] }
 0x6a4   : > { %v6495_v52 = vpop.permute.xlu0 %6494  ;;  %v6252_v37 = vmul.f32 %v9156_v14, %v6111_v33  ;;  %v17350_v33 = vld [vmem:[#allocation168_spill] sm:$0xff] }
 0x6a5   : > { %6559 = vperm.xlu1 %8923, %v6073_v57   ;;  %v6666_v15 = vadd.f32 %v6634_v46, %v6442_v10  ;;  %v9154_v57 = vld [vmem:[%s9383_s17 + $0x28] sm:$0xff]  ;;  %v5950_v10 = vadd.f32 %v15113_v36, %v17349_v58 }
 0x6a6   : > { %8929 = vset.pattern.permute.xlu0 %v9279_v6 }
 0x6a7   : > { %6190 = vperm.xlu0 %8929, %v5948_v21   ;;  %v6706_v18 = vpop.permute.xlu1 %6705 }
 0x6a8   : > { %v6826_v47 = vmul.f32 %v6706_v18, %v17342_v55 }
 0x6a9   : > { %v6310_v50 = vpop.permute.xlu0 %6309  ;;  %8926 = vset.pattern.permute.xlu1 %v9280_v20 }
 0x6aa   : > { %v6858_v38 = vadd.f32 %v6826_v47, %v6666_v15  ;;  %6353 = vperm.xlu1 %8926, %v5946_v45   ;;  %v9155_v45 = vld [vmem:[%s9955_s22 + $0x28] sm:$0xff]  ;;  %v17351_v47 = vld [vmem:[#allocation191_spill] sm:$0xff] }
 0x6ab   : > { %6574 = vperm.xlu0 %8929, %v6076_v31   ;;  %v6078_v35 = vadd.f32 %v15120_v23, %v17351_v47  ;;  %v17360_v47 = vld [vmem:[#allocation194_spill] sm:$0xff] }
 0x6ac   : > { %6890 = vst.msk [vmem:[%s15199_s20 + $0x10] sm:$0xff] %vm1316_vm3, %v6858_v38  ;;  %v6116_v53 = vpop.permute.xlu1 %6115 }
 0x6ad   : > { %v6253_v54 = vmul.f32 %v9154_v57, %v6116_v53  ;;  %v6726_v16 = vpop.permute.xlu0 %6725 }
 0x6ae   : > { %6769 = vperm.xlu1 %8926, %v6074_v56   ;;  %v6829_v56 = vmul.f32 %v6718_v25, %v17347_v39  ;;  %v6636_v25 = vmul.f32 %v9157_v59, %v6495_v52  ;;  %v9158_v52 = vld [vmem:[%s9383_s17 + $0x38] sm:$0xff] }
 0x6af   : > { %8932 = vset.pattern.permute.xlu0 %v9280_v20  ;;  %v6445_v41 = vadd.f32 %v6413_v24, %v6253_v54  ;;  %v17352_v54 = vld [vmem:[#allocation143_spill] sm:$0xff]  ;;  %v6415_v24 = vmul.f32 %v6310_v50, %v17353_v28  ;;  %v17362_v28 = vld [vmem:[#allocation196_spill] sm:$0xff] }
 0x6b0   : > { %6365 = vperm.xlu0 %8932, %v5949_v32   ;;  %v6500_v11 = vpop.permute.xlu1 %6499  ;;  %v5951_v7 = vadd.f32 %v15111_v49, %v17352_v54  ;;  %v17355_v49 = vld [vmem:[#allocation57_spill] sm:$0xff] }
 0x6b1   : > { %v6637_v22 = vmul.f32 %v9155_v45, %v6500_v11  ;;  %v17354_v45 = vld [vmem:[#allocation188_spill] sm:$0xff] }
 0x6b2   : > { %v6121_v48 = vpop.permute.xlu0 %6120  ;;  %8927 = vset.pattern.permute.xlu1 %v9279_v6 }
 0x6b3   : > { %v6669_v8 = vadd.f32 %v6637_v22, %v6445_v41  ;;  %6185 = vperm.xlu1 %8927, %v5947_v44   ;;  %v6079_v22 = vadd.f32 %v15117_v19, %v17354_v45  ;;  %v9161_v19 = vld [vmem:[%s9955_s22 + $0x30] sm:$0xff] }
 0x6b4   : > { %6781 = vperm.xlu0 %8932, %v6077_v27  }
 0x6b5   : > { %v6861_v12 = vadd.f32 %v6829_v56, %v6669_v8  ;;  %v6298_v29 = vpop.permute.xlu1 %6297  ;;  %v9160_v8 = vld [vmem:[%s9383_s17 + $0x30] sm:$0xff] }
 0x6b6   : > { %v6412_v4 = vmul.f32 %v6298_v29, %v17348_v60  ;;  %v6505_v46 = vpop.permute.xlu0 %6504  ;;  %v17356_v29 = vld [vmem:[#allocation202_spill] sm:$0xff]  ;;  %v17357_v60 = vld [vmem:[#allocation39_spill] sm:$0xff] }
 0x6b7   : > { %6893 = vst.msk [vmem:[%s15199_s20 + $0x28] sm:$0xff] %vm1316_vm3, %v6861_v12  ;;  %6569 = vperm.xlu1 %8927, %v6075_v0   ;;  %v6254_v12 = vmul.f32 %v9160_v8, %v6121_v48  ;;  %v17358_v48 = vld [vmem:[#allocation108_spill] sm:$0xff] }
 0x6b8   : > { %v6444_v18 = vadd.f32 %v6412_v4, %v6252_v37  ;;  %8933 = vset.pattern.permute.xlu0 %v9279_v6  ;;  %v5952_v4 = vadd.f32 %v15127_v51, %v17357_v60 }
 0x6b9   : > { %6200 = vperm.xlu0 %8933, %v5950_v10   ;;  %v6714_v44 = vpop.permute.xlu1 %6713 }
 0x6ba   : > { %v6668_v15 = vadd.f32 %v6636_v25, %v6444_v18  ;;  %v6828_v55 = vmul.f32 %v6714_v44, %v17350_v33  ;;  %v17359_v18 = vld [vmem:[#allocation195_spill] sm:$0xff] }
 0x6bb   : > { %v6318_v38 = vpop.permute.xlu0 %6317  ;;  %8930 = vset.pattern.permute.xlu1 %v9280_v20  ;;  %v6080_v44 = vadd.f32 %v15134_v26, %v17359_v18 }
 0x6bc   : > { %v6860_v36 = vadd.f32 %v6828_v55, %v6668_v15  ;;  %6361 = vperm.xlu1 %8930, %v5948_v21   ;;  %v9159_v21 = vld [vmem:[%s9955_s22 + $0x38] sm:$0xff] }
 0x6bd   : > { %6584 = vperm.xlu0 %8933, %v6078_v35  }
 0x6be   : > { %6892 = vst.msk [vmem:[%s15199_s20 + $0x20] sm:$0xff] %vm1316_vm3, %v6860_v36  ;;  %v6126_v0 = vpop.permute.xlu1 %6125  ;;  %v5953_v36 = vadd.f32 %v15125_v43, %v17360_v47  ;;  %v17363_v43 = vld [vmem:[#allocation89_spill] sm:$0xff] }
 0x6bf   : > { %v6255_v53 = vmul.f32 %v9158_v52, %v6126_v0  ;;  %v6734_v57 = vpop.permute.xlu0 %6733  ;;  %v17361_v0 = vld [vmem:[#allocation129_spill] sm:$0xff] }
 0x6c0   : > { %6777 = vperm.xlu1 %8930, %v6076_v31   ;;  %v6831_v31 = vmul.f32 %v6726_v16, %v17355_v49  ;;  %v6638_v16 = vmul.f32 %v9161_v19, %v6505_v46  ;;  %v9162_v46 = vld [vmem:[%s9383_s17 + $0x48] sm:$0xff]  ;;  %v6417_v52 = vmul.f32 %v6318_v38, %v17361_v0  ;;  %v17364_v49 = vld [vmem:[#allocation109_spill] sm:$0xff] }
 0x6c1   : > { %8936 = vset.pattern.permute.xlu0 %v9280_v20  ;;  %v6447_v11 = vadd.f32 %v6415_v24, %v6255_v53  ;;  %v6081_v24 = vadd.f32 %v15131_v42, %v17362_v28  ;;  %v9165_v42 = vld [vmem:[%s9955_s22 + $0x40] sm:$0xff]  ;;  %v17373_v28 = vld [vmem:[#allocation210_spill] sm:$0xff] }
 0x6c2   : > { %6373 = vperm.xlu0 %8936, %v5951_v7   ;;  %v6510_v23 = vpop.permute.xlu1 %6509 }
 0x6c3   : > { %v6639_v41 = vmul.f32 %v9159_v21, %v6510_v23 }
 0x6c4   : > { %v6131_v13 = vpop.permute.xlu0 %6130  ;;  %8931 = vset.pattern.permute.xlu1 %v9279_v6 }
 0x6c5   : > { %v6671_v39 = vadd.f32 %v6639_v41, %v6447_v11  ;;  %6195 = vperm.xlu1 %8931, %v5949_v32   ;;  %v9164_v41 = vld [vmem:[%s9383_s17 + $0x40] sm:$0xff] }
 0x6c6   : > { %6789 = vperm.xlu0 %8936, %v6079_v22   ;;  %v6256_v45 = vmul.f32 %v9164_v41, %v6131_v13  ;;  %v17366_v13 = vld [vmem:[#allocation56_spill] sm:$0xff] }
 0x6c7   : > { %v6863_v50 = vadd.f32 %v6831_v31, %v6671_v39  ;;  %v6306_v56 = vpop.permute.xlu1 %6305 }
 0x6c8   : > { %v6414_v14 = vmul.f32 %v6306_v56, %v17356_v29  ;;  %v6515_v37 = vpop.permute.xlu0 %6514 }
 0x6c9   : > { %6895 = vst.msk [vmem:[%s15199_s20 + $0x38] sm:$0xff] %vm1316_vm3, %v6863_v50  ;;  %6579 = vperm.xlu1 %8931, %v6077_v27   ;;  %v17365_v50 = vld [vmem:[#allocation51_spill] sm:$0xff] }
 0x6ca   : > { %v6446_v58 = vadd.f32 %v6414_v14, %v6254_v12  ;;  %8937 = vset.pattern.permute.xlu0 %v9279_v6  ;;  %v5954_v56 = vadd.f32 %v15141_v1, %v17365_v50  ;;  %v17367_v14 = vld [vmem:[#allocation198_spill] sm:$0xff]  ;;  %v17376_v50 = vld [vmem:[#allocation103_spill] sm:$0xff] }
 0x6cb   : > { %6210 = vperm.xlu0 %8937, %v5952_v4   ;;  %v6722_v32 = vpop.permute.xlu1 %6721  ;;  %v6082_v60 = vadd.f32 %v15151_v63, %v17367_v14 }
 0x6cc   : > { %v6670_v59 = vadd.f32 %v6638_v16, %v6446_v58  ;;  %v6830_v25 = vmul.f32 %v6722_v32, %v17358_v48  ;;  %v17368_v32 = vld [vmem:[#allocation84_spill] sm:$0xff]  ;;  %v17369_v48 = vld [vmem:[#allocation27_spill] sm:$0xff] }
 0x6cd   : > { %v6326_v15 = vpop.permute.xlu0 %6325  ;;  %8934 = vset.pattern.permute.xlu1 %v9280_v20 }
 0x6ce   : > { %v6862_v51 = vadd.f32 %v6830_v25, %v6670_v59  ;;  %6369 = vperm.xlu1 %8934, %v5950_v10   ;;  %v9163_v10 = vld [vmem:[%s9955_s22 + $0x48] sm:$0xff]  ;;  %v5955_v59 = vadd.f32 %v15139_v30, %v17368_v32  ;;  %v6419_v25 = vmul.f32 %v6326_v15, %v17369_v48  ;;  %v17371_v30 = vld [vmem:[#allocation75_spill] sm:$0xff] }
 0x6cf   : > { %6594 = vperm.xlu0 %8937, %v6080_v44   ;;  %v17380_v32 = vld [vmem:[#allocation158_spill] sm:$0xff] }
 0x6d0   : > { %6894 = vst.msk [vmem:[%s15199_s20 + $0x30] sm:$0xff] %vm1316_vm3, %v6862_v51  ;;  %v6136_v27 = vpop.permute.xlu1 %6135 }
 0x6d1   : > { %v6257_v33 = vmul.f32 %v9162_v46, %v6136_v27  ;;  %v6742_v55 = vpop.permute.xlu0 %6741  ;;  %v17370_v27 = vld [vmem:[#allocation204_spill] sm:$0xff] }
 0x6d2   : > { %6785 = vperm.xlu1 %8934, %v6078_v35   ;;  %v6833_v35 = vmul.f32 %v6734_v57, %v17363_v43  ;;  %v6640_v57 = vmul.f32 %v9165_v42, %v6515_v37  ;;  %v9166_v37 = vld [vmem:[%s9383_s17 + $0x58] sm:$0xff]  ;;  %v6083_v46 = vadd.f32 %v15148_v2, %v17370_v27  ;;  %v5956_v43 = vadd.f32 %v15158_v62, %v17373_v28  ;;  %v9169_v2 = vld [vmem:[%s9955_s22 + $0x50] sm:$0xff] }
 0x6d3   : > { %8940 = vset.pattern.permute.xlu0 %v9280_v20  ;;  %v6449_v53 = vadd.f32 %v6417_v52, %v6257_v33  ;;  %v9168_v52 = vld [vmem:[%s9383_s17 + $0x50] sm:$0xff]  ;;  %v5957_v42 = vadd.f32 %v15155_v5, %v17376_v50  ;;  %v17379_v5 = vld [vmem:[#allocation182_spill] sm:$0xff] }
 0x6d4   : > { %6381 = vperm.xlu0 %8940, %v5953_v36   ;;  %v6520_v26 = vpop.permute.xlu1 %6519  ;;  %v17382_v27 = vld [vmem:[#allocation63_spill] sm:$0xff] }
 0x6d5   : > { %v6641_v54 = vmul.f32 %v9163_v10, %v6520_v26 }
 0x6d6   : > { %v6141_v23 = vpop.permute.xlu0 %6140  ;;  %8935 = vset.pattern.permute.xlu1 %v9279_v6 }
 0x6d7   : > { %v6673_v11 = vadd.f32 %v6641_v54, %v6449_v53  ;;  %6205 = vperm.xlu1 %8935, %v5951_v7   ;;  %v6258_v26 = vmul.f32 %v9168_v52, %v6141_v23  ;;  %v17372_v53 = vld [vmem:[#allocation179_spill] sm:$0xff] }
 0x6d8   : > { %6797 = vperm.xlu0 %8940, %v6081_v24   ;;  %v17374_v23 = vld [vmem:[#allocation107_spill] sm:$0xff] }
 0x6d9   : > { %v6865_v38 = vadd.f32 %v6833_v35, %v6673_v11  ;;  %v6314_v21 = vpop.permute.xlu1 %6313 }
 0x6da   : > { %v6416_v31 = vmul.f32 %v6314_v21, %v17364_v49  ;;  %v6525_v39 = vpop.permute.xlu0 %6524  ;;  %v17375_v21 = vld [vmem:[#allocation201_spill] sm:$0xff]  ;;  %v9170_v49 = vld [vmem:[%s9383_s17 + $0x68] sm:$0xff] }
 0x6db   : > { %6897 = vst.msk [vmem:[%s15199_s20 + $0x48] sm:$0xff] %vm1316_vm3, %v6865_v38  ;;  %6589 = vperm.xlu1 %8935, %v6079_v22   ;;  %v6084_v41 = vadd.f32 %v15165_v61, %v17375_v21 }
 0x6dc   : > { %v6448_v8 = vadd.f32 %v6416_v31, %v6256_v45  ;;  %8941 = vset.pattern.permute.xlu0 %v9279_v6 }
 0x6dd   : > { %6220 = vperm.xlu0 %8941, %v5954_v56   ;;  %v6730_v7 = vpop.permute.xlu1 %6729 }
 0x6de   : > { %v6672_v12 = vadd.f32 %v6640_v57, %v6448_v8  ;;  %v6832_v29 = vmul.f32 %v6730_v7, %v17366_v13  ;;  %v17377_v57 = vld [vmem:[#allocation26_spill] sm:$0xff] }
 0x6df   : > { %v6334_v19 = vpop.permute.xlu0 %6333  ;;  %8938 = vset.pattern.permute.xlu1 %v9280_v20  ;;  %v17378_v13 = vld [vmem:[#allocation122_spill] sm:$0xff] }
 0x6e0   : > { %v6864_v1 = vadd.f32 %v6832_v29, %v6672_v12  ;;  %6377 = vperm.xlu1 %8938, %v5952_v4   ;;  %v9167_v4 = vld [vmem:[%s9955_s22 + $0x58] sm:$0xff]  ;;  %v6421_v8 = vmul.f32 %v6334_v19, %v17377_v57  ;;  %v6085_v29 = vadd.f32 %v15163_v40, %v17378_v13  ;;  %v9173_v40 = vld [vmem:[%s9955_s22 + $0x60] sm:$0xff] }
 0x6e1   : > { %6604 = vperm.xlu0 %8941, %v6082_v60  }
 0x6e2   : > { %6896 = vst.msk [vmem:[%s15199_s20 + $0x40] sm:$0xff] %vm1316_vm3, %v6864_v1  ;;  %v6146_v22 = vpop.permute.xlu1 %6145 }
 0x6e3   : > { %v6259_v16 = vmul.f32 %v9166_v37, %v6146_v22  ;;  %v6750_v58 = vpop.permute.xlu0 %6749  ;;  %v9172_v37 = vld [vmem:[%s9383_s17 + $0x60] sm:$0xff] }
 0x6e4   : > { %6793 = vperm.xlu1 %8938, %v6080_v44   ;;  %v6835_v44 = vmul.f32 %v6742_v55, %v17371_v30  ;;  %v6642_v55 = vmul.f32 %v9169_v2, %v6525_v39 }
 0x6e5   : > { %8944 = vset.pattern.permute.xlu0 %v9280_v20  ;;  %v6451_v18 = vadd.f32 %v6419_v25, %v6259_v16 }
 0x6e6   : > { %6389 = vperm.xlu0 %8944, %v5955_v59   ;;  %v6530_v63 = vpop.permute.xlu1 %6529 }
 0x6e7   : > { %v6643_v51 = vmul.f32 %v9167_v4, %v6530_v63  ;;  %v17381_v63 = vld [vmem:[#allocation49_spill] sm:$0xff] }
 0x6e8   : > { %v6151_v33 = vpop.permute.xlu0 %6150  ;;  %8939 = vset.pattern.permute.xlu1 %v9279_v6 }
 0x6e9   : > { %v6675_v47 = vadd.f32 %v6643_v51, %v6451_v18  ;;  %6215 = vperm.xlu1 %8939, %v5953_v36   ;;  %v6260_v16 = vmul.f32 %v9172_v37, %v6151_v33  ;;  %v5958_v18 = vadd.f32 %v15175_v9, %v17381_v63 }
 0x6ea   : > { %6805 = vperm.xlu0 %8944, %v6083_v46  }
 0x6eb   : > { %v6867_v15 = vadd.f32 %v6835_v44, %v6675_v47  ;;  %v6322_v0 = vpop.permute.xlu1 %6321  ;;  %v17383_v44 = vld [vmem:[#allocation94_spill] sm:$0xff] }
 0x6ec   : > { %v6418_v10 = vmul.f32 %v6322_v0, %v17372_v53  ;;  %v6535_v54 = vpop.permute.xlu0 %6534  ;;  %v15361_v47 = vadd.f32 %v15182_v17, %v17383_v44  ;;  %v9174_v0 = vld [vmem:[%s9383_s17 + $0x78] sm:$0xff] }
 0x6ed   : > { %6899 = vst.msk [vmem:[%s15199_s20 + $0x58] sm:$0xff] %vm1316_vm3, %v6867_v15  ;;  %6599 = vperm.xlu1 %8939, %v6081_v24   ;;  %v6644_v4 = vmul.f32 %v9173_v40, %v6535_v54  ;;  %v17393_v44 = vld [vmem:[#allocation16_spill] sm:$0xff] }
 0x6ee   : > { %v6450_v35 = vadd.f32 %v6418_v10, %v6258_v26  ;;  %8945 = vset.pattern.permute.xlu0 %v9279_v6  ;;  %v17384_v26 = vld [vmem:[#allocation71_spill] sm:$0xff] }
 0x6ef   : > { %6230 = vperm.xlu0 %8945, %v5956_v43   ;;  %v6738_v36 = vpop.permute.xlu1 %6737  ;;  %v5959_v53 = vadd.f32 %v15172_v34, %v17384_v26  ;;  %v17385_v10 = vld [vmem:[#allocation151_spill] sm:$0xff] }
 0x6f0   : > { %v6674_v11 = vadd.f32 %v6642_v55, %v6450_v35  ;;  %v6834_v38 = vmul.f32 %v6738_v36, %v17374_v23  ;;  %v17386_v35 = vld [vmem:[#allocation15_spill] sm:$0xff] }
 0x6f1   : > { %v6342_v45 = vpop.permute.xlu0 %6341  ;;  %8942 = vset.pattern.permute.xlu1 %v9280_v20  ;;  %v6087_v36 = vadd.f32 %v15179_v3, %v17386_v35  ;;  %v17387_v34 = vld [vmem:[#allocation187_spill] sm:$0xff] }
 0x6f2   : > { %v6866_v62 = vadd.f32 %v6834_v38, %v6674_v11  ;;  %6385 = vperm.xlu1 %8942, %v5954_v56   ;;  %v9171_v56 = vld [vmem:[%s9955_s22 + $0x68] sm:$0xff]  ;;  %v6423_v17 = vmul.f32 %v6342_v45, %v17385_v10  ;;  %v9176_v45 = vld [vmem:[%s9383_s17 + $0x70] sm:$0xff] }
 0x6f3   : > { %6614 = vperm.xlu0 %8945, %v6084_v41   ;;  %v9177_v3 = vld [vmem:[%s9955_s22 + $0x70] sm:$0xff] }
 0x6f4   : > { %6898 = vst.msk [vmem:[%s15199_s20 + $0x50] sm:$0xff] %vm1316_vm3, %v6866_v62  ;;  %v6156_v24 = vpop.permute.xlu1 %6155 }
 0x6f5   : > { %v6261_v31 = vmul.f32 %v9170_v49, %v6156_v24  ;;  %v6758_v39 = vpop.permute.xlu0 %6757  ;;  %v17388_v24 = vld [vmem:[#allocation12_spill] sm:$0xff] }
 0x6f6   : > { %6801 = vperm.xlu1 %8942, %v6082_v60   ;;  %v6837_v60 = vmul.f32 %v6750_v58, %v17379_v5  ;;  %v6839_v11 = vmul.f32 %v6758_v39, %v17387_v34 }
 0x6f7   : > { %8948 = vset.pattern.permute.xlu0 %v9280_v20  ;;  %v6453_v7 = vadd.f32 %v6421_v8, %v6261_v31 }
 0x6f8   : > { %6397 = vperm.xlu0 %8948, %v5957_v42   ;;  %v6540_v61 = vpop.permute.xlu1 %6539 }
 0x6f9   : > { %v6645_v12 = vmul.f32 %v9171_v56, %v6540_v61 }
 0x6fa   : > { %v6161_v14 = vpop.permute.xlu0 %6160  ;;  %8943 = vset.pattern.permute.xlu1 %v9279_v6 }
 0x6fb   : > { %v6677_v1 = vadd.f32 %v6645_v12, %v6453_v7  ;;  %6225 = vperm.xlu1 %8943, %v5955_v59   ;;  %v6262_v62 = vmul.f32 %v9176_v45, %v6161_v14  ;;  %v9178_v12 = vld [vmem:[%s9383_s17 + $0x80] sm:$0xff] }
 0x6fc   : > { %6813 = vperm.xlu0 %8948, %v6085_v29  }
 0x6fd   : > { %v6869_v19 = vadd.f32 %v6837_v60, %v6677_v1  ;;  %v6330_v22 = vpop.permute.xlu1 %6329  ;;  %v9179_v60 = vld [vmem:[%s9955_s22 + $0x80] sm:$0xff] }
 0x6fe   : > { %v6420_v48 = vmul.f32 %v6330_v22, %v17380_v32  ;;  %v6545_v25 = vpop.permute.xlu0 %6544 }
 0x6ff   : > { %6901 = vst.msk [vmem:[%s15199_s20 + $0x68] sm:$0xff] %vm1316_vm3, %v6869_v19  ;;  %6609 = vperm.xlu1 %8943, %v6083_v46   ;;  %v6646_v31 = vmul.f32 %v9177_v3, %v6545_v25 }
 0x700   : > { %v6452_v58 = vadd.f32 %v6420_v48, %v6260_v16  ;;  %8949 = vset.pattern.permute.xlu0 %v9279_v6  ;;  %v17391_v16 = vld [vmem:[#allocation98_spill] sm:$0xff] }
 0x701   : > { %6240 = vperm.xlu0 %8949, %v5958_v18   ;;  %v6746_v59 = vpop.permute.xlu1 %6745 }
 0x702   : > { %v6676_v51 = vadd.f32 %v6644_v4, %v6452_v58  ;;  %v6836_v33 = vmul.f32 %v6746_v59, %v17382_v27  ;;  %v6171_v30 = vpop.permute.xlu0 %6170  ;;  %v17392_v58 = vld [vmem:[#allocation148_spill] sm:$0xff]  ;;  %v9181_v27 = vld [vmem:[%s9955_s22 + $0x88] sm:$0xff] }
 0x703   : > { %8946 = vset.pattern.permute.xlu1 %v9280_v20  ;;  %v6264_v13 = vmul.f32 %v9178_v12, %v6171_v30 }
 0x704   : > { %v6868_v9 = vadd.f32 %v6836_v33, %v6676_v51  ;;  %6393 = vperm.xlu1 %8946, %v5956_v43   ;;  %v9175_v43 = vld [vmem:[%s9955_s22 + $0x78] sm:$0xff] }
 0x705   : > { %6624 = vperm.xlu0 %8949, %v15361_v47  }
 0x706   : > { %6900 = vst.msk [vmem:[%s15199_s20 + $0x60] sm:$0xff] %vm1316_vm3, %v6868_v9  ;;  %v6555_v46 = vpop.permute.xlu0 %6554  ;;  %v6166_v15 = vpop.permute.xlu1 %6165 }
 0x707   : > { %v6263_v52 = vmul.f32 %v9174_v0, %v6166_v15  ;;  %v6648_v1 = vmul.f32 %v9179_v60, %v6555_v46 }
 0x708   : > { %6809 = vperm.xlu1 %8946, %v6084_v41  }
 0x709   : > { %8952 = vset.pattern.permute.xlu0 %v9280_v20  ;;  %v6455_v28 = vadd.f32 %v6423_v17, %v6263_v52  ;;  %v9182_v52 = vld [vmem:[%s9383_s17 + $0x90] sm:$0xff] }
 0x70a   : > { %6405 = vperm.xlu0 %8952, %v5959_v53   ;;  %v6550_v54 = vpop.permute.xlu1 %6549 }
 0x70b   : > { %v6647_v2 = vmul.f32 %v9175_v43, %v6550_v54  ;;  %v6350_v55 = vpop.permute.xlu0 %6349 }
 0x70c   : > { %8947 = vset.pattern.permute.xlu1 %v9279_v6  ;;  %v6425_v59 = vmul.f32 %v6350_v55, %v17392_v58  ;;  %v9189_v58 = vld [vmem:[%s9955_s22 + $0xa8] sm:$0xff] }
 0x70d   : > { %v6679_v23 = vadd.f32 %v6647_v2, %v6455_v28  ;;  %6235 = vperm.xlu1 %8947, %v5957_v42   ;;  %v17389_v42 = vld [vmem:[#allocation190_spill] sm:$0xff]  ;;  %v17395_v2 = vld [vmem:[#allocation192_spill] sm:$0xff] }
 0x70e   : > { %6821 = vperm.xlu0 %8952, %v6087_v36  }
 0x70f   : > { %v6871_v38 = vadd.f32 %v6839_v11, %v6679_v23  ;;  %v6766_v21 = vpop.permute.xlu0 %6765  ;;  %v6338_v41 = vpop.permute.xlu1 %6337  ;;  %v9184_v11 = vld [vmem:[%s9383_s17 + $0x98] sm:$0xff] }
 0x710   : > { %v6422_v49 = vmul.f32 %v6338_v41, %v17388_v24  ;;  %v6841_v9 = vmul.f32 %v6766_v21, %v17393_v44  ;;  %v17396_v21 = vld [vmem:[#allocation142_spill] sm:$0xff]  ;;  %v9185_v24 = vld [vmem:[%s9955_s22 + $0x98] sm:$0xff] }
 0x711   : > { %6903 = vst.msk [vmem:[%s15199_s20 + $0x78] sm:$0xff] %vm1316_vm3, %v6871_v38  ;;  %6619 = vperm.xlu1 %8947, %v6085_v29   ;;  %v17390_v29 = vld [vmem:[#allocation10_spill] sm:$0xff] }
 0x712   : > { %v6454_v50 = vadd.f32 %v6422_v49, %v6262_v62 }
 0x713   : > { %v6754_v39 = vpop.permute.xlu1 %6753 }
 0x714   : > { %v6678_v57 = vadd.f32 %v6646_v31, %v6454_v50  ;;  %v6838_v8 = vmul.f32 %v6754_v39, %v17389_v42  ;;  %v6181_v61 = vpop.permute.xlu0 %6180  ;;  %v17397_v31 = vld [vmem:[#allocation199_spill] sm:$0xff] }
 0x715   : > { %8950 = vset.pattern.permute.xlu1 %v9280_v20  ;;  %v6266_v26 = vmul.f32 %v9182_v52, %v6181_v61 }
 0x716   : > { %v6870_v7 = vadd.f32 %v6838_v8, %v6678_v57  ;;  %6401 = vperm.xlu1 %8950, %v5958_v18   ;;  %v9180_v18 = vld [vmem:[%s9383_s17 + $0x88] sm:$0xff]  ;;  %v9186_v8 = vld [vmem:[%s9383_s17 + $0xa0] sm:$0xff] }
 0x717   : > { %v6346_v56 = vpop.permute.xlu1 %6345 }
 0x718   : > { %6902 = vst.msk [vmem:[%s15199_s20 + $0x70] sm:$0xff] %vm1316_vm3, %v6870_v7  ;;  %v6424_v14 = vmul.f32 %v6346_v56, %v17390_v29  ;;  %v6565_v5 = vpop.permute.xlu0 %6564  ;;  %v17398_v7 = vld [vmem:[#allocation141_spill] sm:$0xff] }
 0x71a   : > { %v6456_v19 = vadd.f32 %v6424_v14, %v6264_v13  ;;  %8951 = vset.pattern.permute.xlu1 %v9279_v6  ;;  %v9187_v13 = vld [vmem:[%s9955_s22 + $0xa0] sm:$0xff] }
 0x71b   : > { %6245 = vperm.xlu1 %8951, %v5959_v53   ;;  %v6762_v22 = vpop.permute.xlu1 %6761  ;;  %v17394_v53 = vld [vmem:[#allocation185_spill] sm:$0xff] }
 0x71c   : > { %v6680_v37 = vadd.f32 %v6648_v1, %v6456_v19  ;;  %v6840_v32 = vmul.f32 %v6762_v22, %v17391_v16  ;;  %v17399_v1 = vld [vmem:[#allocation205_spill] sm:$0xff] }
 0x71d   : > { %v6358_v48 = vpop.permute.xlu0 %6357 }
 0x71e   : > { %v6872_v25 = vadd.f32 %v6840_v32, %v6680_v37  ;;  %v6427_v41 = vmul.f32 %v6358_v48, %v17396_v21  ;;  %v9188_v32 = vld [vmem:[%s9383_s17 + $0xa8] sm:$0xff]  ;;  %v9193_v21 = vld [vmem:[%s9955_s22 + $0xb8] sm:$0xff] }
 0x71f   : > { %6629 = vperm.xlu1 %8951, %v6087_v36  }
 0x720   : > { %6904 = vst.msk [vmem:[%s15199_s20 + $0x80] sm:$0xff] %vm1316_vm3, %v6872_v25  ;;  %v6176_v63 = vpop.permute.xlu1 %6175 }
 0x721   : > { %v6265_v40 = vmul.f32 %v9180_v18, %v6176_v63  ;;  %v6774_v4 = vpop.permute.xlu0 %6773  ;;  %v17400_v63 = vld [vmem:[#allocation152_spill] sm:$0xff] }
 0x722   : > { %v6843_v50 = vmul.f32 %v6774_v4, %v17397_v31 }
 0x723   : > { %8953 = vset.pattern.permute.xlu1 %v9280_v20  ;;  %v6457_v51 = vadd.f32 %v6425_v59, %v6265_v40 }
 0x724   : > { %6817 = vperm.xlu1 %8953, %v15361_v47   ;;  %v6560_v6 = vpop.permute.xlu1 %6559  ;;  %v9183_v47 = vld [vmem:[%s9955_s22 + $0x90] sm:$0xff] }
 0x725   : > { %v6649_v33 = vmul.f32 %v9181_v27, %v6560_v6  ;;  %v6650_v17 = vmul.f32 %v9183_v47, %v6565_v5 }
 0x726   : > { %v6191_v30 = vpop.permute.xlu0 %6190 }
 0x727   : > { %v6681_v46 = vadd.f32 %v6649_v33, %v6457_v51  ;;  %v6268_v61 = vmul.f32 %v9186_v8, %v6191_v30  ;;  %v17401_v51 = vld [vmem:[#allocation90_spill] sm:$0xff]  ;;  %v9195_v8 = vld [vmem:[%s9955_s22 + $0xc0] sm:$0xff] }
 0x729   : > { %v6873_v15 = vadd.f32 %v6841_v9, %v6681_v46  ;;  %v6354_v0 = vpop.permute.xlu1 %6353  ;;  %v9190_v9 = vld [vmem:[%s9383_s17 + $0xb0] sm:$0xff] }
 0x72a   : > { %v6426_v10 = vmul.f32 %v6354_v0, %v17394_v53  ;;  %v6575_v20 = vpop.permute.xlu0 %6574 }
 0x72b   : > { %6905 = vst.msk [vmem:[%s15199_s20 + $0x88] sm:$0xff] %vm1316_vm3, %v6873_v15  ;;  %v6652_v29 = vmul.f32 %v9187_v13, %v6575_v20  ;;  %v17402_v15 = vld [vmem:[#allocation36_spill] sm:$0xff] }
 0x72c   : > { %v6458_v54 = vadd.f32 %v6426_v10, %v6266_v26  ;;  %v9191_v26 = vld [vmem:[%s9955_s22 + $0xb0] sm:$0xff] }
 0x72d   : > { %v6770_v28 = vpop.permute.xlu1 %6769 }
 0x72e   : > { %v6682_v43 = vadd.f32 %v6650_v17, %v6458_v54  ;;  %v6842_v55 = vmul.f32 %v6770_v28, %v17395_v2  ;;  %v17403_v17 = vld [vmem:[#allocation20_spill] sm:$0xff] }
 0x72f   : > { %v6366_v35 = vpop.permute.xlu0 %6365 }
 0x730   : > { %v6874_v36 = vadd.f32 %v6842_v55, %v6682_v43  ;;  %v6429_v18 = vmul.f32 %v6366_v35, %v17400_v63  ;;  %v9192_v55 = vld [vmem:[%s9383_s17 + $0xb8] sm:$0xff] }
 0x732   : > { %6906 = vst.msk [vmem:[%s15199_s20 + $0x90] sm:$0xff] %vm1316_vm3, %v6874_v36  ;;  %v6186_v34 = vpop.permute.xlu1 %6185 }
 0x733   : > { %v6267_v23 = vmul.f32 %v9184_v11, %v6186_v34  ;;  %v6782_v38 = vpop.permute.xlu0 %6781  ;;  %v17404_v34 = vld [vmem:[#allocation46_spill] sm:$0xff] }
 0x734   : > { %v6845_v27 = vmul.f32 %v6782_v38, %v17401_v51  ;;  %v9198_v51 = vld [vmem:[%s9383_s17 + $0xd0] sm:$0xff] }
 0x735   : > { %v6459_v62 = vadd.f32 %v6427_v41, %v6267_v23 }
 0x736   : > { %v6570_v45 = vpop.permute.xlu1 %6569 }
 0x737   : > { %v6651_v49 = vmul.f32 %v9185_v24, %v6570_v45 }
 0x738   : > { %v6201_v3 = vpop.permute.xlu0 %6200 }
 0x739   : > { %v6683_v39 = vadd.f32 %v6651_v49, %v6459_v62  ;;  %v6270_v46 = vmul.f32 %v9190_v9, %v6201_v3  ;;  %v17405_v62 = vld [vmem:[#allocation88_spill] sm:$0xff] }
 0x73b   : > { %v6875_v57 = vadd.f32 %v6843_v50, %v6683_v39  ;;  %v6362_v42 = vpop.permute.xlu1 %6361  ;;  %v9194_v50 = vld [vmem:[%s9383_s17 + $0xc0] sm:$0xff] }
 0x73c   : > { %v6428_v56 = vmul.f32 %v6362_v42, %v17398_v7  ;;  %v6585_v12 = vpop.permute.xlu0 %6584 }
 0x73d   : > { %6907 = vst.msk [vmem:[%s15199_s20 + $0x98] sm:$0xff] %vm1316_vm3, %v6875_v57  ;;  %v6654_v53 = vmul.f32 %v9191_v26, %v6585_v12  ;;  %v17406_v57 = vld [vmem:[#allocation35_spill] sm:$0xff]  ;;  %v17411_v26 = vld [vmem:[#allocation118_spill] sm:$0xff] }
 0x73e   : > { %v6460_v14 = vadd.f32 %v6428_v56, %v6268_v61 }
 0x73f   : > { %v6778_v5 = vpop.permute.xlu1 %6777 }
 0x740   : > { %v6684_v60 = vadd.f32 %v6652_v29, %v6460_v14  ;;  %v6844_v19 = vmul.f32 %v6778_v5, %v17399_v1  ;;  %v17407_v29 = vld [vmem:[#allocation145_spill] sm:$0xff] }
 0x741   : > { %v6374_v22 = vpop.permute.xlu0 %6373 }
 0x742   : > { %v6876_v37 = vadd.f32 %v6844_v19, %v6684_v60  ;;  %v6431_v11 = vmul.f32 %v6374_v22, %v17404_v34  ;;  %v9196_v19 = vld [vmem:[%s9383_s17 + $0xc8] sm:$0xff] }
 0x744   : > { %6908 = vst.msk [vmem:[%s15199_s20 + $0xa0] sm:$0xff] %vm1316_vm3, %v6876_v37  ;;  %v6196_v16 = vpop.permute.xlu1 %6195  ;;  %v17408_v37 = vld [vmem:[#allocation171_spill] sm:$0xff] }
 0x745   : > { %v6269_v48 = vmul.f32 %v9188_v32, %v6196_v16  ;;  %v6790_v25 = vpop.permute.xlu0 %6789 }
 0x746   : > { %v6847_v24 = vmul.f32 %v6790_v25, %v17405_v62  ;;  %v9197_v25 = vld [vmem:[%s9955_s22 + $0xc8] sm:$0xff] }
 0x747   : > { %v6461_v4 = vadd.f32 %v6429_v18, %v6269_v48 }
 0x748   : > { %v6580_v40 = vpop.permute.xlu1 %6579 }
 0x749   : > { %v6653_v59 = vmul.f32 %v9189_v58, %v6580_v40  ;;  %v17409_v40 = vld [vmem:[#allocation73_spill] sm:$0xff] }
 0x74a   : > { %v6211_v6 = vpop.permute.xlu0 %6210 }
 0x74b   : > { %v6685_v33 = vadd.f32 %v6653_v59, %v6461_v4  ;;  %v6272_v39 = vmul.f32 %v9194_v50, %v6211_v6 }
 0x74d   : > { %v6877_v30 = vadd.f32 %v6845_v27, %v6685_v33  ;;  %v6370_v44 = vpop.permute.xlu1 %6369  ;;  %v17410_v33 = vld [vmem:[#allocation115_spill] sm:$0xff] }
 0x74e   : > { %v6430_v0 = vmul.f32 %v6370_v44, %v17402_v15  ;;  %v6595_v52 = vpop.permute.xlu0 %6594  ;;  %v9199_v44 = vld [vmem:[%s9955_s22 + $0xd0] sm:$0xff] }
 0x74f   : > { %6909 = vst.msk [vmem:[%s15199_s20 + $0xa8] sm:$0xff] %vm1316_vm3, %v6877_v30  ;;  %v6656_v61 = vmul.f32 %v9195_v8, %v6595_v52  ;;  %v17415_v8 = vld [vmem:[#allocation137_spill] sm:$0xff] }
 0x750   : > { %v6462_v10 = vadd.f32 %v6430_v0, %v6270_v46 }
 0x751   : > { %v6786_v20 = vpop.permute.xlu1 %6785 }
 0x752   : > { %v6686_v47 = vadd.f32 %v6654_v53, %v6462_v10  ;;  %v6846_v54 = vmul.f32 %v6786_v20, %v17403_v17  ;;  %v9200_v17 = vld [vmem:[%s9383_s17 + $0xd8] sm:$0xff] }
 0x753   : > { %v6382_v28 = vpop.permute.xlu0 %6381 }
 0x754   : > { %v6878_v43 = vadd.f32 %v6846_v54, %v6686_v47  ;;  %v6433_v16 = vmul.f32 %v6382_v28, %v17408_v37  ;;  %v17412_v28 = vld [vmem:[#allocation209_spill] sm:$0xff] }
 0x756   : > { %6910 = vst.msk [vmem:[%s15199_s20 + $0xb0] sm:$0xff] %vm1316_vm3, %v6878_v43  ;;  %v6206_v2 = vpop.permute.xlu1 %6205 }
 0x757   : > { %v6271_v35 = vmul.f32 %v9192_v55, %v6206_v2  ;;  %v6798_v36 = vpop.permute.xlu0 %6797 }
 0x758   : > { %v6849_v4 = vmul.f32 %v6798_v36, %v17409_v40 }
 0x759   : > { %v6463_v38 = vadd.f32 %v6431_v11, %v6271_v35  ;;  %v9201_v35 = vld [vmem:[%s9955_s22 + $0xd8] sm:$0xff] }
 0x75a   : > { %v6590_v23 = vpop.permute.xlu1 %6589  ;;  %v17413_v11 = vld [vmem:[#allocation28_spill] sm:$0xff] }
 0x75b   : > { %v6655_v41 = vmul.f32 %v9193_v21, %v6590_v23 }
 0x75c   : > { %v6221_v45 = vpop.permute.xlu0 %6220 }
 0x75d   : > { %v6687_v49 = vadd.f32 %v6655_v41, %v6463_v38  ;;  %v6274_v27 = vmul.f32 %v9198_v51, %v6221_v45  ;;  %v9202_v45 = vld [vmem:[%s9383_s17 + $0xe0] sm:$0xff]  ;;  %v17419_v51 = vld [vmem:[#allocation134_spill] sm:$0xff] }
 0x75f   : > { %v6879_v3 = vadd.f32 %v6847_v24, %v6687_v49  ;;  %v6378_v31 = vpop.permute.xlu1 %6377  ;;  %v17414_v24 = vld [vmem:[#allocation112_spill] sm:$0xff] }
 0x760   : > { %v6432_v42 = vmul.f32 %v6378_v31, %v17406_v57  ;;  %v6605_v56 = vpop.permute.xlu0 %6604 }
 0x761   : > { %6911 = vst.msk [vmem:[%s15199_s20 + $0xb8] sm:$0xff] %vm1316_vm3, %v6879_v3  ;;  %v6658_v9 = vmul.f32 %v9199_v44, %v6605_v56  ;;  %v9203_v3 = vld [vmem:[%s9955_s22 + $0xe0] sm:$0xff] }
 0x762   : > { %v6464_v7 = vadd.f32 %v6432_v42, %v6272_v39 }
 0x763   : > { %v6794_v12 = vpop.permute.xlu1 %6793 }
 0x764   : > { %v6688_v13 = vadd.f32 %v6656_v61, %v6464_v7  ;;  %v6848_v14 = vmul.f32 %v6794_v12, %v17407_v29 }
 0x765   : > { %v6390_v60 = vpop.permute.xlu0 %6389 }
 0x766   : > { %v6880_v5 = vadd.f32 %v6848_v14, %v6688_v13  ;;  %v6435_v43 = vmul.f32 %v6390_v60, %v17412_v28  ;;  %v9204_v13 = vld [vmem:[%s9383_s17 + $0xe8] sm:$0xff]  ;;  %v17416_v14 = vld [vmem:[#allocation163_spill] sm:$0xff] }
 0x768   : > { %6912 = vst.msk [vmem:[%s15199_s20 + $0xc0] sm:$0xff] %vm1316_vm3, %v6880_v5  ;;  %v6216_v1 = vpop.permute.xlu1 %6215 }
 0x769   : > { %v6273_v22 = vmul.f32 %v9196_v19, %v6216_v1  ;;  %v6806_v18 = vpop.permute.xlu0 %6805  ;;  %v9205_v19 = vld [vmem:[%s9955_s22 + $0xe8] sm:$0xff] }
 0x76a   : > { %v6851_v23 = vmul.f32 %v6806_v18, %v17413_v11 }
 0x76b   : > { %v6465_v48 = vadd.f32 %v6433_v16, %v6273_v22  ;;  %v17417_v16 = vld [vmem:[#allocation78_spill] sm:$0xff] }
 0x76c   : > { %v6600_v32 = vpop.permute.xlu1 %6599 }
 0x76d   : > { %v6657_v63 = vmul.f32 %v9197_v25, %v6600_v32 }
 0x76e   : > { %v6231_v46 = vpop.permute.xlu0 %6230 }
 0x76f   : > { %v6689_v58 = vadd.f32 %v6657_v63, %v6465_v48  ;;  %v6276_v62 = vmul.f32 %v9202_v45, %v6231_v46 }
 0x771   : > { %v6881_v59 = vadd.f32 %v6849_v4, %v6689_v58  ;;  %v6386_v6 = vpop.permute.xlu1 %6385  ;;  %v9206_v4 = vld [vmem:[%s9383_s17 + $0xf8] sm:$0xff] }
 0x772   : > { %v6434_v30 = vmul.f32 %v6386_v6, %v17410_v33  ;;  %v6615_v20 = vpop.permute.xlu0 %6614  ;;  %v9207_v33 = vld [vmem:[%s9383_s17 + $0xf0] sm:$0xff] }
 0x773   : > { %6913 = vst.msk [vmem:[%s15199_s20 + $0xc8] sm:$0xff] %vm1316_vm3, %v6881_v59  ;;  %v6660_v31 = vmul.f32 %v9203_v3, %v6615_v20  ;;  %v17418_v59 = vld [vmem:[#allocation22_spill] sm:$0xff]  ;;  %v9209_v20 = vld [vmem:[%s9955_s22 + $0xf0] sm:$0xff] }
 0x774   : > { %v6466_v15 = vadd.f32 %v6434_v30, %v6274_v27 }
 0x775   : > { %v6802_v0 = vpop.permute.xlu1 %6801 }
 0x776   : > { %v6690_v52 = vadd.f32 %v6658_v9, %v6466_v15  ;;  %v6850_v53 = vmul.f32 %v6802_v0, %v17411_v26  ;;  %v9208_v15 = vld [vmem:[%s9955_s22 + $0xf8] sm:$0xff]  ;;  %v17420_v26 = vld [vmem:[#allocation21_spill] sm:$0xff]  ;;  %s9210_s22 = scalar_lea.vmem %s15490_s23, 4096 }
 0x777   : > { %v6398_v34 = vpop.permute.xlu0 %6397  ;;  %p9211_p11 = scmp.ne.s32.totalorder %s15490_s23, %s9210_s22  ;;  %p9218_p1 = scmp.lt.s32.totalorder %s9216_s14, %s9210_s22 }
 0x778   : > { %v6882_v10 = vadd.f32 %v6850_v53, %v6690_v52  ;;  %v6437_v5 = vmul.f32 %v6398_v34, %v17416_v14 }
 0x779   : > { %p9212_p12 = pnand %p9211_p11, %p9363_p5  ;;  %p9219_p2 = por %p9218_p1, %p9217_p0 }
 0x77a   : > { %6914 = vst.msk [vmem:[%s15199_s20 + $0xd0] sm:$0xff] %vm1316_vm3, %v6882_v10  ;;  %v6226_v47 = vpop.permute.xlu1 %6225 }
 0x77b   : > { %v6275_v54 = vmul.f32 %v9200_v17, %v6226_v47  ;;  %v6814_v50 = vpop.permute.xlu0 %6813  ;;  %p9213_p13 = pneg %p9212_p12 }
 0x77c   : > { %v6853_v32 = vmul.f32 %v6814_v50, %v17417_v16 }
 0x77d   : > { %v6467_v55 = vadd.f32 %v6435_v43, %v6275_v54  ;;  %v17421_v43 = vld [vmem:[#allocation119_spill] sm:$0xff]  ;;  %p9220_p3 = pnand %p9219_p2, %p9213_p13 }
 0x77e   : > { %v6610_v2 = vpop.permute.xlu1 %6609 }
 0x77f   : > { %v6659_v36 = vmul.f32 %v9201_v35, %v6610_v2 }
 0x780   : > { %v6241_v56 = vpop.permute.xlu0 %6240 }
 0x781   : > { %v6691_v38 = vadd.f32 %v6659_v36, %v6467_v55  ;;  %v6278_v30 = vmul.f32 %v9207_v33, %v6241_v56 }
 0x783   : > { %v6883_v21 = vadd.f32 %v6851_v23, %v6691_v38  ;;  %v6394_v41 = vpop.permute.xlu1 %6393 }
 0x784   : > { %v6436_v49 = vmul.f32 %v6394_v41, %v17414_v24  ;;  %v6625_v37 = vpop.permute.xlu0 %6624 }
 0x785   : > { %6915 = vst.msk [vmem:[%s15199_s20 + $0xd8] sm:$0xff] %vm1316_vm3, %v6883_v21  ;;  %v6662_v47 = vmul.f32 %v9209_v20, %v6625_v37 }
 0x786   : > { %v6468_v39 = vadd.f32 %v6436_v49, %v6276_v62 }
 0x787   : > { %v6810_v57 = vpop.permute.xlu1 %6809 }
 0x788   : > { %v6692_v42 = vadd.f32 %v6660_v31, %v6468_v39  ;;  %v6852_v61 = vmul.f32 %v6810_v57, %v17415_v8 }
 0x789   : > { %v6406_v18 = vpop.permute.xlu0 %6405 }
 0x78a   : > { %v6884_v7 = vadd.f32 %v6852_v61, %v6692_v42  ;;  %v6439_v27 = vmul.f32 %v6406_v18, %v17419_v51 }
 0x78c   : > { %6916 = vst.msk [vmem:[%s15199_s20 + $0xe0] sm:$0xff] %vm1316_vm3, %v6884_v7  ;;  %v6236_v12 = vpop.permute.xlu1 %6235 }
 0x78d   : > { %v6277_v29 = vmul.f32 %v9204_v13, %v6236_v12  ;;  %v6822_v44 = vpop.permute.xlu0 %6821 }
 0x78e   : > { %v6855_v53 = vmul.f32 %v6822_v44, %v17420_v26 }
 0x78f   : > { %v6469_v1 = vadd.f32 %v6437_v5, %v6277_v29 }
 0x790   : > { %v6620_v60 = vpop.permute.xlu1 %6619 }
 0x791   : > { %v6661_v22 = vmul.f32 %v9205_v19, %v6620_v60 }
 0x793   : > { %v6693_v48 = vadd.f32 %v6661_v22, %v6469_v1 }
 0x795   : > { %v6885_v25 = vadd.f32 %v6853_v32, %v6693_v48  ;;  %v6402_v63 = vpop.permute.xlu1 %6401 }
 0x796   : > { %v6438_v6 = vmul.f32 %v6402_v63, %v17418_v59 }
 0x797   : > { %6917 = vst.msk [vmem:[%s15199_s20 + $0xe8] sm:$0xff] %vm1316_vm3, %v6885_v25 }
 0x798   : > { %v6470_v52 = vadd.f32 %v6438_v6, %v6278_v30 }
 0x79a   : > { %v6246_v40 = vpop.permute.xlu1 %6245  ;;  %v6694_v28 = vadd.f32 %v6662_v47, %v6470_v52 }
 0x79b   : > { %v6279_v58 = vmul.f32 %v9206_v4, %v6246_v40 }
 0x79d   : > { %v6471_v46 = vadd.f32 %v6439_v27, %v6279_v58 }
 0x79e   : > { %v6630_v9 = vpop.permute.xlu1 %6629 }
 0x79f   : > { %v6663_v0 = vmul.f32 %v9208_v15, %v6630_v9 }
 0x7a1   : > { %v6695_v10 = vadd.f32 %v6663_v0, %v6471_v46 }
 0x7a3   : > { %v6887_v17 = vadd.f32 %v6855_v53, %v6695_v10  ;;  %v6818_v54 = vpop.permute.xlu1 %6817 }
 0x7a4   : > { %v6854_v2 = vmul.f32 %v6818_v54, %v17421_v43 }
 0x7a5   : > { %6919 = vst.msk [vmem:[%s15199_s20 + $0xf8] sm:$0xff] %vm1316_vm3, %v6887_v17 }
 0x7a6   : > { %v6886_v55 = vadd.f32 %v6854_v2, %v6694_v28 }
 0x7a8   : > { %6918 = vst.msk [vmem:[%s15199_s20 + $0xf0] sm:$0xff] %vm1316_vm3, %v6886_v55 }
 0x7a9   : > { %9223 = shalt.err (!%p9220_p3)
}
 0x7aa   : > { %s9224_s19 = scalar_lea.hbm %s15488_s8, 4096  ;;  %s9228_s16 = scalar_lea.hbm %s15544_s7, 8192 }
 0x7ab   : > { %p9225_p4 = scmp.ne.s32.totalorder %s15488_s8, %s9224_s19  ;;  %p9229_p9 = scmp.lt.u32.totalorder %s15488_s8, %s15544_s7 }
 0x7ac   : > { %p9230_p10 = scmp.lt.u32.totalorder %s9228_s16, %s9224_s19  ;;  %p9232_p12 = scmp.lt.u32.totalorder %s9224_s19, %s15488_s8 }
 0x7ad   : > { %p9226_p7 = pnand %p9225_p4, %p9363_p5 }
 0x7ae   : > { %p9231_p11 = por %p9230_p10, %p9229_p9 }
 0x7af   : > { %p9227_p8 = pneg %p9226_p7 }
 0x7b0   : > { %p9233_p13 = por %p9232_p12, %p9231_p11 }
 0x7b2   : > { %p9234_p0 = pnand %p9233_p13, %p9227_p8 }
 0x7b4   : > { %9237 = shalt.err (!%p9234_p0)
}
 0x7b5   : > { %s9283_s17 = smov 128   ;;  %s9284_s29 = smov 8  }
 0x7b6   : > { %7754 = dma.vmem_to_hbm [thread:$0]  (%p9363_p5), %s15490_s23, 4096, %s15488_s8, %s15496_s28, %s9283_s17, %s9283_s17, %s9284_s29  }
 0x7b7 PF: > { %p7760_p1 = scmp.ge.s32.totalorder %s9272_s27, 2  ;;  %s6949_s22 = sand.u32 1, %s9260_s24  }
 0x7b8   : > { %s6950_s9 = scalar_lea.sflag [#allocation3], %s6949_s22 }
 0x7b9   : > { %p7757_p2 = pnand %p7760_p1, %p9367_p6 }
 0x7bb   : > { %9255 = dma.done.wait (!%p7757_p2), %s6950_s9, 4096  }
 0x7bc   : > { %9257 = vsyncadd (!%p7757_p2), %s6950_s9, 4294963200  ;;  %p17_p3 = scmp.ge.s32.totalorder %s9350_s30, 4   ;;  %s17422_s24 = smov %s9264_s25 }
 0x7bd   : > { %s17423_s25 = smov %s9268_s26  ;;  %s17424_s26 = smov %s9361_s10 }
 0x7be   : > { %s17425_s27 = smov %s9350_s30  ;;  %19 = sbr.rel (!%p17_p3) target bundleno = 3 (0x3), region = 86 }
 0x7c5   :  { %6955 = vsyncpa [#allocation3], 1 }
 0x7c6   :  { %6957 = vsyncpa [#allocation3 + $0x1], 1 }

</bundles_post_ra>
